<compile_context>
chip_gen: v7x
topology: tpu7x:2x2x1
jax: 0.10.0
libtpu: 0.0.40
codegen_flags: <defaults>
</compile_context>

<pallas_src>
import functools

import jax
import jax.numpy as jnp
from jax.experimental import pallas as pl
from jax.experimental.pallas import tpu as pltpu

VMEM_SPEC = pl.BlockSpec(memory_space=pltpu.MemorySpace.VMEM)
ANY_SPEC = pl.BlockSpec(memory_space=pl.ANY)
EPS = 1e-5


# ---------------------------------------------------------------------------
# The fused kernel
# ---------------------------------------------------------------------------
def _big_model_kernel(p1_ref, w1_ref, b1_ref, g1_ref, be1_ref,
                      w2_ref, b2_ref, g2_ref, be2_ref,
                      wf1_hbm, bf1_ref, wf2_ref, bf2_ref, wf3_ref, bf3_ref,
                      out_ref,
                      pooled1_ref, packed_ref, y2_ref, flat_ref,
                      wf1_vmem, wf1_sem, *, n_batch):
    f32 = jnp.float32
    bf16 = jnp.bfloat16
    blk = n_batch * 144                    # pooled conv1 rows: n*144 + h*12 + w

    # --- kick off the fc1-weight DMA; it completes under the conv phases ----
    wf1_copy = pltpu.make_async_copy(wf1_hbm, wf1_vmem, wf1_sem)
    wf1_copy.start()

    # --- conv1 (im2col matmul, K 25->32, Cout 20->128)
    #     + BN1 (single-pass batch stats, biased var) + ReLU ------------------
    y1 = jnp.dot(p1_ref[...], w1_ref[...], preferred_element_type=f32)
    y1 = y1 + b1_ref[...]
    cnt1 = float(n_batch * 576)                               # N*24*24
    m1 = jnp.sum(y1, axis=0, keepdims=True) / cnt1
    v1 = jnp.sum(y1 * y1, axis=0, keepdims=True) / cnt1 - m1 * m1
    scale1 = jax.lax.rsqrt(jnp.maximum(v1, 0.0) + EPS) * g1_ref[...]
    shift1 = be1_ref[...] - m1 * scale1
    y1 = jnp.maximum(y1 * scale1 + shift1, 0.0)

    # --- max-pool 2x2: patch rows were pre-grouped by (h%2, w%2) parity ------
    pool1 = jnp.maximum(
        jnp.maximum(y1[0 * blk:1 * blk, :], y1[1 * blk:2 * blk, :]),
        jnp.maximum(y1[2 * blk:3 * blk, :], y1[3 * blk:4 * blk, :]))
    pooled1_ref[0:blk, :] = pool1                       # rows: n*144 + h*12 + w
    pooled1_ref[blk:blk + 8, :] = jnp.zeros((8, 128), f32)   # finite pad rows

    # --- lane-pack the 5 horizontal conv2 taps: packed[r, dx*20+c] =
    #     pooled1[r+dx, c].  conv2 then only needs the 5 vertical (dy) taps. --
    pk = pooled1_ref[0:blk, :]
    for dx in range(1, 5):
        pk = pk + pltpu.roll(pooled1_ref[dx:dx + blk, :], dx * 20, axis=1)
    packed_ref[...] = pk.astype(bf16)

    # --- conv2 (5x5, 20->50): 5 matmuls per sample, f32 accumulation, pre-BN
    #     result written straight to y2_ref.  y2 rows: n*96 + i*12 + j
    #     (i in 0..7, j in 0..11; only j<8 valid, rest masked in BN2). --------
    for n in range(n_batch):
        base = n * 144
        acc = jnp.dot(packed_ref[base:base + 96, :], w2_ref[0],
                      preferred_element_type=f32)
        for dy in range(1, 5):
            acc = acc + jnp.dot(
                packed_ref[base + dy * 12:base + dy * 12 + 96, :],
                w2_ref[dy], preferred_element_type=f32)
        y2_ref[n * 96:(n + 1) * 96, :] = acc + b2_ref[...]
    y2_ref[n_batch * 96:n_batch * 96 + 16, :] = jnp.zeros((16, 128), f32)

    # --- BN2: single-pass masked stats over the N*8*8 valid positions,
    #     then normalize + ReLU in place in y2_ref ----------------------------
    valid = jax.lax.broadcasted_iota(jnp.int32, (96, 128), 0) % 12 < 8
    cnt2 = float(n_batch * 64)
    s2 = jnp.zeros((1, 128), f32)
    ss2 = jnp.zeros((1, 128), f32)
    for n in range(n_batch):
        ym = jnp.where(valid, y2_ref[n * 96:(n + 1) * 96, :], 0.0)
        s2 = s2 + jnp.sum(ym, axis=0, keepdims=True)
        ss2 = ss2 + jnp.sum(ym * ym, axis=0, keepdims=True)
    m2 = s2 / cnt2
    v2 = ss2 / cnt2 - m2 * m2
    scale2 = jax.lax.rsqrt(jnp.maximum(v2, 0.0) + EPS) * g2_ref[...]
    shift2 = be2_ref[...] - m2 * scale2
    for n in range(n_batch):
        y2_ref[n * 96:(n + 1) * 96, :] = jnp.maximum(
            y2_ref[n * 96:(n + 1) * 96, :] * scale2 + shift2, 0.0)

    # --- max-pool 2x2 (8x8 -> 4x4) + flatten in NCHW x.view(N,-1) order.
    #     Two positions per 128-lane group (channels padded 50->64):
    #     flat lane (2g+o)*64 + c  ->  fc1 K = 1024. ---------------------------
    for n in range(n_batch):
        base = n * 96
        hp = jnp.maximum(
            jnp.maximum(y2_ref[base:base + 96, :],
                        y2_ref[base + 12:base + 108, :]),
            jnp.maximum(y2_ref[base + 1:base + 97, :],
                        y2_ref[base + 13:base + 109, :]))
        hs = pltpu.roll(hp, 64, axis=1)          # odd positions -> lanes 64..127
        for g in range(8):                       # group g holds pos 2g and 2g+1
            r0 = 24 * (g // 2) + 4 * (g % 2)     # row of pos 2g  (= i2*4 + j2)
            flat_ref[n:n + 1, g * 128:(g + 1) * 128] = (
                hp[r0:r0 + 1, :] + hs[r0 + 2:r0 + 3, :])

    # --- fc1 (+ReLU), fc2, fc3 (weights pre-permuted & lane-padded) ----------
    wf1_copy.wait()
    h = jnp.dot(flat_ref[...].astype(bf16), wf1_vmem[...],
                preferred_element_type=f32) + bf1_ref[...]
    h = jnp.maximum(h, 0.0)
    h = jnp.dot(h.astype(bf16), wf2_ref[...],
                preferred_element_type=f32) + bf2_ref[...]
    h = jnp.dot(h.astype(bf16), wf3_ref[...],
                preferred_element_type=f32) + bf3_ref[...]
    out_ref[...] = h


# ---------------------------------------------------------------------------
# Wrapper / XLA glue (tiny, fused by XLA)
# ---------------------------------------------------------------------------
def _build_conv1_patches(x):
    """x: (N,1,28,28) f32 -> (N*576, 32) bf16 im2col rows, grouped by
    (h%2, w%2) parity so the in-kernel pool is a max of 4 contiguous blocks."""
    n = x.shape[0]
    xs = x[:, 0]                                            # (N, 28, 28)
    cols = [xs[:, dy:dy + 24, dx:dx + 24]
            for dy in range(5) for dx in range(5)]
    p = jnp.stack(cols, axis=-1)                            # (N, 24, 24, 25)
    blocks = jnp.stack([p[:, 0::2, 0::2, :], p[:, 0::2, 1::2, :],
                        p[:, 1::2, 0::2, :], p[:, 1::2, 1::2, :]], axis=0)
    p = blocks.reshape(4 * n * 144, 25)                     # (N*576, 25)
    p = jnp.pad(p, ((0, 0), (0, 7)))                        # K: 25 -> 32
    return p.astype(jnp.bfloat16)


@jax.jit
def big_model_forward(x, prep):
    n = x.shape[0]
    patches = _build_conv1_patches(x)
    out = pl.pallas_call(
        functools.partial(_big_model_kernel, n_batch=n),
        out_shape=jax.ShapeDtypeStruct((n, 128), jnp.float32),
        in_specs=[VMEM_SPEC] * 9 + [ANY_SPEC] + [VMEM_SPEC] * 5,
        out_specs=VMEM_SPEC,
        scratch_shapes=[
            pltpu.VMEM((n * 144 + 8, 128), jnp.float32),    # pooled conv1 (+pad)
            pltpu.VMEM((n * 144, 128), jnp.bfloat16),       # lane-packed conv2 LHS
            pltpu.VMEM((n * 96 + 16, 128), jnp.float32),    # conv2 / bn2 / relu
            pltpu.VMEM((n, 1024), jnp.float32),             # flattened features
            pltpu.VMEM((1024, 512), jnp.bfloat16),          # fc1 weight landing buf
            pltpu.SemaphoreType.DMA,                        # fc1 weight DMA sem
        ],
    )(patches, prep["w1"], prep["b1"], prep["g1"], prep["be1"],
      prep["w2"], prep["b2"], prep["g2"], prep["be2"],
      prep["wf1"], prep["bf1"], prep["wf2"], prep["bf2"],
      prep["wf3"], prep["bf3"])
    return out[:, :2]                                       # drop lane padding


# ---------------------------------------------------------------------------
# Parameters: torch-layout init + one-time kernel-layout preparation
# ---------------------------------------------------------------------------
def init_params(seed=0):
    keys = jax.random.split(jax.random.PRNGKey(seed), 16)

    def u(key, shape, fan_in):
        bound = 1.0 / jnp.sqrt(float(fan_in))
        return jax.random.uniform(key, shape, jnp.float32, -bound, bound)

    p = {}
    p["b1_conv_w"] = u(keys[0], (1, 1, 1, 1), 1)        # BackboneModel1 conv
    p["b1_conv_b"] = u(keys[1], (1,), 1)
    p["b2_conv1_w"] = u(keys[2], (20, 1, 5, 5), 25)     # BackboneModel2
    p["b2_conv1_b"] = u(keys[3], (20,), 25)
    p["b2_conv2_w"] = u(keys[4], (50, 20, 5, 5), 500)
    p["b2_conv2_b"] = u(keys[5], (50,), 500)
    p["bn1_gamma"] = jnp.ones((20,), jnp.float32)       # BatchNorm2d defaults
    p["bn1_beta"] = jnp.zeros((20,), jnp.float32)
    p["bn2_gamma"] = jnp.ones((50,), jnp.float32)
    p["bn2_beta"] = jnp.zeros((50,), jnp.float32)
    p["fc1_w"] = u(keys[6], (500, 800), 800)            # torch Linear: (out, in)
    p["fc1_b"] = u(keys[7], (500,), 800)
    p["fc2_w"] = u(keys[8], (10, 500), 500)
    p["fc2_b"] = u(keys[9], (10,), 500)
    p["fc3_w"] = u(keys[10], (2, 10), 10)
    p["fc3_b"] = u(keys[11], (2,), 10)
    return p


def prepare_params(p):
    """One-time: fold the 1x1 conv into conv1, transpose/permute/pad weights."""
    f32 = jnp.float32
    bf16 = jnp.bfloat16

    def pad_vec(v, total):
        return jnp.pad(v, (0, total - v.shape[0])).reshape(1, total).astype(f32)

    # Fold BackboneModel1 (scale s, bias b0) into conv1.
    s = p["b1_conv_w"].reshape(())
    b0 = p["b1_conv_b"].reshape(())
    w1 = p["b2_conv1_w"]                                  # (20,1,5,5)
    b1_fold = p["b2_conv1_b"] + b0 * jnp.sum(w1, axis=(1, 2, 3))
    w1m = jnp.transpose(s * w1, (2, 3, 1, 0)).reshape(25, 20)   # [tap, cout]
    w1m = jnp.pad(w1m, ((0, 7), (0, 108)))                # (32, 128)

    # conv2 weights: (50,20,5,5) -> [dy, dx*20+c, cout], padded to (5,128,128).
    w2p = jnp.transpose(p["b2_conv2_w"], (2, 3, 1, 0)).reshape(5, 100, 50)
    w2p = jnp.pad(w2p, ((0, 0), (0, 28), (0, 78)))        # (5, 128, 128)

    # fc1: rows = pos*64 + c  (pos = i2*4 + j2, channels padded 50->64),
    # outputs padded 500->512  ->  (1024, 512), 1 MB in bf16.
    wf1 = p["fc1_w"].T.reshape(50, 16, 500)               # [c, pos, out]
    wf1 = jnp.transpose(wf1, (1, 0, 2))                   # [pos, c, out]
    wf1 = jnp.pad(wf1, ((0, 0), (0, 14), (0, 12)))        # (16, 64, 512)
    wf1 = wf1.reshape(1024, 512)

    wf2 = jnp.pad(p["fc2_w"].T, ((0, 12), (0, 118)))      # (512, 128)
    wf3 = jnp.pad(p["fc3_w"].T, ((0, 118), (0, 126)))     # (128, 128)

    return dict(
        w1=w1m.astype(bf16), b1=pad_vec(b1_fold, 128),
        g1=pad_vec(p["bn1_gamma"], 128), be1=pad_vec(p["bn1_beta"], 128),
        w2=w2p.astype(bf16), b2=pad_vec(p["b2_conv2_b"], 128),
        g2=pad_vec(p["bn2_gamma"], 128), be2=pad_vec(p["bn2_beta"], 128),
        wf1=wf1.astype(bf16), bf1=pad_vec(p["fc1_b"], 512),
        wf2=wf2.astype(bf16), bf2=pad_vec(p["fc2_b"], 128),
        wf3=wf3.astype(bf16), bf3=pad_vec(p["fc3_b"], 128),
    )


if __name__ == "__main__":
    key = jax.random.PRNGKey(0)
    # fc1 = Linear(4*4*50, 500) implies a 28x28 single-channel input.
    x = jax.random.normal(key, (2, 1, 28, 28), dtype=jnp.float32)

    params = init_params(seed=0)
    prep = prepare_params(params)

    out = jax.block_until_ready(big_model_forward(x, prep))

    assert out.shape == (2, 2), out.shape
    assert bool(jnp.all(jnp.isfinite(out))), "non-finite output"
    print("KERNEL_OK")
</pallas_src>

<mosaic_0001>
module attributes {stable_mosaic.version = 11 : i64} {
  func.func @_big_model_kernel(%arg0: memref<1152x32xbf16, #tpu.memory_space<vmem>>, %arg1: memref<32x128xbf16, #tpu.memory_space<vmem>>, %arg2: memref<1x128xf32, #tpu.memory_space<vmem>>, %arg3: memref<1x128xf32, #tpu.memory_space<vmem>>, %arg4: memref<1x128xf32, #tpu.memory_space<vmem>>, %arg5: memref<5x128x128xbf16, #tpu.memory_space<vmem>>, %arg6: memref<1x128xf32, #tpu.memory_space<vmem>>, %arg7: memref<1x128xf32, #tpu.memory_space<vmem>>, %arg8: memref<1x128xf32, #tpu.memory_space<vmem>>, %arg9: memref<1024x512xbf16, #tpu.memory_space<any>>, %arg10: memref<1x512xf32, #tpu.memory_space<vmem>>, %arg11: memref<512x128xbf16, #tpu.memory_space<vmem>>, %arg12: memref<1x128xf32, #tpu.memory_space<vmem>>, %arg13: memref<128x128xbf16, #tpu.memory_space<vmem>>, %arg14: memref<1x128xf32, #tpu.memory_space<vmem>>, %arg15: memref<2x128xf32, #tpu.memory_space<vmem>>, %arg16: memref<296x128xf32, #tpu.memory_space<vmem>>, %arg17: memref<288x128xbf16, #tpu.memory_space<vmem>>, %arg18: memref<208x128xf32, #tpu.memory_space<vmem>>, %arg19: memref<2x1024xf32, #tpu.memory_space<vmem>>, %arg20: memref<1024x512xbf16, #tpu.memory_space<vmem>>, %arg21: memref<!tpu.dma_semaphore, #tpu.memory_space<semaphore_mem>>) attributes {dimension_semantics = [], scalar_prefetch = 0 : i64, scratch_operands = 6 : i64, tpu.core_type = #tpu.core_type<tc>} {
    tpu.enqueue_dma source(%arg9 : memref<1024x512xbf16, #tpu.memory_space<any>>) target(%arg20 : memref<1024x512xbf16, #tpu.memory_space<vmem>>) target_semaphore(%arg21 : memref<!tpu.dma_semaphore, #tpu.memory_space<semaphore_mem>>)
    %c0 = arith.constant 0 : index
    %c0_0 = arith.constant 0 : index
    %0 = vector.load %arg0[%c0, %c0_0] : memref<1152x32xbf16, #tpu.memory_space<vmem>>, vector<1152x32xbf16>
    %c0_1 = arith.constant 0 : index
    %c0_2 = arith.constant 0 : index
    %1 = vector.load %arg1[%c0_1, %c0_2] : memref<32x128xbf16, #tpu.memory_space<vmem>>, vector<32x128xbf16>
    %cst = arith.constant dense<0.000000e+00> : vector<1152x128xf32>
    %2 = tpu.matmul %0, %1, %cst {dimension_numbers = #tpu.dot_dimension_numbers<[1], [0], [0], [1], [0, 0, 1, 1], [], []>} : vector<1152x32xbf16>, vector<32x128xbf16>, vector<1152x128xf32> -> vector<1152x128xf32>
    %c0_3 = arith.constant 0 : index
    %c0_4 = arith.constant 0 : index
    %3 = vector.load %arg2[%c0_3, %c0_4] : memref<1x128xf32, #tpu.memory_space<vmem>>, vector<1x128xf32>
    %4 = vector.broadcast %3 : vector<1x128xf32> to vector<1152x128xf32>
    %5 = arith.addf %2, %4 : vector<1152x128xf32>
    %cst_5 = arith.constant dense<0.000000e+00> : vector<128xf32>
    %6 = vector.multi_reduction <add>, %5, %cst_5 [0] : vector<1152x128xf32> to vector<128xf32>
    %7 = vector.shape_cast %6 : vector<128xf32> to vector<1x128xf32>
    %cst_6 = arith.constant 1.152000e+03 : f32
    %8 = vector.broadcast %cst_6 : f32 to vector<1x128xf32>
    %9 = arith.divf %7, %8 : vector<1x128xf32>
    %10 = arith.mulf %5, %5 : vector<1152x128xf32>
    %cst_7 = arith.constant dense<0.000000e+00> : vector<128xf32>
    %11 = vector.multi_reduction <add>, %10, %cst_7 [0] : vector<1152x128xf32> to vector<128xf32>
    %12 = vector.shape_cast %11 : vector<128xf32> to vector<1x128xf32>
    %cst_8 = arith.constant 1.152000e+03 : f32
    %13 = vector.broadcast %cst_8 : f32 to vector<1x128xf32>
    %14 = arith.divf %12, %13 : vector<1x128xf32>
    %15 = arith.mulf %9, %9 : vector<1x128xf32>
    %16 = arith.subf %14, %15 : vector<1x128xf32>
    %cst_9 = arith.constant 0.000000e+00 : f32
    %17 = vector.broadcast %cst_9 : f32 to vector<1x128xf32>
    %18 = arith.maximumf %16, %17 : vector<1x128xf32>
    %cst_10 = arith.constant 9.99999974E-6 : f32
    %19 = vector.broadcast %cst_10 : f32 to vector<1x128xf32>
    %20 = arith.addf %18, %19 : vector<1x128xf32>
    %21 = math.rsqrt %20 : vector<1x128xf32>
    %c0_11 = arith.constant 0 : index
    %c0_12 = arith.constant 0 : index
    %22 = vector.load %arg3[%c0_11, %c0_12] : memref<1x128xf32, #tpu.memory_space<vmem>>, vector<1x128xf32>
    %23 = arith.mulf %21, %22 : vector<1x128xf32>
    %c0_13 = arith.constant 0 : index
    %c0_14 = arith.constant 0 : index
    %24 = vector.load %arg4[%c0_13, %c0_14] : memref<1x128xf32, #tpu.memory_space<vmem>>, vector<1x128xf32>
    %25 = arith.mulf %9, %23 : vector<1x128xf32>
    %26 = arith.subf %24, %25 : vector<1x128xf32>
    %27 = vector.broadcast %23 : vector<1x128xf32> to vector<1152x128xf32>
    %28 = arith.mulf %5, %27 : vector<1152x128xf32>
    %29 = vector.broadcast %26 : vector<1x128xf32> to vector<1152x128xf32>
    %30 = arith.addf %28, %29 : vector<1152x128xf32>
    %cst_15 = arith.constant 0.000000e+00 : f32
    %31 = vector.broadcast %cst_15 : f32 to vector<1152x128xf32>
    %32 = arith.maximumf %30, %31 : vector<1152x128xf32>
    %33 = vector.extract_strided_slice %32 {offsets = [0, 0], sizes = [288, 128], strides = [1, 1]} : vector<1152x128xf32> to vector<288x128xf32>
    %34 = vector.extract_strided_slice %32 {offsets = [288, 0], sizes = [288, 128], strides = [1, 1]} : vector<1152x128xf32> to vector<288x128xf32>
    %35 = arith.maximumf %33, %34 : vector<288x128xf32>
    %36 = vector.extract_strided_slice %32 {offsets = [576, 0], sizes = [288, 128], strides = [1, 1]} : vector<1152x128xf32> to vector<288x128xf32>
    %37 = vector.extract_strided_slice %32 {offsets = [864, 0], sizes = [288, 128], strides = [1, 1]} : vector<1152x128xf32> to vector<288x128xf32>
    %38 = arith.maximumf %36, %37 : vector<288x128xf32>
    %39 = arith.maximumf %35, %38 : vector<288x128xf32>
    %c0_16 = arith.constant 0 : index
    %c0_17 = arith.constant 0 : index
    %40 = vector.load %arg16[%c0_16, %c0_17] : memref<296x128xf32, #tpu.memory_space<vmem>>, vector<288x128xf32>
    tpu.vector_store %arg16[%c0_16, %c0_17], %39 {strides = array<i32>} : memref<296x128xf32, #tpu.memory_space<vmem>>, vector<288x128xf32>,
    %cst_18 = arith.constant 0.000000e+00 : f32
    %41 = vector.broadcast %cst_18 : f32 to vector<8x128xf32>
    %c288 = arith.constant 288 : index
    %c0_19 = arith.constant 0 : index
    %42 = vector.load %arg16[%c288, %c0_19] : memref<296x128xf32, #tpu.memory_space<vmem>>, vector<8x128xf32>
    tpu.vector_store %arg16[%c288, %c0_19], %41 {strides = array<i32>} : memref<296x128xf32, #tpu.memory_space<vmem>>, vector<8x128xf32>,
    %c0_20 = arith.constant 0 : index
    %c0_21 = arith.constant 0 : index
    %43 = vector.load %arg16[%c0_20, %c0_21] : memref<296x128xf32, #tpu.memory_space<vmem>>, vector<288x128xf32>
    %c1 = arith.constant 1 : index
    %c0_22 = arith.constant 0 : index
    %44 = vector.load %arg16[%c1, %c0_22] : memref<296x128xf32, #tpu.memory_space<vmem>>, vector<288x128xf32>
    %c20_i32 = arith.constant 20 : i32
    %45 = tpu.dynamic_rotate %44 by %c20_i32 dim 1 : vector<288x128xf32>, i32 -> vector<288x128xf32>
    %46 = arith.addf %43, %45 : vector<288x128xf32>
    %c2 = arith.constant 2 : index
    %c0_23 = arith.constant 0 : index
    %47 = vector.load %arg16[%c2, %c0_23] : memref<296x128xf32, #tpu.memory_space<vmem>>, vector<288x128xf32>
    %c40_i32 = arith.constant 40 : i32
    %48 = tpu.dynamic_rotate %47 by %c40_i32 dim 1 : vector<288x128xf32>, i32 -> vector<288x128xf32>
    %49 = arith.addf %46, %48 : vector<288x128xf32>
    %c3 = arith.constant 3 : index
    %c0_24 = arith.constant 0 : index
    %50 = vector.load %arg16[%c3, %c0_24] : memref<296x128xf32, #tpu.memory_space<vmem>>, vector<288x128xf32>
    %c60_i32 = arith.constant 60 : i32
    %51 = tpu.dynamic_rotate %50 by %c60_i32 dim 1 : vector<288x128xf32>, i32 -> vector<288x128xf32>
    %52 = arith.addf %49, %51 : vector<288x128xf32>
    %c4 = arith.constant 4 : index
    %c0_25 = arith.constant 0 : index
    %53 = vector.load %arg16[%c4, %c0_25] : memref<296x128xf32, #tpu.memory_space<vmem>>, vector<288x128xf32>
    %c80_i32 = arith.constant 80 : i32
    %54 = tpu.dynamic_rotate %53 by %c80_i32 dim 1 : vector<288x128xf32>, i32 -> vector<288x128xf32>
    %55 = arith.addf %52, %54 : vector<288x128xf32>
    %56 = arith.truncf %55 : vector<288x128xf32> to vector<288x128xbf16>
    %c0_26 = arith.constant 0 : index
    %c0_27 = arith.constant 0 : index
    %57 = vector.load %arg17[%c0_26, %c0_27] : memref<288x128xbf16, #tpu.memory_space<vmem>>, vector<288x128xbf16>
    tpu.vector_store %arg17[%c0_26, %c0_27], %56 {strides = array<i32>} : memref<288x128xbf16, #tpu.memory_space<vmem>>, vector<288x128xbf16>,
    %c0_28 = arith.constant 0 : index
    %c0_29 = arith.constant 0 : index
    %58 = vector.load %arg17[%c0_28, %c0_29] : memref<288x128xbf16, #tpu.memory_space<vmem>>, vector<96x128xbf16>
    %c0_30 = arith.constant 0 : index
    %c0_31 = arith.constant 0 : index
    %c0_32 = arith.constant 0 : index
    %59 = vector.load %arg5[%c0_30, %c0_31, %c0_32] : memref<5x128x128xbf16, #tpu.memory_space<vmem>>, vector<1x128x128xbf16>
    %60 = vector.shape_cast %59 : vector<1x128x128xbf16> to vector<128x128xbf16>
    %cst_33 = arith.constant dense<0.000000e+00> : vector<96x128xf32>
    %61 = tpu.matmul %58, %60, %cst_33 {dimension_numbers = #tpu.dot_dimension_numbers<[1], [0], [0], [1], [0, 0, 1, 1], [], []>} : vector<96x128xbf16>, vector<128x128xbf16>, vector<96x128xf32> -> vector<96x128xf32>
    %c12 = arith.constant 12 : index
    %c0_34 = arith.constant 0 : index
    %62 = vector.load %arg17[%c12, %c0_34] : memref<288x128xbf16, #tpu.memory_space<vmem>>, vector<96x128xbf16>
    %c1_35 = arith.constant 1 : index
    %c0_36 = arith.constant 0 : index
    %c0_37 = arith.constant 0 : index
    %63 = vector.load %arg5[%c1_35, %c0_36, %c0_37] : memref<5x128x128xbf16, #tpu.memory_space<vmem>>, vector<1x128x128xbf16>
    %64 = vector.shape_cast %63 : vector<1x128x128xbf16> to vector<128x128xbf16>
    %cst_38 = arith.constant dense<0.000000e+00> : vector<96x128xf32>
    %65 = tpu.matmul %62, %64, %cst_38 {dimension_numbers = #tpu.dot_dimension_numbers<[1], [0], [0], [1], [0, 0, 1, 1], [], []>} : vector<96x128xbf16>, vector<128x128xbf16>, vector<96x128xf32> -> vector<96x128xf32>
    %66 = arith.addf %61, %65 : vector<96x128xf32>
    %c24 = arith.constant 24 : index
    %c0_39 = arith.constant 0 : index
    %67 = vector.load %arg17[%c24, %c0_39] : memref<288x128xbf16, #tpu.memory_space<vmem>>, vector<96x128xbf16>
    %c2_40 = arith.constant 2 : index
    %c0_41 = arith.constant 0 : index
    %c0_42 = arith.constant 0 : index
    %68 = vector.load %arg5[%c2_40, %c0_41, %c0_42] : memref<5x128x128xbf16, #tpu.memory_space<vmem>>, vector<1x128x128xbf16>
    %69 = vector.shape_cast %68 : vector<1x128x128xbf16> to vector<128x128xbf16>
    %cst_43 = arith.constant dense<0.000000e+00> : vector<96x128xf32>
    %70 = tpu.matmul %67, %69, %cst_43 {dimension_numbers = #tpu.dot_dimension_numbers<[1], [0], [0], [1], [0, 0, 1, 1], [], []>} : vector<96x128xbf16>, vector<128x128xbf16>, vector<96x128xf32> -> vector<96x128xf32>
    %71 = arith.addf %66, %70 : vector<96x128xf32>
    %c36 = arith.constant 36 : index
    %c0_44 = arith.constant 0 : index
    %72 = vector.load %arg17[%c36, %c0_44] : memref<288x128xbf16, #tpu.memory_space<vmem>>, vector<96x128xbf16>
    %c3_45 = arith.constant 3 : index
    %c0_46 = arith.constant 0 : index
    %c0_47 = arith.constant 0 : index
    %73 = vector.load %arg5[%c3_45, %c0_46, %c0_47] : memref<5x128x128xbf16, #tpu.memory_space<vmem>>, vector<1x128x128xbf16>
    %74 = vector.shape_cast %73 : vector<1x128x128xbf16> to vector<128x128xbf16>
    %cst_48 = arith.constant dense<0.000000e+00> : vector<96x128xf32>
    %75 = tpu.matmul %72, %74, %cst_48 {dimension_numbers = #tpu.dot_dimension_numbers<[1], [0], [0], [1], [0, 0, 1, 1], [], []>} : vector<96x128xbf16>, vector<128x128xbf16>, vector<96x128xf32> -> vector<96x128xf32>
    %76 = arith.addf %71, %75 : vector<96x128xf32>
    %c48 = arith.constant 48 : index
    %c0_49 = arith.constant 0 : index
    %77 = vector.load %arg17[%c48, %c0_49] : memref<288x128xbf16, #tpu.memory_space<vmem>>, vector<96x128xbf16>
    %c4_50 = arith.constant 4 : index
    %c0_51 = arith.constant 0 : index
    %c0_52 = arith.constant 0 : index
    %78 = vector.load %arg5[%c4_50, %c0_51, %c0_52] : memref<5x128x128xbf16, #tpu.memory_space<vmem>>, vector<1x128x128xbf16>
    %79 = vector.shape_cast %78 : vector<1x128x128xbf16> to vector<128x128xbf16>
    %cst_53 = arith.constant dense<0.000000e+00> : vector<96x128xf32>
    %80 = tpu.matmul %77, %79, %cst_53 {dimension_numbers = #tpu.dot_dimension_numbers<[1], [0], [0], [1], [0, 0, 1, 1], [], []>} : vector<96x128xbf16>, vector<128x128xbf16>, vector<96x128xf32> -> vector<96x128xf32>
    %81 = arith.addf %76, %80 : vector<96x128xf32>
    %c0_54 = arith.constant 0 : index
    %c0_55 = arith.constant 0 : index
    %82 = vector.load %arg6[%c0_54, %c0_55] : memref<1x128xf32, #tpu.memory_space<vmem>>, vector<1x128xf32>
    %83 = vector.broadcast %82 : vector<1x128xf32> to vector<96x128xf32>
    %84 = arith.addf %81, %83 : vector<96x128xf32>
    %c0_56 = arith.constant 0 : index
    %c0_57 = arith.constant 0 : index
    %85 = vector.load %arg18[%c0_56, %c0_57] : memref<208x128xf32, #tpu.memory_space<vmem>>, vector<96x128xf32>
    tpu.vector_store %arg18[%c0_56, %c0_57], %84 {strides = array<i32>} : memref<208x128xf32, #tpu.memory_space<vmem>>, vector<96x128xf32>,
    %c144 = arith.constant 144 : index
    %c0_58 = arith.constant 0 : index
    %86 = vector.load %arg17[%c144, %c0_58] : memref<288x128xbf16, #tpu.memory_space<vmem>>, vector<96x128xbf16>
    %c0_59 = arith.constant 0 : index
    %c0_60 = arith.constant 0 : index
    %c0_61 = arith.constant 0 : index
    %87 = vector.load %arg5[%c0_59, %c0_60, %c0_61] : memref<5x128x128xbf16, #tpu.memory_space<vmem>>, vector<1x128x128xbf16>
    %88 = vector.shape_cast %87 : vector<1x128x128xbf16> to vector<128x128xbf16>
    %cst_62 = arith.constant dense<0.000000e+00> : vector<96x128xf32>
    %89 = tpu.matmul %86, %88, %cst_62 {dimension_numbers = #tpu.dot_dimension_numbers<[1], [0], [0], [1], [0, 0, 1, 1], [], []>} : vector<96x128xbf16>, vector<128x128xbf16>, vector<96x128xf32> -> vector<96x128xf32>
    %c156 = arith.constant 156 : index
    %c0_63 = arith.constant 0 : index
    %90 = vector.load %arg17[%c156, %c0_63] : memref<288x128xbf16, #tpu.memory_space<vmem>>, vector<96x128xbf16>
    %c1_64 = arith.constant 1 : index
    %c0_65 = arith.constant 0 : index
    %c0_66 = arith.constant 0 : index
    %91 = vector.load %arg5[%c1_64, %c0_65, %c0_66] : memref<5x128x128xbf16, #tpu.memory_space<vmem>>, vector<1x128x128xbf16>
    %92 = vector.shape_cast %91 : vector<1x128x128xbf16> to vector<128x128xbf16>
    %cst_67 = arith.constant dense<0.000000e+00> : vector<96x128xf32>
    %93 = tpu.matmul %90, %92, %cst_67 {dimension_numbers = #tpu.dot_dimension_numbers<[1], [0], [0], [1], [0, 0, 1, 1], [], []>} : vector<96x128xbf16>, vector<128x128xbf16>, vector<96x128xf32> -> vector<96x128xf32>
    %94 = arith.addf %89, %93 : vector<96x128xf32>
    %c168 = arith.constant 168 : index
    %c0_68 = arith.constant 0 : index
    %95 = vector.load %arg17[%c168, %c0_68] : memref<288x128xbf16, #tpu.memory_space<vmem>>, vector<96x128xbf16>
    %c2_69 = arith.constant 2 : index
    %c0_70 = arith.constant 0 : index
    %c0_71 = arith.constant 0 : index
    %96 = vector.load %arg5[%c2_69, %c0_70, %c0_71] : memref<5x128x128xbf16, #tpu.memory_space<vmem>>, vector<1x128x128xbf16>
    %97 = vector.shape_cast %96 : vector<1x128x128xbf16> to vector<128x128xbf16>
    %cst_72 = arith.constant dense<0.000000e+00> : vector<96x128xf32>
    %98 = tpu.matmul %95, %97, %cst_72 {dimension_numbers = #tpu.dot_dimension_numbers<[1], [0], [0], [1], [0, 0, 1, 1], [], []>} : vector<96x128xbf16>, vector<128x128xbf16>, vector<96x128xf32> -> vector<96x128xf32>
    %99 = arith.addf %94, %98 : vector<96x128xf32>
    %c180 = arith.constant 180 : index
    %c0_73 = arith.constant 0 : index
    %100 = vector.load %arg17[%c180, %c0_73] : memref<288x128xbf16, #tpu.memory_space<vmem>>, vector<96x128xbf16>
    %c3_74 = arith.constant 3 : index
    %c0_75 = arith.constant 0 : index
    %c0_76 = arith.constant 0 : index
    %101 = vector.load %arg5[%c3_74, %c0_75, %c0_76] : memref<5x128x128xbf16, #tpu.memory_space<vmem>>, vector<1x128x128xbf16>
    %102 = vector.shape_cast %101 : vector<1x128x128xbf16> to vector<128x128xbf16>
    %cst_77 = arith.constant dense<0.000000e+00> : vector<96x128xf32>
    %103 = tpu.matmul %100, %102, %cst_77 {dimension_numbers = #tpu.dot_dimension_numbers<[1], [0], [0], [1], [0, 0, 1, 1], [], []>} : vector<96x128xbf16>, vector<128x128xbf16>, vector<96x128xf32> -> vector<96x128xf32>
    %104 = arith.addf %99, %103 : vector<96x128xf32>
    %c192 = arith.constant 192 : index
    %c0_78 = arith.constant 0 : index
    %105 = vector.load %arg17[%c192, %c0_78] : memref<288x128xbf16, #tpu.memory_space<vmem>>, vector<96x128xbf16>
    %c4_79 = arith.constant 4 : index
    %c0_80 = arith.constant 0 : index
    %c0_81 = arith.constant 0 : index
    %106 = vector.load %arg5[%c4_79, %c0_80, %c0_81] : memref<5x128x128xbf16, #tpu.memory_space<vmem>>, vector<1x128x128xbf16>
    %107 = vector.shape_cast %106 : vector<1x128x128xbf16> to vector<128x128xbf16>
    %cst_82 = arith.constant dense<0.000000e+00> : vector<96x128xf32>
    %108 = tpu.matmul %105, %107, %cst_82 {dimension_numbers = #tpu.dot_dimension_numbers<[1], [0], [0], [1], [0, 0, 1, 1], [], []>} : vector<96x128xbf16>, vector<128x128xbf16>, vector<96x128xf32> -> vector<96x128xf32>
    %109 = arith.addf %104, %108 : vector<96x128xf32>
    %c0_83 = arith.constant 0 : index
    %c0_84 = arith.constant 0 : index
    %110 = vector.load %arg6[%c0_83, %c0_84] : memref<1x128xf32, #tpu.memory_space<vmem>>, vector<1x128xf32>
    %111 = vector.broadcast %110 : vector<1x128xf32> to vector<96x128xf32>
    %112 = arith.addf %109, %111 : vector<96x128xf32>
    %c96 = arith.constant 96 : index
    %c0_85 = arith.constant 0 : index
    %113 = vector.load %arg18[%c96, %c0_85] : memref<208x128xf32, #tpu.memory_space<vmem>>, vector<96x128xf32>
    tpu.vector_store %arg18[%c96, %c0_85], %112 {strides = array<i32>} : memref<208x128xf32, #tpu.memory_space<vmem>>, vector<96x128xf32>,
    %cst_86 = arith.constant 0.000000e+00 : f32
    %114 = vector.broadcast %cst_86 : f32 to vector<16x128xf32>
    %c192_87 = arith.constant 192 : index
    %c0_88 = arith.constant 0 : index
    %115 = vector.load %arg18[%c192_87, %c0_88] : memref<208x128xf32, #tpu.memory_space<vmem>>, vector<16x128xf32>
    tpu.vector_store %arg18[%c192_87, %c0_88], %114 {strides = array<i32>} : memref<208x128xf32, #tpu.memory_space<vmem>>, vector<16x128xf32>,
    %116 = tpu.iota {dimensions = array<i32: 0>} : vector<96x128xi32>
    %c12_i32 = arith.constant 12 : i32
    %c0_i32 = arith.constant 0 : i32
    %117 = arith.cmpi eq, %c12_i32, %c0_i32 : i32
    %c1_i32 = arith.constant 1 : i32
    %118 = arith.select %117, %c1_i32, %c12_i32 : i32
    %119 = vector.broadcast %118 : i32 to vector<96x128xi32>
    %120 = arith.remsi %116, %119 : vector<96x128xi32>
    %c0_i32_89 = arith.constant 0 : i32
    %121 = vector.broadcast %c0_i32_89 : i32 to vector<96x128xi32>
    %122 = arith.cmpi ne, %120, %121 : vector<96x128xi32>
    %c0_i32_90 = arith.constant 0 : i32
    %123 = vector.broadcast %c0_i32_90 : i32 to vector<96x128xi32>
    %124 = arith.cmpi slt, %120, %123 : vector<96x128xi32>
    %c0_i32_91 = arith.constant 0 : i32
    %125 = arith.cmpi slt, %118, %c0_i32_91 : i32
    %126 = vector.broadcast %125 : i1 to vector<96x128xi1>
    %127 = vector.broadcast %126 : vector<96x128xi1> to vector<96x128xi1>
    %128 = arith.xori %124, %127 : vector<96x128xi1>
    %129 = arith.andi %128, %122 : vector<96x128xi1>
    %130 = vector.broadcast %118 : i32 to vector<96x128xi32>
    %131 = arith.addi %120, %130 : vector<96x128xi32>
    %132 = arith.select %129, %131, %120 : vector<96x128xi1>, vector<96x128xi32>
    %c8_i32 = arith.constant 8 : i32
    %133 = vector.broadcast %c8_i32 : i32 to vector<96x128xi32>
    %134 = arith.cmpi slt, %132, %133 : vector<96x128xi32>
    %cst_92 = arith.constant 0.000000e+00 : f32
    %135 = vector.broadcast %cst_92 : f32 to vector<1x128xf32>
    %cst_93 = arith.constant 0.000000e+00 : f32
    %136 = vector.broadcast %cst_93 : f32 to vector<1x128xf32>
    %c0_94 = arith.constant 0 : index
    %c0_95 = arith.constant 0 : index
    %137 = vector.load %arg18[%c0_94, %c0_95] : memref<208x128xf32, #tpu.memory_space<vmem>>, vector<96x128xf32>
    %cst_96 = arith.constant 0.000000e+00 : f32
    %138 = vector.broadcast %cst_96 : f32 to vector<96x128xf32>
    %139 = arith.select %134, %137, %138 : vector<96x128xi1>, vector<96x128xf32>
    %cst_97 = arith.constant dense<0.000000e+00> : vector<128xf32>
    %140 = vector.multi_reduction <add>, %139, %cst_97 [0] : vector<96x128xf32> to vector<128xf32>
    %141 = vector.shape_cast %140 : vector<128xf32> to vector<1x128xf32>
    %142 = arith.addf %135, %141 : vector<1x128xf32>
    %143 = arith.mulf %139, %139 : vector<96x128xf32>
    %cst_98 = arith.constant dense<0.000000e+00> : vector<128xf32>
    %144 = vector.multi_reduction <add>, %143, %cst_98 [0] : vector<96x128xf32> to vector<128xf32>
    %145 = vector.shape_cast %144 : vector<128xf32> to vector<1x128xf32>
    %146 = arith.addf %136, %145 : vector<1x128xf32>
    %c96_99 = arith.constant 96 : index
    %c0_100 = arith.constant 0 : index
    %147 = vector.load %arg18[%c96_99, %c0_100] : memref<208x128xf32, #tpu.memory_space<vmem>>, vector<96x128xf32>
    %cst_101 = arith.constant 0.000000e+00 : f32
    %148 = vector.broadcast %cst_101 : f32 to vector<96x128xf32>
    %149 = arith.select %134, %147, %148 : vector<96x128xi1>, vector<96x128xf32>
    %cst_102 = arith.constant dense<0.000000e+00> : vector<128xf32>
    %150 = vector.multi_reduction <add>, %149, %cst_102 [0] : vector<96x128xf32> to vector<128xf32>
    %151 = vector.shape_cast %150 : vector<128xf32> to vector<1x128xf32>
    %152 = arith.addf %142, %151 : vector<1x128xf32>
    %153 = arith.mulf %149, %149 : vector<96x128xf32>
    %cst_103 = arith.constant dense<0.000000e+00> : vector<128xf32>
    %154 = vector.multi_reduction <add>, %153, %cst_103 [0] : vector<96x128xf32> to vector<128xf32>
    %155 = vector.shape_cast %154 : vector<128xf32> to vector<1x128xf32>
    %156 = arith.addf %146, %155 : vector<1x128xf32>
    %cst_104 = arith.constant 1.280000e+02 : f32
    %157 = vector.broadcast %cst_104 : f32 to vector<1x128xf32>
    %158 = arith.divf %152, %157 : vector<1x128xf32>
    %cst_105 = arith.constant 1.280000e+02 : f32
    %159 = vector.broadcast %cst_105 : f32 to vector<1x128xf32>
    %160 = arith.divf %156, %159 : vector<1x128xf32>
    %161 = arith.mulf %158, %158 : vector<1x128xf32>
    %162 = arith.subf %160, %161 : vector<1x128xf32>
    %cst_106 = arith.constant 0.000000e+00 : f32
    %163 = vector.broadcast %cst_106 : f32 to vector<1x128xf32>
    %164 = arith.maximumf %162, %163 : vector<1x128xf32>
    %cst_107 = arith.constant 9.99999974E-6 : f32
    %165 = vector.broadcast %cst_107 : f32 to vector<1x128xf32>
    %166 = arith.addf %164, %165 : vector<1x128xf32>
    %167 = math.rsqrt %166 : vector<1x128xf32>
    %c0_108 = arith.constant 0 : index
    %c0_109 = arith.constant 0 : index
    %168 = vector.load %arg7[%c0_108, %c0_109] : memref<1x128xf32, #tpu.memory_space<vmem>>, vector<1x128xf32>
    %169 = arith.mulf %167, %168 : vector<1x128xf32>
    %c0_110 = arith.constant 0 : index
    %c0_111 = arith.constant 0 : index
    %170 = vector.load %arg8[%c0_110, %c0_111] : memref<1x128xf32, #tpu.memory_space<vmem>>, vector<1x128xf32>
    %171 = arith.mulf %158, %169 : vector<1x128xf32>
    %172 = arith.subf %170, %171 : vector<1x128xf32>
    %c0_112 = arith.constant 0 : index
    %c0_113 = arith.constant 0 : index
    %173 = vector.load %arg18[%c0_112, %c0_113] : memref<208x128xf32, #tpu.memory_space<vmem>>, vector<96x128xf32>
    %174 = vector.broadcast %169 : vector<1x128xf32> to vector<96x128xf32>
    %175 = arith.mulf %173, %174 : vector<96x128xf32>
    %176 = vector.broadcast %172 : vector<1x128xf32> to vector<96x128xf32>
    %177 = arith.addf %175, %176 : vector<96x128xf32>
    %cst_114 = arith.constant 0.000000e+00 : f32
    %178 = vector.broadcast %cst_114 : f32 to vector<96x128xf32>
    %179 = arith.maximumf %177, %178 : vector<96x128xf32>
    %c0_115 = arith.constant 0 : index
    %c0_116 = arith.constant 0 : index
    %180 = vector.load %arg18[%c0_115, %c0_116] : memref<208x128xf32, #tpu.memory_space<vmem>>, vector<96x128xf32>
    tpu.vector_store %arg18[%c0_115, %c0_116], %179 {strides = array<i32>} : memref<208x128xf32, #tpu.memory_space<vmem>>, vector<96x128xf32>,
    %c96_117 = arith.constant 96 : index
    %c0_118 = arith.constant 0 : index
    %181 = vector.load %arg18[%c96_117, %c0_118] : memref<208x128xf32, #tpu.memory_space<vmem>>, vector<96x128xf32>
    %182 = vector.broadcast %169 : vector<1x128xf32> to vector<96x128xf32>
    %183 = arith.mulf %181, %182 : vector<96x128xf32>
    %184 = vector.broadcast %172 : vector<1x128xf32> to vector<96x128xf32>
    %185 = arith.addf %183, %184 : vector<96x128xf32>
    %cst_119 = arith.constant 0.000000e+00 : f32
    %186 = vector.broadcast %cst_119 : f32 to vector<96x128xf32>
    %187 = arith.maximumf %185, %186 : vector<96x128xf32>
    %c96_120 = arith.constant 96 : index
    %c0_121 = arith.constant 0 : index
    %188 = vector.load %arg18[%c96_120, %c0_121] : memref<208x128xf32, #tpu.memory_space<vmem>>, vector<96x128xf32>
    tpu.vector_store %arg18[%c96_120, %c0_121], %187 {strides = array<i32>} : memref<208x128xf32, #tpu.memory_space<vmem>>, vector<96x128xf32>,
    %c0_122 = arith.constant 0 : index
    %c0_123 = arith.constant 0 : index
    %189 = vector.load %arg18[%c0_122, %c0_123] : memref<208x128xf32, #tpu.memory_space<vmem>>, vector<96x128xf32>
    %c12_124 = arith.constant 12 : index
    %c0_125 = arith.constant 0 : index
    %190 = vector.load %arg18[%c12_124, %c0_125] : memref<208x128xf32, #tpu.memory_space<vmem>>, vector<96x128xf32>
    %191 = arith.maximumf %189, %190 : vector<96x128xf32>
    %c1_126 = arith.constant 1 : index
    %c0_127 = arith.constant 0 : index
    %192 = vector.load %arg18[%c1_126, %c0_127] : memref<208x128xf32, #tpu.memory_space<vmem>>, vector<96x128xf32>
    %c13 = arith.constant 13 : index
    %c0_128 = arith.constant 0 : index
    %193 = vector.load %arg18[%c13, %c0_128] : memref<208x128xf32, #tpu.memory_space<vmem>>, vector<96x128xf32>
    %194 = arith.maximumf %192, %193 : vector<96x128xf32>
    %195 = arith.maximumf %191, %194 : vector<96x128xf32>
    %c64_i32 = arith.constant 64 : i32
    %196 = tpu.dynamic_rotate %195 by %c64_i32 dim 1 : vector<96x128xf32>, i32 -> vector<96x128xf32>
    %197 = vector.extract_strided_slice %195 {offsets = [0, 0], sizes = [1, 128], strides = [1, 1]} : vector<96x128xf32> to vector<1x128xf32>
    %198 = vector.extract_strided_slice %196 {offsets = [2, 0], sizes = [1, 128], strides = [1, 1]} : vector<96x128xf32> to vector<1x128xf32>
    %199 = arith.addf %197, %198 : vector<1x128xf32>
    %c0_129 = arith.constant 0 : index
    %c0_130 = arith.constant 0 : index
    %200 = vector.load %arg19[%c0_129, %c0_130] : memref<2x1024xf32, #tpu.memory_space<vmem>>, vector<1x128xf32>
    tpu.vector_store %arg19[%c0_129, %c0_130], %199 {strides = array<i32>} : memref<2x1024xf32, #tpu.memory_space<vmem>>, vector<1x128xf32>,
    %201 = vector.extract_strided_slice %195 {offsets = [4, 0], sizes = [1, 128], strides = [1, 1]} : vector<96x128xf32> to vector<1x128xf32>
    %202 = vector.extract_strided_slice %196 {offsets = [6, 0], sizes = [1, 128], strides = [1, 1]} : vector<96x128xf32> to vector<1x128xf32>
    %203 = arith.addf %201, %202 : vector<1x128xf32>
    %c0_131 = arith.constant 0 : index
    %c128 = arith.constant 128 : index
    %204 = vector.load %arg19[%c0_131, %c128] : memref<2x1024xf32, #tpu.memory_space<vmem>>, vector<1x128xf32>
    tpu.vector_store %arg19[%c0_131, %c128], %203 {strides = array<i32>} : memref<2x1024xf32, #tpu.memory_space<vmem>>, vector<1x128xf32>,
    %205 = vector.extract_strided_slice %195 {offsets = [24, 0], sizes = [1, 128], strides = [1, 1]} : vector<96x128xf32> to vector<1x128xf32>
    %206 = vector.extract_strided_slice %196 {offsets = [26, 0], sizes = [1, 128], strides = [1, 1]} : vector<96x128xf32> to vector<1x128xf32>
    %207 = arith.addf %205, %206 : vector<1x128xf32>
    %c0_132 = arith.constant 0 : index
    %c256 = arith.constant 256 : index
    %208 = vector.load %arg19[%c0_132, %c256] : memref<2x1024xf32, #tpu.memory_space<vmem>>, vector<1x128xf32>
    tpu.vector_store %arg19[%c0_132, %c256], %207 {strides = array<i32>} : memref<2x1024xf32, #tpu.memory_space<vmem>>, vector<1x128xf32>,
    %209 = vector.extract_strided_slice %195 {offsets = [28, 0], sizes = [1, 128], strides = [1, 1]} : vector<96x128xf32> to vector<1x128xf32>
    %210 = vector.extract_strided_slice %196 {offsets = [30, 0], sizes = [1, 128], strides = [1, 1]} : vector<96x128xf32> to vector<1x128xf32>
    %211 = arith.addf %209, %210 : vector<1x128xf32>
    %c0_133 = arith.constant 0 : index
    %c384 = arith.constant 384 : index
    %212 = vector.load %arg19[%c0_133, %c384] : memref<2x1024xf32, #tpu.memory_space<vmem>>, vector<1x128xf32>
    tpu.vector_store %arg19[%c0_133, %c384], %211 {strides = array<i32>} : memref<2x1024xf32, #tpu.memory_space<vmem>>, vector<1x128xf32>,
    %213 = vector.extract_strided_slice %195 {offsets = [48, 0], sizes = [1, 128], strides = [1, 1]} : vector<96x128xf32> to vector<1x128xf32>
    %214 = vector.extract_strided_slice %196 {offsets = [50, 0], sizes = [1, 128], strides = [1, 1]} : vector<96x128xf32> to vector<1x128xf32>
    %215 = arith.addf %213, %214 : vector<1x128xf32>
    %c0_134 = arith.constant 0 : index
    %c512 = arith.constant 512 : index
    %216 = vector.load %arg19[%c0_134, %c512] : memref<2x1024xf32, #tpu.memory_space<vmem>>, vector<1x128xf32>
    tpu.vector_store %arg19[%c0_134, %c512], %215 {strides = array<i32>} : memref<2x1024xf32, #tpu.memory_space<vmem>>, vector<1x128xf32>,
    %217 = vector.extract_strided_slice %195 {offsets = [52, 0], sizes = [1, 128], strides = [1, 1]} : vector<96x128xf32> to vector<1x128xf32>
    %218 = vector.extract_strided_slice %196 {offsets = [54, 0], sizes = [1, 128], strides = [1, 1]} : vector<96x128xf32> to vector<1x128xf32>
    %219 = arith.addf %217, %218 : vector<1x128xf32>
    %c0_135 = arith.constant 0 : index
    %c640 = arith.constant 640 : index
    %220 = vector.load %arg19[%c0_135, %c640] : memref<2x1024xf32, #tpu.memory_space<vmem>>, vector<1x128xf32>
    tpu.vector_store %arg19[%c0_135, %c640], %219 {strides = array<i32>} : memref<2x1024xf32, #tpu.memory_space<vmem>>, vector<1x128xf32>,
    %221 = vector.extract_strided_slice %195 {offsets = [72, 0], sizes = [1, 128], strides = [1, 1]} : vector<96x128xf32> to vector<1x128xf32>
    %222 = vector.extract_strided_slice %196 {offsets = [74, 0], sizes = [1, 128], strides = [1, 1]} : vector<96x128xf32> to vector<1x128xf32>
    %223 = arith.addf %221, %222 : vector<1x128xf32>
    %c0_136 = arith.constant 0 : index
    %c768 = arith.constant 768 : index
    %224 = vector.load %arg19[%c0_136, %c768] : memref<2x1024xf32, #tpu.memory_space<vmem>>, vector<1x128xf32>
    tpu.vector_store %arg19[%c0_136, %c768], %223 {strides = array<i32>} : memref<2x1024xf32, #tpu.memory_space<vmem>>, vector<1x128xf32>,
    %225 = vector.extract_strided_slice %195 {offsets = [76, 0], sizes = [1, 128], strides = [1, 1]} : vector<96x128xf32> to vector<1x128xf32>
    %226 = vector.extract_strided_slice %196 {offsets = [78, 0], sizes = [1, 128], strides = [1, 1]} : vector<96x128xf32> to vector<1x128xf32>
    %227 = arith.addf %225, %226 : vector<1x128xf32>
    %c0_137 = arith.constant 0 : index
    %c896 = arith.constant 896 : index
    %228 = vector.load %arg19[%c0_137, %c896] : memref<2x1024xf32, #tpu.memory_space<vmem>>, vector<1x128xf32>
    tpu.vector_store %arg19[%c0_137, %c896], %227 {strides = array<i32>} : memref<2x1024xf32, #tpu.memory_space<vmem>>, vector<1x128xf32>,
    %c96_138 = arith.constant 96 : index
    %c0_139 = arith.constant 0 : index
    %229 = vector.load %arg18[%c96_138, %c0_139] : memref<208x128xf32, #tpu.memory_space<vmem>>, vector<96x128xf32>
    %c108 = arith.constant 108 : index
    %c0_140 = arith.constant 0 : index
    %230 = vector.load %arg18[%c108, %c0_140] : memref<208x128xf32, #tpu.memory_space<vmem>>, vector<96x128xf32>
    %231 = arith.maximumf %229, %230 : vector<96x128xf32>
    %c97 = arith.constant 97 : index
    %c0_141 = arith.constant 0 : index
    %232 = vector.load %arg18[%c97, %c0_141] : memref<208x128xf32, #tpu.memory_space<vmem>>, vector<96x128xf32>
    %c109 = arith.constant 109 : index
    %c0_142 = arith.constant 0 : index
    %233 = vector.load %arg18[%c109, %c0_142] : memref<208x128xf32, #tpu.memory_space<vmem>>, vector<96x128xf32>
    %234 = arith.maximumf %232, %233 : vector<96x128xf32>
    %235 = arith.maximumf %231, %234 : vector<96x128xf32>
    %c64_i32_143 = arith.constant 64 : i32
    %236 = tpu.dynamic_rotate %235 by %c64_i32_143 dim 1 : vector<96x128xf32>, i32 -> vector<96x128xf32>
    %237 = vector.extract_strided_slice %235 {offsets = [0, 0], sizes = [1, 128], strides = [1, 1]} : vector<96x128xf32> to vector<1x128xf32>
    %238 = vector.extract_strided_slice %236 {offsets = [2, 0], sizes = [1, 128], strides = [1, 1]} : vector<96x128xf32> to vector<1x128xf32>
    %239 = arith.addf %237, %238 : vector<1x128xf32>
    %c1_144 = arith.constant 1 : index
    %c0_145 = arith.constant 0 : index
    %240 = vector.load %arg19[%c1_144, %c0_145] : memref<2x1024xf32, #tpu.memory_space<vmem>>, vector<1x128xf32>
    tpu.vector_store %arg19[%c1_144, %c0_145], %239 {strides = array<i32>} : memref<2x1024xf32, #tpu.memory_space<vmem>>, vector<1x128xf32>,
    %241 = vector.extract_strided_slice %235 {offsets = [4, 0], sizes = [1, 128], strides = [1, 1]} : vector<96x128xf32> to vector<1x128xf32>
    %242 = vector.extract_strided_slice %236 {offsets = [6, 0], sizes = [1, 128], strides = [1, 1]} : vector<96x128xf32> to vector<1x128xf32>
    %243 = arith.addf %241, %242 : vector<1x128xf32>
    %c1_146 = arith.constant 1 : index
    %c128_147 = arith.constant 128 : index
    %244 = vector.load %arg19[%c1_146, %c128_147] : memref<2x1024xf32, #tpu.memory_space<vmem>>, vector<1x128xf32>
    tpu.vector_store %arg19[%c1_146, %c128_147], %243 {strides = array<i32>} : memref<2x1024xf32, #tpu.memory_space<vmem>>, vector<1x128xf32>,
    %245 = vector.extract_strided_slice %235 {offsets = [24, 0], sizes = [1, 128], strides = [1, 1]} : vector<96x128xf32> to vector<1x128xf32>
    %246 = vector.extract_strided_slice %236 {offsets = [26, 0], sizes = [1, 128], strides = [1, 1]} : vector<96x128xf32> to vector<1x128xf32>
    %247 = arith.addf %245, %246 : vector<1x128xf32>
    %c1_148 = arith.constant 1 : index
    %c256_149 = arith.constant 256 : index
    %248 = vector.load %arg19[%c1_148, %c256_149] : memref<2x1024xf32, #tpu.memory_space<vmem>>, vector<1x128xf32>
    tpu.vector_store %arg19[%c1_148, %c256_149], %247 {strides = array<i32>} : memref<2x1024xf32, #tpu.memory_space<vmem>>, vector<1x128xf32>,
    %249 = vector.extract_strided_slice %235 {offsets = [28, 0], sizes = [1, 128], strides = [1, 1]} : vector<96x128xf32> to vector<1x128xf32>
    %250 = vector.extract_strided_slice %236 {offsets = [30, 0], sizes = [1, 128], strides = [1, 1]} : vector<96x128xf32> to vector<1x128xf32>
    %251 = arith.addf %249, %250 : vector<1x128xf32>
    %c1_150 = arith.constant 1 : index
    %c384_151 = arith.constant 384 : index
    %252 = vector.load %arg19[%c1_150, %c384_151] : memref<2x1024xf32, #tpu.memory_space<vmem>>, vector<1x128xf32>
    tpu.vector_store %arg19[%c1_150, %c384_151], %251 {strides = array<i32>} : memref<2x1024xf32, #tpu.memory_space<vmem>>, vector<1x128xf32>,
    %253 = vector.extract_strided_slice %235 {offsets = [48, 0], sizes = [1, 128], strides = [1, 1]} : vector<96x128xf32> to vector<1x128xf32>
    %254 = vector.extract_strided_slice %236 {offsets = [50, 0], sizes = [1, 128], strides = [1, 1]} : vector<96x128xf32> to vector<1x128xf32>
    %255 = arith.addf %253, %254 : vector<1x128xf32>
    %c1_152 = arith.constant 1 : index
    %c512_153 = arith.constant 512 : index
    %256 = vector.load %arg19[%c1_152, %c512_153] : memref<2x1024xf32, #tpu.memory_space<vmem>>, vector<1x128xf32>
    tpu.vector_store %arg19[%c1_152, %c512_153], %255 {strides = array<i32>} : memref<2x1024xf32, #tpu.memory_space<vmem>>, vector<1x128xf32>,
    %257 = vector.extract_strided_slice %235 {offsets = [52, 0], sizes = [1, 128], strides = [1, 1]} : vector<96x128xf32> to vector<1x128xf32>
    %258 = vector.extract_strided_slice %236 {offsets = [54, 0], sizes = [1, 128], strides = [1, 1]} : vector<96x128xf32> to vector<1x128xf32>
    %259 = arith.addf %257, %258 : vector<1x128xf32>
    %c1_154 = arith.constant 1 : index
    %c640_155 = arith.constant 640 : index
    %260 = vector.load %arg19[%c1_154, %c640_155] : memref<2x1024xf32, #tpu.memory_space<vmem>>, vector<1x128xf32>
    tpu.vector_store %arg19[%c1_154, %c640_155], %259 {strides = array<i32>} : memref<2x1024xf32, #tpu.memory_space<vmem>>, vector<1x128xf32>,
    %261 = vector.extract_strided_slice %235 {offsets = [72, 0], sizes = [1, 128], strides = [1, 1]} : vector<96x128xf32> to vector<1x128xf32>
    %262 = vector.extract_strided_slice %236 {offsets = [74, 0], sizes = [1, 128], strides = [1, 1]} : vector<96x128xf32> to vector<1x128xf32>
    %263 = arith.addf %261, %262 : vector<1x128xf32>
    %c1_156 = arith.constant 1 : index
    %c768_157 = arith.constant 768 : index
    %264 = vector.load %arg19[%c1_156, %c768_157] : memref<2x1024xf32, #tpu.memory_space<vmem>>, vector<1x128xf32>
    tpu.vector_store %arg19[%c1_156, %c768_157], %263 {strides = array<i32>} : memref<2x1024xf32, #tpu.memory_space<vmem>>, vector<1x128xf32>,
    %265 = vector.extract_strided_slice %235 {offsets = [76, 0], sizes = [1, 128], strides = [1, 1]} : vector<96x128xf32> to vector<1x128xf32>
    %266 = vector.extract_strided_slice %236 {offsets = [78, 0], sizes = [1, 128], strides = [1, 1]} : vector<96x128xf32> to vector<1x128xf32>
    %267 = arith.addf %265, %266 : vector<1x128xf32>
    %c1_158 = arith.constant 1 : index
    %c896_159 = arith.constant 896 : index
    %268 = vector.load %arg19[%c1_158, %c896_159] : memref<2x1024xf32, #tpu.memory_space<vmem>>, vector<1x128xf32>
    tpu.vector_store %arg19[%c1_158, %c896_159], %267 {strides = array<i32>} : memref<2x1024xf32, #tpu.memory_space<vmem>>, vector<1x128xf32>,
    tpu.wait_dma2 semaphore(%arg21 : memref<!tpu.dma_semaphore, #tpu.memory_space<semaphore_mem>>) src(%arg9 : memref<1024x512xbf16, #tpu.memory_space<any>>) dst(%arg20 : memref<1024x512xbf16, #tpu.memory_space<vmem>>)
    %c0_160 = arith.constant 0 : index
    %c0_161 = arith.constant 0 : index
    %269 = vector.load %arg19[%c0_160, %c0_161] : memref<2x1024xf32, #tpu.memory_space<vmem>>, vector<2x1024xf32>
    %270 = arith.truncf %269 : vector<2x1024xf32> to vector<2x1024xbf16>
    %c0_162 = arith.constant 0 : index
    %c0_163 = arith.constant 0 : index
    %271 = vector.load %arg20[%c0_162, %c0_163] : memref<1024x512xbf16, #tpu.memory_space<vmem>>, vector<1024x512xbf16>
    %cst_164 = arith.constant dense<0.000000e+00> : vector<2x512xf32>
    %272 = tpu.matmul %270, %271, %cst_164 {dimension_numbers = #tpu.dot_dimension_numbers<[1], [0], [0], [1], [0, 0, 1, 1], [], []>} : vector<2x1024xbf16>, vector<1024x512xbf16>, vector<2x512xf32> -> vector<2x512xf32>
    %c0_165 = arith.constant 0 : index
    %c0_166 = arith.constant 0 : index
    %273 = vector.load %arg10[%c0_165, %c0_166] : memref<1x512xf32, #tpu.memory_space<vmem>>, vector<1x512xf32>
    %274 = vector.broadcast %273 : vector<1x512xf32> to vector<2x512xf32>
    %275 = arith.addf %272, %274 : vector<2x512xf32>
    %cst_167 = arith.constant 0.000000e+00 : f32
    %276 = vector.broadcast %cst_167 : f32 to vector<2x512xf32>
    %277 = arith.maximumf %275, %276 : vector<2x512xf32>
    %278 = arith.truncf %277 : vector<2x512xf32> to vector<2x512xbf16>
    %c0_168 = arith.constant 0 : index
    %c0_169 = arith.constant 0 : index
    %279 = vector.load %arg11[%c0_168, %c0_169] : memref<512x128xbf16, #tpu.memory_space<vmem>>, vector<512x128xbf16>
    %cst_170 = arith.constant dense<0.000000e+00> : vector<2x128xf32>
    %280 = tpu.matmul %278, %279, %cst_170 {dimension_numbers = #tpu.dot_dimension_numbers<[1], [0], [0], [1], [0, 0, 1, 1], [], []>} : vector<2x512xbf16>, vector<512x128xbf16>, vector<2x128xf32> -> vector<2x128xf32>
    %c0_171 = arith.constant 0 : index
    %c0_172 = arith.constant 0 : index
    %281 = vector.load %arg12[%c0_171, %c0_172] : memref<1x128xf32, #tpu.memory_space<vmem>>, vector<1x128xf32>
    %282 = vector.broadcast %281 : vector<1x128xf32> to vector<2x128xf32>
    %283 = arith.addf %280, %282 : vector<2x128xf32>
    %284 = arith.truncf %283 : vector<2x128xf32> to vector<2x128xbf16>
    %c0_173 = arith.constant 0 : index
    %c0_174 = arith.constant 0 : index
    %285 = vector.load %arg13[%c0_173, %c0_174] : memref<128x128xbf16, #tpu.memory_space<vmem>>, vector<128x128xbf16>
    %cst_175 = arith.constant dense<0.000000e+00> : vector<2x128xf32>
    %286 = tpu.matmul %284, %285, %cst_175 {dimension_numbers = #tpu.dot_dimension_numbers<[1], [0], [0], [1], [0, 0, 1, 1], [], []>} : vector<2x128xbf16>, vector<128x128xbf16>, vector<2x128xf32> -> vector<2x128xf32>
    %c0_176 = arith.constant 0 : index
    %c0_177 = arith.constant 0 : index
    %287 = vector.load %arg14[%c0_176, %c0_177] : memref<1x128xf32, #tpu.memory_space<vmem>>, vector<1x128xf32>
    %288 = vector.broadcast %287 : vector<1x128xf32> to vector<2x128xf32>
    %289 = arith.addf %286, %288 : vector<2x128xf32>
    %c0_178 = arith.constant 0 : index
    %c0_179 = arith.constant 0 : index
    %290 = vector.load %arg15[%c0_178, %c0_179] : memref<2x128xf32, #tpu.memory_space<vmem>>, vector<2x128xf32>
    tpu.vector_store %arg15[%c0_178, %c0_179], %289 {strides = array<i32>} : memref<2x128xf32, #tpu.memory_space<vmem>>, vector<2x128xf32>,
    return
  }
}

</mosaic_0001>

<bundles_post_ra>
// kernel: big_model_forward.1
= control target key start
LH: loop header
LB: loop body
LE: loop exit
PB: predicated region body
PF: predicated region fallthrough
CT: control target
= control target key end

     0   :  { %20 = vsyncpa [#allocation9], 0  ;;  %s18042_s0 = inlined_call_operand.vmem [shape: bf16[1152,32], index: 0, kind: input, shape index: {}]   ;;  %s18043_s1 = inlined_call_operand.vmem [shape: bf16[32,128], index: 1, kind: input, shape index: {}]   ;;  %s18044_s2 = inlined_call_operand.vmem [shape: f32[1,128], index: 2, kind: input, shape index: {}]   ;;  %s18045_s3 = inlined_call_operand.vmem [shape: f32[1,128], index: 3, kind: input, shape index: {}]   ;;  %s18046_s4 = inlined_call_operand.vmem [shape: f32[1,128], index: 4, kind: input, shape index: {}]   ;;  %s18047_s5 = inlined_call_operand.vmem [shape: bf16[5,128,128], index: 5, kind: input, shape index: {}]   ;;  %s18048_s6 = inlined_call_operand.vmem [shape: f32[1,128], index: 6, kind: input, shape index: {}]   ;;  %s18049_s7 = inlined_call_operand.vmem [shape: f32[1,128], index: 7, kind: input, shape index: {}]   ;;  %s18050_s8 = inlined_call_operand.vmem [shape: f32[1,128], index: 8, kind: input, shape index: {}]   ;;  %s18051_s9 = inlined_call_operand.vmem [shape: bf16[1024,512], index: 9, kind: input, shape index: {}]   ;;  %s18052_s10 = inlined_call_operand.vmem [shape: f32[1,512], index: 10, kind: input, shape index: {}]   ;;  %s18053_s11 = inlined_call_operand.vmem [shape: bf16[512,128], index: 11, kind: input, shape index: {}]   ;;  %s18054_s12 = inlined_call_operand.vmem [shape: f32[1,128], index: 12, kind: input, shape index: {}]   ;;  %s18055_s13 = inlined_call_operand.vmem [shape: bf16[128,128], index: 13, kind: input, shape index: {}]   ;;  %s18056_s14 = inlined_call_operand.vmem [shape: f32[1,128], index: 14, kind: input, shape index: {}]   ;;  %s18057_s15 = inlined_call_operand.hbm [shape: f32[2,128], index: 15, kind: output, shape index: {}]  }
   0x1   :  { %v67_v0 = vld [vmem:[%s18051_s9] sm:$0xf]  ;;  %v69_v1 = vld [vmem:[%s18051_s9 + $0x10] sm:$0xf]  ;;  %v71_v2 = vld [vmem:[%s18051_s9 + $0x4] sm:$0xf] }
   0x2   :  { %68 = vst [vmem:[#allocation6] sm:$0xf] %v67_v0  ;;  %70 = vst [vmem:[#allocation6 + $0x4] sm:$0xf] %v69_v1  ;;  %v73_v3 = vld [vmem:[%s18051_s9 + $0x14] sm:$0xf] }
   0x3   :  { %v75_v4 = vld [vmem:[%s18051_s9 + $0x8] sm:$0xf]  ;;  %72 = vst [vmem:[#allocation6 + $0x8] sm:$0xf] %v71_v2  ;;  %74 = vst [vmem:[#allocation6 + $0xc] sm:$0xf] %v73_v3 }
   0x4   :  { %76 = vst [vmem:[#allocation6 + $0x10] sm:$0xf] %v75_v4  ;;  %v77_v5 = vld [vmem:[%s18051_s9 + $0x18] sm:$0xf]  ;;  %v79_v6 = vld [vmem:[%s18051_s9 + $0xc] sm:$0xf] }
   0x5   :  { %v81_v7 = vld [vmem:[%s18051_s9 + $0x1c] sm:$0xff]   ;;  %78 = vst [vmem:[#allocation6 + $0x14] sm:$0xf] %v77_v5  ;;  %80 = vst [vmem:[#allocation6 + $0x18] sm:$0xf] %v79_v6 }
   0x6   :  { %82 = vst [vmem:[#allocation6 + $0x1c] sm:$0xff] %v81_v7   ;;  %v85_v8 = vld [vmem:[%s18051_s9 + $0x30] sm:$0xf]  ;;  %v87_v9 = vld [vmem:[%s18051_s9 + $0x24] sm:$0xf]  ;;  %v97_v14 = vld [vmem:[%s18051_s9 + $0x3c] sm:$0xff]  }
   0x7   :  { %v89_v10 = vld [vmem:[%s18051_s9 + $0x34] sm:$0xf]  ;;  %86 = vst [vmem:[#allocation6 + $0x24] sm:$0xf] %v85_v8  ;;  %88 = vst [vmem:[#allocation6 + $0x28] sm:$0xf] %v87_v9 }
   0x8   :  { %90 = vst [vmem:[#allocation6 + $0x2c] sm:$0xf] %v89_v10  ;;  %v91_v11 = vld [vmem:[%s18051_s9 + $0x28] sm:$0xf]  ;;  %v93_v12 = vld [vmem:[%s18051_s9 + $0x38] sm:$0xf] }
   0x9   :  { %v95_v13 = vld [vmem:[%s18051_s9 + $0x2c] sm:$0xf]  ;;  %92 = vst [vmem:[#allocation6 + $0x30] sm:$0xf] %v91_v11  ;;  %94 = vst [vmem:[#allocation6 + $0x34] sm:$0xf] %v93_v12 }
   0xa   :  { %96 = vst [vmem:[#allocation6 + $0x38] sm:$0xf] %v95_v13  ;;  %v101_v15 = vld [vmem:[%s18051_s9 + $0x50] sm:$0xf]  ;;  %v103_v16 = vld [vmem:[%s18051_s9 + $0x44] sm:$0xf] }
   0xb   :  { %98 = vst [vmem:[#allocation6 + $0x3c] sm:$0xff] %v97_v14   ;;  %102 = vst [vmem:[#allocation6 + $0x44] sm:$0xf] %v101_v15  ;;  %v105_v17 = vld [vmem:[%s18051_s9 + $0x54] sm:$0xf]  ;;  %v113_v21 = vld [vmem:[%s18051_s9 + $0x5c] sm:$0xff]  }
   0xc   :  { %104 = vst [vmem:[#allocation6 + $0x48] sm:$0xf] %v103_v16  ;;  %v107_v18 = vld [vmem:[%s18051_s9 + $0x48] sm:$0xf]  ;;  %v109_v19 = vld [vmem:[%s18051_s9 + $0x58] sm:$0xf] }
   0xd   :  { %106 = vst [vmem:[#allocation6 + $0x4c] sm:$0xf] %v105_v17  ;;  %108 = vst [vmem:[#allocation6 + $0x50] sm:$0xf] %v107_v18  ;;  %v111_v20 = vld [vmem:[%s18051_s9 + $0x4c] sm:$0xf] }
   0xe   :  { %110 = vst [vmem:[#allocation6 + $0x54] sm:$0xf] %v109_v19  ;;  %v117_v22 = vld [vmem:[%s18051_s9 + $0x70] sm:$0xf]  ;;  %112 = vst [vmem:[#allocation6 + $0x58] sm:$0xf] %v111_v20 }
   0xf   :  { %114 = vst [vmem:[#allocation6 + $0x5c] sm:$0xff] %v113_v21   ;;  %118 = vst [vmem:[#allocation6 + $0x64] sm:$0xf] %v117_v22  ;;  %v119_v23 = vld [vmem:[%s18051_s9 + $0x64] sm:$0xf]  ;;  %v129_v28 = vld [vmem:[%s18051_s9 + $0x7c] sm:$0xff]  }
  0x10   :  { %v121_v24 = vld [vmem:[%s18051_s9 + $0x74] sm:$0xf]  ;;  %v123_v25 = vld [vmem:[%s18051_s9 + $0x68] sm:$0xf]  ;;  %120 = vst [vmem:[#allocation6 + $0x68] sm:$0xf] %v119_v23 }
  0x11   :  { %122 = vst [vmem:[#allocation6 + $0x6c] sm:$0xf] %v121_v24  ;;  %124 = vst [vmem:[#allocation6 + $0x70] sm:$0xf] %v123_v25  ;;  %v125_v26 = vld [vmem:[%s18051_s9 + $0x78] sm:$0xf] }
  0x12   :  { %v127_v27 = vld [vmem:[%s18051_s9 + $0x6c] sm:$0xf]  ;;  %126 = vst [vmem:[#allocation6 + $0x74] sm:$0xf] %v125_v26  ;;  %130 = vst [vmem:[#allocation6 + $0x7c] sm:$0xff] %v129_v28   ;;  %v145_v35 = vld [vmem:[%s18051_s9 + $0x9c] sm:$0xff]  }
  0x13   :  { %128 = vst [vmem:[#allocation6 + $0x78] sm:$0xf] %v127_v27  ;;  %v133_v29 = vld [vmem:[%s18051_s9 + $0x90] sm:$0xf]  ;;  %v135_v30 = vld [vmem:[%s18051_s9 + $0x84] sm:$0xf] }
  0x14   :  { %v137_v31 = vld [vmem:[%s18051_s9 + $0x94] sm:$0xf]  ;;  %134 = vst [vmem:[#allocation6 + $0x84] sm:$0xf] %v133_v29  ;;  %136 = vst [vmem:[#allocation6 + $0x88] sm:$0xf] %v135_v30 }
  0x15   :  { %138 = vst [vmem:[#allocation6 + $0x8c] sm:$0xf] %v137_v31  ;;  %v139_v32 = vld [vmem:[%s18051_s9 + $0x88] sm:$0xf]  ;;  %v141_v33 = vld [vmem:[%s18051_s9 + $0x98] sm:$0xf] }
  0x16   :  { %v143_v34 = vld [vmem:[%s18051_s9 + $0x8c] sm:$0xf]  ;;  %140 = vst [vmem:[#allocation6 + $0x90] sm:$0xf] %v139_v32  ;;  %142 = vst [vmem:[#allocation6 + $0x94] sm:$0xf] %v141_v33 }
  0x17   :  { %144 = vst [vmem:[#allocation6 + $0x98] sm:$0xf] %v143_v34  ;;  %v149_v36 = vld [vmem:[%s18051_s9 + $0xb0] sm:$0xf]  ;;  %v151_v37 = vld [vmem:[%s18051_s9 + $0xa4] sm:$0xf] }
  0x18   :  { %146 = vst [vmem:[#allocation6 + $0x9c] sm:$0xff] %v145_v35   ;;  %150 = vst [vmem:[#allocation6 + $0xa4] sm:$0xf] %v149_v36  ;;  %v153_v38 = vld [vmem:[%s18051_s9 + $0xb4] sm:$0xf]  ;;  %v161_v42 = vld [vmem:[%s18051_s9 + $0xbc] sm:$0xff]  }
  0x19   :  { %152 = vst [vmem:[#allocation6 + $0xa8] sm:$0xf] %v151_v37  ;;  %v155_v39 = vld [vmem:[%s18051_s9 + $0xa8] sm:$0xf]  ;;  %v157_v40 = vld [vmem:[%s18051_s9 + $0xb8] sm:$0xf] }
  0x1a   :  { %154 = vst [vmem:[#allocation6 + $0xac] sm:$0xf] %v153_v38  ;;  %156 = vst [vmem:[#allocation6 + $0xb0] sm:$0xf] %v155_v39  ;;  %v159_v41 = vld [vmem:[%s18051_s9 + $0xac] sm:$0xf] }
  0x1b   :  { %158 = vst [vmem:[#allocation6 + $0xb4] sm:$0xf] %v157_v40  ;;  %v165_v43 = vld [vmem:[%s18051_s9 + $0xd0] sm:$0xf]  ;;  %160 = vst [vmem:[#allocation6 + $0xb8] sm:$0xf] %v159_v41 }
  0x1c   :  { %162 = vst [vmem:[#allocation6 + $0xbc] sm:$0xff] %v161_v42   ;;  %166 = vst [vmem:[#allocation6 + $0xc4] sm:$0xf] %v165_v43  ;;  %v167_v44 = vld [vmem:[%s18051_s9 + $0xc4] sm:$0xf]  ;;  %v177_v49 = vld [vmem:[%s18051_s9 + $0xdc] sm:$0xff]  }
  0x1d   :  { %v169_v45 = vld [vmem:[%s18051_s9 + $0xd4] sm:$0xf]  ;;  %v171_v46 = vld [vmem:[%s18051_s9 + $0xc8] sm:$0xf]  ;;  %168 = vst [vmem:[#allocation6 + $0xc8] sm:$0xf] %v167_v44 }
  0x1e   :  { %170 = vst [vmem:[#allocation6 + $0xcc] sm:$0xf] %v169_v45  ;;  %172 = vst [vmem:[#allocation6 + $0xd0] sm:$0xf] %v171_v46  ;;  %v173_v47 = vld [vmem:[%s18051_s9 + $0xd8] sm:$0xf] }
  0x1f   :  { %v175_v48 = vld [vmem:[%s18051_s9 + $0xcc] sm:$0xf]  ;;  %174 = vst [vmem:[#allocation6 + $0xd4] sm:$0xf] %v173_v47  ;;  %178 = vst [vmem:[#allocation6 + $0xdc] sm:$0xff] %v177_v49   ;;  %v193_v56 = vld [vmem:[%s18051_s9 + $0xfc] sm:$0xff]  }
  0x20   :  { %176 = vst [vmem:[#allocation6 + $0xd8] sm:$0xf] %v175_v48  ;;  %v181_v50 = vld [vmem:[%s18051_s9 + $0xf0] sm:$0xf]  ;;  %v183_v51 = vld [vmem:[%s18051_s9 + $0xe4] sm:$0xf] }
  0x21   :  { %v185_v52 = vld [vmem:[%s18051_s9 + $0xf4] sm:$0xf]  ;;  %182 = vst [vmem:[#allocation6 + $0xe4] sm:$0xf] %v181_v50  ;;  %184 = vst [vmem:[#allocation6 + $0xe8] sm:$0xf] %v183_v51 }
  0x22   :  { %186 = vst [vmem:[#allocation6 + $0xec] sm:$0xf] %v185_v52  ;;  %v187_v53 = vld [vmem:[%s18051_s9 + $0xe8] sm:$0xf]  ;;  %v189_v54 = vld [vmem:[%s18051_s9 + $0xf8] sm:$0xf] }
  0x23   :  { %v191_v55 = vld [vmem:[%s18051_s9 + $0xec] sm:$0xf]  ;;  %188 = vst [vmem:[#allocation6 + $0xf0] sm:$0xf] %v187_v53  ;;  %190 = vst [vmem:[#allocation6 + $0xf4] sm:$0xf] %v189_v54 }
  0x24   :  { %192 = vst [vmem:[#allocation6 + $0xf8] sm:$0xf] %v191_v55  ;;  %v197_v57 = vld [vmem:[%s18051_s9 + $0x110] sm:$0xf]  ;;  %v199_v58 = vld [vmem:[%s18051_s9 + $0x104] sm:$0xf] }
  0x25   :  { %194 = vst [vmem:[#allocation6 + $0xfc] sm:$0xff] %v193_v56   ;;  %198 = vst [vmem:[#allocation6 + $0x104] sm:$0xf] %v197_v57  ;;  %v201_v59 = vld [vmem:[%s18051_s9 + $0x114] sm:$0xf]  ;;  %v209_v63 = vld [vmem:[%s18051_s9 + $0x11c] sm:$0xff]  }
  0x26   :  { %200 = vst [vmem:[#allocation6 + $0x108] sm:$0xf] %v199_v58  ;;  %v203_v60 = vld [vmem:[%s18051_s9 + $0x108] sm:$0xf]  ;;  %v205_v61 = vld [vmem:[%s18051_s9 + $0x118] sm:$0xf] }
  0x27   :  { %202 = vst [vmem:[#allocation6 + $0x10c] sm:$0xf] %v201_v59  ;;  %204 = vst [vmem:[#allocation6 + $0x110] sm:$0xf] %v203_v60  ;;  %v207_v62 = vld [vmem:[%s18051_s9 + $0x10c] sm:$0xf] }
  0x28   :  { %206 = vst [vmem:[#allocation6 + $0x114] sm:$0xf] %v205_v61  ;;  %v213_v0 = vld [vmem:[%s18051_s9 + $0x130] sm:$0xf]  ;;  %208 = vst [vmem:[#allocation6 + $0x118] sm:$0xf] %v207_v62 }
  0x29   :  { %210 = vst [vmem:[#allocation6 + $0x11c] sm:$0xff] %v209_v63   ;;  %214 = vst [vmem:[#allocation6 + $0x124] sm:$0xf] %v213_v0  ;;  %v215_v1 = vld [vmem:[%s18051_s9 + $0x124] sm:$0xf]  ;;  %v225_v6 = vld [vmem:[%s18051_s9 + $0x13c] sm:$0xff]  }
  0x2a   :  { %v217_v2 = vld [vmem:[%s18051_s9 + $0x134] sm:$0xf]  ;;  %v219_v3 = vld [vmem:[%s18051_s9 + $0x128] sm:$0xf]  ;;  %216 = vst [vmem:[#allocation6 + $0x128] sm:$0xf] %v215_v1 }
  0x2b   :  { %218 = vst [vmem:[#allocation6 + $0x12c] sm:$0xf] %v217_v2  ;;  %220 = vst [vmem:[#allocation6 + $0x130] sm:$0xf] %v219_v3  ;;  %v221_v4 = vld [vmem:[%s18051_s9 + $0x138] sm:$0xf] }
  0x2c   :  { %v223_v5 = vld [vmem:[%s18051_s9 + $0x12c] sm:$0xf]  ;;  %222 = vst [vmem:[#allocation6 + $0x134] sm:$0xf] %v221_v4  ;;  %226 = vst [vmem:[#allocation6 + $0x13c] sm:$0xff] %v225_v6   ;;  %v241_v13 = vld [vmem:[%s18051_s9 + $0x15c] sm:$0xff]  }
  0x2d   :  { %224 = vst [vmem:[#allocation6 + $0x138] sm:$0xf] %v223_v5  ;;  %v229_v7 = vld [vmem:[%s18051_s9 + $0x150] sm:$0xf]  ;;  %v231_v8 = vld [vmem:[%s18051_s9 + $0x144] sm:$0xf] }
  0x2e   :  { %v233_v9 = vld [vmem:[%s18051_s9 + $0x154] sm:$0xf]  ;;  %230 = vst [vmem:[#allocation6 + $0x144] sm:$0xf] %v229_v7  ;;  %232 = vst [vmem:[#allocation6 + $0x148] sm:$0xf] %v231_v8 }
  0x2f   :  { %234 = vst [vmem:[#allocation6 + $0x14c] sm:$0xf] %v233_v9  ;;  %v235_v10 = vld [vmem:[%s18051_s9 + $0x148] sm:$0xf]  ;;  %v237_v11 = vld [vmem:[%s18051_s9 + $0x158] sm:$0xf] }
  0x30   :  { %v239_v12 = vld [vmem:[%s18051_s9 + $0x14c] sm:$0xf]  ;;  %236 = vst [vmem:[#allocation6 + $0x150] sm:$0xf] %v235_v10  ;;  %238 = vst [vmem:[#allocation6 + $0x154] sm:$0xf] %v237_v11 }
  0x31   :  { %240 = vst [vmem:[#allocation6 + $0x158] sm:$0xf] %v239_v12  ;;  %v245_v14 = vld [vmem:[%s18051_s9 + $0x170] sm:$0xf]  ;;  %v247_v15 = vld [vmem:[%s18051_s9 + $0x164] sm:$0xf] }
  0x32   :  { %242 = vst [vmem:[#allocation6 + $0x15c] sm:$0xff] %v241_v13   ;;  %246 = vst [vmem:[#allocation6 + $0x164] sm:$0xf] %v245_v14  ;;  %v249_v16 = vld [vmem:[%s18051_s9 + $0x174] sm:$0xf]  ;;  %v257_v20 = vld [vmem:[%s18051_s9 + $0x17c] sm:$0xff]  }
  0x33   :  { %248 = vst [vmem:[#allocation6 + $0x168] sm:$0xf] %v247_v15  ;;  %v251_v17 = vld [vmem:[%s18051_s9 + $0x168] sm:$0xf]  ;;  %v253_v18 = vld [vmem:[%s18051_s9 + $0x178] sm:$0xf] }
  0x34   :  { %250 = vst [vmem:[#allocation6 + $0x16c] sm:$0xf] %v249_v16  ;;  %252 = vst [vmem:[#allocation6 + $0x170] sm:$0xf] %v251_v17  ;;  %v255_v19 = vld [vmem:[%s18051_s9 + $0x16c] sm:$0xf] }
  0x35   :  { %254 = vst [vmem:[#allocation6 + $0x174] sm:$0xf] %v253_v18  ;;  %v261_v21 = vld [vmem:[%s18051_s9 + $0x190] sm:$0xf]  ;;  %256 = vst [vmem:[#allocation6 + $0x178] sm:$0xf] %v255_v19 }
  0x36   :  { %258 = vst [vmem:[#allocation6 + $0x17c] sm:$0xff] %v257_v20   ;;  %262 = vst [vmem:[#allocation6 + $0x184] sm:$0xf] %v261_v21  ;;  %v263_v22 = vld [vmem:[%s18051_s9 + $0x184] sm:$0xf]  ;;  %v273_v27 = vld [vmem:[%s18051_s9 + $0x19c] sm:$0xff]  }
  0x37   :  { %v265_v23 = vld [vmem:[%s18051_s9 + $0x194] sm:$0xf]  ;;  %v267_v24 = vld [vmem:[%s18051_s9 + $0x188] sm:$0xf]  ;;  %264 = vst [vmem:[#allocation6 + $0x188] sm:$0xf] %v263_v22 }
  0x38   :  { %266 = vst [vmem:[#allocation6 + $0x18c] sm:$0xf] %v265_v23  ;;  %268 = vst [vmem:[#allocation6 + $0x190] sm:$0xf] %v267_v24  ;;  %v269_v25 = vld [vmem:[%s18051_s9 + $0x198] sm:$0xf] }
  0x39   :  { %v271_v26 = vld [vmem:[%s18051_s9 + $0x18c] sm:$0xf]  ;;  %270 = vst [vmem:[#allocation6 + $0x194] sm:$0xf] %v269_v25  ;;  %274 = vst [vmem:[#allocation6 + $0x19c] sm:$0xff] %v273_v27   ;;  %v289_v34 = vld [vmem:[%s18051_s9 + $0x1bc] sm:$0xff]  }
  0x3a   :  { %272 = vst [vmem:[#allocation6 + $0x198] sm:$0xf] %v271_v26  ;;  %v277_v28 = vld [vmem:[%s18051_s9 + $0x1b0] sm:$0xf]  ;;  %v279_v29 = vld [vmem:[%s18051_s9 + $0x1a4] sm:$0xf] }
  0x3b   :  { %v281_v30 = vld [vmem:[%s18051_s9 + $0x1b4] sm:$0xf]  ;;  %278 = vst [vmem:[#allocation6 + $0x1a4] sm:$0xf] %v277_v28  ;;  %280 = vst [vmem:[#allocation6 + $0x1a8] sm:$0xf] %v279_v29 }
  0x3c   :  { %282 = vst [vmem:[#allocation6 + $0x1ac] sm:$0xf] %v281_v30  ;;  %v283_v31 = vld [vmem:[%s18051_s9 + $0x1a8] sm:$0xf]  ;;  %v285_v32 = vld [vmem:[%s18051_s9 + $0x1b8] sm:$0xf] }
  0x3d   :  { %v287_v33 = vld [vmem:[%s18051_s9 + $0x1ac] sm:$0xf]  ;;  %284 = vst [vmem:[#allocation6 + $0x1b0] sm:$0xf] %v283_v31  ;;  %286 = vst [vmem:[#allocation6 + $0x1b4] sm:$0xf] %v285_v32 }
  0x3e   :  { %288 = vst [vmem:[#allocation6 + $0x1b8] sm:$0xf] %v287_v33  ;;  %v293_v35 = vld [vmem:[%s18051_s9 + $0x1d0] sm:$0xf]  ;;  %v295_v36 = vld [vmem:[%s18051_s9 + $0x1c4] sm:$0xf] }
  0x3f   :  { %290 = vst [vmem:[#allocation6 + $0x1bc] sm:$0xff] %v289_v34   ;;  %294 = vst [vmem:[#allocation6 + $0x1c4] sm:$0xf] %v293_v35  ;;  %v297_v37 = vld [vmem:[%s18051_s9 + $0x1d4] sm:$0xf]  ;;  %v305_v41 = vld [vmem:[%s18051_s9 + $0x1dc] sm:$0xff]  }
  0x40   :  { %296 = vst [vmem:[#allocation6 + $0x1c8] sm:$0xf] %v295_v36  ;;  %v299_v38 = vld [vmem:[%s18051_s9 + $0x1c8] sm:$0xf]  ;;  %v301_v39 = vld [vmem:[%s18051_s9 + $0x1d8] sm:$0xf] }
  0x41   :  { %298 = vst [vmem:[#allocation6 + $0x1cc] sm:$0xf] %v297_v37  ;;  %300 = vst [vmem:[#allocation6 + $0x1d0] sm:$0xf] %v299_v38  ;;  %v303_v40 = vld [vmem:[%s18051_s9 + $0x1cc] sm:$0xf] }
  0x42   :  { %302 = vst [vmem:[#allocation6 + $0x1d4] sm:$0xf] %v301_v39  ;;  %v309_v42 = vld [vmem:[%s18051_s9 + $0x1f0] sm:$0xf]  ;;  %304 = vst [vmem:[#allocation6 + $0x1d8] sm:$0xf] %v303_v40 }
  0x43   :  { %306 = vst [vmem:[#allocation6 + $0x1dc] sm:$0xff] %v305_v41   ;;  %310 = vst [vmem:[#allocation6 + $0x1e4] sm:$0xf] %v309_v42  ;;  %v311_v43 = vld [vmem:[%s18051_s9 + $0x1e4] sm:$0xf]  ;;  %v321_v48 = vld [vmem:[%s18051_s9 + $0x1fc] sm:$0xff]  }
  0x44   :  { %v313_v44 = vld [vmem:[%s18051_s9 + $0x1f4] sm:$0xf]  ;;  %v315_v45 = vld [vmem:[%s18051_s9 + $0x1e8] sm:$0xf]  ;;  %312 = vst [vmem:[#allocation6 + $0x1e8] sm:$0xf] %v311_v43 }
  0x45   :  { %314 = vst [vmem:[#allocation6 + $0x1ec] sm:$0xf] %v313_v44  ;;  %316 = vst [vmem:[#allocation6 + $0x1f0] sm:$0xf] %v315_v45  ;;  %v317_v46 = vld [vmem:[%s18051_s9 + $0x1f8] sm:$0xf] }
  0x46   :  { %v319_v47 = vld [vmem:[%s18051_s9 + $0x1ec] sm:$0xf]  ;;  %318 = vst [vmem:[#allocation6 + $0x1f4] sm:$0xf] %v317_v46  ;;  %322 = vst [vmem:[#allocation6 + $0x1fc] sm:$0xff] %v321_v48   ;;  %v337_v55 = vld [vmem:[%s18051_s9 + $0x21c] sm:$0xff]  }
  0x47   :  { %320 = vst [vmem:[#allocation6 + $0x1f8] sm:$0xf] %v319_v47  ;;  %v325_v49 = vld [vmem:[%s18051_s9 + $0x210] sm:$0xf]  ;;  %v327_v50 = vld [vmem:[%s18051_s9 + $0x204] sm:$0xf] }
  0x48   :  { %v329_v51 = vld [vmem:[%s18051_s9 + $0x214] sm:$0xf]  ;;  %326 = vst [vmem:[#allocation6 + $0x204] sm:$0xf] %v325_v49  ;;  %328 = vst [vmem:[#allocation6 + $0x208] sm:$0xf] %v327_v50 }
  0x49   :  { %330 = vst [vmem:[#allocation6 + $0x20c] sm:$0xf] %v329_v51  ;;  %v331_v52 = vld [vmem:[%s18051_s9 + $0x208] sm:$0xf]  ;;  %v333_v53 = vld [vmem:[%s18051_s9 + $0x218] sm:$0xf] }
  0x4a   :  { %v335_v54 = vld [vmem:[%s18051_s9 + $0x20c] sm:$0xf]  ;;  %332 = vst [vmem:[#allocation6 + $0x210] sm:$0xf] %v331_v52  ;;  %334 = vst [vmem:[#allocation6 + $0x214] sm:$0xf] %v333_v53 }
  0x4b   :  { %336 = vst [vmem:[#allocation6 + $0x218] sm:$0xf] %v335_v54  ;;  %v341_v56 = vld [vmem:[%s18051_s9 + $0x230] sm:$0xf]  ;;  %v343_v57 = vld [vmem:[%s18051_s9 + $0x224] sm:$0xf] }
  0x4c   :  { %338 = vst [vmem:[#allocation6 + $0x21c] sm:$0xff] %v337_v55   ;;  %342 = vst [vmem:[#allocation6 + $0x224] sm:$0xf] %v341_v56  ;;  %v345_v58 = vld [vmem:[%s18051_s9 + $0x234] sm:$0xf]  ;;  %v353_v62 = vld [vmem:[%s18051_s9 + $0x23c] sm:$0xff]  }
  0x4d   :  { %344 = vst [vmem:[#allocation6 + $0x228] sm:$0xf] %v343_v57  ;;  %v347_v59 = vld [vmem:[%s18051_s9 + $0x228] sm:$0xf]  ;;  %v349_v60 = vld [vmem:[%s18051_s9 + $0x238] sm:$0xf] }
  0x4e   :  { %346 = vst [vmem:[#allocation6 + $0x22c] sm:$0xf] %v345_v58  ;;  %348 = vst [vmem:[#allocation6 + $0x230] sm:$0xf] %v347_v59  ;;  %v351_v61 = vld [vmem:[%s18051_s9 + $0x22c] sm:$0xf] }
  0x4f   :  { %350 = vst [vmem:[#allocation6 + $0x234] sm:$0xf] %v349_v60  ;;  %v357_v63 = vld [vmem:[%s18051_s9 + $0x250] sm:$0xf]  ;;  %352 = vst [vmem:[#allocation6 + $0x238] sm:$0xf] %v351_v61 }
  0x50   :  { %354 = vst [vmem:[#allocation6 + $0x23c] sm:$0xff] %v353_v62   ;;  %358 = vst [vmem:[#allocation6 + $0x244] sm:$0xf] %v357_v63  ;;  %v359_v0 = vld [vmem:[%s18051_s9 + $0x244] sm:$0xf]  ;;  %v369_v5 = vld [vmem:[%s18051_s9 + $0x25c] sm:$0xff]  }
  0x51   :  { %v361_v1 = vld [vmem:[%s18051_s9 + $0x254] sm:$0xf]  ;;  %v363_v2 = vld [vmem:[%s18051_s9 + $0x248] sm:$0xf]  ;;  %360 = vst [vmem:[#allocation6 + $0x248] sm:$0xf] %v359_v0 }
  0x52   :  { %362 = vst [vmem:[#allocation6 + $0x24c] sm:$0xf] %v361_v1  ;;  %364 = vst [vmem:[#allocation6 + $0x250] sm:$0xf] %v363_v2  ;;  %v365_v3 = vld [vmem:[%s18051_s9 + $0x258] sm:$0xf] }
  0x53   :  { %v367_v4 = vld [vmem:[%s18051_s9 + $0x24c] sm:$0xf]  ;;  %366 = vst [vmem:[#allocation6 + $0x254] sm:$0xf] %v365_v3  ;;  %370 = vst [vmem:[#allocation6 + $0x25c] sm:$0xff] %v369_v5   ;;  %v385_v12 = vld [vmem:[%s18051_s9 + $0x27c] sm:$0xff]  }
  0x54   :  { %368 = vst [vmem:[#allocation6 + $0x258] sm:$0xf] %v367_v4  ;;  %v373_v6 = vld [vmem:[%s18051_s9 + $0x270] sm:$0xf]  ;;  %v375_v7 = vld [vmem:[%s18051_s9 + $0x264] sm:$0xf] }
  0x55   :  { %v377_v8 = vld [vmem:[%s18051_s9 + $0x274] sm:$0xf]  ;;  %374 = vst [vmem:[#allocation6 + $0x264] sm:$0xf] %v373_v6  ;;  %376 = vst [vmem:[#allocation6 + $0x268] sm:$0xf] %v375_v7 }
  0x56   :  { %378 = vst [vmem:[#allocation6 + $0x26c] sm:$0xf] %v377_v8  ;;  %v379_v9 = vld [vmem:[%s18051_s9 + $0x268] sm:$0xf]  ;;  %v381_v10 = vld [vmem:[%s18051_s9 + $0x278] sm:$0xf] }
  0x57   :  { %v383_v11 = vld [vmem:[%s18051_s9 + $0x26c] sm:$0xf]  ;;  %380 = vst [vmem:[#allocation6 + $0x270] sm:$0xf] %v379_v9  ;;  %382 = vst [vmem:[#allocation6 + $0x274] sm:$0xf] %v381_v10 }
  0x58   :  { %384 = vst [vmem:[#allocation6 + $0x278] sm:$0xf] %v383_v11  ;;  %v389_v13 = vld [vmem:[%s18051_s9 + $0x290] sm:$0xf]  ;;  %v391_v14 = vld [vmem:[%s18051_s9 + $0x284] sm:$0xf] }
  0x59   :  { %386 = vst [vmem:[#allocation6 + $0x27c] sm:$0xff] %v385_v12   ;;  %390 = vst [vmem:[#allocation6 + $0x284] sm:$0xf] %v389_v13  ;;  %v393_v15 = vld [vmem:[%s18051_s9 + $0x294] sm:$0xf]  ;;  %v401_v19 = vld [vmem:[%s18051_s9 + $0x29c] sm:$0xff]  }
  0x5a   :  { %392 = vst [vmem:[#allocation6 + $0x288] sm:$0xf] %v391_v14  ;;  %v395_v16 = vld [vmem:[%s18051_s9 + $0x288] sm:$0xf]  ;;  %v397_v17 = vld [vmem:[%s18051_s9 + $0x298] sm:$0xf] }
  0x5b   :  { %394 = vst [vmem:[#allocation6 + $0x28c] sm:$0xf] %v393_v15  ;;  %396 = vst [vmem:[#allocation6 + $0x290] sm:$0xf] %v395_v16  ;;  %v399_v18 = vld [vmem:[%s18051_s9 + $0x28c] sm:$0xf] }
  0x5c   :  { %398 = vst [vmem:[#allocation6 + $0x294] sm:$0xf] %v397_v17  ;;  %v405_v20 = vld [vmem:[%s18051_s9 + $0x2b0] sm:$0xf]  ;;  %400 = vst [vmem:[#allocation6 + $0x298] sm:$0xf] %v399_v18 }
  0x5d   :  { %402 = vst [vmem:[#allocation6 + $0x29c] sm:$0xff] %v401_v19   ;;  %406 = vst [vmem:[#allocation6 + $0x2a4] sm:$0xf] %v405_v20  ;;  %v407_v21 = vld [vmem:[%s18051_s9 + $0x2a4] sm:$0xf]  ;;  %v417_v26 = vld [vmem:[%s18051_s9 + $0x2bc] sm:$0xff]  }
  0x5e   :  { %v409_v22 = vld [vmem:[%s18051_s9 + $0x2b4] sm:$0xf]  ;;  %v411_v23 = vld [vmem:[%s18051_s9 + $0x2a8] sm:$0xf]  ;;  %408 = vst [vmem:[#allocation6 + $0x2a8] sm:$0xf] %v407_v21 }
  0x5f   :  { %410 = vst [vmem:[#allocation6 + $0x2ac] sm:$0xf] %v409_v22  ;;  %412 = vst [vmem:[#allocation6 + $0x2b0] sm:$0xf] %v411_v23  ;;  %v413_v24 = vld [vmem:[%s18051_s9 + $0x2b8] sm:$0xf] }
  0x60   :  { %v415_v25 = vld [vmem:[%s18051_s9 + $0x2ac] sm:$0xf]  ;;  %414 = vst [vmem:[#allocation6 + $0x2b4] sm:$0xf] %v413_v24  ;;  %418 = vst [vmem:[#allocation6 + $0x2bc] sm:$0xff] %v417_v26   ;;  %v433_v33 = vld [vmem:[%s18051_s9 + $0x2dc] sm:$0xff]  }
  0x61   :  { %416 = vst [vmem:[#allocation6 + $0x2b8] sm:$0xf] %v415_v25  ;;  %v421_v27 = vld [vmem:[%s18051_s9 + $0x2d0] sm:$0xf]  ;;  %v423_v28 = vld [vmem:[%s18051_s9 + $0x2c4] sm:$0xf] }
  0x62   :  { %v425_v29 = vld [vmem:[%s18051_s9 + $0x2d4] sm:$0xf]  ;;  %422 = vst [vmem:[#allocation6 + $0x2c4] sm:$0xf] %v421_v27  ;;  %424 = vst [vmem:[#allocation6 + $0x2c8] sm:$0xf] %v423_v28 }
  0x63   :  { %426 = vst [vmem:[#allocation6 + $0x2cc] sm:$0xf] %v425_v29  ;;  %v427_v30 = vld [vmem:[%s18051_s9 + $0x2c8] sm:$0xf]  ;;  %v429_v31 = vld [vmem:[%s18051_s9 + $0x2d8] sm:$0xf] }
  0x64   :  { %v431_v32 = vld [vmem:[%s18051_s9 + $0x2cc] sm:$0xf]  ;;  %428 = vst [vmem:[#allocation6 + $0x2d0] sm:$0xf] %v427_v30  ;;  %430 = vst [vmem:[#allocation6 + $0x2d4] sm:$0xf] %v429_v31 }
  0x65   :  { %432 = vst [vmem:[#allocation6 + $0x2d8] sm:$0xf] %v431_v32  ;;  %v437_v34 = vld [vmem:[%s18051_s9 + $0x2f0] sm:$0xf]  ;;  %v439_v35 = vld [vmem:[%s18051_s9 + $0x2e4] sm:$0xf] }
  0x66   :  { %434 = vst [vmem:[#allocation6 + $0x2dc] sm:$0xff] %v433_v33   ;;  %438 = vst [vmem:[#allocation6 + $0x2e4] sm:$0xf] %v437_v34  ;;  %v441_v36 = vld [vmem:[%s18051_s9 + $0x2f4] sm:$0xf]  ;;  %v449_v40 = vld [vmem:[%s18051_s9 + $0x2fc] sm:$0xff]  }
  0x67   :  { %440 = vst [vmem:[#allocation6 + $0x2e8] sm:$0xf] %v439_v35  ;;  %v443_v37 = vld [vmem:[%s18051_s9 + $0x2e8] sm:$0xf]  ;;  %v445_v38 = vld [vmem:[%s18051_s9 + $0x2f8] sm:$0xf] }
  0x68   :  { %442 = vst [vmem:[#allocation6 + $0x2ec] sm:$0xf] %v441_v36  ;;  %444 = vst [vmem:[#allocation6 + $0x2f0] sm:$0xf] %v443_v37  ;;  %v447_v39 = vld [vmem:[%s18051_s9 + $0x2ec] sm:$0xf] }
  0x69   :  { %446 = vst [vmem:[#allocation6 + $0x2f4] sm:$0xf] %v445_v38  ;;  %v453_v41 = vld [vmem:[%s18051_s9 + $0x310] sm:$0xf]  ;;  %448 = vst [vmem:[#allocation6 + $0x2f8] sm:$0xf] %v447_v39 }
  0x6a   :  { %450 = vst [vmem:[#allocation6 + $0x2fc] sm:$0xff] %v449_v40   ;;  %454 = vst [vmem:[#allocation6 + $0x304] sm:$0xf] %v453_v41  ;;  %v455_v42 = vld [vmem:[%s18051_s9 + $0x304] sm:$0xf]  ;;  %v465_v47 = vld [vmem:[%s18051_s9 + $0x31c] sm:$0xff]  }
  0x6b   :  { %v457_v43 = vld [vmem:[%s18051_s9 + $0x314] sm:$0xf]  ;;  %v459_v44 = vld [vmem:[%s18051_s9 + $0x308] sm:$0xf]  ;;  %456 = vst [vmem:[#allocation6 + $0x308] sm:$0xf] %v455_v42 }
  0x6c   :  { %458 = vst [vmem:[#allocation6 + $0x30c] sm:$0xf] %v457_v43  ;;  %460 = vst [vmem:[#allocation6 + $0x310] sm:$0xf] %v459_v44  ;;  %v461_v45 = vld [vmem:[%s18051_s9 + $0x318] sm:$0xf] }
  0x6d   :  { %v463_v46 = vld [vmem:[%s18051_s9 + $0x30c] sm:$0xf]  ;;  %462 = vst [vmem:[#allocation6 + $0x314] sm:$0xf] %v461_v45  ;;  %466 = vst [vmem:[#allocation6 + $0x31c] sm:$0xff] %v465_v47   ;;  %v481_v54 = vld [vmem:[%s18051_s9 + $0x33c] sm:$0xff]  }
  0x6e   :  { %464 = vst [vmem:[#allocation6 + $0x318] sm:$0xf] %v463_v46  ;;  %v469_v48 = vld [vmem:[%s18051_s9 + $0x330] sm:$0xf]  ;;  %v471_v49 = vld [vmem:[%s18051_s9 + $0x324] sm:$0xf] }
  0x6f   :  { %v473_v50 = vld [vmem:[%s18051_s9 + $0x334] sm:$0xf]  ;;  %470 = vst [vmem:[#allocation6 + $0x324] sm:$0xf] %v469_v48  ;;  %472 = vst [vmem:[#allocation6 + $0x328] sm:$0xf] %v471_v49 }
  0x70   :  { %474 = vst [vmem:[#allocation6 + $0x32c] sm:$0xf] %v473_v50  ;;  %v475_v51 = vld [vmem:[%s18051_s9 + $0x328] sm:$0xf]  ;;  %v477_v52 = vld [vmem:[%s18051_s9 + $0x338] sm:$0xf] }
  0x71   :  { %v479_v53 = vld [vmem:[%s18051_s9 + $0x32c] sm:$0xf]  ;;  %476 = vst [vmem:[#allocation6 + $0x330] sm:$0xf] %v475_v51  ;;  %478 = vst [vmem:[#allocation6 + $0x334] sm:$0xf] %v477_v52 }
  0x72   :  { %480 = vst [vmem:[#allocation6 + $0x338] sm:$0xf] %v479_v53  ;;  %v485_v55 = vld [vmem:[%s18051_s9 + $0x350] sm:$0xf]  ;;  %v487_v56 = vld [vmem:[%s18051_s9 + $0x344] sm:$0xf] }
  0x73   :  { %482 = vst [vmem:[#allocation6 + $0x33c] sm:$0xff] %v481_v54   ;;  %486 = vst [vmem:[#allocation6 + $0x344] sm:$0xf] %v485_v55  ;;  %v489_v57 = vld [vmem:[%s18051_s9 + $0x354] sm:$0xf]  ;;  %v497_v61 = vld [vmem:[%s18051_s9 + $0x35c] sm:$0xff]  }
  0x74   :  { %488 = vst [vmem:[#allocation6 + $0x348] sm:$0xf] %v487_v56  ;;  %v491_v58 = vld [vmem:[%s18051_s9 + $0x348] sm:$0xf]  ;;  %v493_v59 = vld [vmem:[%s18051_s9 + $0x358] sm:$0xf] }
  0x75   :  { %490 = vst [vmem:[#allocation6 + $0x34c] sm:$0xf] %v489_v57  ;;  %492 = vst [vmem:[#allocation6 + $0x350] sm:$0xf] %v491_v58  ;;  %v495_v60 = vld [vmem:[%s18051_s9 + $0x34c] sm:$0xf] }
  0x76   :  { %494 = vst [vmem:[#allocation6 + $0x354] sm:$0xf] %v493_v59  ;;  %v501_v62 = vld [vmem:[%s18051_s9 + $0x370] sm:$0xf]  ;;  %496 = vst [vmem:[#allocation6 + $0x358] sm:$0xf] %v495_v60 }
  0x77   :  { %498 = vst [vmem:[#allocation6 + $0x35c] sm:$0xff] %v497_v61   ;;  %502 = vst [vmem:[#allocation6 + $0x364] sm:$0xf] %v501_v62  ;;  %v503_v63 = vld [vmem:[%s18051_s9 + $0x364] sm:$0xf]  ;;  %v513_v4 = vld [vmem:[%s18051_s9 + $0x37c] sm:$0xff]  }
  0x78   :  { %v505_v0 = vld [vmem:[%s18051_s9 + $0x374] sm:$0xf]  ;;  %v507_v1 = vld [vmem:[%s18051_s9 + $0x368] sm:$0xf]  ;;  %504 = vst [vmem:[#allocation6 + $0x368] sm:$0xf] %v503_v63 }
  0x79   :  { %506 = vst [vmem:[#allocation6 + $0x36c] sm:$0xf] %v505_v0  ;;  %508 = vst [vmem:[#allocation6 + $0x370] sm:$0xf] %v507_v1  ;;  %v509_v2 = vld [vmem:[%s18051_s9 + $0x378] sm:$0xf] }
  0x7a   :  { %v511_v3 = vld [vmem:[%s18051_s9 + $0x36c] sm:$0xf]  ;;  %510 = vst [vmem:[#allocation6 + $0x374] sm:$0xf] %v509_v2  ;;  %514 = vst [vmem:[#allocation6 + $0x37c] sm:$0xff] %v513_v4   ;;  %v529_v11 = vld [vmem:[%s18051_s9 + $0x39c] sm:$0xff]  }
  0x7b   :  { %512 = vst [vmem:[#allocation6 + $0x378] sm:$0xf] %v511_v3  ;;  %v517_v5 = vld [vmem:[%s18051_s9 + $0x390] sm:$0xf]  ;;  %v519_v6 = vld [vmem:[%s18051_s9 + $0x384] sm:$0xf] }
  0x7c   :  { %v521_v7 = vld [vmem:[%s18051_s9 + $0x394] sm:$0xf]  ;;  %518 = vst [vmem:[#allocation6 + $0x384] sm:$0xf] %v517_v5  ;;  %520 = vst [vmem:[#allocation6 + $0x388] sm:$0xf] %v519_v6 }
  0x7d   :  { %522 = vst [vmem:[#allocation6 + $0x38c] sm:$0xf] %v521_v7  ;;  %v523_v8 = vld [vmem:[%s18051_s9 + $0x388] sm:$0xf]  ;;  %v525_v9 = vld [vmem:[%s18051_s9 + $0x398] sm:$0xf] }
  0x7e   :  { %v527_v10 = vld [vmem:[%s18051_s9 + $0x38c] sm:$0xf]  ;;  %524 = vst [vmem:[#allocation6 + $0x390] sm:$0xf] %v523_v8  ;;  %526 = vst [vmem:[#allocation6 + $0x394] sm:$0xf] %v525_v9 }
  0x7f   :  { %528 = vst [vmem:[#allocation6 + $0x398] sm:$0xf] %v527_v10  ;;  %v533_v12 = vld [vmem:[%s18051_s9 + $0x3b0] sm:$0xf]  ;;  %v535_v13 = vld [vmem:[%s18051_s9 + $0x3a4] sm:$0xf] }
  0x80   :  { %530 = vst [vmem:[#allocation6 + $0x39c] sm:$0xff] %v529_v11   ;;  %534 = vst [vmem:[#allocation6 + $0x3a4] sm:$0xf] %v533_v12  ;;  %v537_v14 = vld [vmem:[%s18051_s9 + $0x3b4] sm:$0xf]  ;;  %v545_v18 = vld [vmem:[%s18051_s9 + $0x3bc] sm:$0xff]  }
  0x81   :  { %536 = vst [vmem:[#allocation6 + $0x3a8] sm:$0xf] %v535_v13  ;;  %v539_v15 = vld [vmem:[%s18051_s9 + $0x3a8] sm:$0xf]  ;;  %v541_v16 = vld [vmem:[%s18051_s9 + $0x3b8] sm:$0xf] }
  0x82   :  { %538 = vst [vmem:[#allocation6 + $0x3ac] sm:$0xf] %v537_v14  ;;  %540 = vst [vmem:[#allocation6 + $0x3b0] sm:$0xf] %v539_v15  ;;  %v543_v17 = vld [vmem:[%s18051_s9 + $0x3ac] sm:$0xf] }
  0x83   :  { %542 = vst [vmem:[#allocation6 + $0x3b4] sm:$0xf] %v541_v16  ;;  %v549_v19 = vld [vmem:[%s18051_s9 + $0x3d0] sm:$0xf]  ;;  %544 = vst [vmem:[#allocation6 + $0x3b8] sm:$0xf] %v543_v17 }
  0x84   :  { %546 = vst [vmem:[#allocation6 + $0x3bc] sm:$0xff] %v545_v18   ;;  %550 = vst [vmem:[#allocation6 + $0x3c4] sm:$0xf] %v549_v19  ;;  %v551_v20 = vld [vmem:[%s18051_s9 + $0x3c4] sm:$0xf]  ;;  %v561_v25 = vld [vmem:[%s18051_s9 + $0x3dc] sm:$0xff]  }
  0x85   :  { %v553_v21 = vld [vmem:[%s18051_s9 + $0x3d4] sm:$0xf]  ;;  %v555_v22 = vld [vmem:[%s18051_s9 + $0x3c8] sm:$0xf]  ;;  %552 = vst [vmem:[#allocation6 + $0x3c8] sm:$0xf] %v551_v20 }
  0x86   :  { %554 = vst [vmem:[#allocation6 + $0x3cc] sm:$0xf] %v553_v21  ;;  %556 = vst [vmem:[#allocation6 + $0x3d0] sm:$0xf] %v555_v22  ;;  %v557_v23 = vld [vmem:[%s18051_s9 + $0x3d8] sm:$0xf] }
  0x87   :  { %v559_v24 = vld [vmem:[%s18051_s9 + $0x3cc] sm:$0xf]  ;;  %558 = vst [vmem:[#allocation6 + $0x3d4] sm:$0xf] %v557_v23  ;;  %562 = vst [vmem:[#allocation6 + $0x3dc] sm:$0xff] %v561_v25   ;;  %v577_v32 = vld [vmem:[%s18051_s9 + $0x3fc] sm:$0xff]  }
  0x88   :  { %560 = vst [vmem:[#allocation6 + $0x3d8] sm:$0xf] %v559_v24  ;;  %v565_v26 = vld [vmem:[%s18051_s9 + $0x3f0] sm:$0xf]  ;;  %v567_v27 = vld [vmem:[%s18051_s9 + $0x3e4] sm:$0xf] }
  0x89   :  { %v569_v28 = vld [vmem:[%s18051_s9 + $0x3f4] sm:$0xf]  ;;  %566 = vst [vmem:[#allocation6 + $0x3e4] sm:$0xf] %v565_v26  ;;  %568 = vst [vmem:[#allocation6 + $0x3e8] sm:$0xf] %v567_v27 }
  0x8a   :  { %570 = vst [vmem:[#allocation6 + $0x3ec] sm:$0xf] %v569_v28  ;;  %v571_v29 = vld [vmem:[%s18051_s9 + $0x3e8] sm:$0xf]  ;;  %v573_v30 = vld [vmem:[%s18051_s9 + $0x3f8] sm:$0xf] }
  0x8b   :  { %v575_v31 = vld [vmem:[%s18051_s9 + $0x3ec] sm:$0xf]  ;;  %572 = vst [vmem:[#allocation6 + $0x3f0] sm:$0xf] %v571_v29  ;;  %574 = vst [vmem:[#allocation6 + $0x3f4] sm:$0xf] %v573_v30 }
  0x8c   :  { %576 = vst [vmem:[#allocation6 + $0x3f8] sm:$0xf] %v575_v31  ;;  %v581_v33 = vld [vmem:[%s18051_s9 + $0x410] sm:$0xf]  ;;  %v583_v34 = vld [vmem:[%s18051_s9 + $0x404] sm:$0xf] }
  0x8d   :  { %578 = vst [vmem:[#allocation6 + $0x3fc] sm:$0xff] %v577_v32   ;;  %582 = vst [vmem:[#allocation6 + $0x404] sm:$0xf] %v581_v33  ;;  %v585_v35 = vld [vmem:[%s18051_s9 + $0x414] sm:$0xf]  ;;  %v593_v39 = vld [vmem:[%s18051_s9 + $0x41c] sm:$0xff]  }
  0x8e   :  { %584 = vst [vmem:[#allocation6 + $0x408] sm:$0xf] %v583_v34  ;;  %v587_v36 = vld [vmem:[%s18051_s9 + $0x408] sm:$0xf]  ;;  %v589_v37 = vld [vmem:[%s18051_s9 + $0x418] sm:$0xf] }
  0x8f   :  { %586 = vst [vmem:[#allocation6 + $0x40c] sm:$0xf] %v585_v35  ;;  %588 = vst [vmem:[#allocation6 + $0x410] sm:$0xf] %v587_v36  ;;  %v591_v38 = vld [vmem:[%s18051_s9 + $0x40c] sm:$0xf] }
  0x90   :  { %590 = vst [vmem:[#allocation6 + $0x414] sm:$0xf] %v589_v37  ;;  %v597_v40 = vld [vmem:[%s18051_s9 + $0x430] sm:$0xf]  ;;  %592 = vst [vmem:[#allocation6 + $0x418] sm:$0xf] %v591_v38 }
  0x91   :  { %594 = vst [vmem:[#allocation6 + $0x41c] sm:$0xff] %v593_v39   ;;  %598 = vst [vmem:[#allocation6 + $0x424] sm:$0xf] %v597_v40  ;;  %v599_v41 = vld [vmem:[%s18051_s9 + $0x424] sm:$0xf]  ;;  %v609_v46 = vld [vmem:[%s18051_s9 + $0x43c] sm:$0xff]  }
  0x92   :  { %v601_v42 = vld [vmem:[%s18051_s9 + $0x434] sm:$0xf]  ;;  %v603_v43 = vld [vmem:[%s18051_s9 + $0x428] sm:$0xf]  ;;  %600 = vst [vmem:[#allocation6 + $0x428] sm:$0xf] %v599_v41 }
  0x93   :  { %602 = vst [vmem:[#allocation6 + $0x42c] sm:$0xf] %v601_v42  ;;  %604 = vst [vmem:[#allocation6 + $0x430] sm:$0xf] %v603_v43  ;;  %v605_v44 = vld [vmem:[%s18051_s9 + $0x438] sm:$0xf] }
  0x94   :  { %v607_v45 = vld [vmem:[%s18051_s9 + $0x42c] sm:$0xf]  ;;  %606 = vst [vmem:[#allocation6 + $0x434] sm:$0xf] %v605_v44  ;;  %610 = vst [vmem:[#allocation6 + $0x43c] sm:$0xff] %v609_v46   ;;  %v625_v53 = vld [vmem:[%s18051_s9 + $0x45c] sm:$0xff]  }
  0x95   :  { %608 = vst [vmem:[#allocation6 + $0x438] sm:$0xf] %v607_v45  ;;  %v613_v47 = vld [vmem:[%s18051_s9 + $0x450] sm:$0xf]  ;;  %v615_v48 = vld [vmem:[%s18051_s9 + $0x444] sm:$0xf] }
  0x96   :  { %v617_v49 = vld [vmem:[%s18051_s9 + $0x454] sm:$0xf]  ;;  %614 = vst [vmem:[#allocation6 + $0x444] sm:$0xf] %v613_v47  ;;  %616 = vst [vmem:[#allocation6 + $0x448] sm:$0xf] %v615_v48 }
  0x97   :  { %618 = vst [vmem:[#allocation6 + $0x44c] sm:$0xf] %v617_v49  ;;  %v619_v50 = vld [vmem:[%s18051_s9 + $0x448] sm:$0xf]  ;;  %v621_v51 = vld [vmem:[%s18051_s9 + $0x458] sm:$0xf] }
  0x98   :  { %v623_v52 = vld [vmem:[%s18051_s9 + $0x44c] sm:$0xf]  ;;  %620 = vst [vmem:[#allocation6 + $0x450] sm:$0xf] %v619_v50  ;;  %622 = vst [vmem:[#allocation6 + $0x454] sm:$0xf] %v621_v51 }
  0x99   :  { %624 = vst [vmem:[#allocation6 + $0x458] sm:$0xf] %v623_v52  ;;  %v629_v54 = vld [vmem:[%s18051_s9 + $0x470] sm:$0xf]  ;;  %v631_v55 = vld [vmem:[%s18051_s9 + $0x464] sm:$0xf] }
  0x9a   :  { %626 = vst [vmem:[#allocation6 + $0x45c] sm:$0xff] %v625_v53   ;;  %630 = vst [vmem:[#allocation6 + $0x464] sm:$0xf] %v629_v54  ;;  %v633_v56 = vld [vmem:[%s18051_s9 + $0x474] sm:$0xf]  ;;  %v641_v60 = vld [vmem:[%s18051_s9 + $0x47c] sm:$0xff]  }
  0x9b   :  { %632 = vst [vmem:[#allocation6 + $0x468] sm:$0xf] %v631_v55  ;;  %v635_v57 = vld [vmem:[%s18051_s9 + $0x468] sm:$0xf]  ;;  %v637_v58 = vld [vmem:[%s18051_s9 + $0x478] sm:$0xf] }
  0x9c   :  { %634 = vst [vmem:[#allocation6 + $0x46c] sm:$0xf] %v633_v56  ;;  %636 = vst [vmem:[#allocation6 + $0x470] sm:$0xf] %v635_v57  ;;  %v639_v59 = vld [vmem:[%s18051_s9 + $0x46c] sm:$0xf] }
  0x9d   :  { %638 = vst [vmem:[#allocation6 + $0x474] sm:$0xf] %v637_v58  ;;  %v645_v61 = vld [vmem:[%s18051_s9 + $0x490] sm:$0xf]  ;;  %640 = vst [vmem:[#allocation6 + $0x478] sm:$0xf] %v639_v59 }
  0x9e   :  { %642 = vst [vmem:[#allocation6 + $0x47c] sm:$0xff] %v641_v60   ;;  %646 = vst [vmem:[#allocation6 + $0x484] sm:$0xf] %v645_v61  ;;  %v647_v62 = vld [vmem:[%s18051_s9 + $0x484] sm:$0xf]  ;;  %v657_v3 = vld [vmem:[%s18051_s9 + $0x49c] sm:$0xff]  }
  0x9f   :  { %v649_v63 = vld [vmem:[%s18051_s9 + $0x494] sm:$0xf]  ;;  %v651_v0 = vld [vmem:[%s18051_s9 + $0x488] sm:$0xf]  ;;  %648 = vst [vmem:[#allocation6 + $0x488] sm:$0xf] %v647_v62 }
  0xa0   :  { %650 = vst [vmem:[#allocation6 + $0x48c] sm:$0xf] %v649_v63  ;;  %652 = vst [vmem:[#allocation6 + $0x490] sm:$0xf] %v651_v0  ;;  %v653_v1 = vld [vmem:[%s18051_s9 + $0x498] sm:$0xf] }
  0xa1   :  { %v655_v2 = vld [vmem:[%s18051_s9 + $0x48c] sm:$0xf]  ;;  %654 = vst [vmem:[#allocation6 + $0x494] sm:$0xf] %v653_v1  ;;  %658 = vst [vmem:[#allocation6 + $0x49c] sm:$0xff] %v657_v3   ;;  %v673_v10 = vld [vmem:[%s18051_s9 + $0x4bc] sm:$0xff]  }
  0xa2   :  { %656 = vst [vmem:[#allocation6 + $0x498] sm:$0xf] %v655_v2  ;;  %v661_v4 = vld [vmem:[%s18051_s9 + $0x4b0] sm:$0xf]  ;;  %v663_v5 = vld [vmem:[%s18051_s9 + $0x4a4] sm:$0xf] }
  0xa3   :  { %v665_v6 = vld [vmem:[%s18051_s9 + $0x4b4] sm:$0xf]  ;;  %662 = vst [vmem:[#allocation6 + $0x4a4] sm:$0xf] %v661_v4  ;;  %664 = vst [vmem:[#allocation6 + $0x4a8] sm:$0xf] %v663_v5 }
  0xa4   :  { %666 = vst [vmem:[#allocation6 + $0x4ac] sm:$0xf] %v665_v6  ;;  %v667_v7 = vld [vmem:[%s18051_s9 + $0x4a8] sm:$0xf]  ;;  %v669_v8 = vld [vmem:[%s18051_s9 + $0x4b8] sm:$0xf] }
  0xa5   :  { %v671_v9 = vld [vmem:[%s18051_s9 + $0x4ac] sm:$0xf]  ;;  %668 = vst [vmem:[#allocation6 + $0x4b0] sm:$0xf] %v667_v7  ;;  %670 = vst [vmem:[#allocation6 + $0x4b4] sm:$0xf] %v669_v8 }
  0xa6   :  { %672 = vst [vmem:[#allocation6 + $0x4b8] sm:$0xf] %v671_v9  ;;  %v677_v11 = vld [vmem:[%s18051_s9 + $0x4d0] sm:$0xf]  ;;  %v679_v12 = vld [vmem:[%s18051_s9 + $0x4c4] sm:$0xf] }
  0xa7   :  { %674 = vst [vmem:[#allocation6 + $0x4bc] sm:$0xff] %v673_v10   ;;  %678 = vst [vmem:[#allocation6 + $0x4c4] sm:$0xf] %v677_v11  ;;  %v681_v13 = vld [vmem:[%s18051_s9 + $0x4d4] sm:$0xf]  ;;  %v689_v17 = vld [vmem:[%s18051_s9 + $0x4dc] sm:$0xff]  }
  0xa8   :  { %680 = vst [vmem:[#allocation6 + $0x4c8] sm:$0xf] %v679_v12  ;;  %v683_v14 = vld [vmem:[%s18051_s9 + $0x4c8] sm:$0xf]  ;;  %v685_v15 = vld [vmem:[%s18051_s9 + $0x4d8] sm:$0xf] }
  0xa9   :  { %682 = vst [vmem:[#allocation6 + $0x4cc] sm:$0xf] %v681_v13  ;;  %684 = vst [vmem:[#allocation6 + $0x4d0] sm:$0xf] %v683_v14  ;;  %v687_v16 = vld [vmem:[%s18051_s9 + $0x4cc] sm:$0xf] }
  0xaa   :  { %686 = vst [vmem:[#allocation6 + $0x4d4] sm:$0xf] %v685_v15  ;;  %v693_v18 = vld [vmem:[%s18051_s9 + $0x4f0] sm:$0xf]  ;;  %688 = vst [vmem:[#allocation6 + $0x4d8] sm:$0xf] %v687_v16 }
  0xab   :  { %690 = vst [vmem:[#allocation6 + $0x4dc] sm:$0xff] %v689_v17   ;;  %694 = vst [vmem:[#allocation6 + $0x4e4] sm:$0xf] %v693_v18  ;;  %v695_v19 = vld [vmem:[%s18051_s9 + $0x4e4] sm:$0xf]  ;;  %v705_v24 = vld [vmem:[%s18051_s9 + $0x4fc] sm:$0xff]  }
  0xac   :  { %v697_v20 = vld [vmem:[%s18051_s9 + $0x4f4] sm:$0xf]  ;;  %v699_v21 = vld [vmem:[%s18051_s9 + $0x4e8] sm:$0xf]  ;;  %696 = vst [vmem:[#allocation6 + $0x4e8] sm:$0xf] %v695_v19 }
  0xad   :  { %698 = vst [vmem:[#allocation6 + $0x4ec] sm:$0xf] %v697_v20  ;;  %700 = vst [vmem:[#allocation6 + $0x4f0] sm:$0xf] %v699_v21  ;;  %v701_v22 = vld [vmem:[%s18051_s9 + $0x4f8] sm:$0xf] }
  0xae   :  { %v703_v23 = vld [vmem:[%s18051_s9 + $0x4ec] sm:$0xf]  ;;  %702 = vst [vmem:[#allocation6 + $0x4f4] sm:$0xf] %v701_v22  ;;  %706 = vst [vmem:[#allocation6 + $0x4fc] sm:$0xff] %v705_v24   ;;  %v721_v31 = vld [vmem:[%s18051_s9 + $0x51c] sm:$0xff]  }
  0xaf   :  { %704 = vst [vmem:[#allocation6 + $0x4f8] sm:$0xf] %v703_v23  ;;  %v709_v25 = vld [vmem:[%s18051_s9 + $0x510] sm:$0xf]  ;;  %v711_v26 = vld [vmem:[%s18051_s9 + $0x504] sm:$0xf] }
  0xb0   :  { %v713_v27 = vld [vmem:[%s18051_s9 + $0x514] sm:$0xf]  ;;  %710 = vst [vmem:[#allocation6 + $0x504] sm:$0xf] %v709_v25  ;;  %712 = vst [vmem:[#allocation6 + $0x508] sm:$0xf] %v711_v26 }
  0xb1   :  { %714 = vst [vmem:[#allocation6 + $0x50c] sm:$0xf] %v713_v27  ;;  %v715_v28 = vld [vmem:[%s18051_s9 + $0x508] sm:$0xf]  ;;  %v717_v29 = vld [vmem:[%s18051_s9 + $0x518] sm:$0xf] }
  0xb2   :  { %v719_v30 = vld [vmem:[%s18051_s9 + $0x50c] sm:$0xf]  ;;  %716 = vst [vmem:[#allocation6 + $0x510] sm:$0xf] %v715_v28  ;;  %718 = vst [vmem:[#allocation6 + $0x514] sm:$0xf] %v717_v29 }
  0xb3   :  { %720 = vst [vmem:[#allocation6 + $0x518] sm:$0xf] %v719_v30  ;;  %v725_v32 = vld [vmem:[%s18051_s9 + $0x530] sm:$0xf]  ;;  %v727_v33 = vld [vmem:[%s18051_s9 + $0x524] sm:$0xf] }
  0xb4   :  { %722 = vst [vmem:[#allocation6 + $0x51c] sm:$0xff] %v721_v31   ;;  %726 = vst [vmem:[#allocation6 + $0x524] sm:$0xf] %v725_v32  ;;  %v729_v34 = vld [vmem:[%s18051_s9 + $0x534] sm:$0xf]  ;;  %v737_v38 = vld [vmem:[%s18051_s9 + $0x53c] sm:$0xff]  }
  0xb5   :  { %728 = vst [vmem:[#allocation6 + $0x528] sm:$0xf] %v727_v33  ;;  %v731_v35 = vld [vmem:[%s18051_s9 + $0x528] sm:$0xf]  ;;  %v733_v36 = vld [vmem:[%s18051_s9 + $0x538] sm:$0xf] }
  0xb6   :  { %730 = vst [vmem:[#allocation6 + $0x52c] sm:$0xf] %v729_v34  ;;  %732 = vst [vmem:[#allocation6 + $0x530] sm:$0xf] %v731_v35  ;;  %v735_v37 = vld [vmem:[%s18051_s9 + $0x52c] sm:$0xf] }
  0xb7   :  { %734 = vst [vmem:[#allocation6 + $0x534] sm:$0xf] %v733_v36  ;;  %v741_v39 = vld [vmem:[%s18051_s9 + $0x550] sm:$0xf]  ;;  %736 = vst [vmem:[#allocation6 + $0x538] sm:$0xf] %v735_v37 }
  0xb8   :  { %738 = vst [vmem:[#allocation6 + $0x53c] sm:$0xff] %v737_v38   ;;  %742 = vst [vmem:[#allocation6 + $0x544] sm:$0xf] %v741_v39  ;;  %v743_v40 = vld [vmem:[%s18051_s9 + $0x544] sm:$0xf]  ;;  %v753_v45 = vld [vmem:[%s18051_s9 + $0x55c] sm:$0xff]  }
  0xb9   :  { %v745_v41 = vld [vmem:[%s18051_s9 + $0x554] sm:$0xf]  ;;  %v747_v42 = vld [vmem:[%s18051_s9 + $0x548] sm:$0xf]  ;;  %744 = vst [vmem:[#allocation6 + $0x548] sm:$0xf] %v743_v40 }
  0xba   :  { %746 = vst [vmem:[#allocation6 + $0x54c] sm:$0xf] %v745_v41  ;;  %748 = vst [vmem:[#allocation6 + $0x550] sm:$0xf] %v747_v42  ;;  %v749_v43 = vld [vmem:[%s18051_s9 + $0x558] sm:$0xf] }
  0xbb   :  { %v751_v44 = vld [vmem:[%s18051_s9 + $0x54c] sm:$0xf]  ;;  %750 = vst [vmem:[#allocation6 + $0x554] sm:$0xf] %v749_v43  ;;  %754 = vst [vmem:[#allocation6 + $0x55c] sm:$0xff] %v753_v45   ;;  %v769_v52 = vld [vmem:[%s18051_s9 + $0x57c] sm:$0xff]  }
  0xbc   :  { %752 = vst [vmem:[#allocation6 + $0x558] sm:$0xf] %v751_v44  ;;  %v757_v46 = vld [vmem:[%s18051_s9 + $0x570] sm:$0xf]  ;;  %v759_v47 = vld [vmem:[%s18051_s9 + $0x564] sm:$0xf] }
  0xbd   :  { %v761_v48 = vld [vmem:[%s18051_s9 + $0x574] sm:$0xf]  ;;  %758 = vst [vmem:[#allocation6 + $0x564] sm:$0xf] %v757_v46  ;;  %760 = vst [vmem:[#allocation6 + $0x568] sm:$0xf] %v759_v47 }
  0xbe   :  { %762 = vst [vmem:[#allocation6 + $0x56c] sm:$0xf] %v761_v48  ;;  %v763_v49 = vld [vmem:[%s18051_s9 + $0x568] sm:$0xf]  ;;  %v765_v50 = vld [vmem:[%s18051_s9 + $0x578] sm:$0xf] }
  0xbf   :  { %v767_v51 = vld [vmem:[%s18051_s9 + $0x56c] sm:$0xf]  ;;  %764 = vst [vmem:[#allocation6 + $0x570] sm:$0xf] %v763_v49  ;;  %766 = vst [vmem:[#allocation6 + $0x574] sm:$0xf] %v765_v50 }
  0xc0   :  { %768 = vst [vmem:[#allocation6 + $0x578] sm:$0xf] %v767_v51  ;;  %v773_v53 = vld [vmem:[%s18051_s9 + $0x590] sm:$0xf]  ;;  %v775_v54 = vld [vmem:[%s18051_s9 + $0x584] sm:$0xf] }
  0xc1   :  { %770 = vst [vmem:[#allocation6 + $0x57c] sm:$0xff] %v769_v52   ;;  %774 = vst [vmem:[#allocation6 + $0x584] sm:$0xf] %v773_v53  ;;  %v777_v55 = vld [vmem:[%s18051_s9 + $0x594] sm:$0xf]  ;;  %v785_v59 = vld [vmem:[%s18051_s9 + $0x59c] sm:$0xff]  }
  0xc2   :  { %776 = vst [vmem:[#allocation6 + $0x588] sm:$0xf] %v775_v54  ;;  %v779_v56 = vld [vmem:[%s18051_s9 + $0x588] sm:$0xf]  ;;  %v781_v57 = vld [vmem:[%s18051_s9 + $0x598] sm:$0xf] }
  0xc3   :  { %778 = vst [vmem:[#allocation6 + $0x58c] sm:$0xf] %v777_v55  ;;  %780 = vst [vmem:[#allocation6 + $0x590] sm:$0xf] %v779_v56  ;;  %v783_v58 = vld [vmem:[%s18051_s9 + $0x58c] sm:$0xf] }
  0xc4   :  { %782 = vst [vmem:[#allocation6 + $0x594] sm:$0xf] %v781_v57  ;;  %v789_v60 = vld [vmem:[%s18051_s9 + $0x5b0] sm:$0xf]  ;;  %784 = vst [vmem:[#allocation6 + $0x598] sm:$0xf] %v783_v58 }
  0xc5   :  { %786 = vst [vmem:[#allocation6 + $0x59c] sm:$0xff] %v785_v59   ;;  %790 = vst [vmem:[#allocation6 + $0x5a4] sm:$0xf] %v789_v60  ;;  %v791_v61 = vld [vmem:[%s18051_s9 + $0x5a4] sm:$0xf]  ;;  %v801_v2 = vld [vmem:[%s18051_s9 + $0x5bc] sm:$0xff]  }
  0xc6   :  { %v793_v62 = vld [vmem:[%s18051_s9 + $0x5b4] sm:$0xf]  ;;  %v795_v63 = vld [vmem:[%s18051_s9 + $0x5a8] sm:$0xf]  ;;  %792 = vst [vmem:[#allocation6 + $0x5a8] sm:$0xf] %v791_v61 }
  0xc7   :  { %794 = vst [vmem:[#allocation6 + $0x5ac] sm:$0xf] %v793_v62  ;;  %796 = vst [vmem:[#allocation6 + $0x5b0] sm:$0xf] %v795_v63  ;;  %v797_v0 = vld [vmem:[%s18051_s9 + $0x5b8] sm:$0xf] }
  0xc8   :  { %v799_v1 = vld [vmem:[%s18051_s9 + $0x5ac] sm:$0xf]  ;;  %798 = vst [vmem:[#allocation6 + $0x5b4] sm:$0xf] %v797_v0  ;;  %802 = vst [vmem:[#allocation6 + $0x5bc] sm:$0xff] %v801_v2   ;;  %v817_v9 = vld [vmem:[%s18051_s9 + $0x5dc] sm:$0xff]  }
  0xc9   :  { %800 = vst [vmem:[#allocation6 + $0x5b8] sm:$0xf] %v799_v1  ;;  %v805_v3 = vld [vmem:[%s18051_s9 + $0x5d0] sm:$0xf]  ;;  %v807_v4 = vld [vmem:[%s18051_s9 + $0x5c4] sm:$0xf] }
  0xca   :  { %v809_v5 = vld [vmem:[%s18051_s9 + $0x5d4] sm:$0xf]  ;;  %806 = vst [vmem:[#allocation6 + $0x5c4] sm:$0xf] %v805_v3  ;;  %808 = vst [vmem:[#allocation6 + $0x5c8] sm:$0xf] %v807_v4 }
  0xcb   :  { %810 = vst [vmem:[#allocation6 + $0x5cc] sm:$0xf] %v809_v5  ;;  %v811_v6 = vld [vmem:[%s18051_s9 + $0x5c8] sm:$0xf]  ;;  %v813_v7 = vld [vmem:[%s18051_s9 + $0x5d8] sm:$0xf] }
  0xcc   :  { %v815_v8 = vld [vmem:[%s18051_s9 + $0x5cc] sm:$0xf]  ;;  %812 = vst [vmem:[#allocation6 + $0x5d0] sm:$0xf] %v811_v6  ;;  %814 = vst [vmem:[#allocation6 + $0x5d4] sm:$0xf] %v813_v7 }
  0xcd   :  { %816 = vst [vmem:[#allocation6 + $0x5d8] sm:$0xf] %v815_v8  ;;  %v821_v10 = vld [vmem:[%s18051_s9 + $0x5f0] sm:$0xf]  ;;  %v823_v11 = vld [vmem:[%s18051_s9 + $0x5e4] sm:$0xf] }
  0xce   :  { %818 = vst [vmem:[#allocation6 + $0x5dc] sm:$0xff] %v817_v9   ;;  %822 = vst [vmem:[#allocation6 + $0x5e4] sm:$0xf] %v821_v10  ;;  %v825_v12 = vld [vmem:[%s18051_s9 + $0x5f4] sm:$0xf]  ;;  %v833_v16 = vld [vmem:[%s18051_s9 + $0x5fc] sm:$0xff]  }
  0xcf   :  { %824 = vst [vmem:[#allocation6 + $0x5e8] sm:$0xf] %v823_v11  ;;  %v827_v13 = vld [vmem:[%s18051_s9 + $0x5e8] sm:$0xf]  ;;  %v829_v14 = vld [vmem:[%s18051_s9 + $0x5f8] sm:$0xf] }
  0xd0   :  { %826 = vst [vmem:[#allocation6 + $0x5ec] sm:$0xf] %v825_v12  ;;  %828 = vst [vmem:[#allocation6 + $0x5f0] sm:$0xf] %v827_v13  ;;  %v831_v15 = vld [vmem:[%s18051_s9 + $0x5ec] sm:$0xf] }
  0xd1   :  { %830 = vst [vmem:[#allocation6 + $0x5f4] sm:$0xf] %v829_v14  ;;  %v837_v17 = vld [vmem:[%s18051_s9 + $0x610] sm:$0xf]  ;;  %832 = vst [vmem:[#allocation6 + $0x5f8] sm:$0xf] %v831_v15 }
  0xd2   :  { %834 = vst [vmem:[#allocation6 + $0x5fc] sm:$0xff] %v833_v16   ;;  %838 = vst [vmem:[#allocation6 + $0x604] sm:$0xf] %v837_v17  ;;  %v839_v18 = vld [vmem:[%s18051_s9 + $0x604] sm:$0xf]  ;;  %v849_v23 = vld [vmem:[%s18051_s9 + $0x61c] sm:$0xff]  }
  0xd3   :  { %v841_v19 = vld [vmem:[%s18051_s9 + $0x614] sm:$0xf]  ;;  %v843_v20 = vld [vmem:[%s18051_s9 + $0x608] sm:$0xf]  ;;  %840 = vst [vmem:[#allocation6 + $0x608] sm:$0xf] %v839_v18 }
  0xd4   :  { %842 = vst [vmem:[#allocation6 + $0x60c] sm:$0xf] %v841_v19  ;;  %844 = vst [vmem:[#allocation6 + $0x610] sm:$0xf] %v843_v20  ;;  %v845_v21 = vld [vmem:[%s18051_s9 + $0x618] sm:$0xf] }
  0xd5   :  { %v847_v22 = vld [vmem:[%s18051_s9 + $0x60c] sm:$0xf]  ;;  %846 = vst [vmem:[#allocation6 + $0x614] sm:$0xf] %v845_v21  ;;  %850 = vst [vmem:[#allocation6 + $0x61c] sm:$0xff] %v849_v23   ;;  %v865_v30 = vld [vmem:[%s18051_s9 + $0x63c] sm:$0xff]  }
  0xd6   :  { %848 = vst [vmem:[#allocation6 + $0x618] sm:$0xf] %v847_v22  ;;  %v853_v24 = vld [vmem:[%s18051_s9 + $0x630] sm:$0xf]  ;;  %v855_v25 = vld [vmem:[%s18051_s9 + $0x624] sm:$0xf] }
  0xd7   :  { %v857_v26 = vld [vmem:[%s18051_s9 + $0x634] sm:$0xf]  ;;  %854 = vst [vmem:[#allocation6 + $0x624] sm:$0xf] %v853_v24  ;;  %856 = vst [vmem:[#allocation6 + $0x628] sm:$0xf] %v855_v25 }
  0xd8   :  { %858 = vst [vmem:[#allocation6 + $0x62c] sm:$0xf] %v857_v26  ;;  %v859_v27 = vld [vmem:[%s18051_s9 + $0x628] sm:$0xf]  ;;  %v861_v28 = vld [vmem:[%s18051_s9 + $0x638] sm:$0xf] }
  0xd9   :  { %v863_v29 = vld [vmem:[%s18051_s9 + $0x62c] sm:$0xf]  ;;  %860 = vst [vmem:[#allocation6 + $0x630] sm:$0xf] %v859_v27  ;;  %862 = vst [vmem:[#allocation6 + $0x634] sm:$0xf] %v861_v28 }
  0xda   :  { %864 = vst [vmem:[#allocation6 + $0x638] sm:$0xf] %v863_v29  ;;  %v869_v31 = vld [vmem:[%s18051_s9 + $0x650] sm:$0xf]  ;;  %v871_v32 = vld [vmem:[%s18051_s9 + $0x644] sm:$0xf] }
  0xdb   :  { %866 = vst [vmem:[#allocation6 + $0x63c] sm:$0xff] %v865_v30   ;;  %870 = vst [vmem:[#allocation6 + $0x644] sm:$0xf] %v869_v31  ;;  %v873_v33 = vld [vmem:[%s18051_s9 + $0x654] sm:$0xf]  ;;  %v881_v37 = vld [vmem:[%s18051_s9 + $0x65c] sm:$0xff]  }
  0xdc   :  { %872 = vst [vmem:[#allocation6 + $0x648] sm:$0xf] %v871_v32  ;;  %v875_v34 = vld [vmem:[%s18051_s9 + $0x648] sm:$0xf]  ;;  %v877_v35 = vld [vmem:[%s18051_s9 + $0x658] sm:$0xf] }
  0xdd   :  { %874 = vst [vmem:[#allocation6 + $0x64c] sm:$0xf] %v873_v33  ;;  %876 = vst [vmem:[#allocation6 + $0x650] sm:$0xf] %v875_v34  ;;  %v879_v36 = vld [vmem:[%s18051_s9 + $0x64c] sm:$0xf] }
  0xde   :  { %878 = vst [vmem:[#allocation6 + $0x654] sm:$0xf] %v877_v35  ;;  %v885_v38 = vld [vmem:[%s18051_s9 + $0x670] sm:$0xf]  ;;  %880 = vst [vmem:[#allocation6 + $0x658] sm:$0xf] %v879_v36 }
  0xdf   :  { %882 = vst [vmem:[#allocation6 + $0x65c] sm:$0xff] %v881_v37   ;;  %886 = vst [vmem:[#allocation6 + $0x664] sm:$0xf] %v885_v38  ;;  %v887_v39 = vld [vmem:[%s18051_s9 + $0x664] sm:$0xf]  ;;  %v897_v44 = vld [vmem:[%s18051_s9 + $0x67c] sm:$0xff]  }
  0xe0   :  { %v889_v40 = vld [vmem:[%s18051_s9 + $0x674] sm:$0xf]  ;;  %v891_v41 = vld [vmem:[%s18051_s9 + $0x668] sm:$0xf]  ;;  %888 = vst [vmem:[#allocation6 + $0x668] sm:$0xf] %v887_v39 }
  0xe1   :  { %890 = vst [vmem:[#allocation6 + $0x66c] sm:$0xf] %v889_v40  ;;  %892 = vst [vmem:[#allocation6 + $0x670] sm:$0xf] %v891_v41  ;;  %v893_v42 = vld [vmem:[%s18051_s9 + $0x678] sm:$0xf] }
  0xe2   :  { %v895_v43 = vld [vmem:[%s18051_s9 + $0x66c] sm:$0xf]  ;;  %894 = vst [vmem:[#allocation6 + $0x674] sm:$0xf] %v893_v42  ;;  %898 = vst [vmem:[#allocation6 + $0x67c] sm:$0xff] %v897_v44   ;;  %v913_v51 = vld [vmem:[%s18051_s9 + $0x69c] sm:$0xff]  }
  0xe3   :  { %896 = vst [vmem:[#allocation6 + $0x678] sm:$0xf] %v895_v43  ;;  %v901_v45 = vld [vmem:[%s18051_s9 + $0x690] sm:$0xf]  ;;  %v903_v46 = vld [vmem:[%s18051_s9 + $0x684] sm:$0xf] }
  0xe4   :  { %v905_v47 = vld [vmem:[%s18051_s9 + $0x694] sm:$0xf]  ;;  %902 = vst [vmem:[#allocation6 + $0x684] sm:$0xf] %v901_v45  ;;  %904 = vst [vmem:[#allocation6 + $0x688] sm:$0xf] %v903_v46 }
  0xe5   :  { %906 = vst [vmem:[#allocation6 + $0x68c] sm:$0xf] %v905_v47  ;;  %v907_v48 = vld [vmem:[%s18051_s9 + $0x688] sm:$0xf]  ;;  %v909_v49 = vld [vmem:[%s18051_s9 + $0x698] sm:$0xf] }
  0xe6   :  { %v911_v50 = vld [vmem:[%s18051_s9 + $0x68c] sm:$0xf]  ;;  %908 = vst [vmem:[#allocation6 + $0x690] sm:$0xf] %v907_v48  ;;  %910 = vst [vmem:[#allocation6 + $0x694] sm:$0xf] %v909_v49 }
  0xe7   :  { %912 = vst [vmem:[#allocation6 + $0x698] sm:$0xf] %v911_v50  ;;  %v917_v52 = vld [vmem:[%s18051_s9 + $0x6b0] sm:$0xf]  ;;  %v919_v53 = vld [vmem:[%s18051_s9 + $0x6a4] sm:$0xf] }
  0xe8   :  { %914 = vst [vmem:[#allocation6 + $0x69c] sm:$0xff] %v913_v51   ;;  %918 = vst [vmem:[#allocation6 + $0x6a4] sm:$0xf] %v917_v52  ;;  %v921_v54 = vld [vmem:[%s18051_s9 + $0x6b4] sm:$0xf]  ;;  %v929_v58 = vld [vmem:[%s18051_s9 + $0x6bc] sm:$0xff]  }
  0xe9   :  { %920 = vst [vmem:[#allocation6 + $0x6a8] sm:$0xf] %v919_v53  ;;  %v923_v55 = vld [vmem:[%s18051_s9 + $0x6a8] sm:$0xf]  ;;  %v925_v56 = vld [vmem:[%s18051_s9 + $0x6b8] sm:$0xf] }
  0xea   :  { %922 = vst [vmem:[#allocation6 + $0x6ac] sm:$0xf] %v921_v54  ;;  %924 = vst [vmem:[#allocation6 + $0x6b0] sm:$0xf] %v923_v55  ;;  %v927_v57 = vld [vmem:[%s18051_s9 + $0x6ac] sm:$0xf] }
  0xeb   :  { %926 = vst [vmem:[#allocation6 + $0x6b4] sm:$0xf] %v925_v56  ;;  %v933_v59 = vld [vmem:[%s18051_s9 + $0x6d0] sm:$0xf]  ;;  %928 = vst [vmem:[#allocation6 + $0x6b8] sm:$0xf] %v927_v57 }
  0xec   :  { %930 = vst [vmem:[#allocation6 + $0x6bc] sm:$0xff] %v929_v58   ;;  %934 = vst [vmem:[#allocation6 + $0x6c4] sm:$0xf] %v933_v59  ;;  %v935_v60 = vld [vmem:[%s18051_s9 + $0x6c4] sm:$0xf]  ;;  %v945_v1 = vld [vmem:[%s18051_s9 + $0x6dc] sm:$0xff]  }
  0xed   :  { %v937_v61 = vld [vmem:[%s18051_s9 + $0x6d4] sm:$0xf]  ;;  %v939_v62 = vld [vmem:[%s18051_s9 + $0x6c8] sm:$0xf]  ;;  %936 = vst [vmem:[#allocation6 + $0x6c8] sm:$0xf] %v935_v60 }
  0xee   :  { %938 = vst [vmem:[#allocation6 + $0x6cc] sm:$0xf] %v937_v61  ;;  %940 = vst [vmem:[#allocation6 + $0x6d0] sm:$0xf] %v939_v62  ;;  %v941_v63 = vld [vmem:[%s18051_s9 + $0x6d8] sm:$0xf] }
  0xef   :  { %v943_v0 = vld [vmem:[%s18051_s9 + $0x6cc] sm:$0xf]  ;;  %942 = vst [vmem:[#allocation6 + $0x6d4] sm:$0xf] %v941_v63  ;;  %946 = vst [vmem:[#allocation6 + $0x6dc] sm:$0xff] %v945_v1   ;;  %v961_v8 = vld [vmem:[%s18051_s9 + $0x6fc] sm:$0xff]  }
  0xf0   :  { %944 = vst [vmem:[#allocation6 + $0x6d8] sm:$0xf] %v943_v0  ;;  %v949_v2 = vld [vmem:[%s18051_s9 + $0x6f0] sm:$0xf]  ;;  %v951_v3 = vld [vmem:[%s18051_s9 + $0x6e4] sm:$0xf] }
  0xf1   :  { %v953_v4 = vld [vmem:[%s18051_s9 + $0x6f4] sm:$0xf]  ;;  %950 = vst [vmem:[#allocation6 + $0x6e4] sm:$0xf] %v949_v2  ;;  %952 = vst [vmem:[#allocation6 + $0x6e8] sm:$0xf] %v951_v3 }
  0xf2   :  { %954 = vst [vmem:[#allocation6 + $0x6ec] sm:$0xf] %v953_v4  ;;  %v955_v5 = vld [vmem:[%s18051_s9 + $0x6e8] sm:$0xf]  ;;  %v957_v6 = vld [vmem:[%s18051_s9 + $0x6f8] sm:$0xf] }
  0xf3   :  { %v959_v7 = vld [vmem:[%s18051_s9 + $0x6ec] sm:$0xf]  ;;  %956 = vst [vmem:[#allocation6 + $0x6f0] sm:$0xf] %v955_v5  ;;  %958 = vst [vmem:[#allocation6 + $0x6f4] sm:$0xf] %v957_v6 }
  0xf4   :  { %960 = vst [vmem:[#allocation6 + $0x6f8] sm:$0xf] %v959_v7  ;;  %v965_v9 = vld [vmem:[%s18051_s9 + $0x710] sm:$0xf]  ;;  %v967_v10 = vld [vmem:[%s18051_s9 + $0x704] sm:$0xf] }
  0xf5   :  { %962 = vst [vmem:[#allocation6 + $0x6fc] sm:$0xff] %v961_v8   ;;  %966 = vst [vmem:[#allocation6 + $0x704] sm:$0xf] %v965_v9  ;;  %v969_v11 = vld [vmem:[%s18051_s9 + $0x714] sm:$0xf]  ;;  %v977_v15 = vld [vmem:[%s18051_s9 + $0x71c] sm:$0xff]  }
  0xf6   :  { %968 = vst [vmem:[#allocation6 + $0x708] sm:$0xf] %v967_v10  ;;  %v971_v12 = vld [vmem:[%s18051_s9 + $0x708] sm:$0xf]  ;;  %v973_v13 = vld [vmem:[%s18051_s9 + $0x718] sm:$0xf] }
  0xf7   :  { %970 = vst [vmem:[#allocation6 + $0x70c] sm:$0xf] %v969_v11  ;;  %972 = vst [vmem:[#allocation6 + $0x710] sm:$0xf] %v971_v12  ;;  %v975_v14 = vld [vmem:[%s18051_s9 + $0x70c] sm:$0xf] }
  0xf8   :  { %974 = vst [vmem:[#allocation6 + $0x714] sm:$0xf] %v973_v13  ;;  %v981_v16 = vld [vmem:[%s18051_s9 + $0x730] sm:$0xf]  ;;  %976 = vst [vmem:[#allocation6 + $0x718] sm:$0xf] %v975_v14 }
  0xf9   :  { %978 = vst [vmem:[#allocation6 + $0x71c] sm:$0xff] %v977_v15   ;;  %982 = vst [vmem:[#allocation6 + $0x724] sm:$0xf] %v981_v16  ;;  %v983_v17 = vld [vmem:[%s18051_s9 + $0x724] sm:$0xf]  ;;  %v993_v22 = vld [vmem:[%s18051_s9 + $0x73c] sm:$0xff]  }
  0xfa   :  { %v985_v18 = vld [vmem:[%s18051_s9 + $0x734] sm:$0xf]  ;;  %v987_v19 = vld [vmem:[%s18051_s9 + $0x728] sm:$0xf]  ;;  %984 = vst [vmem:[#allocation6 + $0x728] sm:$0xf] %v983_v17 }
  0xfb   :  { %986 = vst [vmem:[#allocation6 + $0x72c] sm:$0xf] %v985_v18  ;;  %988 = vst [vmem:[#allocation6 + $0x730] sm:$0xf] %v987_v19  ;;  %v989_v20 = vld [vmem:[%s18051_s9 + $0x738] sm:$0xf] }
  0xfc   :  { %v991_v21 = vld [vmem:[%s18051_s9 + $0x72c] sm:$0xf]  ;;  %990 = vst [vmem:[#allocation6 + $0x734] sm:$0xf] %v989_v20  ;;  %994 = vst [vmem:[#allocation6 + $0x73c] sm:$0xff] %v993_v22   ;;  %v1009_v29 = vld [vmem:[%s18051_s9 + $0x75c] sm:$0xff]  }
  0xfd   :  { %992 = vst [vmem:[#allocation6 + $0x738] sm:$0xf] %v991_v21  ;;  %v997_v23 = vld [vmem:[%s18051_s9 + $0x750] sm:$0xf]  ;;  %v999_v24 = vld [vmem:[%s18051_s9 + $0x744] sm:$0xf] }
  0xfe   :  { %v1001_v25 = vld [vmem:[%s18051_s9 + $0x754] sm:$0xf]  ;;  %998 = vst [vmem:[#allocation6 + $0x744] sm:$0xf] %v997_v23  ;;  %1000 = vst [vmem:[#allocation6 + $0x748] sm:$0xf] %v999_v24 }
  0xff   :  { %1002 = vst [vmem:[#allocation6 + $0x74c] sm:$0xf] %v1001_v25  ;;  %v1003_v26 = vld [vmem:[%s18051_s9 + $0x748] sm:$0xf]  ;;  %v1005_v27 = vld [vmem:[%s18051_s9 + $0x758] sm:$0xf] }
 0x100   :  { %v1007_v28 = vld [vmem:[%s18051_s9 + $0x74c] sm:$0xf]  ;;  %1004 = vst [vmem:[#allocation6 + $0x750] sm:$0xf] %v1003_v26  ;;  %1006 = vst [vmem:[#allocation6 + $0x754] sm:$0xf] %v1005_v27 }
 0x101   :  { %1008 = vst [vmem:[#allocation6 + $0x758] sm:$0xf] %v1007_v28  ;;  %v1013_v30 = vld [vmem:[%s18051_s9 + $0x770] sm:$0xf]  ;;  %v1015_v31 = vld [vmem:[%s18051_s9 + $0x764] sm:$0xf] }
 0x102   :  { %1010 = vst [vmem:[#allocation6 + $0x75c] sm:$0xff] %v1009_v29   ;;  %1014 = vst [vmem:[#allocation6 + $0x764] sm:$0xf] %v1013_v30  ;;  %v1017_v32 = vld [vmem:[%s18051_s9 + $0x774] sm:$0xf]  ;;  %v1025_v36 = vld [vmem:[%s18051_s9 + $0x77c] sm:$0xff]  }
 0x103   :  { %1016 = vst [vmem:[#allocation6 + $0x768] sm:$0xf] %v1015_v31  ;;  %v1019_v33 = vld [vmem:[%s18051_s9 + $0x768] sm:$0xf]  ;;  %v1021_v34 = vld [vmem:[%s18051_s9 + $0x778] sm:$0xf] }
 0x104   :  { %1018 = vst [vmem:[#allocation6 + $0x76c] sm:$0xf] %v1017_v32  ;;  %1020 = vst [vmem:[#allocation6 + $0x770] sm:$0xf] %v1019_v33  ;;  %v1023_v35 = vld [vmem:[%s18051_s9 + $0x76c] sm:$0xf] }
 0x105   :  { %1022 = vst [vmem:[#allocation6 + $0x774] sm:$0xf] %v1021_v34  ;;  %v1029_v37 = vld [vmem:[%s18051_s9 + $0x790] sm:$0xf]  ;;  %1024 = vst [vmem:[#allocation6 + $0x778] sm:$0xf] %v1023_v35 }
 0x106   :  { %1026 = vst [vmem:[#allocation6 + $0x77c] sm:$0xff] %v1025_v36   ;;  %1030 = vst [vmem:[#allocation6 + $0x784] sm:$0xf] %v1029_v37  ;;  %v1031_v38 = vld [vmem:[%s18051_s9 + $0x784] sm:$0xf]  ;;  %v1041_v43 = vld [vmem:[%s18051_s9 + $0x79c] sm:$0xff]  }
 0x107   :  { %v1033_v39 = vld [vmem:[%s18051_s9 + $0x794] sm:$0xf]  ;;  %v1035_v40 = vld [vmem:[%s18051_s9 + $0x788] sm:$0xf]  ;;  %1032 = vst [vmem:[#allocation6 + $0x788] sm:$0xf] %v1031_v38 }
 0x108   :  { %1034 = vst [vmem:[#allocation6 + $0x78c] sm:$0xf] %v1033_v39  ;;  %1036 = vst [vmem:[#allocation6 + $0x790] sm:$0xf] %v1035_v40  ;;  %v1037_v41 = vld [vmem:[%s18051_s9 + $0x798] sm:$0xf] }
 0x109   :  { %v1039_v42 = vld [vmem:[%s18051_s9 + $0x78c] sm:$0xf]  ;;  %1038 = vst [vmem:[#allocation6 + $0x794] sm:$0xf] %v1037_v41  ;;  %1042 = vst [vmem:[#allocation6 + $0x79c] sm:$0xff] %v1041_v43   ;;  %v1057_v50 = vld [vmem:[%s18051_s9 + $0x7bc] sm:$0xff]  }
 0x10a   :  { %1040 = vst [vmem:[#allocation6 + $0x798] sm:$0xf] %v1039_v42  ;;  %v1045_v44 = vld [vmem:[%s18051_s9 + $0x7b0] sm:$0xf]  ;;  %v1047_v45 = vld [vmem:[%s18051_s9 + $0x7a4] sm:$0xf] }
 0x10b   :  { %v1049_v46 = vld [vmem:[%s18051_s9 + $0x7b4] sm:$0xf]  ;;  %1046 = vst [vmem:[#allocation6 + $0x7a4] sm:$0xf] %v1045_v44  ;;  %1048 = vst [vmem:[#allocation6 + $0x7a8] sm:$0xf] %v1047_v45 }
 0x10c   :  { %1050 = vst [vmem:[#allocation6 + $0x7ac] sm:$0xf] %v1049_v46  ;;  %v1051_v47 = vld [vmem:[%s18051_s9 + $0x7a8] sm:$0xf]  ;;  %v1053_v48 = vld [vmem:[%s18051_s9 + $0x7b8] sm:$0xf] }
 0x10d   :  { %v1055_v49 = vld [vmem:[%s18051_s9 + $0x7ac] sm:$0xf]  ;;  %1052 = vst [vmem:[#allocation6 + $0x7b0] sm:$0xf] %v1051_v47  ;;  %1054 = vst [vmem:[#allocation6 + $0x7b4] sm:$0xf] %v1053_v48 }
 0x10e   :  { %1056 = vst [vmem:[#allocation6 + $0x7b8] sm:$0xf] %v1055_v49  ;;  %v1061_v51 = vld [vmem:[%s18051_s9 + $0x7d0] sm:$0xf]  ;;  %v1063_v52 = vld [vmem:[%s18051_s9 + $0x7c4] sm:$0xf] }
 0x10f   :  { %1058 = vst [vmem:[#allocation6 + $0x7bc] sm:$0xff] %v1057_v50   ;;  %1062 = vst [vmem:[#allocation6 + $0x7c4] sm:$0xf] %v1061_v51  ;;  %v1065_v53 = vld [vmem:[%s18051_s9 + $0x7d4] sm:$0xf]  ;;  %v1073_v57 = vld [vmem:[%s18051_s9 + $0x7dc] sm:$0xff]  }
 0x110   :  { %1064 = vst [vmem:[#allocation6 + $0x7c8] sm:$0xf] %v1063_v52  ;;  %v1067_v54 = vld [vmem:[%s18051_s9 + $0x7c8] sm:$0xf]  ;;  %v1069_v55 = vld [vmem:[%s18051_s9 + $0x7d8] sm:$0xf] }
 0x111   :  { %1066 = vst [vmem:[#allocation6 + $0x7cc] sm:$0xf] %v1065_v53  ;;  %1068 = vst [vmem:[#allocation6 + $0x7d0] sm:$0xf] %v1067_v54  ;;  %v1071_v56 = vld [vmem:[%s18051_s9 + $0x7cc] sm:$0xf] }
 0x112   :  { %1070 = vst [vmem:[#allocation6 + $0x7d4] sm:$0xf] %v1069_v55  ;;  %v1077_v58 = vld [vmem:[%s18051_s9 + $0x7f0] sm:$0xf]  ;;  %1072 = vst [vmem:[#allocation6 + $0x7d8] sm:$0xf] %v1071_v56 }
 0x113   :  { %1074 = vst [vmem:[#allocation6 + $0x7dc] sm:$0xff] %v1073_v57   ;;  %1078 = vst [vmem:[#allocation6 + $0x7e4] sm:$0xf] %v1077_v58  ;;  %v1079_v59 = vld [vmem:[%s18051_s9 + $0x7e4] sm:$0xf] }
 0x114   :  { %v1081_v60 = vld [vmem:[%s18051_s9 + $0x7f4] sm:$0xf]  ;;  %v1083_v61 = vld [vmem:[%s18051_s9 + $0x7e8] sm:$0xf]  ;;  %1080 = vst [vmem:[#allocation6 + $0x7e8] sm:$0xf] %v1079_v59 }
 0x115   :  { %1082 = vst [vmem:[#allocation6 + $0x7ec] sm:$0xf] %v1081_v60  ;;  %1084 = vst [vmem:[#allocation6 + $0x7f0] sm:$0xf] %v1083_v61  ;;  %v1085_v62 = vld [vmem:[%s18051_s9 + $0x7f8] sm:$0xf] }
 0x116   :  { %v1087_v63 = vld [vmem:[%s18051_s9 + $0x7ec] sm:$0xf]  ;;  %v1089_v0 = vld [vmem:[%s18051_s9 + $0x7fc] sm:$0xf]  ;;  %1086 = vst [vmem:[#allocation6 + $0x7f4] sm:$0xf] %v1085_v62 }
 0x117   :  { %1088 = vst [vmem:[#allocation6 + $0x7f8] sm:$0xf] %v1087_v63  ;;  %1090 = vst [vmem:[#allocation6 + $0x7fc] sm:$0xf] %v1089_v0 }
 0x118   :  { %4226 = vsyncadd [#allocation7], 32768  ;;  %v12235_v1 = vld [vmem:[%s18043_s1] sm:$0xff]   ;;  %v12236_v2 = vld [vmem:[%s18043_s1 + $0x8] sm:$0xff]   ;;  %vm4754_vm0 = vcmask 261120   ;;  %s12465_s17 = smov 60  }
 0x119   :  { %11630 = vmatprep.subr.bf16.mxu0 %v12235_v1  ;;  %v12237_v3 = vld [vmem:[%s18042_s0] sm:$0xff]   ;;  %v12238_v4 = vld [vmem:[%s18042_s0 + $0x8] sm:$0xff]   ;;  %v12239_v5 = vld [vmem:[%s18042_s0 + $0x10] sm:$0xff]   ;;  %s12466_s1 = smov 80   ;;  %vm7318_vm1 = vcmask 1041408   ;;  %vm7627_vm2 = vcmask 1043456  }
 0x11a   :  { %11631 = vmatpush3.bf16.msra.mxu0 %v12235_v1  ;;  %11634 = vmatprep.mubr.msk.bf16.mxu0 %vm4754_vm0, %v12237_v3  ;;  %v12240_v6 = vld [vmem:[%s18042_s0 + $0x18] sm:$0xff]   ;;  %v12241_v7 = vld [vmem:[%s18042_s0 + $0x20] sm:$0xff]   ;;  %v12242_v8 = vld [vmem:[%s18042_s0 + $0x28] sm:$0xff]   ;;  %vm7819_vm3 = vcmask 1045504  }
 0x11b   :  { %11632 = vmatprep.subr.bf16.mxu0 %v12236_v2  ;;  %v12243_v9 = vld [vmem:[%s18042_s0 + $0x30] sm:$0xff]   ;;  %v12244_v10 = vld [vmem:[%s18042_s0 + $0x38] sm:$0xff]   ;;  %v12245_v11 = vld [vmem:[%s18042_s0 + $0x40] sm:$0xff]  }
 0x11c   :  { %v12246_v12 = vld [vmem:[%s18042_s0 + $0x48] sm:$0xff]   ;;  %v12247_v13 = vld [vmem:[%s18042_s0 + $0x50] sm:$0xff]   ;;  %v12248_v14 = vld [vmem:[%s18042_s0 + $0x58] sm:$0xff]  }
 0x11d   :  { %v12249_v15 = vld [vmem:[%s18042_s0 + $0x60] sm:$0xff]   ;;  %v12250_v16 = vld [vmem:[%s18042_s0 + $0x68] sm:$0xff]   ;;  %v12251_v17 = vld [vmem:[%s18042_s0 + $0x70] sm:$0xff]  }
 0x11e   :  { %11633 = vmatpush3.bf16.msra.mxu0 %v12236_v2  ;;  %v12252_v18 = vld [vmem:[%s18042_s0 + $0x78] sm:$0xff]   ;;  %v12253_v19 = vld [vmem:[%s18042_s0 + $0x80] sm:$0xff]   ;;  %v12254_v20 = vld [vmem:[%s18042_s0 + $0x88] sm:$0xff]  }
 0x11f   :  { %v12255_v21 = vld [vmem:[%s18042_s0 + $0x90] sm:$0xff]   ;;  %v12256_v22 = vld [vmem:[%s18042_s0 + $0x98] sm:$0xff]   ;;  %v12257_v23 = vld [vmem:[%s18042_s0 + $0xa0] sm:$0xff]  }
 0x120   :  { %v12258_v24 = vld [vmem:[%s18042_s0 + $0xa8] sm:$0xff]   ;;  %v12259_v25 = vld [vmem:[%s18042_s0 + $0xb0] sm:$0xff]   ;;  %v12260_v26 = vld [vmem:[%s18042_s0 + $0xb8] sm:$0xff]  }
 0x121   :  { %11635 = vmatmul.mubr.msk.bf16.vlgmr.msra.gmra.mrb[0].mxu0 %vm4754_vm0, %v12238_v4  ;;  %v12261_v27 = vld [vmem:[%s18042_s0 + $0xc0] sm:$0xff]   ;;  %v12262_v28 = vld [vmem:[%s18042_s0 + $0xc8] sm:$0xff]   ;;  %v12263_v29 = vld [vmem:[%s18042_s0 + $0xd0] sm:$0xff]  }
 0x122   :  { %11638 = vmatprep.mubr.msk.bf16.mxu0 %vm4754_vm0, %v12239_v5  ;;  %v12264_v30 = vld [vmem:[%s18042_s0 + $0xd8] sm:$0xff]   ;;  %v12265_v31 = vld [vmem:[%s18042_s0 + $0xe0] sm:$0xff]   ;;  %v12266_v32 = vld [vmem:[%s18042_s0 + $0xe8] sm:$0xff]  }
 0x123   :  { %v12267_v33 = vld [vmem:[%s18042_s0 + $0xf0] sm:$0xff]   ;;  %v12268_v34 = vld [vmem:[%s18042_s0 + $0xf8] sm:$0xff]   ;;  %v12269_v35 = vld [vmem:[%s18042_s0 + $0x100] sm:$0xff]  }
 0x124   :  { %v12270_v36 = vld [vmem:[%s18042_s0 + $0x108] sm:$0xff]   ;;  %v12271_v37 = vld [vmem:[%s18042_s0 + $0x110] sm:$0xff]   ;;  %v12272_v38 = vld [vmem:[%s18042_s0 + $0x118] sm:$0xff]  }
 0x125   :  { %v12273_v39 = vld [vmem:[%s18042_s0 + $0x120] sm:$0xff]   ;;  %v12274_v40 = vld [vmem:[%s18042_s0 + $0x128] sm:$0xff]   ;;  %v12275_v41 = vld [vmem:[%s18042_s0 + $0x130] sm:$0xff]  }
 0x126   :  { %v12276_v42 = vld [vmem:[%s18042_s0 + $0x138] sm:$0xff]   ;;  %v12277_v43 = vld [vmem:[%s18042_s0 + $0x140] sm:$0xff]   ;;  %v12278_v44 = vld [vmem:[%s18042_s0 + $0x148] sm:$0xff]  }
 0x127   :  { %v12279_v45 = vld [vmem:[%s18042_s0 + $0x150] sm:$0xff]   ;;  %v12280_v46 = vld [vmem:[%s18042_s0 + $0x158] sm:$0xff]   ;;  %v12281_v47 = vld [vmem:[%s18042_s0 + $0x160] sm:$0xff]  }
 0x128   :  { %v12282_v48 = vld [vmem:[%s18042_s0 + $0x168] sm:$0xff]   ;;  %v12283_v49 = vld [vmem:[%s18042_s0 + $0x170] sm:$0xff]   ;;  %v12284_v50 = vld [vmem:[%s18042_s0 + $0x178] sm:$0xff]  }
 0x129   :  { %11639 = vmatmul.mubr.msk.bf16.gmra.mrb[4].mxu0 %vm4754_vm0, %v12240_v6  ;;  %v12285_v51 = vld [vmem:[%s18042_s0 + $0x180] sm:$0xff]   ;;  %v12286_v52 = vld [vmem:[%s18042_s0 + $0x188] sm:$0xff]   ;;  %v12287_v53 = vld [vmem:[%s18042_s0 + $0x190] sm:$0xff]  }
 0x12a   :  { %11642 = vmatprep.mubr.msk.bf16.mxu0 %vm4754_vm0, %v12241_v7  ;;  %v12288_v54 = vld [vmem:[%s18042_s0 + $0x198] sm:$0xff]   ;;  %v12289_v55 = vld [vmem:[%s18042_s0 + $0x1a0] sm:$0xff]   ;;  %v12290_v56 = vld [vmem:[%s18042_s0 + $0x1a8] sm:$0xff]  }
 0x12b   :  { %v12291_v57 = vld [vmem:[%s18042_s0 + $0x1b0] sm:$0xff]   ;;  %v14127_v58 = vld [vmem:[%s18044_s2] ss:$0 sm:$0xff]  ;;  %v12292_v61 = vld [vmem:[%s18042_s0 + $0x1b8] sm:$0xff]  }
 0x12c   :  { %v12293_v0 = vld [vmem:[%s18042_s0 + $0x1c0] sm:$0xff]  }
 0x131   :  { %11643 = vmatmul.mubr.msk.bf16.gmra.mrb[8].mxu0 %vm4754_vm0, %v12242_v8 }
 0x132   :  { %11646 = vmatprep.mubr.msk.bf16.mxu0 %vm4754_vm0, %v12243_v9 }
 0x139   :  { %11647 = vmatmul.mubr.msk.bf16.gmra.mrb[12].mxu0 %vm4754_vm0, %v12244_v10 }
 0x13a   :  { %11650 = vmatprep.mubr.msk.bf16.mxu0 %vm4754_vm0, %v12245_v11 }
 0x141   :  { %11651 = vmatmul.mubr.msk.bf16.gmra.mrb[16].mxu0 %vm4754_vm0, %v12246_v12 }
 0x142   :  { %11654 = vmatprep.mubr.msk.bf16.mxu0 %vm4754_vm0, %v12247_v13  ;;  %v12294_v13 = vld [vmem:[%s18042_s0 + $0x1c8] sm:$0xff]  }
 0x149   :  { %11655 = vmatmul.mubr.msk.bf16.gmra.mrb[20].mxu0 %vm4754_vm0, %v12248_v14 }
 0x14a   :  { %11658 = vmatprep.mubr.msk.bf16.mxu0 %vm4754_vm0, %v12249_v15 }
 0x151   :  { %11659 = vmatmul.mubr.msk.bf16.gmra.mrb[24].mxu0 %vm4754_vm0, %v12250_v16 }
 0x152   :  { %11662 = vmatprep.mubr.msk.bf16.mxu0 %vm4754_vm0, %v12251_v17 }
 0x159   :  { %11663 = vmatmul.mubr.msk.bf16.gmra.mrb[28].mxu0 %vm4754_vm0, %v12252_v18 }
 0x15a   :  { %11666 = vmatprep.mubr.msk.bf16.mxu0 %vm4754_vm0, %v12253_v19  ;;  %v12295_v19 = vld [vmem:[%s18042_s0 + $0x1d0] sm:$0xff]  }
 0x161   :  { %11667 = vmatmul.mubr.msk.bf16.gmra.mrb[32].mxu0 %vm4754_vm0, %v12254_v20 }
 0x162   :  { %11670 = vmatprep.mubr.msk.bf16.mxu0 %vm4754_vm0, %v12255_v21 }
 0x169   :  { %11671 = vmatmul.mubr.msk.bf16.gmra.mrb[36].mxu0 %vm4754_vm0, %v12256_v22 }
 0x16a   :  { %11674 = vmatprep.mubr.msk.bf16.mxu0 %vm4754_vm0, %v12257_v23 }
 0x171   :  { %11675 = vmatmul.mubr.msk.bf16.gmra.mrb[40].mxu0 %vm4754_vm0, %v12258_v24 }
 0x172   :  { %11678 = vmatprep.mubr.msk.bf16.mxu0 %vm4754_vm0, %v12259_v25 }
 0x179   :  { %11679 = vmatmul.mubr.msk.bf16.gmra.mrb[44].mxu0 %vm4754_vm0, %v12260_v26 }
 0x17a   :  { %11682 = vmatprep.mubr.msk.bf16.mxu0 %vm4754_vm0, %v12261_v27 }
 0x181   :  { %11683 = vmatmul.mubr.msk.bf16.gmra.mrb[48].mxu0 %vm4754_vm0, %v12262_v28 }
 0x182   :  { %11686 = vmatprep.mubr.msk.bf16.mxu0 %vm4754_vm0, %v12263_v29 }
 0x189   :  { %11687 = vmatmul.mubr.msk.bf16.gmra.mrb[52].mxu0 %vm4754_vm0, %v12264_v30 }
 0x18a   :  { %11690 = vmatprep.mubr.msk.bf16.mxu0 %vm4754_vm0, %v12265_v31 }
 0x191   :  { %11691 = vmatmul.mubr.msk.bf16.gmra.mrb[56].mxu0 %vm4754_vm0, %v12266_v32 }
 0x192   :  { %11694 = vmatprep.mubr.msk.bf16.mxu0 %vm4754_vm0, %v12267_v33 }
 0x199   :  { %11695 = vmatmul.mubr.msk.bf16.gmra.mrb[60].mxu0 %vm4754_vm0, %v12268_v34 }
 0x19a   :  { %11698 = vmatprep.mubr.msk.bf16.mxu0 %vm4754_vm0, %v12269_v35  ;;  %v12296_v35 = vld [vmem:[%s18042_s0 + $0x1d8] sm:$0xff]  }
 0x1a1   :  { %11699 = vmatmul.mubr.msk.bf16.gmra.mrb[64].mxu0 %vm4754_vm0, %v12270_v36 }
 0x1a2   :  { %11702 = vmatprep.mubr.msk.bf16.mxu0 %vm4754_vm0, %v12271_v37 }
 0x1a9   :  { %11703 = vmatmul.mubr.msk.bf16.gmra.mrb[68].mxu0 %vm4754_vm0, %v12272_v38 }
 0x1aa   :  { %11706 = vmatprep.mubr.msk.bf16.mxu0 %vm4754_vm0, %v12273_v39 }
 0x1b1   :  { %11707 = vmatmul.mubr.msk.bf16.gmra.mrb[72].mxu0 %vm4754_vm0, %v12274_v40 }
 0x1b2   :  { %11710 = vmatprep.mubr.msk.bf16.mxu0 %vm4754_vm0, %v12275_v41  ;;  %v12297_v41 = vld [vmem:[%s18042_s0 + $0x1e0] sm:$0xff]  }
 0x1b9   :  { %11711 = vmatmul.mubr.msk.bf16.gmra.mrb[76].mxu0 %vm4754_vm0, %v12276_v42 }
 0x1ba   :  { %11714 = vmatprep.mubr.msk.bf16.mxu0 %vm4754_vm0, %v12277_v43 }
 0x1c1   :  { %11715 = vmatmul.mubr.msk.bf16.gmra.mrb[80].mxu0 %vm4754_vm0, %v12278_v44 }
 0x1c2   :  { %11718 = vmatprep.mubr.msk.bf16.mxu0 %vm4754_vm0, %v12279_v45 }
 0x1c9   :  { %11719 = vmatmul.mubr.msk.bf16.gmra.mrb[84].mxu0 %vm4754_vm0, %v12280_v46 }
 0x1ca   :  { %11722 = vmatprep.mubr.msk.bf16.mxu0 %vm4754_vm0, %v12281_v47 }
 0x1d1   :  { %11723 = vmatmul.mubr.msk.bf16.gmra.mrb[88].mxu0 %vm4754_vm0, %v12282_v48 }
 0x1d2   :  { %11726 = vmatprep.mubr.msk.bf16.mxu0 %vm4754_vm0, %v12283_v49 }
 0x1d9   :  { %11727 = vmatmul.mubr.msk.bf16.gmra.mrb[92].mxu0 %vm4754_vm0, %v12284_v50 }
 0x1da   :  { %11730 = vmatprep.mubr.msk.bf16.mxu0 %vm4754_vm0, %v12285_v51 }
 0x1e1   :  { %11731 = vmatmul.mubr.msk.bf16.gmra.mrb[96].mxu0 %vm4754_vm0, %v12286_v52 }
 0x1e2   :  { %11734 = vmatprep.mubr.msk.bf16.mxu0 %vm4754_vm0, %v12287_v53 }
 0x1e9   :  { %11735 = vmatmul.mubr.msk.bf16.gmra.mrb[100].mxu0 %vm4754_vm0, %v12288_v54 }
 0x1ea   :  { %11738 = vmatprep.mubr.msk.bf16.mxu0 %vm4754_vm0, %v12289_v55 }
 0x1f1   :  { %11739 = vmatmul.mubr.msk.bf16.gmra.mrb[104].mxu0 %vm4754_vm0, %v12290_v56 }
 0x1f2   :  { %11742 = vmatprep.mubr.msk.bf16.mxu0 %vm4754_vm0, %v12291_v57  ;;  %v12298_v57 = vld [vmem:[%s18042_s0 + $0x1e8] sm:$0xff]  }
 0x1f4   :  { %v11636_v59 = vpop.f32.mrb[0].mxu0 }
 0x1f5   :  { %v5005_v60 = vpop.f32.mrb[1].mxu0  ;;  %v14139_v2 = vadd.f32 %v11636_v59, %v14127_v58 }
 0x1f6   :  { %v14133_v62 = vadd.f32 %v14127_v58, %v5005_v60  ;;  %v11637_v63 = vpop.f32.mrb[2].mxu0 }
 0x1f7   :  { %v5008_v1 = vpop.f32.mrb[3].mxu0  ;;  %v14148_v5 = vadd.f32 %v11637_v63, %v14127_v58  ;;  %v5733_v8 = vmul.f32 %v14139_v2, %v14139_v2 }
 0x1f8   :  { %v14142_v3 = vadd.f32 %v14127_v58, %v5008_v1  ;;  %v5731_v4 = vmul.f32 %v14133_v62, %v14133_v62  ;;  %v12299_v1 = vld [vmem:[%s18042_s0 + $0x1f0] sm:$0xff]  }
 0x1f9   :  { %11743 = vmatmul.mubr.msk.bf16.gmra.mrb[108].mxu0 %vm4754_vm0, %v12292_v61  ;;  %v5734_v14 = vmul.f32 %v14148_v5, %v14148_v5 }
 0x1fa   :  { %v5580_v6 = vadd.f32 %v14142_v3, %v14133_v62  ;;  %v5732_v7 = vmul.f32 %v14142_v3, %v14142_v3  ;;  %11746 = vmatprep.mubr.msk.bf16.mxu0 %vm4754_vm0, %v12293_v0 }
 0x1fc   :  { %v5581_v9 = vadd.f32 %v5580_v6, %v14139_v2  ;;  %v5875_v10 = vadd.f32 %v5732_v7, %v5731_v4  ;;  %v11640_v11 = vpop.f32.mrb[4].mxu0 }
 0x1fd   :  { %v5021_v12 = vpop.f32.mrb[5].mxu0  ;;  %v14171_v20 = vadd.f32 %v11640_v11, %v14127_v58 }
 0x1fe   :  { %v5582_v15 = vadd.f32 %v5581_v9, %v14148_v5  ;;  %v5876_v16 = vadd.f32 %v5875_v10, %v5733_v8  ;;  %v14165_v17 = vadd.f32 %v14127_v58, %v5021_v12  ;;  %v11641_v18 = vpop.f32.mrb[6].mxu0 }
 0x1ff   :  { %v5024_v21 = vpop.f32.mrb[7].mxu0  ;;  %v14181_v27 = vadd.f32 %v11641_v18, %v14127_v58  ;;  %v5737_v30 = vmul.f32 %v14171_v20, %v14171_v20 }
 0x200   :  { %v5877_v22 = vadd.f32 %v5876_v16, %v5734_v14  ;;  %v5583_v23 = vadd.f32 %v5582_v15, %v14165_v17  ;;  %v5735_v24 = vmul.f32 %v14165_v17, %v14165_v17  ;;  %v14177_v25 = vadd.f32 %v14127_v58, %v5024_v21 }
 0x201   :  { %11747 = vmatmul.mubr.msk.bf16.gmra.mrb[112].mxu0 %vm4754_vm0, %v12294_v13  ;;  %v5738_v36 = vmul.f32 %v14181_v27, %v14181_v27 }
 0x202   :  { %v5878_v26 = vadd.f32 %v5877_v22, %v5735_v24  ;;  %v5584_v28 = vadd.f32 %v5583_v23, %v14177_v25  ;;  %v5736_v29 = vmul.f32 %v14177_v25, %v14177_v25  ;;  %11750 = vmatprep.mubr.msk.bf16.mxu0 %vm4754_vm0, %v12295_v19  ;;  %v12300_v22 = vld [vmem:[%s18042_s0 + $0x1f8] sm:$0xff]  }
 0x204   :  { %v5585_v31 = vadd.f32 %v5584_v28, %v14171_v20  ;;  %v5879_v32 = vadd.f32 %v5878_v26, %v5736_v29  ;;  %v11644_v33 = vpop.f32.mrb[8].mxu0 }
 0x205   :  { %v5037_v34 = vpop.f32.mrb[9].mxu0  ;;  %v14203_v42 = vadd.f32 %v11644_v33, %v14127_v58 }
 0x206   :  { %v5586_v37 = vadd.f32 %v5585_v31, %v14181_v27  ;;  %v5880_v38 = vadd.f32 %v5879_v32, %v5737_v30  ;;  %v14197_v39 = vadd.f32 %v14127_v58, %v5037_v34  ;;  %v11645_v40 = vpop.f32.mrb[10].mxu0  ;;  %v12301_v30 = vld [vmem:[%s18042_s0 + $0x200] sm:$0xff]  }
 0x207   :  { %v5040_v43 = vpop.f32.mrb[11].mxu0  ;;  %v14213_v49 = vadd.f32 %v11645_v40, %v14127_v58  ;;  %v5741_v52 = vmul.f32 %v14203_v42, %v14203_v42 }
 0x208   :  { %v5881_v44 = vadd.f32 %v5880_v38, %v5738_v36  ;;  %v5587_v45 = vadd.f32 %v5586_v37, %v14197_v39  ;;  %v5739_v46 = vmul.f32 %v14197_v39, %v14197_v39  ;;  %v14209_v47 = vadd.f32 %v14127_v58, %v5040_v43 }
 0x209   :  { %11751 = vmatmul.mubr.msk.bf16.gmra.mrb[116].mxu0 %vm4754_vm0, %v12296_v35  ;;  %v5742_v59 = vmul.f32 %v14213_v49, %v14213_v49 }
 0x20a   :  { %v5882_v48 = vadd.f32 %v5881_v44, %v5739_v46  ;;  %v5588_v50 = vadd.f32 %v5587_v45, %v14209_v47  ;;  %v5740_v51 = vmul.f32 %v14209_v47, %v14209_v47  ;;  %11754 = vmatprep.mubr.msk.bf16.mxu0 %vm4754_vm0, %v12297_v41 }
 0x20c   :  { %v5589_v53 = vadd.f32 %v5588_v50, %v14203_v42  ;;  %v5883_v54 = vadd.f32 %v5882_v48, %v5740_v51  ;;  %v11648_v55 = vpop.f32.mrb[12].mxu0  ;;  %v12302_v50 = vld [vmem:[%s18042_s0 + $0x208] sm:$0xff]  }
 0x20d   :  { %v5053_v56 = vpop.f32.mrb[13].mxu0  ;;  %v14235_v4 = vadd.f32 %v11648_v55, %v14127_v58 }
 0x20e   :  { %v5590_v60 = vadd.f32 %v5589_v53, %v14213_v49  ;;  %v5884_v61 = vadd.f32 %v5883_v54, %v5741_v52  ;;  %v14229_v63 = vadd.f32 %v14127_v58, %v5053_v56  ;;  %v11649_v0 = vpop.f32.mrb[14].mxu0  ;;  %v12303_v56 = vld [vmem:[%s18042_s0 + $0x210] sm:$0xff]  }
 0x20f   :  { %v5056_v6 = vpop.f32.mrb[15].mxu0  ;;  %v14245_v12 = vadd.f32 %v11649_v0, %v14127_v58  ;;  %v5745_v15 = vmul.f32 %v14235_v4, %v14235_v4 }
 0x210   :  { %v5885_v7 = vadd.f32 %v5884_v61, %v5742_v59  ;;  %v5591_v8 = vadd.f32 %v5590_v60, %v14229_v63  ;;  %v5743_v9 = vmul.f32 %v14229_v63, %v14229_v63  ;;  %v14241_v10 = vadd.f32 %v14127_v58, %v5056_v6 }
 0x211   :  { %11755 = vmatmul.mubr.msk.bf16.gmra.mrb[120].mxu0 %vm4754_vm0, %v12298_v57  ;;  %v5746_v23 = vmul.f32 %v14245_v12, %v14245_v12 }
 0x212   :  { %v5886_v11 = vadd.f32 %v5885_v7, %v5743_v9  ;;  %v5592_v13 = vadd.f32 %v5591_v8, %v14241_v10  ;;  %v5744_v14 = vmul.f32 %v14241_v10, %v14241_v10  ;;  %11758 = vmatprep.mubr.msk.bf16.mxu0 %vm4754_vm0, %v12299_v1 }
 0x214   :  { %v5593_v16 = vadd.f32 %v5592_v13, %v14235_v4  ;;  %v5887_v18 = vadd.f32 %v5886_v11, %v5744_v14  ;;  %v11652_v19 = vpop.f32.mrb[16].mxu0 }
 0x215   :  { %v5069_v21 = vpop.f32.mrb[17].mxu0  ;;  %v14267_v31 = vadd.f32 %v11652_v19, %v14127_v58 }
 0x216   :  { %v5594_v24 = vadd.f32 %v5593_v16, %v14245_v12  ;;  %v5888_v26 = vadd.f32 %v5887_v18, %v5745_v15  ;;  %v14261_v28 = vadd.f32 %v14127_v58, %v5069_v21  ;;  %v11653_v29 = vpop.f32.mrb[18].mxu0  ;;  %v12304_v18 = vld [vmem:[%s18042_s0 + $0x218] sm:$0xff]  }
 0x217   :  { %v5072_v32 = vpop.f32.mrb[19].mxu0  ;;  %v14277_v38 = vadd.f32 %v11653_v29, %v14127_v58  ;;  %v5749_v43 = vmul.f32 %v14267_v31, %v14267_v31 }
 0x218   :  { %v5889_v33 = vadd.f32 %v5888_v26, %v5746_v23  ;;  %v5595_v34 = vadd.f32 %v5594_v24, %v14261_v28  ;;  %v5747_v35 = vmul.f32 %v14261_v28, %v14261_v28  ;;  %v14273_v36 = vadd.f32 %v14127_v58, %v5072_v32  ;;  %v12305_v26 = vld [vmem:[%s18042_s0 + $0x220] sm:$0xff]  }
 0x219   :  { %11759 = vmatmul.mubr.msk.bf16.gmra.mrb[124].mxu0 %vm4754_vm0, %v12300_v22  ;;  %v5750_v51 = vmul.f32 %v14277_v38, %v14277_v38 }
 0x21a   :  { %v5890_v37 = vadd.f32 %v5889_v33, %v5747_v35  ;;  %v5596_v40 = vadd.f32 %v5595_v34, %v14273_v36  ;;  %v5748_v41 = vmul.f32 %v14273_v36, %v14273_v36  ;;  %11762 = vmatprep.mubr.msk.bf16.mxu0 %vm4754_vm0, %v12301_v30 }
 0x21c   :  { %v5597_v44 = vadd.f32 %v5596_v40, %v14267_v31  ;;  %v5891_v45 = vadd.f32 %v5890_v37, %v5748_v41  ;;  %v11656_v46 = vpop.f32.mrb[20].mxu0 }
 0x21d   :  { %v5085_v48 = vpop.f32.mrb[21].mxu0  ;;  %v14299_v57 = vadd.f32 %v11656_v46, %v14127_v58 }
 0x21e   :  { %v5598_v52 = vadd.f32 %v5597_v44, %v14277_v38  ;;  %v5892_v53 = vadd.f32 %v5891_v45, %v5749_v43  ;;  %v14293_v54 = vadd.f32 %v14127_v58, %v5085_v48  ;;  %v11657_v55 = vpop.f32.mrb[22].mxu0 }
 0x21f   :  { %v5088_v59 = vpop.f32.mrb[23].mxu0  ;;  %v14309_v7 = vadd.f32 %v11657_v55, %v14127_v58  ;;  %v5753_v11 = vmul.f32 %v14299_v57, %v14299_v57 }
 0x220   :  { %v5893_v60 = vadd.f32 %v5892_v53, %v5750_v51  ;;  %v5599_v61 = vadd.f32 %v5598_v52, %v14293_v54  ;;  %v5751_v0 = vmul.f32 %v14293_v54, %v14293_v54  ;;  %v14305_v1 = vadd.f32 %v14127_v58, %v5088_v59  ;;  %v12306_v51 = vld [vmem:[%s18042_s0 + $0x228] sm:$0xff]  }
 0x221   :  { %11763 = vmatmul.mubr.msk.bf16.gmra.mrb[128].mxu0 %vm4754_vm0, %v12302_v50  ;;  %v5754_v19 = vmul.f32 %v14309_v7, %v14309_v7 }
 0x222   :  { %v5894_v6 = vadd.f32 %v5893_v60, %v5751_v0  ;;  %v5600_v8 = vadd.f32 %v5599_v61, %v14305_v1  ;;  %v5752_v9 = vmul.f32 %v14305_v1, %v14305_v1  ;;  %11766 = vmatprep.mubr.msk.bf16.mxu0 %vm4754_vm0, %v12303_v56  ;;  %v12307_v60 = vld [vmem:[%s18042_s0 + $0x230] sm:$0xff]  }
 0x224   :  { %v5601_v13 = vadd.f32 %v5600_v8, %v14299_v57  ;;  %v5895_v14 = vadd.f32 %v5894_v6, %v5752_v9  ;;  %v11660_v15 = vpop.f32.mrb[24].mxu0 }
 0x225   :  { %v5101_v16 = vpop.f32.mrb[25].mxu0  ;;  %v14331_v29 = vadd.f32 %v11660_v15, %v14127_v58 }
 0x226   :  { %v5602_v21 = vadd.f32 %v5601_v13, %v14309_v7  ;;  %v5896_v22 = vadd.f32 %v5895_v14, %v5753_v11  ;;  %v14325_v23 = vadd.f32 %v14127_v58, %v5101_v16  ;;  %v11661_v24 = vpop.f32.mrb[26].mxu0 }
 0x227   :  { %v5104_v30 = vpop.f32.mrb[27].mxu0  ;;  %v14341_v40 = vadd.f32 %v11661_v24, %v14127_v58  ;;  %v5757_v44 = vmul.f32 %v14331_v29, %v14331_v29 }
 0x228   :  { %v5897_v32 = vadd.f32 %v5896_v22, %v5754_v19  ;;  %v5603_v33 = vadd.f32 %v5602_v21, %v14325_v23  ;;  %v5755_v34 = vmul.f32 %v14325_v23, %v14325_v23  ;;  %v14337_v35 = vadd.f32 %v14127_v58, %v5104_v30 }
 0x229   :  { %11767 = vmatmul.mubr.msk.bf16.gmra.mrb[132].mxu0 %vm4754_vm0, %v12304_v18  ;;  %v5758_v52 = vmul.f32 %v14341_v40, %v14341_v40 }
 0x22a   :  { %v5898_v37 = vadd.f32 %v5897_v32, %v5755_v34  ;;  %v5604_v41 = vadd.f32 %v5603_v33, %v14337_v35  ;;  %v5756_v43 = vmul.f32 %v14337_v35, %v14337_v35  ;;  %11770 = vmatprep.mubr.msk.bf16.mxu0 %vm4754_vm0, %v12305_v26  ;;  %v12308_v26 = vld [vmem:[%s18042_s0 + $0x238] sm:$0xff]  }
 0x22c   :  { %v5605_v45 = vadd.f32 %v5604_v41, %v14331_v29  ;;  %v5899_v46 = vadd.f32 %v5898_v37, %v5756_v43  ;;  %v11664_v48 = vpop.f32.mrb[28].mxu0 }
 0x22d   :  { %v5117_v50 = vpop.f32.mrb[29].mxu0  ;;  %v14363_v61 = vadd.f32 %v11664_v48, %v14127_v58 }
 0x22e   :  { %v5606_v53 = vadd.f32 %v5605_v45, %v14341_v40  ;;  %v5900_v55 = vadd.f32 %v5899_v46, %v5757_v44  ;;  %v14357_v56 = vadd.f32 %v14127_v58, %v5117_v50  ;;  %v11665_v59 = vpop.f32.mrb[30].mxu0 }
 0x22f   :  { %v5120_v0 = vpop.f32.mrb[31].mxu0  ;;  %v14373_v14 = vadd.f32 %v11665_v59, %v14127_v58  ;;  %v5761_v18 = vmul.f32 %v14363_v61, %v14363_v61 }
 0x230   :  { %v5901_v6 = vadd.f32 %v5900_v55, %v5758_v52  ;;  %v5607_v8 = vadd.f32 %v5606_v53, %v14357_v56  ;;  %v5759_v9 = vmul.f32 %v14357_v56, %v14357_v56  ;;  %v14369_v11 = vadd.f32 %v14127_v58, %v5120_v0 }
 0x231   :  { %11771 = vmatmul.mubr.msk.bf16.gmra.mrb[136].mxu0 %vm4754_vm0, %v12306_v51  ;;  %v5762_v30 = vmul.f32 %v14373_v14, %v14373_v14 }
 0x232   :  { %v5902_v13 = vadd.f32 %v5901_v6, %v5759_v9  ;;  %v5608_v15 = vadd.f32 %v5607_v8, %v14369_v11  ;;  %v5760_v16 = vmul.f32 %v14369_v11, %v14369_v11  ;;  %11774 = vmatprep.mubr.msk.bf16.mxu0 %vm4754_vm0, %v12307_v60 }
 0x234   :  { %v5609_v19 = vadd.f32 %v5608_v15, %v14363_v61  ;;  %v5903_v21 = vadd.f32 %v5902_v13, %v5760_v16  ;;  %v11668_v22 = vpop.f32.mrb[32].mxu0 }
 0x235   :  { %v5133_v24 = vpop.f32.mrb[33].mxu0  ;;  %v14392_v41 = vadd.f32 %v11668_v22, %v14127_v58 }
 0x236   :  { %v5610_v32 = vadd.f32 %v5609_v19, %v14373_v14  ;;  %v5904_v33 = vadd.f32 %v5903_v21, %v5761_v18  ;;  %v14389_v34 = vadd.f32 %v14127_v58, %v5133_v24  ;;  %v11669_v37 = vpop.f32.mrb[34].mxu0 }
 0x237   :  { %v5136_v43 = vpop.f32.mrb[35].mxu0  ;;  %v14402_v51 = vadd.f32 %v11669_v37, %v14127_v58  ;;  %v5765_v55 = vmul.f32 %v14392_v41, %v14392_v41 }
 0x238   :  { %v5905_v44 = vadd.f32 %v5904_v33, %v5762_v30  ;;  %v5611_v45 = vadd.f32 %v5610_v32, %v14389_v34  ;;  %v5763_v46 = vmul.f32 %v14389_v34, %v14389_v34  ;;  %v14398_v48 = vadd.f32 %v14127_v58, %v5136_v43 }
 0x239   :  { %11775 = vmatmul.mubr.msk.bf16.gmra.mrb[140].mxu0 %vm4754_vm0, %v12308_v26  ;;  %v5766_v8 = vmul.f32 %v14402_v51, %v14402_v51 }
 0x23a   :  { %v5906_v50 = vadd.f32 %v5905_v44, %v5763_v46  ;;  %v5612_v52 = vadd.f32 %v5611_v45, %v14398_v48  ;;  %v5764_v53 = vmul.f32 %v14398_v48, %v14398_v48 }
 0x23c   :  { %v5613_v59 = vadd.f32 %v5612_v52, %v14392_v41  ;;  %v5907_v60 = vadd.f32 %v5906_v50, %v5764_v53  ;;  %v11672_v0 = vpop.f32.mrb[36].mxu0 }
 0x23d   :  { %v5149_v6 = vpop.f32.mrb[37].mxu0  ;;  %v14417_v18 = vadd.f32 %v11672_v0, %v14127_v58 }
 0x23e   :  { %v5614_v9 = vadd.f32 %v5613_v59, %v14402_v51  ;;  %v5908_v13 = vadd.f32 %v5907_v60, %v5765_v55  ;;  %v14414_v15 = vadd.f32 %v14127_v58, %v5149_v6  ;;  %v11673_v16 = vpop.f32.mrb[38].mxu0 }
 0x23f   :  { %18261 = vst [vmem:[#allocation14_spill] sm:$0xff] %v14417_v18  ;;  %v5152_v19 = vpop.f32.mrb[39].mxu0  ;;  %v14426_v32 = vadd.f32 %v11673_v16, %v14127_v58  ;;  %v5769_v43 = vmul.f32 %v14417_v18, %v14417_v18 }
 0x240   :  { %18260 = vst [vmem:[#allocation13_spill] sm:$0xff] %v14414_v15  ;;  %v5909_v21 = vadd.f32 %v5908_v13, %v5766_v8  ;;  %v5615_v22 = vadd.f32 %v5614_v9, %v14414_v15  ;;  %v5767_v24 = vmul.f32 %v14414_v15, %v14414_v15  ;;  %v14423_v26 = vadd.f32 %v14127_v58, %v5152_v19 }
 0x241   :  { %18263 = vst [vmem:[#allocation16_spill] sm:$0xff] %v14426_v32  ;;  %v5770_v52 = vmul.f32 %v14426_v32, %v14426_v32 }
 0x242   :  { %18262 = vst [vmem:[#allocation15_spill] sm:$0xff] %v14423_v26  ;;  %v5910_v30 = vadd.f32 %v5909_v21, %v5767_v24  ;;  %v5616_v33 = vadd.f32 %v5615_v22, %v14423_v26  ;;  %v5768_v37 = vmul.f32 %v14423_v26, %v14423_v26 }
 0x244   :  { %v5617_v44 = vadd.f32 %v5616_v33, %v14417_v18  ;;  %v5911_v45 = vadd.f32 %v5910_v30, %v5768_v37  ;;  %v11676_v46 = vpop.f32.mrb[40].mxu0 }
 0x245   :  { %v5165_v50 = vpop.f32.mrb[41].mxu0  ;;  %v14441_v0 = vadd.f32 %v11676_v46, %v14127_v58 }
 0x246   :  { %v5618_v53 = vadd.f32 %v5617_v44, %v14426_v32  ;;  %v5912_v55 = vadd.f32 %v5911_v45, %v5769_v43  ;;  %v14438_v59 = vadd.f32 %v14127_v58, %v5165_v50  ;;  %v11677_v60 = vpop.f32.mrb[42].mxu0 }
 0x247   :  { %18265 = vst [vmem:[#allocation18_spill] sm:$0xff] %v14441_v0  ;;  %v5168_v6 = vpop.f32.mrb[43].mxu0  ;;  %v14450_v21 = vadd.f32 %v11677_v60, %v14127_v58  ;;  %v5773_v30 = vmul.f32 %v14441_v0, %v14441_v0 }
 0x248   :  { %18264 = vst [vmem:[#allocation17_spill] sm:$0xff] %v14438_v59  ;;  %v5913_v8 = vadd.f32 %v5912_v55, %v5770_v52  ;;  %v5619_v9 = vadd.f32 %v5618_v53, %v14438_v59  ;;  %v5771_v13 = vmul.f32 %v14438_v59, %v14438_v59  ;;  %v14447_v16 = vadd.f32 %v14127_v58, %v5168_v6 }
 0x249   :  { %18267 = vst [vmem:[#allocation20_spill] sm:$0xff] %v14450_v21  ;;  %v5774_v45 = vmul.f32 %v14450_v21, %v14450_v21 }
 0x24a   :  { %18266 = vst [vmem:[#allocation19_spill] sm:$0xff] %v14447_v16  ;;  %v5914_v19 = vadd.f32 %v5913_v8, %v5771_v13  ;;  %v5620_v22 = vadd.f32 %v5619_v9, %v14447_v16  ;;  %v5772_v24 = vmul.f32 %v14447_v16, %v14447_v16 }
 0x24c   :  { %v5621_v33 = vadd.f32 %v5620_v22, %v14441_v0  ;;  %v5915_v37 = vadd.f32 %v5914_v19, %v5772_v24  ;;  %v11680_v43 = vpop.f32.mrb[44].mxu0 }
 0x24d   :  { %v5181_v44 = vpop.f32.mrb[45].mxu0  ;;  %v14465_v55 = vadd.f32 %v11680_v43, %v14127_v58 }
 0x24e   :  { %v5622_v46 = vadd.f32 %v5621_v33, %v14450_v21  ;;  %v5916_v50 = vadd.f32 %v5915_v37, %v5773_v30  ;;  %v14462_v52 = vadd.f32 %v14127_v58, %v5181_v44  ;;  %v11681_v53 = vpop.f32.mrb[46].mxu0 }
 0x24f   :  { %18269 = vst [vmem:[#allocation22_spill] sm:$0xff] %v14465_v55  ;;  %v5184_v60 = vpop.f32.mrb[47].mxu0  ;;  %v14474_v22 = vadd.f32 %v11681_v53, %v14127_v58  ;;  %v5777_v33 = vmul.f32 %v14465_v55, %v14465_v55 }
 0x250   :  { %18268 = vst [vmem:[#allocation21_spill] sm:$0xff] %v14462_v52  ;;  %v5917_v6 = vadd.f32 %v5916_v50, %v5774_v45  ;;  %v5623_v8 = vadd.f32 %v5622_v46, %v14462_v52  ;;  %v5775_v9 = vmul.f32 %v14462_v52, %v14462_v52  ;;  %v14471_v13 = vadd.f32 %v14127_v58, %v5184_v60 }
 0x251   :  { %18271 = vst [vmem:[#allocation24_spill] sm:$0xff] %v14474_v22  ;;  %v5778_v46 = vmul.f32 %v14474_v22, %v14474_v22 }
 0x252   :  { %18270 = vst [vmem:[#allocation23_spill] sm:$0xff] %v14471_v13  ;;  %v5918_v19 = vadd.f32 %v5917_v6, %v5775_v9  ;;  %v5624_v24 = vadd.f32 %v5623_v8, %v14471_v13  ;;  %v5776_v30 = vmul.f32 %v14471_v13, %v14471_v13 }
 0x254   :  { %v5625_v37 = vadd.f32 %v5624_v24, %v14465_v55  ;;  %v5919_v43 = vadd.f32 %v5918_v19, %v5776_v30  ;;  %v11684_v44 = vpop.f32.mrb[48].mxu0 }
 0x255   :  { %v5197_v45 = vpop.f32.mrb[49].mxu0  ;;  %v14489_v8 = vadd.f32 %v11684_v44, %v14127_v58 }
 0x256   :  { %v5626_v50 = vadd.f32 %v5625_v37, %v14474_v22  ;;  %v5920_v53 = vadd.f32 %v5919_v43, %v5777_v33  ;;  %v14486_v60 = vadd.f32 %v14127_v58, %v5197_v45  ;;  %v11685_v6 = vpop.f32.mrb[50].mxu0 }
 0x257   :  { %18273 = vst [vmem:[#allocation26_spill] sm:$0xff] %v14489_v8  ;;  %v5200_v9 = vpop.f32.mrb[51].mxu0  ;;  %v14498_v33 = vadd.f32 %v11685_v6, %v14127_v58  ;;  %v5781_v44 = vmul.f32 %v14489_v8, %v14489_v8 }
 0x258   :  { %18272 = vst [vmem:[#allocation25_spill] sm:$0xff] %v14486_v60  ;;  %v5921_v13 = vadd.f32 %v5920_v53, %v5778_v46  ;;  %v5627_v24 = vadd.f32 %v5626_v50, %v14486_v60  ;;  %v5779_v19 = vmul.f32 %v14486_v60, %v14486_v60  ;;  %v14495_v30 = vadd.f32 %v14127_v58, %v5200_v9 }
 0x259   :  { %18275 = vst [vmem:[#allocation28_spill] sm:$0xff] %v14498_v33  ;;  %v5782_v9 = vmul.f32 %v14498_v33, %v14498_v33 }
 0x25a   :  { %18274 = vst [vmem:[#allocation27_spill] sm:$0xff] %v14495_v30  ;;  %v5922_v55 = vadd.f32 %v5921_v13, %v5779_v19  ;;  %v5628_v37 = vadd.f32 %v5627_v24, %v14495_v30  ;;  %v5780_v43 = vmul.f32 %v14495_v30, %v14495_v30 }
 0x25c   :  { %v5629_v45 = vadd.f32 %v5628_v37, %v14489_v8  ;;  %v5923_v46 = vadd.f32 %v5922_v55, %v5780_v43  ;;  %v11688_v50 = vpop.f32.mrb[52].mxu0 }
 0x25d   :  { %v5213_v53 = vpop.f32.mrb[53].mxu0  ;;  %v14513_v30 = vadd.f32 %v11688_v50, %v14127_v58 }
 0x25e   :  { %v5630_v13 = vadd.f32 %v5629_v45, %v14498_v33  ;;  %v5924_v6 = vadd.f32 %v5923_v46, %v5781_v44  ;;  %v14510_v19 = vadd.f32 %v14127_v58, %v5213_v53  ;;  %v11689_v24 = vpop.f32.mrb[54].mxu0 }
 0x25f   :  { %18277 = vst [vmem:[#allocation30_spill] sm:$0xff] %v14513_v30  ;;  %v5216_v60 = vpop.f32.mrb[55].mxu0  ;;  %v14522_v44 = vadd.f32 %v11689_v24, %v14127_v58  ;;  %v5785_v50 = vmul.f32 %v14513_v30, %v14513_v30 }
 0x260   :  { %18276 = vst [vmem:[#allocation29_spill] sm:$0xff] %v14510_v19  ;;  %v5925_v22 = vadd.f32 %v5924_v6, %v5782_v9  ;;  %v5631_v37 = vadd.f32 %v5630_v13, %v14510_v19  ;;  %v5783_v55 = vmul.f32 %v14510_v19, %v14510_v19  ;;  %v14519_v43 = vadd.f32 %v14127_v58, %v5216_v60 }
 0x261   :  { %18279 = vst [vmem:[#allocation32_spill] sm:$0xff] %v14522_v44  ;;  %v5786_v60 = vmul.f32 %v14522_v44, %v14522_v44 }
 0x262   :  { %18278 = vst [vmem:[#allocation31_spill] sm:$0xff] %v14519_v43  ;;  %v5926_v8 = vadd.f32 %v5925_v22, %v5783_v55  ;;  %v5632_v45 = vadd.f32 %v5631_v37, %v14519_v43  ;;  %v5784_v46 = vmul.f32 %v14519_v43, %v14519_v43 }
 0x264   :  { %v5633_v53 = vadd.f32 %v5632_v45, %v14513_v30  ;;  %v5927_v9 = vadd.f32 %v5926_v8, %v5784_v46  ;;  %v11692_v13 = vpop.f32.mrb[56].mxu0 }
 0x265   :  { %v5229_v6 = vpop.f32.mrb[57].mxu0  ;;  %v14537_v43 = vadd.f32 %v11692_v13, %v14127_v58 }
 0x266   :  { %v5634_v22 = vadd.f32 %v5633_v53, %v14522_v44  ;;  %v5928_v24 = vadd.f32 %v5927_v9, %v5785_v50  ;;  %v14534_v55 = vadd.f32 %v14127_v58, %v5229_v6  ;;  %v11693_v37 = vpop.f32.mrb[58].mxu0 }
 0x267   :  { %18281 = vst [vmem:[#allocation34_spill] sm:$0xff] %v14537_v43  ;;  %v5232_v19 = vpop.f32.mrb[59].mxu0  ;;  %v14546_v50 = vadd.f32 %v11693_v37, %v14127_v58  ;;  %v5789_v13 = vmul.f32 %v14537_v43, %v14537_v43 }
 0x268   :  { %18280 = vst [vmem:[#allocation33_spill] sm:$0xff] %v14534_v55  ;;  %v5929_v33 = vadd.f32 %v5928_v24, %v5786_v60  ;;  %v5635_v45 = vadd.f32 %v5634_v22, %v14534_v55  ;;  %v5787_v8 = vmul.f32 %v14534_v55, %v14534_v55  ;;  %v14543_v46 = vadd.f32 %v14127_v58, %v5232_v19 }
 0x269   :  { %18283 = vst [vmem:[#allocation36_spill] sm:$0xff] %v14546_v50  ;;  %v5790_v19 = vmul.f32 %v14546_v50, %v14546_v50 }
 0x26a   :  { %18282 = vst [vmem:[#allocation35_spill] sm:$0xff] %v14543_v46  ;;  %v5930_v30 = vadd.f32 %v5929_v33, %v5787_v8  ;;  %v5636_v53 = vadd.f32 %v5635_v45, %v14543_v46  ;;  %v5788_v9 = vmul.f32 %v14543_v46, %v14543_v46 }
 0x26c   :  { %v5637_v6 = vadd.f32 %v5636_v53, %v14537_v43  ;;  %v5931_v60 = vadd.f32 %v5930_v30, %v5788_v9  ;;  %v11696_v22 = vpop.f32.mrb[60].mxu0 }
 0x26d   :  { %v5245_v24 = vpop.f32.mrb[61].mxu0  ;;  %v14561_v46 = vadd.f32 %v11696_v22, %v14127_v58 }
 0x26e   :  { %v5638_v33 = vadd.f32 %v5637_v6, %v14546_v50  ;;  %v5932_v37 = vadd.f32 %v5931_v60, %v5789_v13  ;;  %v14558_v8 = vadd.f32 %v14127_v58, %v5245_v24  ;;  %v11697_v45 = vpop.f32.mrb[62].mxu0 }
 0x26f   :  { %18285 = vst [vmem:[#allocation38_spill] sm:$0xff] %v14561_v46  ;;  %v5248_v55 = vpop.f32.mrb[63].mxu0  ;;  %v14570_v13 = vadd.f32 %v11697_v45, %v14127_v58  ;;  %v5793_v22 = vmul.f32 %v14561_v46, %v14561_v46 }
 0x270   :  { %18284 = vst [vmem:[#allocation37_spill] sm:$0xff] %v14558_v8  ;;  %v5933_v44 = vadd.f32 %v5932_v37, %v5790_v19  ;;  %v5639_v53 = vadd.f32 %v5638_v33, %v14558_v8  ;;  %v5791_v30 = vmul.f32 %v14558_v8, %v14558_v8  ;;  %v14567_v9 = vadd.f32 %v14127_v58, %v5248_v55 }
 0x271   :  { %18287 = vst [vmem:[#allocation40_spill] sm:$0xff] %v14570_v13  ;;  %v5794_v55 = vmul.f32 %v14570_v13, %v14570_v13 }
 0x272   :  { %18286 = vst [vmem:[#allocation39_spill] sm:$0xff] %v14567_v9  ;;  %v5934_v43 = vadd.f32 %v5933_v44, %v5791_v30  ;;  %v5640_v6 = vadd.f32 %v5639_v53, %v14567_v9  ;;  %v5792_v60 = vmul.f32 %v14567_v9, %v14567_v9 }
 0x274   :  { %v5641_v24 = vadd.f32 %v5640_v6, %v14561_v46  ;;  %v5935_v19 = vadd.f32 %v5934_v43, %v5792_v60  ;;  %v11700_v33 = vpop.f32.mrb[64].mxu0 }
 0x275   :  { %v5261_v37 = vpop.f32.mrb[65].mxu0  ;;  %v14585_v9 = vadd.f32 %v11700_v33, %v14127_v58 }
 0x276   :  { %v5642_v44 = vadd.f32 %v5641_v24, %v14570_v13  ;;  %v5936_v45 = vadd.f32 %v5935_v19, %v5793_v22  ;;  %v14582_v30 = vadd.f32 %v14127_v58, %v5261_v37  ;;  %v11701_v53 = vpop.f32.mrb[66].mxu0 }
 0x277   :  { %18289 = vst [vmem:[#allocation42_spill] sm:$0xff] %v14585_v9  ;;  %v5264_v8 = vpop.f32.mrb[67].mxu0  ;;  %v14594_v22 = vadd.f32 %v11701_v53, %v14127_v58  ;;  %v5797_v33 = vmul.f32 %v14585_v9, %v14585_v9 }
 0x278   :  { %18288 = vst [vmem:[#allocation41_spill] sm:$0xff] %v14582_v30  ;;  %v5937_v50 = vadd.f32 %v5936_v45, %v5794_v55  ;;  %v5643_v6 = vadd.f32 %v5642_v44, %v14582_v30  ;;  %v5795_v43 = vmul.f32 %v14582_v30, %v14582_v30  ;;  %v14591_v60 = vadd.f32 %v14127_v58, %v5264_v8 }
 0x279   :  { %18291 = vst [vmem:[#allocation44_spill] sm:$0xff] %v14594_v22  ;;  %v5798_v8 = vmul.f32 %v14594_v22, %v14594_v22 }
 0x27a   :  { %18290 = vst [vmem:[#allocation43_spill] sm:$0xff] %v14591_v60  ;;  %v5938_v46 = vadd.f32 %v5937_v50, %v5795_v43  ;;  %v5644_v24 = vadd.f32 %v5643_v6, %v14591_v60  ;;  %v5796_v19 = vmul.f32 %v14591_v60, %v14591_v60 }
 0x27c   :  { %v5645_v37 = vadd.f32 %v5644_v24, %v14585_v9  ;;  %v5939_v55 = vadd.f32 %v5938_v46, %v5796_v19  ;;  %v11704_v44 = vpop.f32.mrb[68].mxu0 }
 0x27d   :  { %v5277_v45 = vpop.f32.mrb[69].mxu0  ;;  %v14609_v60 = vadd.f32 %v11704_v44, %v14127_v58 }
 0x27e   :  { %v5646_v50 = vadd.f32 %v5645_v37, %v14594_v22  ;;  %v5940_v53 = vadd.f32 %v5939_v55, %v5797_v33  ;;  %v14606_v43 = vadd.f32 %v14127_v58, %v5277_v45  ;;  %v11705_v6 = vpop.f32.mrb[70].mxu0 }
 0x27f   :  { %18293 = vst [vmem:[#allocation46_spill] sm:$0xff] %v14609_v60  ;;  %v5280_v30 = vpop.f32.mrb[71].mxu0  ;;  %v14618_v33 = vadd.f32 %v11705_v6, %v14127_v58  ;;  %v5801_v44 = vmul.f32 %v14609_v60, %v14609_v60 }
 0x280   :  { %18292 = vst [vmem:[#allocation45_spill] sm:$0xff] %v14606_v43  ;;  %v5941_v13 = vadd.f32 %v5940_v53, %v5798_v8  ;;  %v5647_v24 = vadd.f32 %v5646_v50, %v14606_v43  ;;  %v5799_v46 = vmul.f32 %v14606_v43, %v14606_v43  ;;  %v14615_v19 = vadd.f32 %v14127_v58, %v5280_v30 }
 0x281   :  { %18294 = vst [vmem:[#allocation47_spill] sm:$0xff] %v14618_v33  ;;  %v5802_v30 = vmul.f32 %v14618_v33, %v14618_v33 }
 0x282   :  { %v5942_v9 = vadd.f32 %v5941_v13, %v5799_v46  ;;  %v5648_v37 = vadd.f32 %v5647_v24, %v14615_v19  ;;  %v5800_v55 = vmul.f32 %v14615_v19, %v14615_v19 }
 0x284   :  { %v5649_v45 = vadd.f32 %v5648_v37, %v14609_v60  ;;  %v5943_v8 = vadd.f32 %v5942_v9, %v5800_v55  ;;  %v11708_v50 = vpop.f32.mrb[72].mxu0 }
 0x285   :  { %v5293_v53 = vpop.f32.mrb[73].mxu0  ;;  %v14633_v43 = vadd.f32 %v11708_v50, %v14127_v58 }
 0x286   :  { %v5650_v13 = vadd.f32 %v5649_v45, %v14618_v33  ;;  %v5944_v6 = vadd.f32 %v5943_v8, %v5801_v44  ;;  %v14630_v46 = vadd.f32 %v14127_v58, %v5293_v53  ;;  %v11709_v24 = vpop.f32.mrb[74].mxu0 }
 0x287   :  { %18296 = vst [vmem:[#allocation49_spill] sm:$0xff] %v14633_v43  ;;  %v5296_v22 = vpop.f32.mrb[75].mxu0  ;;  %v14642_v44 = vadd.f32 %v11709_v24, %v14127_v58  ;;  %v5805_v50 = vmul.f32 %v14633_v43, %v14633_v43 }
 0x288   :  { %18295 = vst [vmem:[#allocation48_spill] sm:$0xff] %v14630_v46  ;;  %v5945_v52 = vadd.f32 %v5944_v6, %v5802_v30  ;;  %v5651_v37 = vadd.f32 %v5650_v13, %v14630_v46  ;;  %v5803_v9 = vmul.f32 %v14630_v46, %v14630_v46  ;;  %v14639_v55 = vadd.f32 %v14127_v58, %v5296_v22 }
 0x289   :  { %18298 = vst [vmem:[#allocation51_spill] sm:$0xff] %v14642_v44  ;;  %v5806_v22 = vmul.f32 %v14642_v44, %v14642_v44 }
 0x28a   :  { %18297 = vst [vmem:[#allocation50_spill] sm:$0xff] %v14639_v55  ;;  %v5946_v60 = vadd.f32 %v5945_v52, %v5803_v9  ;;  %v5652_v45 = vadd.f32 %v5651_v37, %v14639_v55  ;;  %v5804_v8 = vmul.f32 %v14639_v55, %v14639_v55 }
 0x28c   :  { %v5653_v53 = vadd.f32 %v5652_v45, %v14633_v43  ;;  %v5947_v30 = vadd.f32 %v5946_v60, %v5804_v8  ;;  %v11712_v13 = vpop.f32.mrb[76].mxu0 }
 0x28d   :  { %v5309_v6 = vpop.f32.mrb[77].mxu0  ;;  %v14657_v55 = vadd.f32 %v11712_v13, %v14127_v58 }
 0x28e   :  { %v5654_v52 = vadd.f32 %v5653_v53, %v14642_v44  ;;  %v5948_v24 = vadd.f32 %v5947_v30, %v5805_v50  ;;  %v14654_v9 = vadd.f32 %v14127_v58, %v5309_v6  ;;  %v11713_v37 = vpop.f32.mrb[78].mxu0 }
 0x28f   :  { %18300 = vst [vmem:[#allocation53_spill] sm:$0xff] %v14657_v55  ;;  %v5312_v46 = vpop.f32.mrb[79].mxu0  ;;  %v14666_v50 = vadd.f32 %v11713_v37, %v14127_v58  ;;  %v5809_v13 = vmul.f32 %v14657_v55, %v14657_v55 }
 0x290   :  { %18299 = vst [vmem:[#allocation52_spill] sm:$0xff] %v14654_v9  ;;  %v5949_v33 = vadd.f32 %v5948_v24, %v5806_v22  ;;  %v5655_v45 = vadd.f32 %v5654_v52, %v14654_v9  ;;  %v5807_v60 = vmul.f32 %v14654_v9, %v14654_v9  ;;  %v14663_v8 = vadd.f32 %v14127_v58, %v5312_v46 }
 0x291   :  { %18302 = vst [vmem:[#allocation55_spill] sm:$0xff] %v14666_v50  ;;  %v5810_v46 = vmul.f32 %v14666_v50, %v14666_v50 }
 0x292   :  { %18301 = vst [vmem:[#allocation54_spill] sm:$0xff] %v14663_v8  ;;  %v5950_v43 = vadd.f32 %v5949_v33, %v5807_v60  ;;  %v5656_v53 = vadd.f32 %v5655_v45, %v14663_v8  ;;  %v5808_v30 = vmul.f32 %v14663_v8, %v14663_v8 }
 0x294   :  { %v5657_v6 = vadd.f32 %v5656_v53, %v14657_v55  ;;  %v5951_v22 = vadd.f32 %v5950_v43, %v5808_v30  ;;  %v11716_v52 = vpop.f32.mrb[80].mxu0 }
 0x295   :  { %v5325_v24 = vpop.f32.mrb[81].mxu0  ;;  %v14681_v8 = vadd.f32 %v11716_v52, %v14127_v58 }
 0x296   :  { %v5658_v33 = vadd.f32 %v5657_v6, %v14666_v50  ;;  %v5952_v37 = vadd.f32 %v5951_v22, %v5809_v13  ;;  %v14678_v60 = vadd.f32 %v14127_v58, %v5325_v24  ;;  %v11717_v45 = vpop.f32.mrb[82].mxu0 }
 0x297   :  { %18304 = vst [vmem:[#allocation57_spill] sm:$0xff] %v14681_v8  ;;  %v5328_v9 = vpop.f32.mrb[83].mxu0  ;;  %v14690_v13 = vadd.f32 %v11717_v45, %v14127_v58  ;;  %v5813_v52 = vmul.f32 %v14681_v8, %v14681_v8 }
 0x298   :  { %18303 = vst [vmem:[#allocation56_spill] sm:$0xff] %v14678_v60  ;;  %v5953_v44 = vadd.f32 %v5952_v37, %v5810_v46  ;;  %v5659_v53 = vadd.f32 %v5658_v33, %v14678_v60  ;;  %v5811_v43 = vmul.f32 %v14678_v60, %v14678_v60  ;;  %v14687_v30 = vadd.f32 %v14127_v58, %v5328_v9 }
 0x299   :  { %18306 = vst [vmem:[#allocation59_spill] sm:$0xff] %v14690_v13  ;;  %v5814_v9 = vmul.f32 %v14690_v13, %v14690_v13 }
 0x29a   :  { %18305 = vst [vmem:[#allocation58_spill] sm:$0xff] %v14687_v30  ;;  %v5954_v55 = vadd.f32 %v5953_v44, %v5811_v43  ;;  %v5660_v6 = vadd.f32 %v5659_v53, %v14687_v30  ;;  %v5812_v22 = vmul.f32 %v14687_v30, %v14687_v30 }
 0x29c   :  { %v5661_v24 = vadd.f32 %v5660_v6, %v14681_v8  ;;  %v5955_v46 = vadd.f32 %v5954_v55, %v5812_v22  ;;  %v11720_v33 = vpop.f32.mrb[84].mxu0 }
 0x29d   :  { %v5341_v37 = vpop.f32.mrb[85].mxu0  ;;  %v14705_v30 = vadd.f32 %v11720_v33, %v14127_v58 }
 0x29e   :  { %v5956_v44 = vadd.f32 %v5955_v46, %v5813_v52  ;;  %v14701_v45 = vadd.f32 %v14127_v58, %v5341_v37  ;;  %v5662_v53 = vadd.f32 %v5661_v24, %v14690_v13  ;;  %v11721_v43 = vpop.f32.mrb[86].mxu0 }
 0x29f   :  { %18308 = vst [vmem:[#allocation61_spill] sm:$0xff] %v14705_v30  ;;  %v5344_v60 = vpop.f32.mrb[87].mxu0  ;;  %v14714_v46 = vadd.f32 %v11721_v43, %v14127_v58  ;;  %v5817_v37 = vmul.f32 %v14705_v30, %v14705_v30 }
 0x2a0   :  { %18307 = vst [vmem:[#allocation60_spill] sm:$0xff] %v14701_v45  ;;  %v5663_v50 = vadd.f32 %v5662_v53, %v14701_v45  ;;  %v5815_v55 = vmul.f32 %v14701_v45, %v14701_v45  ;;  %v5957_v6 = vadd.f32 %v5956_v44, %v5814_v9  ;;  %v14711_v22 = vadd.f32 %v14127_v58, %v5344_v60 }
 0x2a1   :  { %18310 = vst [vmem:[#allocation63_spill] sm:$0xff] %v14714_v46  ;;  %v5818_v60 = vmul.f32 %v14714_v46, %v14714_v46 }
 0x2a2   :  { %18309 = vst [vmem:[#allocation62_spill] sm:$0xff] %v14711_v22  ;;  %v5958_v52 = vadd.f32 %v5957_v6, %v5815_v55  ;;  %v5664_v24 = vadd.f32 %v5663_v50, %v14711_v22  ;;  %v5816_v33 = vmul.f32 %v14711_v22, %v14711_v22 }
 0x2a4   :  { %v5665_v53 = vadd.f32 %v5664_v24, %v14705_v30  ;;  %v5959_v13 = vadd.f32 %v5958_v52, %v5816_v33  ;;  %v11724_v45 = vpop.f32.mrb[88].mxu0 }
 0x2a5   :  { %v5357_v9 = vpop.f32.mrb[89].mxu0  ;;  %v14729_v6 = vadd.f32 %v11724_v45, %v14127_v58 }
 0x2a6   :  { %v5960_v44 = vadd.f32 %v5959_v13, %v5817_v37  ;;  %v14725_v43 = vadd.f32 %v14127_v58, %v5357_v9  ;;  %v5666_v50 = vadd.f32 %v5665_v53, %v14714_v46  ;;  %v11725_v55 = vpop.f32.mrb[90].mxu0 }
 0x2a7   :  { %18312 = vst [vmem:[#allocation65_spill] sm:$0xff] %v14729_v6  ;;  %v5360_v22 = vpop.f32.mrb[91].mxu0  ;;  %v14738_v37 = vadd.f32 %v11725_v55, %v14127_v58  ;;  %v5821_v9 = vmul.f32 %v14729_v6, %v14729_v6 }
 0x2a8   :  { %18311 = vst [vmem:[#allocation64_spill] sm:$0xff] %v14725_v43  ;;  %v5667_v8 = vadd.f32 %v5666_v50, %v14725_v43  ;;  %v5819_v52 = vmul.f32 %v14725_v43, %v14725_v43  ;;  %v5961_v24 = vadd.f32 %v5960_v44, %v5818_v60  ;;  %v14735_v33 = vadd.f32 %v14127_v58, %v5360_v22 }
 0x2a9   :  { %18314 = vst [vmem:[#allocation67_spill] sm:$0xff] %v14738_v37  ;;  %v5822_v22 = vmul.f32 %v14738_v37, %v14738_v37 }
 0x2aa   :  { %18313 = vst [vmem:[#allocation66_spill] sm:$0xff] %v14735_v33  ;;  %v5962_v13 = vadd.f32 %v5961_v24, %v5819_v52  ;;  %v5668_v53 = vadd.f32 %v5667_v8, %v14735_v33  ;;  %v5820_v45 = vmul.f32 %v14735_v33, %v14735_v33 }
 0x2ac   :  { %v5669_v50 = vadd.f32 %v5668_v53, %v14729_v6  ;;  %v5963_v46 = vadd.f32 %v5962_v13, %v5820_v45  ;;  %v11728_v43 = vpop.f32.mrb[92].mxu0 }
 0x2ad   :  { %v5373_v60 = vpop.f32.mrb[93].mxu0  ;;  %v14753_v24 = vadd.f32 %v11728_v43, %v14127_v58 }
 0x2ae   :  { %v5964_v44 = vadd.f32 %v5963_v46, %v5821_v9  ;;  %v14749_v55 = vadd.f32 %v14127_v58, %v5373_v60  ;;  %v5670_v8 = vadd.f32 %v5669_v50, %v14738_v37  ;;  %v11729_v52 = vpop.f32.mrb[94].mxu0 }
 0x2af   :  { %18316 = vst [vmem:[#allocation69_spill] sm:$0xff] %v14753_v24  ;;  %v5376_v33 = vpop.f32.mrb[95].mxu0  ;;  %v14762_v9 = vadd.f32 %v11729_v52, %v14127_v58  ;;  %v5825_v60 = vmul.f32 %v14753_v24, %v14753_v24 }
 0x2b0   :  { %18315 = vst [vmem:[#allocation68_spill] sm:$0xff] %v14749_v55  ;;  %v5671_v30 = vadd.f32 %v5670_v8, %v14749_v55  ;;  %v5823_v13 = vmul.f32 %v14749_v55, %v14749_v55  ;;  %v5965_v53 = vadd.f32 %v5964_v44, %v5822_v22  ;;  %v14759_v45 = vadd.f32 %v14127_v58, %v5376_v33  ;;  %v14775_v58 = vld [vmem:[%s18044_s2] ss:$0 sm:$0xff] }
 0x2b1   :  { %18318 = vst [vmem:[#allocation71_spill] sm:$0xff] %v14762_v9  ;;  %v5826_v33 = vmul.f32 %v14762_v9, %v14762_v9 }
 0x2b2   :  { %18317 = vst [vmem:[#allocation70_spill] sm:$0xff] %v14759_v45  ;;  %v5966_v46 = vadd.f32 %v5965_v53, %v5823_v13  ;;  %v5672_v50 = vadd.f32 %v5671_v30, %v14759_v45  ;;  %v5824_v43 = vmul.f32 %v14759_v45, %v14759_v45 }
 0x2b4   :  { %v5673_v8 = vadd.f32 %v5672_v50, %v14753_v24  ;;  %v5967_v37 = vadd.f32 %v5966_v46, %v5824_v43  ;;  %v11732_v55 = vpop.f32.mrb[96].mxu0 }
 0x2b5   :  { %v5389_v22 = vpop.f32.mrb[97].mxu0  ;;  %v14782_v53 = vadd.f32 %v14775_v58, %v11732_v55 }
 0x2b6   :  { %v5968_v44 = vadd.f32 %v5967_v37, %v5825_v60  ;;  %v14778_v30 = vadd.f32 %v14775_v58, %v5389_v22  ;;  %v5674_v52 = vadd.f32 %v5673_v8, %v14762_v9  ;;  %v11733_v13 = vpop.f32.mrb[98].mxu0 }
 0x2b7   :  { %18320 = vst [vmem:[#allocation73_spill] sm:$0xff] %v14782_v53  ;;  %v5392_v46 = vpop.f32.mrb[99].mxu0  ;;  %v14791_v22 = vadd.f32 %v14775_v58, %v11733_v13  ;;  %v5829_v9 = vmul.f32 %v14782_v53, %v14782_v53 }
 0x2b8   :  { %18319 = vst [vmem:[#allocation72_spill] sm:$0xff] %v14778_v30  ;;  %v5675_v50 = vadd.f32 %v5674_v52, %v14778_v30  ;;  %v5827_v37 = vmul.f32 %v14778_v30, %v14778_v30  ;;  %v5969_v43 = vadd.f32 %v5968_v44, %v5826_v33  ;;  %v14788_v60 = vadd.f32 %v14775_v58, %v5392_v46 }
 0x2b9   :  { %18322 = vst [vmem:[#allocation75_spill] sm:$0xff] %v14791_v22  ;;  %v5830_v44 = vmul.f32 %v14791_v22, %v14791_v22 }
 0x2ba   :  { %18321 = vst [vmem:[#allocation74_spill] sm:$0xff] %v14788_v60  ;;  %v5970_v24 = vadd.f32 %v5969_v43, %v5827_v37  ;;  %v5676_v8 = vadd.f32 %v5675_v50, %v14788_v60  ;;  %v5828_v55 = vmul.f32 %v14788_v60, %v14788_v60 }
 0x2bc   :  { %v5677_v52 = vadd.f32 %v5676_v8, %v14782_v53  ;;  %v5971_v45 = vadd.f32 %v5970_v24, %v5828_v55  ;;  %v11736_v30 = vpop.f32.mrb[100].mxu0 }
 0x2bd   :  { %v5405_v33 = vpop.f32.mrb[101].mxu0  ;;  %v14806_v43 = vadd.f32 %v14775_v58, %v11736_v30 }
 0x2be   :  { %v5972_v46 = vadd.f32 %v5971_v45, %v5829_v9  ;;  %v14802_v13 = vadd.f32 %v14775_v58, %v5405_v33  ;;  %v5678_v50 = vadd.f32 %v5677_v52, %v14791_v22  ;;  %v11737_v37 = vpop.f32.mrb[102].mxu0 }
 0x2bf   :  { %18324 = vst [vmem:[#allocation77_spill] sm:$0xff] %v14806_v43  ;;  %v5408_v60 = vpop.f32.mrb[103].mxu0  ;;  %v14815_v9 = vadd.f32 %v14775_v58, %v11737_v37  ;;  %v5833_v33 = vmul.f32 %v14806_v43, %v14806_v43 }
 0x2c0   :  { %18323 = vst [vmem:[#allocation76_spill] sm:$0xff] %v14802_v13  ;;  %v5679_v6 = vadd.f32 %v5678_v50, %v14802_v13  ;;  %v5831_v24 = vmul.f32 %v14802_v13, %v14802_v13  ;;  %v5973_v8 = vadd.f32 %v5972_v46, %v5830_v44  ;;  %v14812_v55 = vadd.f32 %v14775_v58, %v5408_v60 }
 0x2c1   :  { %18326 = vst [vmem:[#allocation79_spill] sm:$0xff] %v14815_v9  ;;  %v5834_v60 = vmul.f32 %v14815_v9, %v14815_v9 }
 0x2c2   :  { %18325 = vst [vmem:[#allocation78_spill] sm:$0xff] %v14812_v55  ;;  %v5974_v45 = vadd.f32 %v5973_v8, %v5831_v24  ;;  %v5680_v52 = vadd.f32 %v5679_v6, %v14812_v55  ;;  %v5832_v30 = vmul.f32 %v14812_v55, %v14812_v55 }
 0x2c4   :  { %v5681_v50 = vadd.f32 %v5680_v52, %v14806_v43  ;;  %v5975_v22 = vadd.f32 %v5974_v45, %v5832_v30  ;;  %v11740_v13 = vpop.f32.mrb[104].mxu0 }
 0x2c5   :  { %v5421_v44 = vpop.f32.mrb[105].mxu0  ;;  %v14830_v8 = vadd.f32 %v14775_v58, %v11740_v13 }
 0x2c6   :  { %v5976_v46 = vadd.f32 %v5975_v22, %v5833_v33  ;;  %v14826_v37 = vadd.f32 %v14775_v58, %v5421_v44  ;;  %v5682_v6 = vadd.f32 %v5681_v50, %v14815_v9  ;;  %v11741_v24 = vpop.f32.mrb[106].mxu0 }
 0x2c7   :  { %18328 = vst [vmem:[#allocation81_spill] sm:$0xff] %v14830_v8  ;;  %v5424_v55 = vpop.f32.mrb[107].mxu0  ;;  %v14839_v33 = vadd.f32 %v14775_v58, %v11741_v24  ;;  %v5837_v44 = vmul.f32 %v14830_v8, %v14830_v8 }
 0x2c8   :  { %18327 = vst [vmem:[#allocation80_spill] sm:$0xff] %v14826_v37  ;;  %v5683_v53 = vadd.f32 %v5682_v6, %v14826_v37  ;;  %v5835_v45 = vmul.f32 %v14826_v37, %v14826_v37  ;;  %v5977_v52 = vadd.f32 %v5976_v46, %v5834_v60  ;;  %v14836_v30 = vadd.f32 %v14775_v58, %v5424_v55 }
 0x2c9   :  { %18329 = vst [vmem:[#allocation82_spill] sm:$0xff] %v14839_v33  ;;  %v5838_v55 = vmul.f32 %v14839_v33, %v14839_v33 }
 0x2ca   :  { %v5978_v22 = vadd.f32 %v5977_v52, %v5835_v45  ;;  %v5684_v50 = vadd.f32 %v5683_v53, %v14836_v30  ;;  %v5836_v13 = vmul.f32 %v14836_v30, %v14836_v30 }
 0x2cc   :  { %v5685_v6 = vadd.f32 %v5684_v50, %v14830_v8  ;;  %v5979_v9 = vadd.f32 %v5978_v22, %v5836_v13  ;;  %v11744_v37 = vpop.f32.mrb[108].mxu0 }
 0x2cd   :  { %v5437_v60 = vpop.f32.mrb[109].mxu0  ;;  %v14854_v52 = vadd.f32 %v14775_v58, %v11744_v37 }
 0x2ce   :  { %v5980_v46 = vadd.f32 %v5979_v9, %v5837_v44  ;;  %v14850_v24 = vadd.f32 %v14775_v58, %v5437_v60  ;;  %v5686_v53 = vadd.f32 %v5685_v6, %v14839_v33  ;;  %v11745_v45 = vpop.f32.mrb[110].mxu0 }
 0x2cf   :  { %18331 = vst [vmem:[#allocation84_spill] sm:$0xff] %v14854_v52  ;;  %v5440_v43 = vpop.f32.mrb[111].mxu0  ;;  %v14863_v44 = vadd.f32 %v14775_v58, %v11745_v45  ;;  %v5841_v60 = vmul.f32 %v14854_v52, %v14854_v52 }
 0x2d0   :  { %18330 = vst [vmem:[#allocation83_spill] sm:$0xff] %v14850_v24  ;;  %v5687_v21 = vadd.f32 %v5686_v53, %v14850_v24  ;;  %v5839_v22 = vmul.f32 %v14850_v24, %v14850_v24  ;;  %v5981_v50 = vadd.f32 %v5980_v46, %v5838_v55  ;;  %v14860_v13 = vadd.f32 %v14775_v58, %v5440_v43 }
 0x2d1   :  { %18333 = vst [vmem:[#allocation86_spill] sm:$0xff] %v14863_v44  ;;  %v5842_v43 = vmul.f32 %v14863_v44, %v14863_v44 }
 0x2d2   :  { %18332 = vst [vmem:[#allocation85_spill] sm:$0xff] %v14860_v13  ;;  %v5982_v9 = vadd.f32 %v5981_v50, %v5839_v22  ;;  %v5688_v6 = vadd.f32 %v5687_v21, %v14860_v13  ;;  %v5840_v37 = vmul.f32 %v14860_v13, %v14860_v13 }
 0x2d4   :  { %v5689_v53 = vadd.f32 %v5688_v6, %v14854_v52  ;;  %v5983_v33 = vadd.f32 %v5982_v9, %v5840_v37  ;;  %v11748_v24 = vpop.f32.mrb[112].mxu0 }
 0x2d5   :  { %v5453_v55 = vpop.f32.mrb[113].mxu0  ;;  %v14878_v50 = vadd.f32 %v14775_v58, %v11748_v24 }
 0x2d6   :  { %v5984_v46 = vadd.f32 %v5983_v33, %v5841_v60  ;;  %v14874_v45 = vadd.f32 %v14775_v58, %v5453_v55  ;;  %v5690_v21 = vadd.f32 %v5689_v53, %v14863_v44  ;;  %v11749_v22 = vpop.f32.mrb[114].mxu0 }
 0x2d7   :  { %18335 = vst [vmem:[#allocation88_spill] sm:$0xff] %v14878_v50  ;;  %v5456_v13 = vpop.f32.mrb[115].mxu0  ;;  %v14887_v60 = vadd.f32 %v14775_v58, %v11749_v22  ;;  %v5845_v55 = vmul.f32 %v14878_v50, %v14878_v50 }
 0x2d8   :  { %18334 = vst [vmem:[#allocation87_spill] sm:$0xff] %v14874_v45  ;;  %v5691_v8 = vadd.f32 %v5690_v21, %v14874_v45  ;;  %v5843_v9 = vmul.f32 %v14874_v45, %v14874_v45  ;;  %v5985_v6 = vadd.f32 %v5984_v46, %v5842_v43  ;;  %v14884_v37 = vadd.f32 %v14775_v58, %v5456_v13 }
 0x2d9   :  { %18337 = vst [vmem:[#allocation90_spill] sm:$0xff] %v14887_v60  ;;  %v5846_v13 = vmul.f32 %v14887_v60, %v14887_v60 }
 0x2da   :  { %18336 = vst [vmem:[#allocation89_spill] sm:$0xff] %v14884_v37  ;;  %v5986_v33 = vadd.f32 %v5985_v6, %v5843_v9  ;;  %v5692_v53 = vadd.f32 %v5691_v8, %v14884_v37  ;;  %v5844_v24 = vmul.f32 %v14884_v37, %v14884_v37 }
 0x2dc   :  { %v5693_v21 = vadd.f32 %v5692_v53, %v14878_v50  ;;  %v5987_v44 = vadd.f32 %v5986_v33, %v5844_v24  ;;  %v11752_v45 = vpop.f32.mrb[116].mxu0 }
 0x2dd   :  { %v5469_v43 = vpop.f32.mrb[117].mxu0  ;;  %v14902_v6 = vadd.f32 %v14775_v58, %v11752_v45 }
 0x2de   :  { %v5988_v46 = vadd.f32 %v5987_v44, %v5845_v55  ;;  %v14898_v22 = vadd.f32 %v14775_v58, %v5469_v43  ;;  %v5694_v8 = vadd.f32 %v5693_v21, %v14887_v60  ;;  %v11753_v9 = vpop.f32.mrb[118].mxu0 }
 0x2df   :  { %18339 = vst [vmem:[#allocation92_spill] sm:$0xff] %v14902_v6  ;;  %v5472_v37 = vpop.f32.mrb[119].mxu0  ;;  %v14911_v55 = vadd.f32 %v14775_v58, %v11753_v9  ;;  %v5849_v43 = vmul.f32 %v14902_v6, %v14902_v6 }
 0x2e0   :  { %18338 = vst [vmem:[#allocation91_spill] sm:$0xff] %v14898_v22  ;;  %v5695_v52 = vadd.f32 %v5694_v8, %v14898_v22  ;;  %v5847_v33 = vmul.f32 %v14898_v22, %v14898_v22  ;;  %v5989_v53 = vadd.f32 %v5988_v46, %v5846_v13  ;;  %v14908_v24 = vadd.f32 %v14775_v58, %v5472_v37 }
 0x2e1   :  { %18341 = vst [vmem:[#allocation94_spill] sm:$0xff] %v14911_v55  ;;  %v5850_v37 = vmul.f32 %v14911_v55, %v14911_v55 }
 0x2e2   :  { %18340 = vst [vmem:[#allocation93_spill] sm:$0xff] %v14908_v24  ;;  %v5990_v44 = vadd.f32 %v5989_v53, %v5847_v33  ;;  %v5696_v21 = vadd.f32 %v5695_v52, %v14908_v24  ;;  %v5848_v45 = vmul.f32 %v14908_v24, %v14908_v24 }
 0x2e4   :  { %v5697_v8 = vadd.f32 %v5696_v21, %v14902_v6  ;;  %v5991_v60 = vadd.f32 %v5990_v44, %v5848_v45  ;;  %v11756_v22 = vpop.f32.mrb[120].mxu0 }
 0x2e5   :  { %v5485_v13 = vpop.f32.mrb[121].mxu0  ;;  %v14926_v53 = vadd.f32 %v14775_v58, %v11756_v22 }
 0x2e6   :  { %v5992_v46 = vadd.f32 %v5991_v60, %v5849_v43  ;;  %v14922_v9 = vadd.f32 %v14775_v58, %v5485_v13  ;;  %v5698_v52 = vadd.f32 %v5697_v8, %v14911_v55  ;;  %v11757_v33 = vpop.f32.mrb[122].mxu0 }
 0x2e7   :  { %18343 = vst [vmem:[#allocation96_spill] sm:$0xff] %v14926_v53  ;;  %v5488_v24 = vpop.f32.mrb[123].mxu0  ;;  %v14935_v43 = vadd.f32 %v14775_v58, %v11757_v33  ;;  %v5853_v13 = vmul.f32 %v14926_v53, %v14926_v53 }
 0x2e8   :  { %18342 = vst [vmem:[#allocation95_spill] sm:$0xff] %v14922_v9  ;;  %v5699_v50 = vadd.f32 %v5698_v52, %v14922_v9  ;;  %v5851_v44 = vmul.f32 %v14922_v9, %v14922_v9  ;;  %v5993_v21 = vadd.f32 %v5992_v46, %v5850_v37  ;;  %v14932_v45 = vadd.f32 %v14775_v58, %v5488_v24 }
 0x2e9   :  { %18345 = vst [vmem:[#allocation98_spill] sm:$0xff] %v14935_v43  ;;  %v5854_v24 = vmul.f32 %v14935_v43, %v14935_v43 }
 0x2ea   :  { %18344 = vst [vmem:[#allocation97_spill] sm:$0xff] %v14932_v45  ;;  %v5994_v60 = vadd.f32 %v5993_v21, %v5851_v44  ;;  %v5700_v8 = vadd.f32 %v5699_v50, %v14932_v45  ;;  %v5852_v22 = vmul.f32 %v14932_v45, %v14932_v45 }
 0x2ec   :  { %v5701_v52 = vadd.f32 %v5700_v8, %v14926_v53  ;;  %v5995_v55 = vadd.f32 %v5994_v60, %v5852_v22  ;;  %v11760_v9 = vpop.f32.mrb[124].mxu0 }
 0x2ed   :  { %v5501_v37 = vpop.f32.mrb[125].mxu0  ;;  %v14950_v21 = vadd.f32 %v14775_v58, %v11760_v9 }
 0x2ee   :  { %v5996_v46 = vadd.f32 %v5995_v55, %v5853_v13  ;;  %v14946_v33 = vadd.f32 %v14775_v58, %v5501_v37  ;;  %v5702_v50 = vadd.f32 %v5701_v52, %v14935_v43  ;;  %v11761_v44 = vpop.f32.mrb[126].mxu0 }
 0x2ef   :  { %18347 = vst [vmem:[#allocation100_spill] sm:$0xff] %v14950_v21  ;;  %v5504_v45 = vpop.f32.mrb[127].mxu0  ;;  %v14959_v13 = vadd.f32 %v14775_v58, %v11761_v44  ;;  %v5857_v37 = vmul.f32 %v14950_v21, %v14950_v21 }
 0x2f0   :  { %18346 = vst [vmem:[#allocation99_spill] sm:$0xff] %v14946_v33  ;;  %v5703_v6 = vadd.f32 %v5702_v50, %v14946_v33  ;;  %v5855_v60 = vmul.f32 %v14946_v33, %v14946_v33  ;;  %v5997_v8 = vadd.f32 %v5996_v46, %v5854_v24  ;;  %v14956_v22 = vadd.f32 %v14775_v58, %v5504_v45 }
 0x2f1   :  { %18349 = vst [vmem:[#allocation102_spill] sm:$0xff] %v14959_v13  ;;  %v5858_v45 = vmul.f32 %v14959_v13, %v14959_v13 }
 0x2f2   :  { %18348 = vst [vmem:[#allocation101_spill] sm:$0xff] %v14956_v22  ;;  %v5998_v55 = vadd.f32 %v5997_v8, %v5855_v60  ;;  %v5704_v52 = vadd.f32 %v5703_v6, %v14956_v22  ;;  %v5856_v9 = vmul.f32 %v14956_v22, %v14956_v22 }
 0x2f4   :  { %v5705_v50 = vadd.f32 %v5704_v52, %v14950_v21  ;;  %v5999_v43 = vadd.f32 %v5998_v55, %v5856_v9  ;;  %v11764_v33 = vpop.f32.mrb[128].mxu0 }
 0x2f5   :  { %v5517_v24 = vpop.f32.mrb[129].mxu0  ;;  %v14974_v8 = vadd.f32 %v14775_v58, %v11764_v33 }
 0x2f6   :  { %v6000_v46 = vadd.f32 %v5999_v43, %v5857_v37  ;;  %v14970_v44 = vadd.f32 %v14775_v58, %v5517_v24  ;;  %v5706_v6 = vadd.f32 %v5705_v50, %v14959_v13  ;;  %v11765_v60 = vpop.f32.mrb[130].mxu0 }
 0x2f7   :  { %18351 = vst [vmem:[#allocation104_spill] sm:$0xff] %v14974_v8  ;;  %v5520_v22 = vpop.f32.mrb[131].mxu0  ;;  %v14983_v37 = vadd.f32 %v14775_v58, %v11765_v60  ;;  %v5861_v24 = vmul.f32 %v14974_v8, %v14974_v8 }
 0x2f8   :  { %18350 = vst [vmem:[#allocation103_spill] sm:$0xff] %v14970_v44  ;;  %v5707_v53 = vadd.f32 %v5706_v6, %v14970_v44  ;;  %v5859_v55 = vmul.f32 %v14970_v44, %v14970_v44  ;;  %v6001_v52 = vadd.f32 %v6000_v46, %v5858_v45  ;;  %v14980_v9 = vadd.f32 %v14775_v58, %v5520_v22 }
 0x2f9   :  { %18353 = vst [vmem:[#allocation106_spill] sm:$0xff] %v14983_v37  ;;  %v5862_v22 = vmul.f32 %v14983_v37, %v14983_v37 }
 0x2fa   :  { %18352 = vst [vmem:[#allocation105_spill] sm:$0xff] %v14980_v9  ;;  %v6002_v43 = vadd.f32 %v6001_v52, %v5859_v55  ;;  %v5708_v50 = vadd.f32 %v5707_v53, %v14980_v9  ;;  %v5860_v33 = vmul.f32 %v14980_v9, %v14980_v9 }
 0x2fc   :  { %v5709_v6 = vadd.f32 %v5708_v50, %v14974_v8  ;;  %v6003_v13 = vadd.f32 %v6002_v43, %v5860_v33  ;;  %v11768_v44 = vpop.f32.mrb[132].mxu0 }
 0x2fd   :  { %v5533_v45 = vpop.f32.mrb[133].mxu0  ;;  %v14998_v52 = vadd.f32 %v14775_v58, %v11768_v44 }
 0x2fe   :  { %v6004_v46 = vadd.f32 %v6003_v13, %v5861_v24  ;;  %v14994_v60 = vadd.f32 %v14775_v58, %v5533_v45  ;;  %v5710_v53 = vadd.f32 %v5709_v6, %v14983_v37  ;;  %v11769_v55 = vpop.f32.mrb[134].mxu0 }
 0x2ff   :  { %18355 = vst [vmem:[#allocation108_spill] sm:$0xff] %v14998_v52  ;;  %v5536_v9 = vpop.f32.mrb[135].mxu0  ;;  %v15007_v24 = vadd.f32 %v14775_v58, %v11769_v55  ;;  %v5865_v45 = vmul.f32 %v14998_v52, %v14998_v52 }
 0x300   :  { %18354 = vst [vmem:[#allocation107_spill] sm:$0xff] %v14994_v60  ;;  %v5711_v21 = vadd.f32 %v5710_v53, %v14994_v60  ;;  %v5863_v43 = vmul.f32 %v14994_v60, %v14994_v60  ;;  %v6005_v50 = vadd.f32 %v6004_v46, %v5862_v22  ;;  %v15004_v33 = vadd.f32 %v14775_v58, %v5536_v9 }
 0x301   :  { %18357 = vst [vmem:[#allocation110_spill] sm:$0xff] %v15007_v24  ;;  %v5866_v9 = vmul.f32 %v15007_v24, %v15007_v24 }
 0x302   :  { %18356 = vst [vmem:[#allocation109_spill] sm:$0xff] %v15004_v33  ;;  %v6006_v13 = vadd.f32 %v6005_v50, %v5863_v43  ;;  %v5712_v6 = vadd.f32 %v5711_v21, %v15004_v33  ;;  %v5864_v44 = vmul.f32 %v15004_v33, %v15004_v33 }
 0x304   :  { %v5713_v53 = vadd.f32 %v5712_v6, %v14998_v52  ;;  %v6007_v37 = vadd.f32 %v6006_v13, %v5864_v44  ;;  %v11772_v60 = vpop.f32.mrb[136].mxu0 }
 0x305   :  { %v5549_v22 = vpop.f32.mrb[137].mxu0  ;;  %v15022_v50 = vadd.f32 %v14775_v58, %v11772_v60 }
 0x306   :  { %v6008_v46 = vadd.f32 %v6007_v37, %v5865_v45  ;;  %v15018_v55 = vadd.f32 %v14775_v58, %v5549_v22  ;;  %v5714_v21 = vadd.f32 %v5713_v53, %v15007_v24  ;;  %v11773_v43 = vpop.f32.mrb[138].mxu0 }
 0x307   :  { %18359 = vst [vmem:[#allocation112_spill] sm:$0xff] %v15022_v50  ;;  %v5552_v33 = vpop.f32.mrb[139].mxu0  ;;  %v15031_v45 = vadd.f32 %v14775_v58, %v11773_v43  ;;  %v5869_v22 = vmul.f32 %v15022_v50, %v15022_v50 }
 0x308   :  { %18358 = vst [vmem:[#allocation111_spill] sm:$0xff] %v15018_v55  ;;  %v5715_v8 = vadd.f32 %v5714_v21, %v15018_v55  ;;  %v5867_v13 = vmul.f32 %v15018_v55, %v15018_v55  ;;  %v6009_v6 = vadd.f32 %v6008_v46, %v5866_v9  ;;  %v15028_v44 = vadd.f32 %v14775_v58, %v5552_v33 }
 0x309   :  { %18361 = vst [vmem:[#allocation114_spill] sm:$0xff] %v15031_v45  ;;  %v5870_v33 = vmul.f32 %v15031_v45, %v15031_v45 }
 0x30a   :  { %18360 = vst [vmem:[#allocation113_spill] sm:$0xff] %v15028_v44  ;;  %v6010_v37 = vadd.f32 %v6009_v6, %v5867_v13  ;;  %v5716_v53 = vadd.f32 %v5715_v8, %v15028_v44  ;;  %v5868_v60 = vmul.f32 %v15028_v44, %v15028_v44 }
 0x30c   :  { %v5717_v21 = vadd.f32 %v5716_v53, %v15022_v50  ;;  %v6011_v24 = vadd.f32 %v6010_v37, %v5868_v60  ;;  %v11776_v55 = vpop.f32.mrb[140].mxu0 }
 0x30d   :  { %v5565_v9 = vpop.f32.mrb[141].mxu0  ;;  %v15046_v6 = vadd.f32 %v14775_v58, %v11776_v55 }
 0x30e   :  { %v6012_v46 = vadd.f32 %v6011_v24, %v5869_v22  ;;  %v15042_v43 = vadd.f32 %v14775_v58, %v5565_v9  ;;  %v5718_v8 = vadd.f32 %v5717_v21, %v15031_v45  ;;  %v11777_v13 = vpop.f32.mrb[142].mxu0 }
 0x30f   :  { %18363 = vst [vmem:[#allocation116_spill] sm:$0xff] %v15046_v6  ;;  %v5568_v44 = vpop.f32.mrb[143].mxu0  ;;  %v15053_v24 = vadd.f32 %v14775_v58, %v11777_v13  ;;  %v5873_v21 = vmul.f32 %v15046_v6, %v15046_v6 }
 0x310   :  { %18362 = vst [vmem:[#allocation115_spill] sm:$0xff] %v15042_v43  ;;  %v5719_v52 = vadd.f32 %v5718_v8, %v15042_v43  ;;  %v5871_v37 = vmul.f32 %v15042_v43, %v15042_v43  ;;  %v6013_v53 = vadd.f32 %v6012_v46, %v5870_v33  ;;  %v5569_v60 = vadd.f32 %v14775_v58, %v5568_v44 }
 0x311   :  { %v5874_v8 = vmul.f32 %v15053_v24, %v15053_v24 }
 0x312   :  { %v6014_v50 = vadd.f32 %v6013_v53, %v5871_v37  ;;  %v5720_v22 = vadd.f32 %v5719_v52, %v5569_v60  ;;  %v5872_v9 = vmul.f32 %v5569_v60, %v5569_v60 }
 0x314   :  { %v5721_v55 = vadd.f32 %v5720_v22, %v15046_v6  ;;  %v6015_v45 = vadd.f32 %v6014_v50, %v5872_v9 }
 0x316   :  { %v5722_v43 = vadd.f32 %v5721_v55, %v15053_v24  ;;  %v6016_v33 = vadd.f32 %v6015_v45, %v5873_v21  ;;  %v6035_v45 = vlaneseq }
 0x318   :  { %v5723_v46 = vrot.slane %v5722_v43, 4  ;;  %v6017_v44 = vadd.f32 %v6016_v33, %v5874_v8  ;;  %v15061_v21 = vshrl.u32 %v6035_v45, 7 }
 0x31a   :  { %v5724_v37 = vadd.f32 %v5723_v46, %v5722_v43  ;;  %v6018_v53 = vrot.slane %v6017_v44, 4  ;;  %18364 = vst [vmem:[#allocation117_spill] sm:$0xff] %v15061_v21  ;;  %v6030_v43 = vld [vmem:[%s18045_s3] sm:$0x1]  ;;  %v15067_v8 = vsub.s32 0, %v15061_v21  ;;  %v18396_v21 = vld [vmem:[#allocation33_spill] sm:$0xff] }
 0x31b   :  { %s12462_s3 = smov 20  }
 0x31c   :  { %v5725_v58 = vrot.slane %v5724_v37, 2  ;;  %v6019_v13 = vadd.f32 %v6018_v53, %v6017_v44  ;;  %18365 = vst [vmem:[#allocation118_spill] sm:$0xff] %v15067_v8 }
 0x31e   :  { %v5726_v52 = vadd.f32 %v5725_v58, %v5724_v37  ;;  %v6020_v0 = vrot.slane %v6019_v13, 2 }
 0x320   :  { %v5727_v16 = vrot.slane %v5726_v52, 1  ;;  %v6021_v59 = vadd.f32 %v6020_v0, %v6019_v13 }
 0x322   :  { %v5728_v32 = vadd.f32 %v5727_v16, %v5726_v52  ;;  %v6022_v18 = vrot.slane %v6021_v59, 1 }
 0x324   :  { %v5730_v22 = vmul.f32 0.00086805556, %v5728_v32  ;;  %v6023_v50 = vadd.f32 %v6022_v18, %v6021_v59  ;;  %v6032_v18 = vld [vmem:[%s18046_s4] sm:$0x1]  ;;  %s12464_s4 = smov 40  }
 0x326   :  { %v6024_v9 = vmul.f32 0.00086805556, %v6023_v50  ;;  %v6025_v6 = vmul.f32 %v5730_v22, %v5730_v22 }
 0x328   :  { %v6026_v26 = vsub.f32 %v6024_v9, %v6025_v6 }
 0x32a   :  { %v6027_v15 = vmax.f32 %v6026_v26, 0.0 }
 0x32c   :  { %v6028_v55 = vadd.f32 1e-05, %v6027_v15 }
 0x32e   :  { %12389 = vrsqrt.f32 %v6028_v55 }
 0x338   :  { %v12390_v0 = vpop.eup %12389 }
 0x339   :  { %v6031_v16 = vmul.f32 %v12390_v0, %v6030_v43 }
 0x33b   :  { %v6033_v32 = vmul.f32 %v6031_v16, %v5730_v22  ;;  %v15073_v15 = vrot.slane %v6031_v16, %v15067_v8  ;;  %v18366_v16 = vld [vmem:[#allocation13_spill] sm:$0xff] }
 0x33d   :  { %v6034_v26 = vsub.f32 %v6032_v18, %v6033_v32  ;;  %v6072_v59 = vmul.f32 %v15073_v15, %v14398_v48  ;;  %v6108_v6 = vmul.f32 %v15073_v15, %v14615_v19  ;;  %v6144_v33 = vmul.f32 %v15073_v15, %v14836_v30  ;;  %v18367_v18 = vld [vmem:[#allocation15_spill] sm:$0xff]  ;;  %v18368_v32 = vld [vmem:[#allocation14_spill] sm:$0xff] }
 0x33e   :  { %v6180_v46 = vmul.f32 %v15073_v15, %v5569_v60  ;;  %v15084_v44 = vmul.f32 %v15073_v15, %v14133_v62  ;;  %v15088_v37 = vmul.f32 %v15073_v15, %v14142_v3  ;;  %v15092_v53 = vmul.f32 %v15073_v15, %v14139_v2 }
 0x33f   :  { %v15095_v48 = vrot.slane %v6034_v26, %v15067_v8  ;;  %v15099_v19 = vmul.f32 %v15073_v15, %v14148_v5  ;;  %v15103_v30 = vmul.f32 %v15073_v15, %v14165_v17  ;;  %v15107_v62 = vmul.f32 %v15073_v15, %v14177_v25  ;;  %v18369_v26 = vld [vmem:[#allocation16_spill] sm:$0xff] }
 0x340   :  { %v15111_v3 = vmul.f32 %v15073_v15, %v14171_v20  ;;  %v15115_v2 = vmul.f32 %v15073_v15, %v14181_v27  ;;  %v15119_v5 = vmul.f32 %v15073_v15, %v14197_v39  ;;  %v15123_v17 = vmul.f32 %v15073_v15, %v14209_v47  ;;  %v18394_v8 = vld [vmem:[#allocation32_spill] sm:$0xff] }
 0x341   :  { %v6222_v60 = vadd.f32 %v15095_v48, %v6072_v59  ;;  %v6258_v25 = vadd.f32 %v15095_v48, %v6108_v6  ;;  %v6294_v58 = vadd.f32 %v15095_v48, %v6144_v33  ;;  %v6330_v20 = vadd.f32 %v15095_v48, %v6180_v46  ;;  %v18370_v59 = vld [vmem:[#allocation17_spill] sm:$0xff]  ;;  %v18371_v6 = vld [vmem:[#allocation19_spill] sm:$0xff]  ;;  %v18372_v46 = vld [vmem:[#allocation18_spill] sm:$0xff] }
 0x342   :  { %v15131_v27 = vmul.f32 %v15073_v15, %v14203_v42  ;;  %v15135_v39 = vmul.f32 %v15073_v15, %v14213_v49  ;;  %v15139_v47 = vmul.f32 %v15073_v15, %v14229_v63  ;;  %v15143_v13 = vmul.f32 %v15073_v15, %v14241_v10 }
 0x343   :  { %v6366_v52 = vmax.f32 %v6222_v60, 0.0  ;;  %v6402_v22 = vmax.f32 %v6258_v25, 0.0  ;;  %v6438_v50 = vmax.f32 %v6294_v58, 0.0  ;;  %v6474_v9 = vmax.f32 %v6330_v20, 0.0  ;;  %v18373_v25 = vld [vmem:[#allocation20_spill] sm:$0xff]  ;;  %v18374_v20 = vld [vmem:[#allocation21_spill] sm:$0xff] }
 0x344   :  { %v15147_v42 = vmul.f32 %v15073_v15, %v14235_v4  ;;  %v15151_v49 = vmul.f32 %v15073_v15, %v14245_v12  ;;  %v15155_v63 = vmul.f32 %v15073_v15, %v14261_v28  ;;  %v15159_v10 = vmul.f32 %v15073_v15, %v14273_v36 }
 0x345   :  { %v6510_v55 = vmax.f32 %v6366_v52, %v6402_v22  ;;  %v6546_v45 = vmax.f32 %v6438_v50, %v6474_v9  ;;  %v15163_v43 = vmul.f32 %v15073_v15, %v14267_v31  ;;  %v15167_v4 = vmul.f32 %v15073_v15, %v14277_v38  ;;  %v18375_v22 = vld [vmem:[#allocation23_spill] sm:$0xff]  ;;  %v18376_v9 = vld [vmem:[#allocation22_spill] sm:$0xff] }
 0x346   :  { %v15171_v12 = vmul.f32 %v15073_v15, %v14293_v54  ;;  %v15175_v28 = vmul.f32 %v15073_v15, %v14305_v1  ;;  %v15179_v36 = vmul.f32 %v15073_v15, %v14299_v57  ;;  %v15183_v31 = vmul.f32 %v15073_v15, %v14309_v7 }
 0x347   :  { %v6582_v0 = vmax.f32 %v6510_v55, %v6546_v45  ;;  %v15187_v38 = vmul.f32 %v15073_v15, %v14325_v23  ;;  %v15191_v54 = vmul.f32 %v15073_v15, %v14337_v35  ;;  %v15195_v1 = vmul.f32 %v15073_v15, %v14331_v29  ;;  %v18378_v45 = vld [vmem:[#allocation24_spill] sm:$0xff] }
 0x348   :  { %v15199_v57 = vmul.f32 %v15073_v15, %v14341_v40  ;;  %v15203_v7 = vmul.f32 %v15073_v15, %v14357_v56  ;;  %v15207_v23 = vmul.f32 %v15073_v15, %v14369_v11  ;;  %v15211_v35 = vmul.f32 %v15073_v15, %v14363_v61 }
 0x349   :  { %6618 = vst [vmem:[#allocation2 + $0x108] sm:$0xff] %v6582_v0  ;;  %v15215_v29 = vmul.f32 %v15073_v15, %v14373_v14  ;;  %v15219_v40 = vmul.f32 %v15073_v15, %v14389_v34  ;;  %v15223_v56 = vmul.f32 %v15073_v15, %v14392_v41  ;;  %v15227_v11 = vmul.f32 %v15073_v15, %v14402_v51 }
 0x34a   :  { %v15231_v61 = vmul.f32 %v15073_v15, %v18366_v16  ;;  %v15235_v14 = vmul.f32 %v15073_v15, %v18367_v18  ;;  %v15239_v34 = vmul.f32 %v15073_v15, %v18368_v32  ;;  %v15243_v41 = vmul.f32 %v15073_v15, %v18369_v26  ;;  %v18380_v16 = vld [vmem:[#allocation25_spill] sm:$0xff]  ;;  %v18382_v32 = vld [vmem:[#allocation27_spill] sm:$0xff] }
 0x34b   :  { %v15247_v51 = vmul.f32 %v15073_v15, %v18370_v59  ;;  %v15251_v33 = vmul.f32 %v15073_v15, %v18371_v6  ;;  %v15255_v60 = vmul.f32 %v15073_v15, %v18372_v46  ;;  %v15259_v58 = vmul.f32 %v15073_v15, %v18373_v25  ;;  %v18384_v59 = vld [vmem:[#allocation26_spill] sm:$0xff]  ;;  %v18386_v46 = vld [vmem:[#allocation28_spill] sm:$0xff] }
 0x34c   :  { %v15263_v52 = vmul.f32 %v15073_v15, %v18374_v20  ;;  %v15267_v50 = vmul.f32 %v15073_v15, %v18375_v22  ;;  %v15271_v55 = vmul.f32 %v15073_v15, %v18376_v9  ;;  %v15275_v0 = vmul.f32 %v15073_v15, %v18378_v45  ;;  %v18388_v20 = vld [vmem:[#allocation29_spill] sm:$0xff]  ;;  %v18390_v9 = vld [vmem:[#allocation31_spill] sm:$0xff] }
 0x34d   :  { %v15279_v18 = vmul.f32 %v15073_v15, %v18380_v16  ;;  %v15283_v26 = vmul.f32 %v15073_v15, %v18382_v32  ;;  %v15287_v6 = vmul.f32 %v15073_v15, %v18384_v59  ;;  %v15291_v25 = vmul.f32 %v15073_v15, %v18386_v46  ;;  %v18392_v16 = vld [vmem:[#allocation30_spill] sm:$0xff] }
 0x34e   :  { %18377 = vst [vmem:[#allocation13_spill] sm:$0xff] %v15271_v55  ;;  %18379 = vst [vmem:[#allocation15_spill] sm:$0xff] %v15275_v0  ;;  %v15295_v22 = vmul.f32 %v15073_v15, %v18388_v20  ;;  %v15299_v45 = vmul.f32 %v15073_v15, %v18390_v9  ;;  %v15303_v32 = vmul.f32 %v15073_v15, %v18392_v16 }
 0x34f   :  { %18381 = vst [vmem:[#allocation14_spill] sm:$0xff] %v15279_v18  ;;  %18383 = vst [vmem:[#allocation16_spill] sm:$0xff] %v15283_v26  ;;  %v15307_v59 = vmul.f32 %v15073_v15, %v18394_v8  ;;  %v15311_v46 = vmul.f32 %v15073_v15, %v18396_v21  ;;  %v18442_v26 = vld [vmem:[#allocation58_spill] sm:$0xff] }
 0x350   :  { %18385 = vst [vmem:[#allocation17_spill] sm:$0xff] %v15287_v6  ;;  %18387 = vst [vmem:[#allocation19_spill] sm:$0xff] %v15291_v25  ;;  %v18398_v25 = vld [vmem:[#allocation35_spill] sm:$0xff]  ;;  %v18440_v6 = vld [vmem:[#allocation56_spill] sm:$0xff] }
 0x351   :  { %18389 = vst [vmem:[#allocation18_spill] sm:$0xff] %v15295_v22  ;;  %18391 = vst [vmem:[#allocation20_spill] sm:$0xff] %v15299_v45  ;;  %v15315_v20 = vmul.f32 %v15073_v15, %v18398_v25  ;;  %v18400_v22 = vld [vmem:[#allocation34_spill] sm:$0xff]  ;;  %v18402_v45 = vld [vmem:[#allocation36_spill] sm:$0xff] }
 0x352   :  { %18393 = vst [vmem:[#allocation21_spill] sm:$0xff] %v15303_v32  ;;  %18395 = vst [vmem:[#allocation23_spill] sm:$0xff] %v15307_v59  ;;  %v15319_v9 = vmul.f32 %v15073_v15, %v18400_v22  ;;  %v15323_v16 = vmul.f32 %v15073_v15, %v18402_v45  ;;  %v18404_v32 = vld [vmem:[#allocation37_spill] sm:$0xff]  ;;  %v18406_v59 = vld [vmem:[#allocation39_spill] sm:$0xff] }
 0x353   :  { %18397 = vst [vmem:[#allocation22_spill] sm:$0xff] %v15311_v46  ;;  %18399 = vst [vmem:[#allocation24_spill] sm:$0xff] %v15315_v20  ;;  %v15327_v8 = vmul.f32 %v15073_v15, %v18404_v32  ;;  %v15331_v21 = vmul.f32 %v15073_v15, %v18406_v59  ;;  %v18408_v46 = vld [vmem:[#allocation38_spill] sm:$0xff]  ;;  %v18410_v20 = vld [vmem:[#allocation40_spill] sm:$0xff] }
 0x354   :  { %18401 = vst [vmem:[#allocation25_spill] sm:$0xff] %v15319_v9  ;;  %18403 = vst [vmem:[#allocation27_spill] sm:$0xff] %v15323_v16  ;;  %v15335_v25 = vmul.f32 %v15073_v15, %v18408_v46  ;;  %v15339_v22 = vmul.f32 %v15073_v15, %v18410_v20  ;;  %v18412_v9 = vld [vmem:[#allocation41_spill] sm:$0xff]  ;;  %v18414_v16 = vld [vmem:[#allocation43_spill] sm:$0xff] }
 0x355   :  { %18405 = vst [vmem:[#allocation26_spill] sm:$0xff] %v15327_v8  ;;  %18407 = vst [vmem:[#allocation28_spill] sm:$0xff] %v15331_v21  ;;  %v15343_v45 = vmul.f32 %v15073_v15, %v18412_v9  ;;  %v15347_v32 = vmul.f32 %v15073_v15, %v18414_v16  ;;  %v18416_v8 = vld [vmem:[#allocation42_spill] sm:$0xff]  ;;  %v18418_v21 = vld [vmem:[#allocation44_spill] sm:$0xff] }
 0x356   :  { %18409 = vst [vmem:[#allocation29_spill] sm:$0xff] %v15335_v25  ;;  %18411 = vst [vmem:[#allocation31_spill] sm:$0xff] %v15339_v22  ;;  %v15351_v59 = vmul.f32 %v15073_v15, %v18416_v8  ;;  %v15355_v46 = vmul.f32 %v15073_v15, %v18418_v21  ;;  %v18420_v25 = vld [vmem:[#allocation45_spill] sm:$0xff]  ;;  %v18422_v22 = vld [vmem:[#allocation46_spill] sm:$0xff] }
 0x357   :  { %18413 = vst [vmem:[#allocation30_spill] sm:$0xff] %v15343_v45  ;;  %18415 = vst [vmem:[#allocation32_spill] sm:$0xff] %v15347_v32  ;;  %v15359_v20 = vmul.f32 %v15073_v15, %v18420_v25  ;;  %v15363_v9 = vmul.f32 %v15073_v15, %v18422_v22  ;;  %v18424_v45 = vld [vmem:[#allocation47_spill] sm:$0xff]  ;;  %v18426_v32 = vld [vmem:[#allocation48_spill] sm:$0xff] }
 0x358   :  { %18417 = vst [vmem:[#allocation33_spill] sm:$0xff] %v15351_v59  ;;  %18419 = vst [vmem:[#allocation35_spill] sm:$0xff] %v15355_v46  ;;  %v15367_v16 = vmul.f32 %v15073_v15, %v18424_v45  ;;  %v15371_v8 = vmul.f32 %v15073_v15, %v18426_v32  ;;  %v18428_v59 = vld [vmem:[#allocation50_spill] sm:$0xff]  ;;  %v18430_v46 = vld [vmem:[#allocation49_spill] sm:$0xff] }
 0x359   :  { %18421 = vst [vmem:[#allocation34_spill] sm:$0xff] %v15359_v20  ;;  %18423 = vst [vmem:[#allocation36_spill] sm:$0xff] %v15363_v9  ;;  %v15375_v21 = vmul.f32 %v15073_v15, %v18428_v59  ;;  %v15379_v25 = vmul.f32 %v15073_v15, %v18430_v46  ;;  %v18431_v20 = vld [vmem:[#allocation51_spill] sm:$0xff]  ;;  %v18432_v9 = vld [vmem:[#allocation52_spill] sm:$0xff] }
 0x35a   :  { %18425 = vst [vmem:[#allocation37_spill] sm:$0xff] %v15367_v16  ;;  %18427 = vst [vmem:[#allocation39_spill] sm:$0xff] %v15371_v8  ;;  %v15383_v22 = vmul.f32 %v15073_v15, %v18431_v20  ;;  %v15387_v45 = vmul.f32 %v15073_v15, %v18432_v9  ;;  %v18434_v16 = vld [vmem:[#allocation54_spill] sm:$0xff]  ;;  %v18436_v8 = vld [vmem:[#allocation53_spill] sm:$0xff]  ;;  %v15403_v20 = vmul.f32 %v15073_v15, %v18440_v6 }
 0x35b   :  { %18429 = vst [vmem:[#allocation38_spill] sm:$0xff] %v15375_v21  ;;  %v15391_v32 = vmul.f32 %v15073_v15, %v18434_v16  ;;  %v15395_v59 = vmul.f32 %v15073_v15, %v18436_v8  ;;  %v18438_v21 = vld [vmem:[#allocation55_spill] sm:$0xff]  ;;  %v15407_v9 = vmul.f32 %v15073_v15, %v18442_v26 }
 0x35c   :  { %18433 = vst [vmem:[#allocation40_spill] sm:$0xff] %v15387_v45  ;;  %v15399_v46 = vmul.f32 %v15073_v15, %v18438_v21  ;;  %18441 = vst [vmem:[#allocation44_spill] sm:$0xff] %v15403_v20  ;;  %v18444_v45 = vld [vmem:[#allocation57_spill] sm:$0xff] }
 0x35d   :  { %18435 = vst [vmem:[#allocation41_spill] sm:$0xff] %v15391_v32  ;;  %18437 = vst [vmem:[#allocation43_spill] sm:$0xff] %v15395_v59  ;;  %v15411_v16 = vmul.f32 %v15073_v15, %v18444_v45  ;;  %v18446_v32 = vld [vmem:[#allocation59_spill] sm:$0xff]  ;;  %v18448_v59 = vld [vmem:[#allocation60_spill] sm:$0xff] }
 0x35e   :  { %18439 = vst [vmem:[#allocation42_spill] sm:$0xff] %v15399_v46  ;;  %18443 = vst [vmem:[#allocation45_spill] sm:$0xff] %v15407_v9  ;;  %v15415_v8 = vmul.f32 %v15073_v15, %v18446_v32  ;;  %v15419_v21 = vmul.f32 %v15073_v15, %v18448_v59  ;;  %v18450_v46 = vld [vmem:[#allocation62_spill] sm:$0xff]  ;;  %v18452_v20 = vld [vmem:[#allocation61_spill] sm:$0xff] }
 0x35f   :  { %18445 = vst [vmem:[#allocation46_spill] sm:$0xff] %v15411_v16  ;;  %v15423_v6 = vmul.f32 %v15073_v15, %v18450_v46  ;;  %v15427_v26 = vmul.f32 %v15073_v15, %v18452_v20  ;;  %v18454_v9 = vld [vmem:[#allocation63_spill] sm:$0xff]  ;;  %v18456_v16 = vld [vmem:[#allocation64_spill] sm:$0xff] }
 0x360   :  { %18447 = vst [vmem:[#allocation47_spill] sm:$0xff] %v15415_v8  ;;  %18449 = vst [vmem:[#allocation48_spill] sm:$0xff] %v15419_v21  ;;  %v15431_v45 = vmul.f32 %v15073_v15, %v18454_v9  ;;  %v15435_v32 = vmul.f32 %v15073_v15, %v18456_v16  ;;  %v18458_v8 = vld [vmem:[#allocation66_spill] sm:$0xff]  ;;  %v18460_v21 = vld [vmem:[#allocation65_spill] sm:$0xff] }
 0x361   :  { %18451 = vst [vmem:[#allocation50_spill] sm:$0xff] %v15423_v6  ;;  %18453 = vst [vmem:[#allocation49_spill] sm:$0xff] %v15427_v26  ;;  %v15439_v59 = vmul.f32 %v15073_v15, %v18458_v8  ;;  %v15443_v46 = vmul.f32 %v15073_v15, %v18460_v21  ;;  %v18462_v6 = vld [vmem:[#allocation67_spill] sm:$0xff]  ;;  %v18464_v26 = vld [vmem:[#allocation68_spill] sm:$0xff] }
 0x362   :  { %18455 = vst [vmem:[#allocation51_spill] sm:$0xff] %v15431_v45  ;;  %18457 = vst [vmem:[#allocation52_spill] sm:$0xff] %v15435_v32  ;;  %v15447_v20 = vmul.f32 %v15073_v15, %v18462_v6  ;;  %v15451_v9 = vmul.f32 %v15073_v15, %v18464_v26  ;;  %v18466_v45 = vld [vmem:[#allocation70_spill] sm:$0xff]  ;;  %v18468_v32 = vld [vmem:[#allocation69_spill] sm:$0xff] }
 0x363   :  { %18459 = vst [vmem:[#allocation54_spill] sm:$0xff] %v15439_v59  ;;  %18461 = vst [vmem:[#allocation53_spill] sm:$0xff] %v15443_v46  ;;  %v15455_v16 = vmul.f32 %v15073_v15, %v18466_v45  ;;  %v15459_v8 = vmul.f32 %v15073_v15, %v18468_v32  ;;  %v18470_v59 = vld [vmem:[#allocation71_spill] sm:$0xff]  ;;  %v18472_v46 = vld [vmem:[#allocation72_spill] sm:$0xff] }
 0x364   :  { %18463 = vst [vmem:[#allocation55_spill] sm:$0xff] %v15447_v20  ;;  %18465 = vst [vmem:[#allocation56_spill] sm:$0xff] %v15451_v9  ;;  %v15463_v21 = vmul.f32 %v15073_v15, %v18470_v59  ;;  %v15467_v6 = vmul.f32 %v15073_v15, %v18472_v46  ;;  %v18474_v20 = vld [vmem:[#allocation74_spill] sm:$0xff]  ;;  %v18476_v9 = vld [vmem:[#allocation73_spill] sm:$0xff] }
 0x365   :  { %18467 = vst [vmem:[#allocation58_spill] sm:$0xff] %v15455_v16  ;;  %18469 = vst [vmem:[#allocation57_spill] sm:$0xff] %v15459_v8  ;;  %v15471_v26 = vmul.f32 %v15073_v15, %v18474_v20  ;;  %v15475_v45 = vmul.f32 %v15073_v15, %v18476_v9  ;;  %v18478_v16 = vld [vmem:[#allocation75_spill] sm:$0xff]  ;;  %v18480_v8 = vld [vmem:[#allocation76_spill] sm:$0xff] }
 0x366   :  { %18471 = vst [vmem:[#allocation59_spill] sm:$0xff] %v15463_v21  ;;  %18473 = vst [vmem:[#allocation60_spill] sm:$0xff] %v15467_v6  ;;  %v15479_v32 = vmul.f32 %v15073_v15, %v18478_v16  ;;  %v15483_v59 = vmul.f32 %v15073_v15, %v18480_v8  ;;  %v18482_v21 = vld [vmem:[#allocation78_spill] sm:$0xff]  ;;  %v18484_v6 = vld [vmem:[#allocation77_spill] sm:$0xff] }
 0x367   :  { %18475 = vst [vmem:[#allocation62_spill] sm:$0xff] %v15471_v26  ;;  %18477 = vst [vmem:[#allocation61_spill] sm:$0xff] %v15475_v45  ;;  %v15487_v46 = vmul.f32 %v15073_v15, %v18482_v21  ;;  %v15491_v20 = vmul.f32 %v15073_v15, %v18484_v6  ;;  %v18486_v26 = vld [vmem:[#allocation79_spill] sm:$0xff]  ;;  %v18488_v45 = vld [vmem:[#allocation80_spill] sm:$0xff] }
 0x368   :  { %18479 = vst [vmem:[#allocation63_spill] sm:$0xff] %v15479_v32  ;;  %18481 = vst [vmem:[#allocation64_spill] sm:$0xff] %v15483_v59  ;;  %v15495_v9 = vmul.f32 %v15073_v15, %v18486_v26  ;;  %v15499_v16 = vmul.f32 %v15073_v15, %v18488_v45  ;;  %v18490_v32 = vld [vmem:[#allocation81_spill] sm:$0xff]  ;;  %v18492_v59 = vld [vmem:[#allocation82_spill] sm:$0xff] }
 0x369   :  { %18483 = vst [vmem:[#allocation66_spill] sm:$0xff] %v15487_v46  ;;  %18485 = vst [vmem:[#allocation65_spill] sm:$0xff] %v15491_v20  ;;  %v15503_v8 = vmul.f32 %v15073_v15, %v18490_v32  ;;  %v15507_v21 = vmul.f32 %v15073_v15, %v18492_v59  ;;  %v18494_v46 = vld [vmem:[#allocation83_spill] sm:$0xff]  ;;  %v18496_v20 = vld [vmem:[#allocation85_spill] sm:$0xff] }
 0x36a   :  { %18487 = vst [vmem:[#allocation67_spill] sm:$0xff] %v15495_v9  ;;  %18489 = vst [vmem:[#allocation68_spill] sm:$0xff] %v15499_v16  ;;  %v15511_v6 = vmul.f32 %v15073_v15, %v18494_v46  ;;  %v15515_v26 = vmul.f32 %v15073_v15, %v18496_v20  ;;  %v18498_v9 = vld [vmem:[#allocation84_spill] sm:$0xff]  ;;  %v18499_v16 = vld [vmem:[#allocation86_spill] sm:$0xff] }
 0x36b   :  { %18491 = vst [vmem:[#allocation70_spill] sm:$0xff] %v15503_v8  ;;  %18493 = vst [vmem:[#allocation69_spill] sm:$0xff] %v15507_v21  ;;  %v6149_v45 = vmul.f32 %v15073_v15, %v18498_v9  ;;  %v6150_v18 = vmul.f32 %v15073_v15, %v18499_v16  ;;  %v18500_v32 = vld [vmem:[#allocation87_spill] sm:$0xff]  ;;  %v18502_v59 = vld [vmem:[#allocation89_spill] sm:$0xff] }
 0x36c   :  { %18495 = vst [vmem:[#allocation71_spill] sm:$0xff] %v15511_v6  ;;  %18497 = vst [vmem:[#allocation72_spill] sm:$0xff] %v15515_v26  ;;  %v15523_v8 = vmul.f32 %v15073_v15, %v18500_v32  ;;  %v15527_v21 = vmul.f32 %v15073_v15, %v18502_v59  ;;  %v18504_v46 = vld [vmem:[#allocation88_spill] sm:$0xff]  ;;  %v18506_v20 = vld [vmem:[#allocation90_spill] sm:$0xff] }
 0x36d   :  { %v15531_v6 = vmul.f32 %v15073_v15, %v18504_v46  ;;  %v15535_v26 = vmul.f32 %v15073_v15, %v18506_v20  ;;  %v18508_v9 = vld [vmem:[#allocation91_spill] sm:$0xff]  ;;  %v18510_v16 = vld [vmem:[#allocation93_spill] sm:$0xff] }
 0x36e   :  { %18501 = vst [vmem:[#allocation74_spill] sm:$0xff] %v15523_v8  ;;  %18503 = vst [vmem:[#allocation73_spill] sm:$0xff] %v15527_v21  ;;  %v15539_v0 = vmul.f32 %v15073_v15, %v18508_v9  ;;  %v15543_v32 = vmul.f32 %v15073_v15, %v18510_v16  ;;  %v18512_v8 = vld [vmem:[#allocation92_spill] sm:$0xff]  ;;  %v18514_v21 = vld [vmem:[#allocation94_spill] sm:$0xff] }
 0x36f   :  { %18505 = vst [vmem:[#allocation75_spill] sm:$0xff] %v15531_v6  ;;  %18507 = vst [vmem:[#allocation76_spill] sm:$0xff] %v15535_v26  ;;  %v15547_v59 = vmul.f32 %v15073_v15, %v18512_v8  ;;  %v15551_v46 = vmul.f32 %v15073_v15, %v18514_v21  ;;  %v18516_v6 = vld [vmem:[#allocation95_spill] sm:$0xff]  ;;  %v18518_v26 = vld [vmem:[#allocation97_spill] sm:$0xff] }
 0x370   :  { %18509 = vst [vmem:[#allocation78_spill] sm:$0xff] %v15539_v0  ;;  %18511 = vst [vmem:[#allocation77_spill] sm:$0xff] %v15543_v32  ;;  %v15555_v20 = vmul.f32 %v15073_v15, %v18516_v6  ;;  %v15559_v9 = vmul.f32 %v15073_v15, %v18518_v26  ;;  %v18520_v0 = vld [vmem:[#allocation96_spill] sm:$0xff]  ;;  %v18522_v32 = vld [vmem:[#allocation98_spill] sm:$0xff] }
 0x371   :  { %18513 = vst [vmem:[#allocation79_spill] sm:$0xff] %v15547_v59  ;;  %18515 = vst [vmem:[#allocation80_spill] sm:$0xff] %v15551_v46  ;;  %v15563_v16 = vmul.f32 %v15073_v15, %v18520_v0  ;;  %v15567_v8 = vmul.f32 %v15073_v15, %v18522_v32  ;;  %v18524_v59 = vld [vmem:[#allocation99_spill] sm:$0xff]  ;;  %v18526_v46 = vld [vmem:[#allocation101_spill] sm:$0xff] }
 0x372   :  { %18517 = vst [vmem:[#allocation81_spill] sm:$0xff] %v15555_v20  ;;  %18519 = vst [vmem:[#allocation82_spill] sm:$0xff] %v15559_v9  ;;  %v15571_v21 = vmul.f32 %v15073_v15, %v18524_v59  ;;  %v15575_v6 = vmul.f32 %v15073_v15, %v18526_v46  ;;  %v18528_v20 = vld [vmem:[#allocation100_spill] sm:$0xff]  ;;  %v18530_v9 = vld [vmem:[#allocation102_spill] sm:$0xff] }
 0x373   :  { %18521 = vst [vmem:[#allocation83_spill] sm:$0xff] %v15563_v16  ;;  %18523 = vst [vmem:[#allocation85_spill] sm:$0xff] %v15567_v8  ;;  %v15579_v26 = vmul.f32 %v15073_v15, %v18528_v20  ;;  %v15583_v0 = vmul.f32 %v15073_v15, %v18530_v9  ;;  %v18532_v16 = vld [vmem:[#allocation103_spill] sm:$0xff]  ;;  %v18534_v8 = vld [vmem:[#allocation105_spill] sm:$0xff] }
 0x374   :  { %18525 = vst [vmem:[#allocation84_spill] sm:$0xff] %v15571_v21  ;;  %18527 = vst [vmem:[#allocation86_spill] sm:$0xff] %v15575_v6  ;;  %v15587_v32 = vmul.f32 %v15073_v15, %v18532_v16  ;;  %v15591_v59 = vmul.f32 %v15073_v15, %v18534_v8  ;;  %v18536_v21 = vld [vmem:[#allocation104_spill] sm:$0xff]  ;;  %v18538_v6 = vld [vmem:[#allocation106_spill] sm:$0xff] }
 0x375   :  { %18529 = vst [vmem:[#allocation87_spill] sm:$0xff] %v15579_v26  ;;  %18531 = vst [vmem:[#allocation89_spill] sm:$0xff] %v15583_v0  ;;  %v15595_v46 = vmul.f32 %v15073_v15, %v18536_v21  ;;  %v15599_v20 = vmul.f32 %v15073_v15, %v18538_v6  ;;  %v18540_v26 = vld [vmem:[#allocation107_spill] sm:$0xff]  ;;  %v18542_v0 = vld [vmem:[#allocation109_spill] sm:$0xff] }
 0x376   :  { %18533 = vst [vmem:[#allocation88_spill] sm:$0xff] %v15587_v32  ;;  %18535 = vst [vmem:[#allocation90_spill] sm:$0xff] %v15591_v59  ;;  %v15603_v9 = vmul.f32 %v15073_v15, %v18540_v26  ;;  %v15607_v16 = vmul.f32 %v15073_v15, %v18542_v0  ;;  %v18544_v32 = vld [vmem:[#allocation108_spill] sm:$0xff]  ;;  %v18546_v59 = vld [vmem:[#allocation110_spill] sm:$0xff] }
 0x377   :  { %18537 = vst [vmem:[#allocation91_spill] sm:$0xff] %v15595_v46  ;;  %18539 = vst [vmem:[#allocation93_spill] sm:$0xff] %v15599_v20  ;;  %v15611_v8 = vmul.f32 %v15073_v15, %v18544_v32  ;;  %v15615_v21 = vmul.f32 %v15073_v15, %v18546_v59  ;;  %v18548_v46 = vld [vmem:[#allocation111_spill] sm:$0xff]  ;;  %v18550_v20 = vld [vmem:[#allocation113_spill] sm:$0xff] }
 0x378   :  { %18541 = vst [vmem:[#allocation92_spill] sm:$0xff] %v15603_v9  ;;  %18543 = vst [vmem:[#allocation94_spill] sm:$0xff] %v15607_v16  ;;  %v15619_v6 = vmul.f32 %v15073_v15, %v18548_v46  ;;  %v15623_v26 = vmul.f32 %v15073_v15, %v18550_v20  ;;  %v18552_v9 = vld [vmem:[#allocation112_spill] sm:$0xff]  ;;  %v18554_v16 = vld [vmem:[#allocation114_spill] sm:$0xff]  ;;  %v15643_v20 = vmul.f32 %v15073_v15, %v15053_v24 }
 0x379   :  { %18545 = vst [vmem:[#allocation95_spill] sm:$0xff] %v15611_v8  ;;  %18547 = vst [vmem:[#allocation97_spill] sm:$0xff] %v15615_v21  ;;  %v15627_v0 = vmul.f32 %v15073_v15, %v18552_v9  ;;  %v15631_v32 = vmul.f32 %v15073_v15, %v18554_v16  ;;  %v18556_v8 = vld [vmem:[#allocation115_spill] sm:$0xff]  ;;  %v18558_v21 = vld [vmem:[#allocation116_spill] sm:$0xff]  ;;  %v6191_v9 = vadd.f32 %v15095_v48, %v15092_v53 }
 0x37a   :  { %18549 = vst [vmem:[#allocation96_spill] sm:$0xff] %v15619_v6  ;;  %18551 = vst [vmem:[#allocation98_spill] sm:$0xff] %v15623_v26  ;;  %v15635_v59 = vmul.f32 %v15073_v15, %v18556_v8  ;;  %v15639_v46 = vmul.f32 %v15073_v15, %v18558_v21  ;;  %v6227_v16 = vadd.f32 %v15095_v48, %v15239_v34 }
 0x37b   :  { %18553 = vst [vmem:[#allocation99_spill] sm:$0xff] %v15627_v0  ;;  %18555 = vst [vmem:[#allocation101_spill] sm:$0xff] %v15631_v32  ;;  %v6192_v0 = vadd.f32 %v15095_v48, %v15099_v19  ;;  %v6228_v8 = vadd.f32 %v15095_v48, %v15243_v41  ;;  %v6263_v21 = vadd.f32 %v15095_v48, %v15379_v25  ;;  %v6335_v53 = vmax.f32 %v6191_v9, 0.0  ;;  %v18575_v9 = vld [vmem:[#allocation16_spill] sm:$0xff] }
 0x37c   :  { %18557 = vst [vmem:[#allocation100_spill] sm:$0xff] %v15635_v59  ;;  %18559 = vst [vmem:[#allocation102_spill] sm:$0xff] %v15639_v46  ;;  %v6264_v46 = vadd.f32 %v15095_v48, %v15383_v22  ;;  %v6299_v24 = vadd.f32 %v15095_v48, %v6149_v45  ;;  %v6300_v15 = vadd.f32 %v15095_v48, %v6150_v18  ;;  %v6371_v59 = vmax.f32 %v6227_v16, 0.0 }
 0x37d   :  { %18560 = vst [vmem:[#allocation103_spill] sm:$0xff] %v15643_v20  ;;  %v6336_v20 = vmax.f32 %v6192_v0, 0.0  ;;  %v6372_v19 = vmax.f32 %v6228_v8, 0.0  ;;  %v6407_v32 = vmax.f32 %v6263_v21, 0.0  ;;  %v15661_v41 = vadd.f32 %v15095_v48, %v15084_v44  ;;  %v18576_v8 = vld [vmem:[#allocation17_spill] sm:$0xff]  ;;  %v18577_v21 = vld [vmem:[#allocation19_spill] sm:$0xff] }
 0x37e   :  { %v6408_v26 = vmax.f32 %v6264_v46, 0.0  ;;  %v6443_v34 = vmax.f32 %v6299_v24, 0.0  ;;  %v6444_v6 = vmax.f32 %v6300_v15, 0.0  ;;  %v6479_v55 = vmax.f32 %v6335_v53, %v6371_v59  ;;  %v18579_v15 = vld [vmem:[#allocation18_spill] sm:$0xff] }
 0x37f   :  { %v15665_v25 = vadd.f32 %v15095_v48, %v15088_v37  ;;  %v6480_v22 = vmax.f32 %v6336_v20, %v6372_v19  ;;  %v15669_v18 = vadd.f32 %v15095_v48, %v15103_v30  ;;  %v15673_v0 = vadd.f32 %v15095_v48, %v15107_v62  ;;  %v18574_v20 = vld [vmem:[#allocation14_spill] sm:$0xff]  ;;  %v18581_v19 = vld [vmem:[#allocation20_spill] sm:$0xff] }
 0x380   :  { %v6515_v45 = vmax.f32 %v6407_v32, %v6443_v34  ;;  %v6516_v46 = vmax.f32 %v6408_v26, %v6444_v6  ;;  %v15677_v59 = vadd.f32 %v15095_v48, %v15111_v3  ;;  %v15681_v44 = vadd.f32 %v15095_v48, %v15115_v2  ;;  %v18573_v26 = vld [vmem:[#allocation15_spill] sm:$0xff] }
 0x381   :  { %v15685_v37 = vadd.f32 %v15095_v48, %v15119_v5  ;;  %v15689_v30 = vadd.f32 %v15095_v48, %v15123_v17  ;;  %v15693_v62 = vadd.f32 %v15095_v48, %v15131_v27  ;;  %v15697_v3 = vadd.f32 %v15095_v48, %v15135_v39 }
 0x382   :  { %v6551_v32 = vmax.f32 %v6479_v55, %v6515_v45  ;;  %v6552_v6 = vmax.f32 %v6480_v22, %v6516_v46  ;;  %v15701_v2 = vadd.f32 %v15095_v48, %v15139_v47  ;;  %v15705_v5 = vadd.f32 %v15095_v48, %v15143_v13  ;;  %v18572_v55 = vld [vmem:[#allocation13_spill] sm:$0xff]  ;;  %v18585_v46 = vld [vmem:[#allocation23_spill] sm:$0xff] }
 0x383   :  { %v15709_v17 = vadd.f32 %v15095_v48, %v15147_v42  ;;  %v15713_v27 = vadd.f32 %v15095_v48, %v15151_v49  ;;  %v15717_v39 = vadd.f32 %v15095_v48, %v15155_v63  ;;  %v15721_v47 = vadd.f32 %v15095_v48, %v15159_v10  ;;  %v18583_v22 = vld [vmem:[#allocation21_spill] sm:$0xff] }
 0x384   :  { %6587 = vst [vmem:[#allocation2 + $0x10] sm:$0xff] %v6551_v32  ;;  %v15725_v13 = vadd.f32 %v15095_v48, %v15163_v43  ;;  %6588 = vst [vmem:[#allocation2 + $0x18] sm:$0xff] %v6552_v6  ;;  %v15729_v42 = vadd.f32 %v15095_v48, %v15167_v4  ;;  %v15733_v49 = vadd.f32 %v15095_v48, %v15171_v12  ;;  %v18587_v6 = vld [vmem:[#allocation22_spill] sm:$0xff] }
 0x385   :  { %v15737_v63 = vadd.f32 %v15095_v48, %v15175_v28  ;;  %v15741_v10 = vadd.f32 %v15095_v48, %v15179_v36  ;;  %v15745_v43 = vadd.f32 %v15095_v48, %v15183_v31  ;;  %v15749_v4 = vadd.f32 %v15095_v48, %v15187_v38 }
 0x386   :  { %v15753_v12 = vadd.f32 %v15095_v48, %v15191_v54  ;;  %v15757_v28 = vadd.f32 %v15095_v48, %v15195_v1  ;;  %v15761_v36 = vadd.f32 %v15095_v48, %v15199_v57  ;;  %v15765_v31 = vadd.f32 %v15095_v48, %v15203_v7 }
 0x387   :  { %18561 = vst [vmem:[#allocation105_spill] sm:$0xff] %v15749_v4  ;;  %v15769_v38 = vadd.f32 %v15095_v48, %v15207_v23  ;;  %v15773_v54 = vadd.f32 %v15095_v48, %v15211_v35  ;;  %v15777_v1 = vadd.f32 %v15095_v48, %v15215_v29  ;;  %v15781_v57 = vadd.f32 %v15095_v48, %v15219_v40 }
 0x388   :  { %18562 = vst [vmem:[#allocation104_spill] sm:$0xff] %v15753_v12  ;;  %18563 = vst [vmem:[#allocation106_spill] sm:$0xff] %v15757_v28  ;;  %v15785_v7 = vadd.f32 %v15095_v48, %v15223_v56  ;;  %v15789_v23 = vadd.f32 %v15095_v48, %v15227_v11  ;;  %v15793_v35 = vadd.f32 %v15095_v48, %v15231_v61 }
 0x389   :  { %18564 = vst [vmem:[#allocation107_spill] sm:$0xff] %v15761_v36  ;;  %18565 = vst [vmem:[#allocation109_spill] sm:$0xff] %v15765_v31  ;;  %v15797_v29 = vadd.f32 %v15095_v48, %v15235_v14  ;;  %v15801_v40 = vadd.f32 %v15095_v48, %v15247_v51  ;;  %v15805_v56 = vadd.f32 %v15095_v48, %v15251_v33  ;;  %v18831_v36 = vmax.f32 %v15673_v0, 0.0 }
 0x38a   :  { %18566 = vst [vmem:[#allocation108_spill] sm:$0xff] %v15769_v38  ;;  %18567 = vst [vmem:[#allocation110_spill] sm:$0xff] %v15773_v54  ;;  %v15809_v11 = vadd.f32 %v15095_v48, %v15255_v60  ;;  %v15813_v61 = vadd.f32 %v15095_v48, %v15259_v58  ;;  %v15817_v14 = vadd.f32 %v15095_v48, %v15263_v52 }
 0x38b   :  { %18568 = vst [vmem:[#allocation111_spill] sm:$0xff] %v15777_v1  ;;  %18569 = vst [vmem:[#allocation113_spill] sm:$0xff] %v15781_v57  ;;  %v15821_v51 = vadd.f32 %v15095_v48, %v15267_v50  ;;  %v15825_v33 = vadd.f32 %v15095_v48, %v18572_v55  ;;  %v15829_v60 = vadd.f32 %v15095_v48, %v18573_v26  ;;  %v6660_v16 = vld [vmem:[#allocation2 + $0x11] sm:$0xff]  ;;  %v18827_v57 = vmax.f32 %v15801_v40, 0.0 }
 0x38c   :  { %18570 = vst [vmem:[#allocation112_spill] sm:$0xff] %v15785_v7  ;;  %18571 = vst [vmem:[#allocation114_spill] sm:$0xff] %v15789_v23  ;;  %v15833_v58 = vadd.f32 %v15095_v48, %v18574_v20  ;;  %v15837_v52 = vadd.f32 %v15095_v48, %v18575_v9  ;;  %v15841_v50 = vadd.f32 %v15095_v48, %v18576_v8  ;;  %6698 = vrot.lane.b32.xlu1 %v6660_v16, %s12462_s3  ;;  %v18589_v26 = vld [vmem:[#allocation24_spill] sm:$0xff]  ;;  %v18591_v9 = vld [vmem:[#allocation25_spill] sm:$0xff] }
 0x38d   :  { %v15845_v24 = vadd.f32 %v15095_v48, %v18577_v21  ;;  %v15849_v53 = vadd.f32 %v15095_v48, %v18579_v15  ;;  %v15853_v34 = vadd.f32 %v15095_v48, %v18581_v19  ;;  %v15858_v45 = vadd.f32 %v15095_v48, %v18583_v22  ;;  %v18593_v16 = vld [vmem:[#allocation27_spill] sm:$0xff]  ;;  %v18595_v15 = vld [vmem:[#allocation26_spill] sm:$0xff]  ;;  %v18597_v22 = vld [vmem:[#allocation28_spill] sm:$0xff] }
 0x38e   :  { %v15862_v32 = vadd.f32 %v15095_v48, %v18585_v46  ;;  %v15866_v55 = vadd.f32 %v15095_v48, %v18587_v6  ;;  %v15870_v20 = vadd.f32 %v15095_v48, %v18589_v26  ;;  %v15874_v8 = vadd.f32 %v15095_v48, %v18591_v9  ;;  %v18599_v6 = vld [vmem:[#allocation29_spill] sm:$0xff] }
 0x38f   :  { %18578 = vst [vmem:[#allocation115_spill] sm:$0xff] %v15845_v24  ;;  %18580 = vst [vmem:[#allocation116_spill] sm:$0xff] %v15849_v53  ;;  %v15878_v21 = vadd.f32 %v15095_v48, %v18593_v16  ;;  %v15882_v19 = vadd.f32 %v15095_v48, %v18595_v15  ;;  %v15886_v46 = vadd.f32 %v15095_v48, %v18597_v22  ;;  %v18828_v1 = vmax.f32 %v15669_v18, 0.0 }
 0x390   :  { %18582 = vst [vmem:[#allocation13_spill] sm:$0xff] %v15853_v34  ;;  %18584 = vst [vmem:[#allocation15_spill] sm:$0xff] %v15858_v45  ;;  %v15890_v26 = vadd.f32 %v15095_v48, %v18599_v6  ;;  %v18830_v31 = vmax.f32 %v15805_v56, 0.0  ;;  %v18832_v38 = vmax.f32 %v15809_v11, 0.0  ;;  %v18833_v23 = vmax.f32 %v15677_v59, 0.0 }
 0x391   :  { %18586 = vst [vmem:[#allocation14_spill] sm:$0xff] %v15862_v32  ;;  %18588 = vst [vmem:[#allocation16_spill] sm:$0xff] %v15866_v55  ;;  %v18627_v55 = vld [vmem:[#allocation44_spill] sm:$0xff]  ;;  %v18629_v32 = vld [vmem:[#allocation45_spill] sm:$0xff]  ;;  %v18834_v40 = vmax.f32 %v15813_v61, 0.0  ;;  %v18835_v18 = vmax.f32 %v15681_v44, 0.0 }
 0x392   :  { %18590 = vst [vmem:[#allocation17_spill] sm:$0xff] %v15870_v20  ;;  %18592 = vst [vmem:[#allocation19_spill] sm:$0xff] %v15874_v8  ;;  %v18601_v20 = vld [vmem:[#allocation31_spill] sm:$0xff]  ;;  %v18603_v8 = vld [vmem:[#allocation30_spill] sm:$0xff]  ;;  %v16338_v28 = vmax.f32 %v18833_v23, %v18832_v38  ;;  %v18838_v0 = vmax.f32 %v15821_v51, 0.0  ;;  %v18841_v38 = vmax.f32 %v15825_v33, 0.0 }
 0x393   :  { %18594 = vst [vmem:[#allocation18_spill] sm:$0xff] %v15878_v21  ;;  %18596 = vst [vmem:[#allocation20_spill] sm:$0xff] %v15882_v19  ;;  %v15894_v9 = vadd.f32 %v15095_v48, %v18601_v20  ;;  %v15898_v16 = vadd.f32 %v15095_v48, %v18603_v8  ;;  %v18605_v21 = vld [vmem:[#allocation32_spill] sm:$0xff]  ;;  %v18607_v19 = vld [vmem:[#allocation33_spill] sm:$0xff]  ;;  %v18842_v44 = vmax.f32 %v15693_v62, 0.0  ;;  %v18843_v56 = vmax.f32 %v15829_v60, 0.0 }
 0x394   :  { %18598 = vst [vmem:[#allocation21_spill] sm:$0xff] %v15886_v46  ;;  %18600 = vst [vmem:[#allocation23_spill] sm:$0xff] %v15890_v26  ;;  %v15902_v15 = vadd.f32 %v15095_v48, %v18605_v21  ;;  %v15906_v22 = vadd.f32 %v15095_v48, %v18607_v19  ;;  %v18609_v46 = vld [vmem:[#allocation35_spill] sm:$0xff]  ;;  %v18611_v26 = vld [vmem:[#allocation34_spill] sm:$0xff]  ;;  %v18845_v61 = vmax.f32 %v15833_v58, 0.0  ;;  %v18847_v51 = vmax.f32 %v15837_v52, 0.0 }
 0x395   :  { %18602 = vst [vmem:[#allocation22_spill] sm:$0xff] %v15894_v9  ;;  %18604 = vst [vmem:[#allocation24_spill] sm:$0xff] %v15898_v16  ;;  %v15910_v6 = vadd.f32 %v15095_v48, %v18609_v46  ;;  %v15914_v20 = vadd.f32 %v15095_v48, %v18611_v26  ;;  %v18613_v9 = vld [vmem:[#allocation36_spill] sm:$0xff]  ;;  %v18615_v16 = vld [vmem:[#allocation37_spill] sm:$0xff]  ;;  %v16364_v23 = vmax.f32 %v18842_v44, %v18841_v38  ;;  %v18848_v33 = vmax.f32 %v15705_v5, 0.0 }
 0x396   :  { %18606 = vst [vmem:[#allocation25_spill] sm:$0xff] %v15902_v15  ;;  %18608 = vst [vmem:[#allocation27_spill] sm:$0xff] %v15906_v22  ;;  %v15918_v8 = vadd.f32 %v15095_v48, %v18613_v9  ;;  %v15922_v21 = vadd.f32 %v15095_v48, %v18615_v16  ;;  %v18617_v15 = vld [vmem:[#allocation39_spill] sm:$0xff]  ;;  %v18618_v22 = vld [vmem:[#allocation38_spill] sm:$0xff]  ;;  %v18849_v62 = vmax.f32 %v15841_v50, 0.0  ;;  %v18850_v60 = vmax.f32 %v15709_v17, 0.0 }
 0x397   :  { %18610 = vst [vmem:[#allocation26_spill] sm:$0xff] %v15910_v6  ;;  %18612 = vst [vmem:[#allocation28_spill] sm:$0xff] %v15914_v20  ;;  %v15926_v19 = vadd.f32 %v15095_v48, %v18617_v15  ;;  %v15930_v46 = vadd.f32 %v15095_v48, %v18618_v22  ;;  %v18619_v6 = vld [vmem:[#allocation40_spill] sm:$0xff]  ;;  %v18621_v20 = vld [vmem:[#allocation41_spill] sm:$0xff]  ;;  %v15950_v22 = vadd.f32 %v15095_v48, %v18627_v55  ;;  %v18852_v58 = vmax.f32 %v15713_v27, 0.0 }
 0x398   :  { %18614 = vst [vmem:[#allocation29_spill] sm:$0xff] %v15918_v8  ;;  %18616 = vst [vmem:[#allocation31_spill] sm:$0xff] %v15922_v21  ;;  %v15934_v26 = vadd.f32 %v15095_v48, %v18619_v6  ;;  %v15938_v9 = vadd.f32 %v15095_v48, %v18621_v20  ;;  %v18623_v8 = vld [vmem:[#allocation43_spill] sm:$0xff]  ;;  %v18625_v21 = vld [vmem:[#allocation42_spill] sm:$0xff]  ;;  %v15954_v6 = vadd.f32 %v15095_v48, %v18629_v32  ;;  %v18854_v52 = vmax.f32 %v15717_v39, 0.0 }
 0x399   :  { %v15942_v16 = vadd.f32 %v15095_v48, %v18623_v8  ;;  %v15946_v15 = vadd.f32 %v15095_v48, %v18625_v21  ;;  %18628 = vst [vmem:[#allocation34_spill] sm:$0xff] %v15950_v22  ;;  %v18639_v22 = vld [vmem:[#allocation49_spill] sm:$0xff]  ;;  %v18856_v17 = vmax.f32 %v15721_v47, 0.0  ;;  %v18858_v27 = vmax.f32 %v15725_v13, 0.0 }
 0x39a   :  { %18620 = vst [vmem:[#allocation30_spill] sm:$0xff] %v15934_v26  ;;  %18622 = vst [vmem:[#allocation32_spill] sm:$0xff] %v15938_v9  ;;  %v18631_v26 = vld [vmem:[#allocation46_spill] sm:$0xff]  ;;  %v18633_v9 = vld [vmem:[#allocation47_spill] sm:$0xff]  ;;  %v15974_v32 = vadd.f32 %v15095_v48, %v18639_v22  ;;  %v18860_v39 = vmax.f32 %v15729_v42, 0.0 }
 0x39b   :  { %18624 = vst [vmem:[#allocation33_spill] sm:$0xff] %v15942_v16  ;;  %18626 = vst [vmem:[#allocation35_spill] sm:$0xff] %v15946_v15  ;;  %v15958_v20 = vadd.f32 %v15095_v48, %v18631_v26  ;;  %v15962_v8 = vadd.f32 %v15095_v48, %v18633_v9  ;;  %v18635_v16 = vld [vmem:[#allocation48_spill] sm:$0xff]  ;;  %v18637_v15 = vld [vmem:[#allocation50_spill] sm:$0xff] }
 0x39c   :  { %18630 = vst [vmem:[#allocation36_spill] sm:$0xff] %v15954_v6  ;;  %v15966_v21 = vadd.f32 %v15095_v48, %v18635_v16  ;;  %v15970_v55 = vadd.f32 %v15095_v48, %v18637_v15  ;;  %18640 = vst [vmem:[#allocation41_spill] sm:$0xff] %v15974_v32  ;;  %v18641_v6 = vld [vmem:[#allocation51_spill] sm:$0xff]  ;;  %v18651_v32 = vld [vmem:[#allocation56_spill] sm:$0xff] }
 0x39d   :  { %18632 = vst [vmem:[#allocation37_spill] sm:$0xff] %v15958_v20  ;;  %18634 = vst [vmem:[#allocation39_spill] sm:$0xff] %v15962_v8  ;;  %v15978_v26 = vadd.f32 %v15095_v48, %v18641_v6  ;;  %v18643_v20 = vld [vmem:[#allocation52_spill] sm:$0xff]  ;;  %v18645_v8 = vld [vmem:[#allocation54_spill] sm:$0xff]  ;;  %v15998_v6 = vadd.f32 %v15095_v48, %v18651_v32 }
 0x39e   :  { %18636 = vst [vmem:[#allocation38_spill] sm:$0xff] %v15966_v21  ;;  %18638 = vst [vmem:[#allocation40_spill] sm:$0xff] %v15970_v55  ;;  %v15982_v9 = vadd.f32 %v15095_v48, %v18643_v20  ;;  %v15986_v16 = vadd.f32 %v15095_v48, %v18645_v8  ;;  %v18647_v21 = vld [vmem:[#allocation53_spill] sm:$0xff]  ;;  %v18649_v55 = vld [vmem:[#allocation55_spill] sm:$0xff] }
 0x39f   :  { %18642 = vst [vmem:[#allocation43_spill] sm:$0xff] %v15978_v26  ;;  %v15990_v15 = vadd.f32 %v15095_v48, %v18647_v21  ;;  %v15994_v22 = vadd.f32 %v15095_v48, %v18649_v55  ;;  %18652 = vst [vmem:[#allocation47_spill] sm:$0xff] %v15998_v6  ;;  %v18653_v26 = vld [vmem:[#allocation58_spill] sm:$0xff]  ;;  %v18663_v6 = vld [vmem:[#allocation61_spill] sm:$0xff] }
 0x3a0   :  { %18644 = vst [vmem:[#allocation42_spill] sm:$0xff] %v15982_v9  ;;  %18646 = vst [vmem:[#allocation44_spill] sm:$0xff] %v15986_v16  ;;  %v16002_v20 = vadd.f32 %v15095_v48, %v18653_v26  ;;  %v18655_v9 = vld [vmem:[#allocation57_spill] sm:$0xff]  ;;  %v18657_v16 = vld [vmem:[#allocation59_spill] sm:$0xff]  ;;  %v16022_v26 = vadd.f32 %v15095_v48, %v18663_v6 }
 0x3a1   :  { %18648 = vst [vmem:[#allocation45_spill] sm:$0xff] %v15990_v15  ;;  %18650 = vst [vmem:[#allocation46_spill] sm:$0xff] %v15994_v22  ;;  %v16006_v8 = vadd.f32 %v15095_v48, %v18655_v9  ;;  %v16010_v21 = vadd.f32 %v15095_v48, %v18657_v16  ;;  %v18659_v15 = vld [vmem:[#allocation60_spill] sm:$0xff]  ;;  %v18661_v22 = vld [vmem:[#allocation62_spill] sm:$0xff] }
 0x3a2   :  { %18654 = vst [vmem:[#allocation48_spill] sm:$0xff] %v16002_v20  ;;  %v16014_v55 = vadd.f32 %v15095_v48, %v18659_v15  ;;  %v16018_v32 = vadd.f32 %v15095_v48, %v18661_v22  ;;  %18664 = vst [vmem:[#allocation54_spill] sm:$0xff] %v16022_v26  ;;  %v18665_v20 = vld [vmem:[#allocation63_spill] sm:$0xff]  ;;  %v18675_v26 = vld [vmem:[#allocation68_spill] sm:$0xff] }
 0x3a3   :  { %18656 = vst [vmem:[#allocation50_spill] sm:$0xff] %v16006_v8  ;;  %18658 = vst [vmem:[#allocation49_spill] sm:$0xff] %v16010_v21  ;;  %v16026_v9 = vadd.f32 %v15095_v48, %v18665_v20  ;;  %v18667_v8 = vld [vmem:[#allocation64_spill] sm:$0xff]  ;;  %v18669_v21 = vld [vmem:[#allocation66_spill] sm:$0xff]  ;;  %v16046_v20 = vadd.f32 %v15095_v48, %v18675_v26 }
 0x3a4   :  { %18660 = vst [vmem:[#allocation51_spill] sm:$0xff] %v16014_v55  ;;  %18662 = vst [vmem:[#allocation52_spill] sm:$0xff] %v16018_v32  ;;  %v16030_v16 = vadd.f32 %v15095_v48, %v18667_v8  ;;  %v16034_v15 = vadd.f32 %v15095_v48, %v18669_v21  ;;  %v18671_v55 = vld [vmem:[#allocation65_spill] sm:$0xff]  ;;  %v18673_v32 = vld [vmem:[#allocation67_spill] sm:$0xff] }
 0x3a5   :  { %18666 = vst [vmem:[#allocation53_spill] sm:$0xff] %v16026_v9  ;;  %v16038_v22 = vadd.f32 %v15095_v48, %v18671_v55  ;;  %v16042_v6 = vadd.f32 %v15095_v48, %v18673_v32  ;;  %18676 = vst [vmem:[#allocation59_spill] sm:$0xff] %v16046_v20  ;;  %v18677_v9 = vld [vmem:[#allocation70_spill] sm:$0xff]  ;;  %v18685_v26 = vld [vmem:[#allocation73_spill] sm:$0xff] }
 0x3a6   :  { %18668 = vst [vmem:[#allocation55_spill] sm:$0xff] %v16030_v16  ;;  %18670 = vst [vmem:[#allocation56_spill] sm:$0xff] %v16034_v15  ;;  %v16050_v8 = vadd.f32 %v15095_v48, %v18677_v9  ;;  %v18679_v16 = vld [vmem:[#allocation69_spill] sm:$0xff]  ;;  %v18681_v15 = vld [vmem:[#allocation71_spill] sm:$0xff]  ;;  %v16066_v20 = vadd.f32 %v15095_v48, %v18685_v26 }
 0x3a7   :  { %18672 = vst [vmem:[#allocation58_spill] sm:$0xff] %v16038_v22  ;;  %18674 = vst [vmem:[#allocation57_spill] sm:$0xff] %v16042_v6  ;;  %v16054_v21 = vadd.f32 %v15095_v48, %v18679_v16  ;;  %v6297_v55 = vadd.f32 %v15095_v48, %v18681_v15  ;;  %v18682_v22 = vld [vmem:[#allocation72_spill] sm:$0xff]  ;;  %v18683_v32 = vld [vmem:[#allocation74_spill] sm:$0xff] }
 0x3a8   :  { %18678 = vst [vmem:[#allocation60_spill] sm:$0xff] %v16050_v8  ;;  %v6298_v45 = vadd.f32 %v15095_v48, %v18682_v22  ;;  %v16062_v6 = vadd.f32 %v15095_v48, %v18683_v32  ;;  %18686 = vst [vmem:[#allocation63_spill] sm:$0xff] %v16066_v20  ;;  %v18687_v9 = vld [vmem:[#allocation75_spill] sm:$0xff]  ;;  %v18689_v16 = vld [vmem:[#allocation76_spill] sm:$0xff] }
 0x3a9   :  { %18680 = vst [vmem:[#allocation62_spill] sm:$0xff] %v16054_v21  ;;  %v16070_v8 = vadd.f32 %v15095_v48, %v18687_v9  ;;  %v16074_v21 = vadd.f32 %v15095_v48, %v18689_v16  ;;  %v18691_v15 = vld [vmem:[#allocation78_spill] sm:$0xff]  ;;  %v18693_v22 = vld [vmem:[#allocation77_spill] sm:$0xff]  ;;  %v18697_v20 = vld [vmem:[#allocation80_spill] sm:$0xff] }
 0x3aa   :  { %18684 = vst [vmem:[#allocation61_spill] sm:$0xff] %v16062_v6  ;;  %v16078_v34 = vadd.f32 %v15095_v48, %v18691_v15  ;;  %v16082_v32 = vadd.f32 %v15095_v48, %v18693_v22  ;;  %v18695_v6 = vld [vmem:[#allocation79_spill] sm:$0xff]  ;;  %v16090_v9 = vadd.f32 %v15095_v48, %v18697_v20  ;;  %v6442_v53 = vmax.f32 %v6298_v45, 0.0  ;;  %v18766_v12 = vld [vmem:[#allocation30_spill] sm:$0xff] }
 0x3ab   :  { %18688 = vst [vmem:[#allocation64_spill] sm:$0xff] %v16070_v8  ;;  %18690 = vst [vmem:[#allocation66_spill] sm:$0xff] %v16074_v21  ;;  %v16086_v26 = vadd.f32 %v15095_v48, %v18695_v6  ;;  %v18699_v8 = vld [vmem:[#allocation81_spill] sm:$0xff]  ;;  %v18701_v21 = vld [vmem:[#allocation82_spill] sm:$0xff] }
 0x3ac   :  { %18692 = vst [vmem:[#allocation65_spill] sm:$0xff] %v16078_v34  ;;  %18694 = vst [vmem:[#allocation67_spill] sm:$0xff] %v16082_v32  ;;  %v16094_v16 = vadd.f32 %v15095_v48, %v18699_v8  ;;  %v16098_v15 = vadd.f32 %v15095_v48, %v18701_v21  ;;  %v18703_v34 = vld [vmem:[#allocation83_spill] sm:$0xff]  ;;  %v18705_v32 = vld [vmem:[#allocation85_spill] sm:$0xff] }
 0x3ad   :  { %18696 = vst [vmem:[#allocation68_spill] sm:$0xff] %v16086_v26  ;;  %18698 = vst [vmem:[#allocation70_spill] sm:$0xff] %v16090_v9  ;;  %v16102_v22 = vadd.f32 %v15095_v48, %v18703_v34  ;;  %v16106_v6 = vadd.f32 %v15095_v48, %v18705_v32  ;;  %v18707_v26 = vld [vmem:[#allocation84_spill] sm:$0xff]  ;;  %v18709_v9 = vld [vmem:[#allocation86_spill] sm:$0xff] }
 0x3ae   :  { %18700 = vst [vmem:[#allocation69_spill] sm:$0xff] %v16094_v16  ;;  %18702 = vst [vmem:[#allocation71_spill] sm:$0xff] %v16098_v15  ;;  %v16110_v20 = vadd.f32 %v15095_v48, %v18707_v26  ;;  %v16114_v8 = vadd.f32 %v15095_v48, %v18709_v9  ;;  %v18711_v16 = vld [vmem:[#allocation87_spill] sm:$0xff]  ;;  %v18713_v15 = vld [vmem:[#allocation89_spill] sm:$0xff] }
 0x3af   :  { %18704 = vst [vmem:[#allocation72_spill] sm:$0xff] %v16102_v22  ;;  %18706 = vst [vmem:[#allocation74_spill] sm:$0xff] %v16106_v6  ;;  %v16118_v21 = vadd.f32 %v15095_v48, %v18711_v16  ;;  %v16122_v34 = vadd.f32 %v15095_v48, %v18713_v15  ;;  %v18715_v22 = vld [vmem:[#allocation88_spill] sm:$0xff]  ;;  %v18717_v6 = vld [vmem:[#allocation90_spill] sm:$0xff] }
 0x3b0   :  { %18708 = vst [vmem:[#allocation73_spill] sm:$0xff] %v16110_v20  ;;  %18710 = vst [vmem:[#allocation75_spill] sm:$0xff] %v16114_v8  ;;  %v16126_v32 = vadd.f32 %v15095_v48, %v18715_v22  ;;  %v16130_v26 = vadd.f32 %v15095_v48, %v18717_v6  ;;  %v18719_v20 = vld [vmem:[#allocation91_spill] sm:$0xff]  ;;  %v18721_v8 = vld [vmem:[#allocation93_spill] sm:$0xff] }
 0x3b1   :  { %18712 = vst [vmem:[#allocation76_spill] sm:$0xff] %v16118_v21  ;;  %18714 = vst [vmem:[#allocation78_spill] sm:$0xff] %v16122_v34  ;;  %v16134_v9 = vadd.f32 %v15095_v48, %v18719_v20  ;;  %v16138_v16 = vadd.f32 %v15095_v48, %v18721_v8  ;;  %v18723_v21 = vld [vmem:[#allocation92_spill] sm:$0xff]  ;;  %v18725_v34 = vld [vmem:[#allocation94_spill] sm:$0xff] }
 0x3b2   :  { %18716 = vst [vmem:[#allocation77_spill] sm:$0xff] %v16126_v32  ;;  %18718 = vst [vmem:[#allocation79_spill] sm:$0xff] %v16130_v26  ;;  %v16142_v15 = vadd.f32 %v15095_v48, %v18723_v21  ;;  %v16146_v22 = vadd.f32 %v15095_v48, %v18725_v34  ;;  %v18727_v32 = vld [vmem:[#allocation95_spill] sm:$0xff]  ;;  %v18729_v26 = vld [vmem:[#allocation97_spill] sm:$0xff] }
 0x3b3   :  { %18720 = vst [vmem:[#allocation80_spill] sm:$0xff] %v16134_v9  ;;  %18722 = vst [vmem:[#allocation81_spill] sm:$0xff] %v16138_v16  ;;  %v16150_v6 = vadd.f32 %v15095_v48, %v18727_v32  ;;  %v16154_v20 = vadd.f32 %v15095_v48, %v18729_v26  ;;  %v18731_v9 = vld [vmem:[#allocation96_spill] sm:$0xff]  ;;  %v18733_v16 = vld [vmem:[#allocation98_spill] sm:$0xff] }
 0x3b4   :  { %18724 = vst [vmem:[#allocation82_spill] sm:$0xff] %v16142_v15  ;;  %18726 = vst [vmem:[#allocation83_spill] sm:$0xff] %v16146_v22  ;;  %v16158_v8 = vadd.f32 %v15095_v48, %v18731_v9  ;;  %v16162_v21 = vadd.f32 %v15095_v48, %v18733_v16  ;;  %v18735_v15 = vld [vmem:[#allocation99_spill] sm:$0xff]  ;;  %v18737_v22 = vld [vmem:[#allocation101_spill] sm:$0xff] }
 0x3b5   :  { %18728 = vst [vmem:[#allocation85_spill] sm:$0xff] %v16150_v6  ;;  %18730 = vst [vmem:[#allocation84_spill] sm:$0xff] %v16154_v20  ;;  %v16166_v34 = vadd.f32 %v15095_v48, %v18735_v15  ;;  %v16170_v32 = vadd.f32 %v15095_v48, %v18737_v22  ;;  %v18739_v6 = vld [vmem:[#allocation100_spill] sm:$0xff]  ;;  %v18741_v20 = vld [vmem:[#allocation102_spill] sm:$0xff]  ;;  %v6334_v15 = vmax.f32 %v15665_v25, 0.0  ;;  %v6370_v22 = vmax.f32 %v15797_v29, 0.0 }
 0x3b6   :  { %18732 = vst [vmem:[#allocation86_spill] sm:$0xff] %v16158_v8  ;;  %18734 = vst [vmem:[#allocation87_spill] sm:$0xff] %v16162_v21  ;;  %v16174_v26 = vadd.f32 %v15095_v48, %v18739_v6  ;;  %v16178_v9 = vadd.f32 %v15095_v48, %v18741_v20  ;;  %v18743_v8 = vld [vmem:[#allocation103_spill] sm:$0xff]  ;;  %v6333_v21 = vmax.f32 %v15661_v41, 0.0  ;;  %v6406_v6 = vmax.f32 %v15930_v46, 0.0  ;;  %v18747_v29 = vld [vmem:[#allocation116_spill] sm:$0xff] }
 0x3b7   :  { %18736 = vst [vmem:[#allocation89_spill] sm:$0xff] %v16166_v34  ;;  %18738 = vst [vmem:[#allocation88_spill] sm:$0xff] %v16170_v32  ;;  %v16182_v16 = vadd.f32 %v15095_v48, %v18743_v8  ;;  %v6369_v34 = vmax.f32 %v15793_v35, 0.0  ;;  %v6405_v32 = vmax.f32 %v15926_v19, 0.0  ;;  %v6478_v24 = vmax.f32 %v6334_v15, %v6370_v22  ;;  %v18746_v45 = vld [vmem:[#allocation115_spill] sm:$0xff]  ;;  %v18748_v15 = vld [vmem:[#allocation13_spill] sm:$0xff] }
 0x3b8   :  { %18740 = vst [vmem:[#allocation90_spill] sm:$0xff] %v16174_v26  ;;  %18742 = vst [vmem:[#allocation91_spill] sm:$0xff] %v16178_v9  ;;  %v6441_v26 = vmax.f32 %v6297_v55, 0.0  ;;  %v6514_v25 = vmax.f32 %v6406_v6, %v6442_v53  ;;  %v18754_v55 = vld [vmem:[#allocation18_spill] sm:$0xff]  ;;  %v18797_v35 = vld [vmem:[#allocation61_spill] sm:$0xff]  ;;  %v6481_v46 = vmax.f32 %v18828_v1, %v18827_v57  ;;  %v16332_v48 = vmax.f32 %v18831_v36, %v18830_v31 }
 0x3b9   :  { %v6477_v9 = vmax.f32 %v6333_v21, %v6369_v34  ;;  %v6445_v7 = vmax.f32 %v18797_v35, 0.0  ;;  %v16344_v1 = vmax.f32 %v18835_v18, %v18834_v40  ;;  %v18837_v57 = vmax.f32 %v15685_v37, 0.0  ;;  %v18948_v35 = vld [vmem:[#allocation37_spill] sm:$0xff] }
 0x3ba   :  { %v6513_v8 = vmax.f32 %v6405_v32, %v6441_v26  ;;  %v16201_v34 = vmax.f32 %v6478_v24, %v6514_v25  ;;  %v18750_v24 = vld [vmem:[#allocation14_spill] sm:$0xff]  ;;  %v18751_v25 = vld [vmem:[#allocation16_spill] sm:$0xff]  ;;  %v18752_v32 = vld [vmem:[#allocation17_spill] sm:$0xff]  ;;  %v18839_v36 = vmax.f32 %v15689_v30, 0.0  ;;  %v18844_v37 = vmax.f32 %v15697_v3, 0.0 }
 0x3bb   :  { %v18753_v26 = vld [vmem:[#allocation19_spill] sm:$0xff]  ;;  %v18816_v20 = vld [vmem:[#allocation81_spill] sm:$0xff]  ;;  %v18817_v22 = vld [vmem:[#allocation82_spill] sm:$0xff]  ;;  %v18846_v30 = vmax.f32 %v15701_v2, 0.0  ;;  %v18851_v3 = vmax.f32 %v18746_v45, 0.0  ;;  %v18853_v2 = vmax.f32 %v18747_v29, 0.0 }
 0x3bc   :  { %v16199_v21 = vmax.f32 %v6477_v9, %v6513_v8  ;;  %18745 = vst [vmem:[#allocation92_spill] sm:$0xff] %v16201_v34  ;;  %6586 = vst [vmem:[#allocation2 + $0x8] sm:$0xff] %v16201_v34  ;;  %v18749_v9 = vld [vmem:[#allocation15_spill] sm:$0xff]  ;;  %v18820_v54 = vld [vmem:[#allocation84_spill] sm:$0xff]  ;;  %v16356_v31 = vmax.f32 %v18839_v36, %v18838_v0  ;;  %v16370_v11 = vmax.f32 %v18844_v37, %v18843_v56  ;;  %v18855_v5 = vmax.f32 %v18748_v15, 0.0 }
 0x3bd   :  { %v18818_v34 = vld [vmem:[#allocation83_spill] sm:$0xff]  ;;  %v18821_v41 = vld [vmem:[#allocation86_spill] sm:$0xff]  ;;  %v16400_v40 = vmax.f32 %v18854_v52, %v18853_v2  ;;  %v18857_v45 = vmax.f32 %v18749_v9, 0.0  ;;  %v18859_v29 = vmax.f32 %v18750_v24, 0.0  ;;  %v18862_v15 = vmax.f32 %v15733_v49, 0.0  ;;  %v18871_v49 = vld [vmem:[#allocation20_spill] sm:$0xff] }
 0x3be   :  { %18744 = vst [vmem:[#allocation93_spill] sm:$0xff] %v16199_v21  ;;  %6585 = vst [vmem:[#allocation2] sm:$0xff] %v16199_v21  ;;  %v18822_v53 = vld [vmem:[#allocation87_spill] sm:$0xff]  ;;  %v16407_v50 = vmax.f32 %v18856_v17, %v18855_v5  ;;  %v18863_v47 = vmax.f32 %v18752_v32, 0.0  ;;  %v18864_v9 = vmax.f32 %v15737_v63, 0.0  ;;  %v18865_v13 = vmax.f32 %v18753_v26, 0.0 }
 0x3bf   :  { %v18825_v4 = vld [vmem:[#allocation90_spill] sm:$0xff]  ;;  %v18826_v6 = vld [vmem:[#allocation91_spill] sm:$0xff]  ;;  %v16413_v18 = vmax.f32 %v18858_v27, %v18857_v45  ;;  %v18866_v24 = vmax.f32 %v15741_v10, 0.0  ;;  %v18868_v42 = vmax.f32 %v18754_v55, 0.0  ;;  %v18872_v56 = vmax.f32 %v18871_v49, 0.0  ;;  %v18873_v37 = vld [vmem:[#allocation105_spill] sm:$0xff] }
 0x3c0   :  { %v16431_v36 = vmax.f32 %v18864_v9, %v18863_v47  ;;  %v18874_v32 = vmax.f32 %v18873_v37, 0.0  ;;  %v18876_v63 = vld [vmem:[#allocation21_spill] sm:$0xff]  ;;  %v18881_v10 = vld [vmem:[#allocation23_spill] sm:$0xff]  ;;  %v18891_v17 = vld [vmem:[#allocation24_spill] sm:$0xff] }
 0x3c1   :  { %v16437_v38 = vmax.f32 %v18866_v24, %v18865_v13  ;;  %v18888_v2 = vld [vmem:[#allocation107_spill] sm:$0xff]  ;;  %v18892_v45 = vmax.f32 %v18891_v17, 0.0  ;;  %v18893_v27 = vld [vmem:[#allocation109_spill] sm:$0xff]  ;;  %v18898_v47 = vld [vmem:[#allocation108_spill] sm:$0xff] }
 0x3c2   :  { %v18889_v52 = vmax.f32 %v18888_v2, 0.0  ;;  %v18899_v9 = vmax.f32 %v18898_v47, 0.0  ;;  %v18901_v24 = vld [vmem:[#allocation27_spill] sm:$0xff]  ;;  %v18906_v37 = vld [vmem:[#allocation26_spill] sm:$0xff]  ;;  %v18918_v2 = vld [vmem:[#allocation112_spill] sm:$0xff] }
 0x3c3   :  { %v6659_v21 = vld [vmem:[#allocation2 + $0x9] sm:$0xff]  ;;  %18867 = vst [vmem:[#allocation95_spill] sm:$0xff] %v16437_v38 }
 0x3c4   :  { %v18926_v47 = vld [vmem:[#allocation63_spill] sm:$0xff]  ;;  %v19022_v38 = vld [vmem:[#allocation58_spill] sm:$0xff] }
 0x3c5   :  { %v6658_v19 = vld [vmem:[#allocation2 + $0x1] sm:$0xff] }
 0x3c6   :  { %6694 = vrot.lane.b32.xlu0 %v6658_v19, %s12462_s3  ;;  %v18824_v19 = vld [vmem:[#allocation88_spill] sm:$0xff] }
 0x3ca   :  { %6696 = vrot.lane.b32.xlu0 %v6659_v21, %s12462_s3  ;;  %v18829_v21 = vmax.f32 %v18766_v12, 0.0  ;;  %v18836_v12 = vmax.f32 %v15817_v14, 0.0  ;;  %v16376_v14 = vmax.f32 %v18846_v30, %v18845_v61  ;;  %v16449_v61 = vmax.f32 %v18874_v32, %v18872_v56 }
 0x3cb   :  { %v18877_v30 = vmax.f32 %v18876_v63, 0.0  ;;  %v18907_v32 = vmax.f32 %v18906_v37, 0.0  ;;  %v18908_v63 = vld [vmem:[#allocation111_spill] sm:$0xff] }
 0x3cc   :  { %v6517_v8 = vmax.f32 %v18829_v21, %v6445_v7  ;;  %v16350_v7 = vmax.f32 %v18837_v57, %v18836_v12  ;;  %v16394_v21 = vmax.f32 %v18852_v58, %v18851_v3  ;;  %v16419_v12 = vmax.f32 %v18860_v39, %v18859_v29  ;;  %18875 = vst [vmem:[#allocation96_spill] sm:$0xff] %v16449_v61  ;;  %v18999_v61 = vld [vmem:[#allocation49_spill] sm:$0xff] }
 0x3cd   :  { %v18861_v57 = vmax.f32 %v18751_v25, 0.0  ;;  %v18869_v25 = vmax.f32 %v15745_v43, 0.0  ;;  %v18886_v43 = vld [vmem:[#allocation22_spill] sm:$0xff]  ;;  %v18894_v29 = vmax.f32 %v18893_v27, 0.0 }
 0x3ce   :  { %v16358_v59 = vmax.f32 %v6481_v46, %v6517_v8  ;;  %v16382_v46 = vmax.f32 %v18848_v33, %v18847_v51  ;;  %v16388_v8 = vmax.f32 %v18850_v60, %v18849_v62  ;;  %v18878_v51 = vld [vmem:[#allocation104_spill] sm:$0xff]  ;;  %v18882_v62 = vmax.f32 %v18881_v10, 0.0  ;;  %v18883_v60 = vld [vmem:[#allocation106_spill] sm:$0xff] }
 0x3cf   :  { %v16425_v0 = vmax.f32 %v18862_v15, %v18861_v57  ;;  %v16443_v44 = vmax.f32 %v18869_v25, %v18868_v42  ;;  %v18879_v26 = vmax.f32 %v18878_v51, 0.0  ;;  %v18884_v55 = vmax.f32 %v18883_v60, 0.0  ;;  %v18896_v57 = vld [vmem:[#allocation25_spill] sm:$0xff]  ;;  %v18903_v25 = vld [vmem:[#allocation110_spill] sm:$0xff] }
 0x3d0   :  { %18840 = vst [vmem:[#allocation94_spill] sm:$0xff] %v16358_v59  ;;  %6589 = vst [vmem:[#allocation2 + $0x20] sm:$0xff] %v16358_v59  ;;  %v18887_v58 = vmax.f32 %v18886_v43, 0.0  ;;  %v16473_v39 = vmax.f32 %v18894_v29, %v18892_v45  ;;  %v18897_v15 = vmax.f32 %v18896_v57, 0.0  ;;  %v18902_v42 = vmax.f32 %v18901_v24, 0.0  ;;  %v18916_v43 = vld [vmem:[#allocation29_spill] sm:$0xff] }
 0x3d1   :  { %18870 = vst [vmem:[#allocation97_spill] sm:$0xff] %v16443_v44  ;;  %v16455_v33 = vmax.f32 %v18879_v26, %v18877_v30  ;;  %v16461_v3 = vmax.f32 %v18884_v55, %v18882_v62  ;;  %v18904_v49 = vmax.f32 %v18903_v25, 0.0  ;;  %v18909_v30 = vmax.f32 %v18908_v63, 0.0  ;;  %v18911_v26 = vld [vmem:[#allocation28_spill] sm:$0xff]  ;;  %v18913_v62 = vld [vmem:[#allocation113_spill] sm:$0xff]  ;;  %v18921_v45 = vld [vmem:[#allocation31_spill] sm:$0xff] }
 0x3d2   :  { %v16467_v5 = vmax.f32 %v18889_v52, %v18887_v58  ;;  %18895 = vst [vmem:[#allocation100_spill] sm:$0xff] %v16473_v39  ;;  %v16479_v13 = vmax.f32 %v18899_v9, %v18897_v15  ;;  %v18912_v10 = vmax.f32 %v18911_v26, 0.0  ;;  %v18914_v60 = vmax.f32 %v18913_v62, 0.0  ;;  %v18923_v29 = vld [vmem:[#allocation114_spill] sm:$0xff]  ;;  %v18928_v24 = vld [vmem:[#allocation32_spill] sm:$0xff]  ;;  %v18936_v62 = vld [vmem:[#allocation35_spill] sm:$0xff] }
 0x3d3   :  { %18880 = vst [vmem:[#allocation98_spill] sm:$0xff] %v16455_v33  ;;  %18885 = vst [vmem:[#allocation99_spill] sm:$0xff] %v16461_v3  ;;  %v16485_v56 = vmax.f32 %v18904_v49, %v18902_v42  ;;  %v16491_v51 = vmax.f32 %v18909_v30, %v18907_v32  ;;  %v18917_v58 = vmax.f32 %v18916_v43, 0.0  ;;  %v18919_v52 = vmax.f32 %v18918_v2, 0.0  ;;  %v18930_v49 = vld [vmem:[#allocation64_spill] sm:$0xff]  ;;  %v18932_v32 = vld [vmem:[#allocation33_spill] sm:$0xff] }
 0x3d4   :  { %18890 = vst [vmem:[#allocation101_spill] sm:$0xff] %v16467_v5  ;;  %18900 = vst [vmem:[#allocation102_spill] sm:$0xff] %v16479_v13  ;;  %v16497_v55 = vmax.f32 %v18914_v60, %v18912_v10  ;;  %v18922_v27 = vmax.f32 %v18921_v45, 0.0  ;;  %v18924_v57 = vmax.f32 %v18923_v29, 0.0  ;;  %v18927_v9 = vmax.f32 %v18926_v47, 0.0  ;;  %v18934_v26 = vld [vmem:[#allocation66_spill] sm:$0xff] }
 0x3d5   :  { %18905 = vst [vmem:[#allocation103_spill] sm:$0xff] %v16485_v56  ;;  %18910 = vst [vmem:[#allocation115_spill] sm:$0xff] %v16491_v51  ;;  %v16503_v17 = vmax.f32 %v18919_v52, %v18917_v58  ;;  %v18929_v42 = vmax.f32 %v18928_v24, 0.0  ;;  %v18931_v37 = vmax.f32 %v18930_v49, 0.0  ;;  %v18933_v63 = vmax.f32 %v18932_v32, 0.0  ;;  %v18938_v58 = vld [vmem:[#allocation65_spill] sm:$0xff] }
 0x3d6   :  { %18915 = vst [vmem:[#allocation116_spill] sm:$0xff] %v16497_v55  ;;  %v16509_v15 = vmax.f32 %v18924_v57, %v18922_v27  ;;  %v18935_v10 = vmax.f32 %v18934_v26, 0.0  ;;  %v18937_v60 = vmax.f32 %v18936_v62, 0.0  ;;  %v18939_v2 = vmax.f32 %v18938_v58, 0.0  ;;  %v18940_v52 = vld [vmem:[#allocation34_spill] sm:$0xff]  ;;  %v18942_v29 = vld [vmem:[#allocation67_spill] sm:$0xff] }
 0x3d7   :  { %18920 = vst [vmem:[#allocation13_spill] sm:$0xff] %v16503_v17  ;;  %v6518_v25 = vmax.f32 %v18929_v42, %v18927_v9  ;;  %v6519_v30 = vmax.f32 %v18933_v63, %v18931_v37  ;;  %v18941_v45 = vmax.f32 %v18940_v52, 0.0  ;;  %v18943_v57 = vmax.f32 %v18942_v29, 0.0  ;;  %v18944_v47 = vld [vmem:[#allocation36_spill] sm:$0xff]  ;;  %v18950_v63 = vld [vmem:[#allocation70_spill] sm:$0xff]  ;;  %v18952_v59 = vld [vmem:[#allocation39_spill] sm:$0xff] }
 0x3d8   :  { %18925 = vst [vmem:[#allocation15_spill] sm:$0xff] %v16509_v15  ;;  %v6520_v43 = vmax.f32 %v18937_v60, %v18935_v10  ;;  %v18945_v24 = vmax.f32 %v18944_v47, 0.0  ;;  %v18946_v42 = vld [vmem:[#allocation68_spill] sm:$0xff]  ;;  %v18949_v32 = vmax.f32 %v18948_v35, 0.0  ;;  %v18951_v26 = vmax.f32 %v18950_v63, 0.0  ;;  %v18954_v60 = vld [vmem:[#allocation69_spill] sm:$0xff] }
 0x3d9   :  { %v6521_v27 = vmax.f32 %v18941_v45, %v18939_v2  ;;  %v18947_v49 = vmax.f32 %v18946_v42, 0.0  ;;  %v18953_v62 = vmax.f32 %v18952_v59, 0.0  ;;  %v18955_v58 = vmax.f32 %v18954_v60, 0.0  ;;  %v18956_v15 = vld [vmem:[#allocation38_spill] sm:$0xff]  ;;  %v18958_v45 = vld [vmem:[#allocation71_spill] sm:$0xff]  ;;  %v18960_v17 = vld [vmem:[#allocation40_spill] sm:$0xff] }
 0x3da   :  { %v6522_v9 = vmax.f32 %v18945_v24, %v18943_v57  ;;  %v18957_v52 = vmax.f32 %v18956_v15, 0.0  ;;  %v18959_v29 = vmax.f32 %v18958_v45, 0.0  ;;  %v18961_v47 = vmax.f32 %v18960_v17, 0.0  ;;  %v18962_v24 = vld [vmem:[#allocation72_spill] sm:$0xff]  ;;  %v18964_v55 = vld [vmem:[#allocation41_spill] sm:$0xff]  ;;  %v18966_v63 = vld [vmem:[#allocation74_spill] sm:$0xff] }
 0x3db   :  { %v6523_v37 = vmax.f32 %v18949_v32, %v18947_v49  ;;  %v6524_v10 = vmax.f32 %v18953_v62, %v18951_v26  ;;  %v18963_v42 = vmax.f32 %v18962_v24, 0.0  ;;  %v18965_v35 = vmax.f32 %v18964_v55, 0.0  ;;  %v6661_v32 = vld [vmem:[#allocation2 + $0x19] sm:$0xff]  ;;  %v18968_v59 = vld [vmem:[#allocation43_spill] sm:$0xff]  ;;  %v18972_v15 = vld [vmem:[#allocation42_spill] sm:$0xff] }
 0x3dc   :  { %v6525_v2 = vmax.f32 %v18957_v52, %v18955_v58  ;;  %v6526_v57 = vmax.f32 %v18961_v47, %v18959_v29  ;;  %v18967_v51 = vmax.f32 %v18966_v63, 0.0  ;;  %v18969_v26 = vmax.f32 %v18968_v59, 0.0  ;;  %v18970_v60 = vld [vmem:[#allocation73_spill] sm:$0xff]  ;;  %v18974_v45 = vld [vmem:[#allocation75_spill] sm:$0xff]  ;;  %v18976_v17 = vld [vmem:[#allocation44_spill] sm:$0xff]  ;;  %6700 = vrot.lane.b32.xlu1 %v6661_v32, %s12462_s3 }
 0x3dd   :  { %v6527_v49 = vmax.f32 %v18965_v35, %v18963_v42  ;;  %v18971_v56 = vmax.f32 %v18970_v60, 0.0  ;;  %v18973_v58 = vmax.f32 %v18972_v15, 0.0  ;;  %v18975_v13 = vmax.f32 %v18974_v45, 0.0  ;;  %v18978_v24 = vld [vmem:[#allocation76_spill] sm:$0xff]  ;;  %v18980_v55 = vld [vmem:[#allocation45_spill] sm:$0xff]  ;;  %v18982_v63 = vld [vmem:[#allocation78_spill] sm:$0xff] }
 0x3de   :  { %v6528_v62 = vmax.f32 %v18969_v26, %v18967_v51  ;;  %v18977_v29 = vmax.f32 %v18976_v17, 0.0  ;;  %v18979_v39 = vmax.f32 %v18978_v24, 0.0  ;;  %v18981_v42 = vmax.f32 %v18980_v55, 0.0  ;;  %v18984_v51 = vld [vmem:[#allocation46_spill] sm:$0xff]  ;;  %v18986_v5 = vld [vmem:[#allocation77_spill] sm:$0xff]  ;;  %v18990_v3 = vld [vmem:[#allocation79_spill] sm:$0xff] }
 0x3df   :  { %v6529_v52 = vmax.f32 %v18973_v58, %v18971_v56  ;;  %v18983_v59 = vmax.f32 %v18982_v63, 0.0  ;;  %v18985_v26 = vmax.f32 %v18984_v51, 0.0  ;;  %v18987_v15 = vmax.f32 %v18986_v5, 0.0  ;;  %v18988_v56 = vld [vmem:[#allocation47_spill] sm:$0xff]  ;;  %v18994_v33 = vld [vmem:[#allocation80_spill] sm:$0xff]  ;;  %v19009_v44 = vld [vmem:[#allocation54_spill] sm:$0xff] }
 0x3e0   :  { %v6530_v47 = vmax.f32 %v18977_v29, %v18975_v13  ;;  %v6531_v35 = vmax.f32 %v18981_v42, %v18979_v39  ;;  %v18989_v58 = vmax.f32 %v18988_v56, 0.0  ;;  %v18991_v17 = vmax.f32 %v18990_v3, 0.0  ;;  %v18992_v13 = vld [vmem:[#allocation48_spill] sm:$0xff]  ;;  %v18996_v39 = vld [vmem:[#allocation50_spill] sm:$0xff] }
 0x3e1   :  { %v6532_v60 = vmax.f32 %v18985_v26, %v18983_v59  ;;  %v18993_v29 = vmax.f32 %v18992_v13, 0.0  ;;  %v18995_v55 = vmax.f32 %v18994_v33, 0.0  ;;  %v18997_v42 = vmax.f32 %v18996_v39, 0.0  ;;  %v19002_v26 = vld [vmem:[#allocation51_spill] sm:$0xff] }
 0x3e2   :  { %v6533_v45 = vmax.f32 %v18989_v58, %v18987_v15  ;;  %v18998_v63 = vmax.f32 %v18816_v20, 0.0  ;;  %v19000_v51 = vmax.f32 %v18999_v61, 0.0  ;;  %v19001_v5 = vmax.f32 %v18817_v22, 0.0  ;;  %v19005_v58 = vld [vmem:[#allocation52_spill] sm:$0xff] }
 0x3e3   :  { %v6534_v24 = vmax.f32 %v18993_v29, %v18991_v17  ;;  %v6535_v32 = vmax.f32 %v18997_v42, %v18995_v55  ;;  %v19003_v56 = vmax.f32 %v19002_v26, 0.0  ;;  %v19004_v3 = vmax.f32 %v18818_v34, 0.0  ;;  %v19007_v29 = vld [vmem:[#allocation85_spill] sm:$0xff] }
 0x3e4   :  { %v6536_v59 = vmax.f32 %v19000_v51, %v18998_v63  ;;  %v19006_v13 = vmax.f32 %v19005_v58, 0.0  ;;  %v19008_v33 = vmax.f32 %v19007_v29, 0.0  ;;  %v19010_v39 = vmax.f32 %v19009_v44, 0.0  ;;  %v19012_v42 = vld [vmem:[#allocation53_spill] sm:$0xff]  ;;  %v19015_v51 = vld [vmem:[#allocation55_spill] sm:$0xff] }
 0x3e5   :  { %v6537_v15 = vmax.f32 %v19003_v56, %v19001_v5  ;;  %v19011_v20 = vmax.f32 %v18820_v54, 0.0  ;;  %v19013_v61 = vmax.f32 %v19012_v42, 0.0  ;;  %v19014_v22 = vmax.f32 %v18821_v41, 0.0  ;;  %v19018_v56 = vld [vmem:[#allocation56_spill] sm:$0xff] }
 0x3e6   :  { %v6538_v17 = vmax.f32 %v19006_v13, %v19004_v3  ;;  %v6539_v55 = vmax.f32 %v19010_v39, %v19008_v33  ;;  %v19016_v26 = vmax.f32 %v19015_v51, 0.0  ;;  %v19017_v34 = vmax.f32 %v18822_v53, 0.0  ;;  %v19020_v13 = vld [vmem:[#allocation89_spill] sm:$0xff] }
 0x3e7   :  { %v6540_v63 = vmax.f32 %v19013_v61, %v19011_v20  ;;  %v19019_v58 = vmax.f32 %v19018_v56, 0.0  ;;  %v19021_v29 = vmax.f32 %v19020_v13, 0.0  ;;  %v19023_v44 = vmax.f32 %v19022_v38, 0.0  ;;  %v19025_v39 = vld [vmem:[#allocation57_spill] sm:$0xff]  ;;  %v19028_v61 = vld [vmem:[#allocation59_spill] sm:$0xff]  ;;  %v19034_v38 = vld [vmem:[#allocation62_spill] sm:$0xff] }
 0x3e8   :  { %v6541_v5 = vmax.f32 %v19016_v26, %v19014_v22  ;;  %v19024_v54 = vmax.f32 %v18824_v19, 0.0  ;;  %v19026_v42 = vmax.f32 %v19025_v39, 0.0  ;;  %v19027_v41 = vmax.f32 %v18825_v4, 0.0  ;;  %v19031_v26 = vld [vmem:[#allocation60_spill] sm:$0xff] }
 0x3e9   :  { %v6542_v3 = vmax.f32 %v19019_v58, %v19017_v34  ;;  %v6543_v33 = vmax.f32 %v19023_v44, %v19021_v29  ;;  %v19029_v51 = vmax.f32 %v19028_v61, 0.0  ;;  %v19030_v53 = vmax.f32 %v18826_v6, 0.0  ;;  %v6946_v61 = vld [vmem:[#allocation2 + $0x3] sm:$0xff] }
 0x3ea   :  { %v6544_v20 = vmax.f32 %v19026_v42, %v19024_v54  ;;  %v19032_v56 = vmax.f32 %v19031_v26, 0.0  ;;  %v19033_v58 = vmax.f32 %v16182_v16, 0.0  ;;  %v19035_v13 = vmax.f32 %v19034_v38, 0.0  ;;  %v6948_v26 = vld [vmem:[#allocation2 + $0x13] sm:$0xff]  ;;  %v12312_v38 = vld [vmem:[%s18047_s5 + $0x58] sm:$0xff]  }
 0x3eb   :  { %v6545_v22 = vmax.f32 %v19029_v51, %v19027_v41  ;;  %v16637_v19 = vmax.f32 %v16332_v48, %v6518_v25  ;;  %v16640_v4 = vmax.f32 %v16338_v28, %v6519_v30  ;;  %v16643_v44 = vmax.f32 %v16344_v1, %v6520_v43  ;;  %v19037_v25 = vld [vmem:[#allocation97_spill] sm:$0xff]  ;;  %v19038_v30 = vld [vmem:[#allocation96_spill] sm:$0xff]  ;;  %v19040_v43 = vld [vmem:[#allocation99_spill] sm:$0xff] }
 0x3ec   :  { %v16628_v34 = vmax.f32 %v19032_v56, %v19030_v53  ;;  %v16634_v29 = vmax.f32 %v19035_v13, %v19033_v58  ;;  %v16646_v6 = vmax.f32 %v16350_v7, %v6521_v27  ;;  %v16649_v54 = vmax.f32 %v16356_v31, %v6522_v9  ;;  %v19041_v9 = vld [vmem:[#allocation101_spill] sm:$0xff]  ;;  %v6947_v41 = vld [vmem:[#allocation2 + $0xb] sm:$0xff] }
 0x3ed   :  { %v16652_v16 = vmax.f32 %v16364_v23, %v6523_v37  ;;  %v16655_v39 = vmax.f32 %v16370_v11, %v6524_v10  ;;  %v16658_v48 = vmax.f32 %v16376_v14, %v6525_v2  ;;  %v16661_v28 = vmax.f32 %v16382_v46, %v6526_v57  ;;  %6590 = vst [vmem:[#allocation2 + $0x28] sm:$0xff] %v16637_v19  ;;  %v19043_v2 = vld [vmem:[#allocation102_spill] sm:$0xff]  ;;  %v12311_v56 = vld [vmem:[%s18047_s5 + $0x50] sm:$0xff]   ;;  %v7091_v13 = vld [vmem:[#allocation2 + $0xc] sm:$0xff] }
 0x3ee   :  { %v16664_v1 = vmax.f32 %v16388_v8, %v6527_v49  ;;  %v16667_v7 = vmax.f32 %v16394_v21, %v6528_v62  ;;  %v6565_v31 = vmax.f32 %v16400_v40, %v6529_v52  ;;  %6591 = vst [vmem:[#allocation2 + $0x30] sm:$0xff] %v16640_v4  ;;  %6592 = vst [vmem:[#allocation2 + $0x38] sm:$0xff] %v16643_v44  ;;  %v19036_v21 = vld [vmem:[#allocation95_spill] sm:$0xff]  ;;  %v6949_v53 = vld [vmem:[#allocation2 + $0x1b] sm:$0xff] }
 0x3ef   :  { %6593 = vst [vmem:[#allocation2 + $0x40] sm:$0xff] %v16646_v6  ;;  %v6566_v23 = vmax.f32 %v16407_v50, %v6530_v47  ;;  %v6567_v11 = vmax.f32 %v16413_v18, %v6531_v35  ;;  %v6568_v14 = vmax.f32 %v16419_v12, %v6532_v60  ;;  %v6569_v46 = vmax.f32 %v16425_v0, %v6533_v45  ;;  %v19039_v12 = vld [vmem:[#allocation98_spill] sm:$0xff]  ;;  %v19044_v49 = vld [vmem:[#allocation103_spill] sm:$0xff]  ;;  %v19046_v35 = vld [vmem:[#allocation116_spill] sm:$0xff] }
 0x3f0   :  { %6594 = vst [vmem:[#allocation2 + $0x48] sm:$0xff] %v16649_v54  ;;  %6595 = vst [vmem:[#allocation2 + $0x50] sm:$0xff] %v16652_v16  ;;  %v6570_v8 = vmax.f32 %v16431_v36, %v6534_v24  ;;  %v6571_v40 = vmax.f32 %v19036_v21, %v6535_v32  ;;  %v6572_v50 = vmax.f32 %v19037_v25, %v6536_v59  ;;  %v19042_v36 = vld [vmem:[#allocation100_spill] sm:$0xff]  ;;  %v19045_v52 = vld [vmem:[#allocation115_spill] sm:$0xff] }
 0x3f1   :  { %6596 = vst [vmem:[#allocation2 + $0x58] sm:$0xff] %v16655_v39  ;;  %6597 = vst [vmem:[#allocation2 + $0x60] sm:$0xff] %v16658_v48  ;;  %v6573_v18 = vmax.f32 %v19038_v30, %v6537_v15  ;;  %v6574_v0 = vmax.f32 %v19039_v12, %v6538_v17  ;;  %v6575_v27 = vmax.f32 %v19040_v43, %v6539_v55  ;;  %v19047_v45 = vld [vmem:[#allocation13_spill] sm:$0xff]  ;;  %v19048_v32 = vld [vmem:[#allocation15_spill] sm:$0xff]  ;;  %v12463_v15 = vmov 0.0  }
 0x3f2   :  { %6598 = vst [vmem:[#allocation2 + $0x68] sm:$0xff] %v16661_v28  ;;  %6599 = vst [vmem:[#allocation2 + $0x70] sm:$0xff] %v16664_v1  ;;  %v6576_v37 = vmax.f32 %v19041_v9, %v6540_v63  ;;  %v6577_v10 = vmax.f32 %v19042_v36, %v6541_v5  ;;  %v6578_v57 = vmax.f32 %v19043_v2, %v6542_v3  ;;  %v6803_v63 = vld [vmem:[#allocation2 + $0xa] sm:$0xff]  ;;  %v6802_v5 = vld [vmem:[#allocation2 + $0x2] sm:$0xff] }
 0x3f3   :  { %6600 = vst [vmem:[#allocation2 + $0x78] sm:$0xff] %v16667_v7  ;;  %6601 = vst [vmem:[#allocation2 + $0x80] sm:$0xff] %v6565_v31  ;;  %v6579_v62 = vmax.f32 %v19044_v49, %v6543_v33  ;;  %v6580_v47 = vmax.f32 %v19045_v52, %v6544_v20  ;;  %v6581_v60 = vmax.f32 %v19046_v35, %v6545_v22  ;;  %v6805_v3 = vld [vmem:[#allocation2 + $0x1a] sm:$0xff]  ;;  %v6804_v33 = vld [vmem:[#allocation2 + $0x12] sm:$0xff] }
 0x3f4   :  { %6602 = vst [vmem:[#allocation2 + $0x88] sm:$0xff] %v6566_v23  ;;  %6603 = vst [vmem:[#allocation2 + $0x90] sm:$0xff] %v6567_v11  ;;  %v6583_v24 = vmax.f32 %v19047_v45, %v16628_v34  ;;  %v6584_v59 = vmax.f32 %v19048_v32, %v16634_v29  ;;  %v6662_v55 = vld [vmem:[#allocation2 + $0x21] sm:$0xff]  ;;  %v12310_v22 = vld [vmem:[%s18047_s5 + $0x48] sm:$0xff]  }
 0x3f5   :  { %6604 = vst [vmem:[#allocation2 + $0x98] sm:$0xff] %v6568_v14  ;;  %6605 = vst [vmem:[#allocation2 + $0xa0] sm:$0xff] %v6569_v46  ;;  %v6663_v17 = vld [vmem:[#allocation2 + $0x29] sm:$0xff]  ;;  %6702 = vrot.lane.b32.xlu0 %v6662_v55, %s12462_s3  ;;  %v7093_v23 = vld [vmem:[#allocation2 + $0x1c] sm:$0xff] }
 0x3f6   :  { %6606 = vst [vmem:[#allocation2 + $0xa8] sm:$0xff] %v6570_v8  ;;  %6607 = vst [vmem:[#allocation2 + $0xb0] sm:$0xff] %v6571_v40  ;;  %6704 = vrot.lane.b32.xlu1 %v6663_v17, %s12462_s3  ;;  %v6807_v42 = vld [vmem:[#allocation2 + $0x2a] sm:$0xff]  ;;  %v6806_v20 = vld [vmem:[#allocation2 + $0x22] sm:$0xff] }
 0x3f7   :  { %6608 = vst [vmem:[#allocation2 + $0xb8] sm:$0xff] %v6572_v50  ;;  %6609 = vst [vmem:[#allocation2 + $0xc0] sm:$0xff] %v6573_v18  ;;  %v12309_v51 = vld [vmem:[%s18047_s5 + $0x40] sm:$0xff]   ;;  %v7092_v11 = vld [vmem:[#allocation2 + $0x14] sm:$0xff] }
 0x3f8   :  { %6610 = vst [vmem:[#allocation2 + $0xc8] sm:$0xff] %v6574_v0  ;;  %6611 = vst [vmem:[#allocation2 + $0xd0] sm:$0xff] %v6575_v27  ;;  %11778 = vmatprep.subr.bf16.mxu1 %v12309_v51  ;;  %v6951_v34 = vld [vmem:[#allocation2 + $0x2b] sm:$0xff]  ;;  %v6950_v58 = vld [vmem:[#allocation2 + $0x23] sm:$0xff] }
 0x3f9   :  { %6612 = vst [vmem:[#allocation2 + $0xd8] sm:$0xff] %v6576_v37  ;;  %6613 = vst [vmem:[#allocation2 + $0xe0] sm:$0xff] %v6577_v10  ;;  %6838 = vrot.lane.b32.xlu0 %v6802_v5, %s12464_s4  ;;  %11779 = vmatpush3.bf16.msra.mxu1 %v12309_v51  ;;  %v7090_v29 = vld [vmem:[#allocation2 + $0x4] sm:$0xff]  ;;  %v12314_v14 = vld [vmem:[%s18047_s5 + $0x68] sm:$0xff]  }
 0x3fa   :  { %6614 = vst [vmem:[#allocation2 + $0xe8] sm:$0xff] %v6578_v57  ;;  %6615 = vst [vmem:[#allocation2 + $0xf0] sm:$0xff] %v6579_v62  ;;  %6840 = vrot.lane.b32.xlu1 %v6803_v63, %s12464_s4  ;;  %11780 = vmatprep.subr.bf16.mxu1 %v12310_v22  ;;  %v12313_v31 = vld [vmem:[%s18047_s5 + $0x60] sm:$0xff]   ;;  %v12315_v21 = vld [vmem:[%s18047_s5 + $0x70] sm:$0xff]  }
 0x3fb   :  { %6616 = vst [vmem:[#allocation2 + $0xf8] sm:$0xff] %v6580_v47  ;;  %6617 = vst [vmem:[#allocation2 + $0x100] sm:$0xff] %v6581_v60  ;;  %v7095_v46 = vld [vmem:[#allocation2 + $0x2c] sm:$0xff]  ;;  %v7094_v8 = vld [vmem:[#allocation2 + $0x24] sm:$0xff] }
 0x3fc   :  { %6621 = vst [vmem:[#allocation2 + $0x120] sm:$0xff] %v12463_v15  ;;  %6619 = vst [vmem:[#allocation2 + $0x110] sm:$0xff] %v6583_v24  ;;  %v6665_v40 = vld [vmem:[#allocation2 + $0x39] sm:$0xff]  ;;  %v6664_v25 = vld [vmem:[#allocation2 + $0x31] sm:$0xff] }
 0x3fd   :  { %6620 = vst [vmem:[#allocation2 + $0x118] sm:$0xff] %v6584_v59  ;;  %6842 = vrot.lane.b32.xlu0 %v6804_v33, %s12464_s4  ;;  %11781 = vmatpush3.bf16.msra.mxu1 %v12310_v22  ;;  %v12316_v50 = vld [vmem:[%s18047_s5 + $0x78] sm:$0xff]   ;;  %v6667_v30 = vld [vmem:[#allocation2 + $0x49] sm:$0xff]  ;;  %v6808_v0 = vld [vmem:[#allocation2 + $0x32] sm:$0xff] }
 0x3fe   :  { %6844 = vrot.lane.b32.xlu1 %v6805_v3, %s12464_s4  ;;  %11782 = vmatprep.subr.bf16.mxu1 %v12311_v56  ;;  %v6666_v18 = vld [vmem:[#allocation2 + $0x41] sm:$0xff]  ;;  %v6811_v43 = vld [vmem:[#allocation2 + $0x4a] sm:$0xff]  ;;  %v6952_v37 = vld [vmem:[#allocation2 + $0x33] sm:$0xff] }
 0x3ff   :  { %v6809_v12 = vld [vmem:[#allocation2 + $0x3a] sm:$0xff]  ;;  %v6810_v27 = vld [vmem:[#allocation2 + $0x42] sm:$0xff]  ;;  %v6955_v36 = vld [vmem:[#allocation2 + $0x4b] sm:$0xff] }
 0x400   :  { %v6953_v9 = vld [vmem:[#allocation2 + $0x3b] sm:$0xff]  ;;  %v6954_v10 = vld [vmem:[#allocation2 + $0x43] sm:$0xff]  ;;  %v7099_v49 = vld [vmem:[#allocation2 + $0x4c] sm:$0xff] }
 0x401   :  { %6846 = vrot.lane.b32.xlu0 %v6806_v20, %s12464_s4  ;;  %11783 = vmatpush3.bf16.msra.mxu1 %v12311_v56  ;;  %v7097_v2 = vld [vmem:[#allocation2 + $0x3c] sm:$0xff]  ;;  %v7096_v57 = vld [vmem:[#allocation2 + $0x34] sm:$0xff]  ;;  %v7098_v62 = vld [vmem:[#allocation2 + $0x44] sm:$0xff] }
 0x402   :  { %6848 = vrot.lane.b32.xlu1 %v6807_v42, %s12464_s4  ;;  %11784 = vmatprep.subr.bf16.mxu1 %v12312_v38  ;;  %v6669_v52 = vld [vmem:[#allocation2 + $0x59] sm:$0xff]  ;;  %v6668_v47 = vld [vmem:[#allocation2 + $0x51] sm:$0xff]  ;;  %v6671_v35 = vld [vmem:[#allocation2 + $0x69] sm:$0xff] }
 0x403   :  { %v6670_v60 = vld [vmem:[#allocation2 + $0x61] sm:$0xff]  ;;  %v6812_v32 = vld [vmem:[#allocation2 + $0x52] sm:$0xff]  ;;  %v6815_v59 = vld [vmem:[#allocation2 + $0x6a] sm:$0xff] }
 0x404   :  { %v16769_v45 = vld [vmem:[%s18047_s5] sm:$0xff]   ;;  %v6813_v24 = vld [vmem:[#allocation2 + $0x5a] sm:$0xff]  ;;  %v6816_v56 = vld [vmem:[#allocation2 + $0x72] sm:$0xff] }
 0x405   :  { %6982 = vrot.lane.b32.xlu0 %v6946_v61, %s12465_s17  ;;  %11785 = vmatpush3.bf16.msra.mxu1 %v12312_v38  ;;  %v6814_v17 = vld [vmem:[#allocation2 + $0x62] sm:$0xff]  ;;  %v6956_v63 = vld [vmem:[#allocation2 + $0x53] sm:$0xff]  ;;  %v6959_v5 = vld [vmem:[#allocation2 + $0x6b] sm:$0xff]  ;;  %v16784_v61 = vpop.permute.xlu1 %6698 }
 0x406   :  { %6984 = vrot.lane.b32.xlu1 %v6947_v41, %s12465_s17  ;;  %11786 = vmatprep.subr.bf16.mxu1 %v12313_v31  ;;  %v6957_v55 = vld [vmem:[#allocation2 + $0x5b] sm:$0xff]  ;;  %v6958_v3 = vld [vmem:[#allocation2 + $0x63] sm:$0xff]  ;;  %v7103_v20 = vld [vmem:[#allocation2 + $0x6c] sm:$0xff] }
 0x407   :  { %v7101_v33 = vld [vmem:[#allocation2 + $0x5c] sm:$0xff]  ;;  %v7100_v42 = vld [vmem:[#allocation2 + $0x54] sm:$0xff]  ;;  %v7102_v41 = vld [vmem:[#allocation2 + $0x64] sm:$0xff] }
 0x408   :  { %v6673_v22 = vld [vmem:[#allocation2 + $0x79] sm:$0xff] }
 0x409   :  { %6986 = vrot.lane.b32.xlu0 %v6948_v26, %s12465_s17  ;;  %11787 = vmatpush3.bf16.msra.mxu1 %v12313_v31  ;;  %v6817_v26 = vld [vmem:[#allocation2 + $0x7a] sm:$0xff] }
 0x40a   :  { %6988 = vrot.lane.b32.xlu1 %v6949_v53, %s12465_s17  ;;  %11788 = vmatprep.subr.bf16.mxu1 %v12314_v14  ;;  %v6672_v53 = vld [vmem:[#allocation2 + $0x71] sm:$0xff]  ;;  %v6961_v38 = vld [vmem:[#allocation2 + $0x7b] sm:$0xff] }
 0x40d   :  { %6990 = vrot.lane.b32.xlu0 %v6950_v58, %s12465_s17  ;;  %11789 = vmatpush3.bf16.msra.mxu1 %v12314_v14 }
 0x40e   :  { %6992 = vrot.lane.b32.xlu1 %v6951_v34, %s12465_s17  ;;  %11790 = vmatprep.subr.bf16.mxu1 %v12315_v21 }
 0x411   :  { %7126 = vrot.lane.b32.xlu0 %v7090_v29, %s12466_s1  ;;  %11791 = vmatpush3.bf16.msra.mxu1 %v12315_v21  ;;  %v6674_v21 = vld [vmem:[#allocation2 + $0x81] sm:$0xff] }
 0x412   :  { %7128 = vrot.lane.b32.xlu1 %v7091_v13, %s12466_s1  ;;  %11792 = vmatprep.subr.bf16.mxu1 %v12316_v50  ;;  %v6960_v13 = vld [vmem:[#allocation2 + $0x73] sm:$0xff] }
 0x415   :  { %7130 = vrot.lane.b32.xlu0 %v7092_v11, %s12466_s1  ;;  %11793 = vmatpush3.bf16.msra.mxu1 %v12316_v50  ;;  %v7104_v11 = vld [vmem:[#allocation2 + $0x74] sm:$0xff]  ;;  %v6819_v50 = vld [vmem:[#allocation2 + $0x8a] sm:$0xff] }
 0x416   :  { %7132 = vrot.lane.b32.xlu1 %v7093_v23, %s12466_s1  ;;  %11806 = vmatprep.subr.bf16.mxu1 %v16769_v45  ;;  %v7105_v23 = vld [vmem:[#allocation2 + $0x7c] sm:$0xff] }
 0x419   :  { %7134 = vrot.lane.b32.xlu0 %v7094_v8, %s12466_s1  ;;  %v6675_v8 = vld [vmem:[#allocation2 + $0x89] sm:$0xff] }
 0x41a   :  { %7136 = vrot.lane.b32.xlu1 %v7095_v46, %s12466_s1 }
 0x41d   :  { %6706 = vrot.lane.b32.xlu0 %v6664_v25, %s12462_s3 }
 0x41e   :  { %6708 = vrot.lane.b32.xlu1 %v6665_v40, %s12462_s3 }
 0x421   :  { %6710 = vrot.lane.b32.xlu0 %v6666_v18, %s12462_s3 }
 0x422   :  { %6712 = vrot.lane.b32.xlu1 %v6667_v30, %s12462_s3  ;;  %v6818_v30 = vld [vmem:[#allocation2 + $0x82] sm:$0xff] }
 0x425   :  { %6850 = vrot.lane.b32.xlu0 %v6808_v0, %s12464_s4  ;;  %v6963_v0 = vld [vmem:[#allocation2 + $0x8b] sm:$0xff] }
 0x426   :  { %6852 = vrot.lane.b32.xlu1 %v6809_v12, %s12464_s4 }
 0x429   :  { %6854 = vrot.lane.b32.xlu0 %v6810_v27, %s12464_s4 }
 0x42a   :  { %6856 = vrot.lane.b32.xlu1 %v6811_v43, %s12464_s4  ;;  %v6962_v43 = vld [vmem:[#allocation2 + $0x83] sm:$0xff] }
 0x42d   :  { %6994 = vrot.lane.b32.xlu0 %v6952_v37, %s12465_s17  ;;  %v7107_v37 = vld [vmem:[#allocation2 + $0x8c] sm:$0xff] }
 0x42e   :  { %6996 = vrot.lane.b32.xlu1 %v6953_v9, %s12465_s17 }
 0x431   :  { %6998 = vrot.lane.b32.xlu0 %v6954_v10, %s12465_s17 }
 0x432   :  { %7000 = vrot.lane.b32.xlu1 %v6955_v36, %s12465_s17  ;;  %v7106_v36 = vld [vmem:[#allocation2 + $0x84] sm:$0xff] }
 0x435   :  { %7138 = vrot.lane.b32.xlu0 %v7096_v57, %s12466_s1  ;;  %v6677_v57 = vld [vmem:[#allocation2 + $0x99] sm:$0xff] }
 0x436   :  { %7140 = vrot.lane.b32.xlu1 %v7097_v2, %s12466_s1 }
 0x438   :  { %v6695_v51 = vpop.permute.xlu0 %6694 }
 0x439   :  { %7142 = vrot.lane.b32.xlu0 %v7098_v62, %s12466_s1  ;;  %v19049_v62 = vld [vmem:[#allocation93_spill] sm:$0xff] }
 0x43a   :  { %7144 = vrot.lane.b32.xlu1 %v7099_v49, %s12466_s1  ;;  %v6676_v49 = vld [vmem:[#allocation2 + $0x91] sm:$0xff] }
 0x43c   :  { %v6697_v58 = vpop.permute.xlu0 %6696 }
 0x43d   :  { %6714 = vrot.lane.b32.xlu0 %v6668_v47, %s12462_s3  ;;  %v19050_v47 = vld [vmem:[#allocation92_spill] sm:$0xff] }
 0x43e   :  { %6716 = vrot.lane.b32.xlu1 %v6669_v52, %s12462_s3  ;;  %v6766_v52 = vadd.f32 %v6695_v51, %v19049_v62  ;;  %v6824_v62 = vld [vmem:[#allocation2 + $0xb2] sm:$0xff] }
 0x441   :  { %6718 = vrot.lane.b32.xlu0 %v6670_v60, %s12462_s3 }
 0x442   :  { %6720 = vrot.lane.b32.xlu1 %v6671_v35, %s12462_s3  ;;  %v6767_v35 = vadd.f32 %v6697_v58, %v19050_v47  ;;  %v6681_v58 = vld [vmem:[#allocation2 + $0xb9] sm:$0xff] }
 0x445   :  { %6858 = vrot.lane.b32.xlu0 %v6812_v32, %s12464_s4 }
 0x446   :  { %6860 = vrot.lane.b32.xlu1 %v6813_v24, %s12464_s4 }
 0x449   :  { %6862 = vrot.lane.b32.xlu0 %v6814_v17, %s12464_s4  ;;  %v6679_v17 = vld [vmem:[#allocation2 + $0xa9] sm:$0xff] }
 0x44a   :  { %6864 = vrot.lane.b32.xlu1 %v6815_v59, %s12464_s4 }
 0x44d   :  { %7002 = vrot.lane.b32.xlu0 %v6956_v63, %s12465_s17  ;;  %v6624_v63 = vld [vmem:[#allocation2 + $0x10] sm:$0xff] }
 0x44e   :  { %7004 = vrot.lane.b32.xlu1 %v6957_v55, %s12465_s17  ;;  %v6701_v34 = vpop.permute.xlu1 %6700  ;;  %v6678_v55 = vld [vmem:[#allocation2 + $0xa1] sm:$0xff] }
 0x451   :  { %7006 = vrot.lane.b32.xlu0 %v6958_v3, %s12465_s17  ;;  %v6768_v3 = vadd.f32 %v16784_v61, %v6624_v63  ;;  %v6964_v63 = vld [vmem:[#allocation2 + $0x93] sm:$0xff] }
 0x452   :  { %7008 = vrot.lane.b32.xlu1 %v6959_v5, %s12465_s17  ;;  %v6625_v5 = vld [vmem:[#allocation2 + $0x18] sm:$0xff] }
 0x455   :  { %7146 = vrot.lane.b32.xlu0 %v7100_v42, %s12466_s1 }
 0x456   :  { %7148 = vrot.lane.b32.xlu1 %v7101_v33, %s12466_s1  ;;  %v6769_v33 = vadd.f32 %v6701_v34, %v6625_v5 }
 0x459   :  { %7150 = vrot.lane.b32.xlu0 %v7102_v41, %s12466_s1 }
 0x45a   :  { %7152 = vrot.lane.b32.xlu1 %v7103_v20, %s12466_s1 }
 0x45d   :  { %6722 = vrot.lane.b32.xlu0 %v6672_v53, %s12462_s3 }
 0x45e   :  { %6724 = vrot.lane.b32.xlu1 %v6673_v22, %s12462_s3 }
 0x461   :  { %6866 = vrot.lane.b32.xlu0 %v6816_v56, %s12464_s4 }
 0x462   :  { %6868 = vrot.lane.b32.xlu1 %v6817_v26, %s12464_s4 }
 0x465   :  { %7010 = vrot.lane.b32.xlu0 %v6960_v13, %s12465_s17 }
 0x466   :  { %7012 = vrot.lane.b32.xlu1 %v6961_v38, %s12465_s17  ;;  %v6680_v38 = vld [vmem:[#allocation2 + $0xb1] sm:$0xff] }
 0x467   :  { %v6703_v31 = vpop.permute.xlu0 %6702 }
 0x468   :  { %v6705_v29 = vpop.permute.xlu1 %6704 }
 0x469   :  { %7154 = vrot.lane.b32.xlu0 %v7104_v11, %s12466_s1  ;;  %v6771_v13 = vadd.f32 %v6705_v29, %v16637_v19  ;;  %v6820_v19 = vld [vmem:[#allocation2 + $0x92] sm:$0xff] }
 0x46a   :  { %7156 = vrot.lane.b32.xlu1 %v7105_v23, %s12466_s1  ;;  %v19051_v23 = vld [vmem:[#allocation94_spill] sm:$0xff] }
 0x46b   :  { %v6839_v46 = vpop.permute.xlu0 %6838  ;;  %v6770_v11 = vadd.f32 %v6703_v31, %v19051_v23 }
 0x46c   :  { %v6841_v14 = vpop.permute.xlu1 %6840  ;;  %v6910_v59 = vadd.f32 %v6839_v46, %v6766_v52 }
 0x46d   :  { %6726 = vrot.lane.b32.xlu0 %v6674_v21, %s12462_s3  ;;  %v6911_v32 = vadd.f32 %v6841_v14, %v6767_v35 }
 0x46e   :  { %6728 = vrot.lane.b32.xlu1 %v6675_v8, %s12462_s3 }
 0x46f   :  { %v6843_v25 = vpop.permute.xlu0 %6842 }
 0x470   :  { %v6845_v40 = vpop.permute.xlu1 %6844  ;;  %v6912_v53 = vadd.f32 %v6843_v25, %v6768_v3 }
 0x471   :  { %6870 = vrot.lane.b32.xlu0 %v6818_v30, %s12464_s4  ;;  %v6913_v22 = vadd.f32 %v6845_v40, %v6769_v33  ;;  %v6821_v30 = vld [vmem:[#allocation2 + $0x9a] sm:$0xff] }
 0x472   :  { %6872 = vrot.lane.b32.xlu1 %v6819_v50, %s12464_s4  ;;  %v12319_v33 = vld [vmem:[%s18047_s5 + $0x10] sm:$0xff]  }
 0x473   :  { %v6847_v12 = vpop.permute.xlu0 %6846 }
 0x474   :  { %v6849_v18 = vpop.permute.xlu1 %6848  ;;  %v6914_v40 = vadd.f32 %v6847_v12, %v6770_v11 }
 0x475   :  { %7014 = vrot.lane.b32.xlu0 %v6962_v43, %s12465_s17  ;;  %v6915_v21 = vadd.f32 %v6849_v18, %v6771_v13  ;;  %v7108_v13 = vld [vmem:[#allocation2 + $0x94] sm:$0xff] }
 0x476   :  { %7016 = vrot.lane.b32.xlu1 %v6963_v0, %s12465_s17 }
 0x477   :  { %v6983_v9 = vpop.permute.xlu0 %6982 }
 0x478   :  { %v6985_v27 = vpop.permute.xlu1 %6984  ;;  %v7054_v20 = vadd.f32 %v6983_v9, %v6910_v59  ;;  %v6823_v9 = vld [vmem:[#allocation2 + $0xaa] sm:$0xff] }
 0x479   :  { %7158 = vrot.lane.b32.xlu0 %v7106_v36, %s12466_s1  ;;  %v7055_v42 = vadd.f32 %v6985_v27, %v6911_v32 }
 0x47a   :  { %7160 = vrot.lane.b32.xlu1 %v7107_v37, %s12466_s1  ;;  %v6822_v37 = vld [vmem:[#allocation2 + $0xa2] sm:$0xff] }
 0x47b   :  { %v6987_v2 = vpop.permute.xlu0 %6986 }
 0x47c   :  { %v6989_v10 = vpop.permute.xlu1 %6988  ;;  %v7056_v34 = vadd.f32 %v6987_v2, %v6912_v53  ;;  %v6968_v53 = vld [vmem:[#allocation2 + $0xb3] sm:$0xff] }
 0x47d   :  { %6730 = vrot.lane.b32.xlu0 %v6676_v49, %s12462_s3  ;;  %v7057_v61 = vadd.f32 %v6989_v10, %v6913_v22  ;;  %v6825_v49 = vld [vmem:[#allocation2 + $0xba] sm:$0xff] }
 0x47e   :  { %6732 = vrot.lane.b32.xlu1 %v6677_v57, %s12462_s3  ;;  %v6969_v22 = vld [vmem:[#allocation2 + $0xbb] sm:$0xff] }
 0x47f   :  { %v6991_v24 = vpop.permute.xlu0 %6990 }
 0x480   :  { %v6993_v60 = vpop.permute.xlu1 %6992  ;;  %v7058_v31 = vadd.f32 %v6991_v24, %v6914_v40  ;;  %v7111_v40 = vld [vmem:[#allocation2 + $0xac] sm:$0xff] }
 0x481   :  { %6734 = vrot.lane.b32.xlu0 %v6678_v55, %s12462_s3  ;;  %v7059_v29 = vadd.f32 %v6993_v60, %v6915_v21  ;;  %v6965_v55 = vld [vmem:[#allocation2 + $0x9b] sm:$0xff] }
 0x482   :  { %6736 = vrot.lane.b32.xlu1 %v6679_v17, %s12462_s3  ;;  %v12318_v17 = vld [vmem:[%s18047_s5 + $0x8] sm:$0xff]  }
 0x483   :  { %v7127_v51 = vpop.permute.xlu0 %7126 }
 0x484   :  { %v7129_v41 = vpop.permute.xlu1 %7128  ;;  %v7198_v56 = vadd.f32 %v7127_v51, %v7054_v20  ;;  %v6966_v20 = vld [vmem:[#allocation2 + $0xa3] sm:$0xff] }
 0x485   :  { %v7199_v26 = vadd.f32 %v7129_v41, %v7055_v42  ;;  %6738 = vrot.lane.b32.xlu0 %v6680_v38, %s12462_s3  ;;  %v6967_v42 = vld [vmem:[#allocation2 + $0xab] sm:$0xff]  ;;  %v7109_v38 = vld [vmem:[#allocation2 + $0x9c] sm:$0xff] }
 0x486   :  { %6740 = vrot.lane.b32.xlu1 %v6681_v58, %s12462_s3  ;;  %v12321_v58 = vld [vmem:[%s18047_s5 + $0x20] sm:$0xff]  }
 0x487   :  { %v16813_v14 = vpack.c.bf16 %v7199_v26, %v7198_v56  ;;  %v7131_v8 = vpop.permute.xlu0 %7130 }
 0x488   :  { %v7133_v46 = vpop.permute.xlu1 %7132  ;;  %v7200_v50 = vadd.f32 %v7131_v8, %v7056_v34 }
 0x489   :  { %7252 = vst [vmem:[#allocation3] sm:$0xff] %v16813_v14  ;;  %v7201_v25 = vadd.f32 %v7133_v46, %v7057_v61  ;;  %6874 = vrot.lane.b32.xlu0 %v6820_v19, %s12464_s4  ;;  %v12322_v46 = vld [vmem:[%s18047_s5 + $0x28] sm:$0xff]  }
 0x48a   :  { %6876 = vrot.lane.b32.xlu1 %v6821_v30, %s12464_s4 }
 0x48b   :  { %v16818_v0 = vpack.c.bf16 %v7201_v25, %v7200_v50  ;;  %v7135_v27 = vpop.permute.xlu0 %7134  ;;  %v7110_v25 = vld [vmem:[#allocation2 + $0xa4] sm:$0xff] }
 0x48c   :  { %v7137_v43 = vpop.permute.xlu1 %7136  ;;  %v7202_v12 = vadd.f32 %v7135_v27, %v7058_v31  ;;  %v12323_v31 = vld [vmem:[%s18047_s5 + $0x30] sm:$0xff]  }
 0x48d   :  { %7253 = vst [vmem:[#allocation3 + $0x8] sm:$0xff] %v16818_v0  ;;  %v7203_v18 = vadd.f32 %v7137_v43, %v7059_v29  ;;  %6878 = vrot.lane.b32.xlu0 %v6822_v37, %s12464_s4  ;;  %v7320_v47 = vrot.slane %v16818_v0, 6  ;;  %v7112_v37 = vld [vmem:[#allocation2 + $0xb4] sm:$0xff] }
 0x48e   :  { %6880 = vrot.lane.b32.xlu1 %v6823_v9, %s12464_s4  ;;  %v7113_v9 = vld [vmem:[#allocation2 + $0xbc] sm:$0xff] }
 0x48f   :  { %v16823_v36 = vpack.c.bf16 %v7203_v18, %v7202_v12  ;;  %v6707_v2 = vpop.permute.xlu0 %6706 }
 0x490   :  { %v6709_v10 = vpop.permute.xlu1 %6708  ;;  %v7292_v57 = vld [vmem:[#allocation3] sm:$0xc0]  ;;  %v6772_v11 = vadd.f32 %v6707_v2, %v16640_v4 }
 0x491   :  { %7254 = vst [vmem:[#allocation3 + $0x10] sm:$0xff] %v16823_v36  ;;  %v7319_v52 = vrot.slane %v7292_v57, 6  ;;  %v7322_v35 = vrot.slane %v16823_v36, 6  ;;  %6882 = vrot.lane.b32.xlu0 %v6824_v62, %s12464_s4  ;;  %v6773_v23 = vadd.f32 %v6709_v10, %v16643_v44 }
 0x492   :  { %6884 = vrot.lane.b32.xlu1 %v6825_v49, %s12464_s4  ;;  %v12324_v49 = vld [vmem:[%s18047_s5 + $0x38] sm:$0xff]  }
 0x493   :  { %v7321_v60 = vsel %vm7318_vm1, %v7319_v52, %v7320_v47  ;;  %v7323_v24 = vsel %vm7318_vm1, %v7320_v47, %v7322_v35  ;;  %v6711_v59 = vpop.permute.xlu0 %6710  ;;  %v6683_v47 = vld [vmem:[#allocation2 + $0xc9] sm:$0xff] }
 0x494   :  { %v6713_v32 = vpop.permute.xlu1 %6712  ;;  %11794 = vmatprep.mubr.bf16.mxu1 %v7321_v60  ;;  %v6774_v4 = vadd.f32 %v6711_v59, %v16646_v6  ;;  %v6682_v60 = vld [vmem:[#allocation2 + $0xc1] sm:$0xff] }
 0x495   :  { %11795 = vmatmul.mubr.bf16.vlgmr.msra.gmra.mrb[0].mxu1 %v7323_v24  ;;  %7018 = vrot.lane.b32.xlu0 %v6964_v63, %s12465_s17  ;;  %v6775_v44 = vadd.f32 %v6713_v32, %v16649_v54  ;;  %v16885_v63 = vld [vmem:[%s18047_s5 + $0x80] sm:$0xff]  }
 0x496   :  { %7020 = vrot.lane.b32.xlu1 %v6965_v55, %s12465_s17  ;;  %11807 = vmatpush3.bf16.msra.mxu1 %v16769_v45  ;;  %v12320_v45 = vld [vmem:[%s18047_s5 + $0x18] sm:$0xff]  }
 0x497   :  { %v6851_v3 = vpop.permute.xlu0 %6850  ;;  %11808 = vmatprep.subr.bf16.mxu1 %v12318_v17 }
 0x498   :  { %v6853_v5 = vpop.permute.xlu1 %6852  ;;  %v6916_v21 = vadd.f32 %v6851_v3, %v6772_v11  ;;  %v6684_v3 = vld [vmem:[#allocation2 + $0xd1] sm:$0xff] }
 0x499   :  { %7022 = vrot.lane.b32.xlu0 %v6966_v20, %s12465_s17  ;;  %v6917_v8 = vadd.f32 %v6853_v5, %v6773_v23  ;;  %v6685_v5 = vld [vmem:[#allocation2 + $0xd9] sm:$0xff] }
 0x49a   :  { %7024 = vrot.lane.b32.xlu1 %v6967_v42, %s12465_s17  ;;  %11809 = vmatpush3.bf16.msra.mxu1 %v12318_v17 }
 0x49b   :  { %v6855_v51 = vpop.permute.xlu0 %6854  ;;  %11810 = vmatprep.subr.bf16.mxu1 %v12319_v33 }
 0x49c   :  { %v6857_v41 = vpop.permute.xlu1 %6856  ;;  %v6918_v27 = vadd.f32 %v6855_v51, %v6774_v4  ;;  %v6826_v51 = vld [vmem:[#allocation2 + $0xc2] sm:$0xff]  ;;  %v7115_v4 = vld [vmem:[#allocation2 + $0xcc] sm:$0xff] }
 0x49d   :  { %7026 = vrot.lane.b32.xlu0 %v6968_v53, %s12465_s17  ;;  %v6919_v43 = vadd.f32 %v6857_v41, %v6775_v44  ;;  %v6827_v41 = vld [vmem:[#allocation2 + $0xca] sm:$0xff]  ;;  %v6829_v53 = vld [vmem:[#allocation2 + $0xda] sm:$0xff] }
 0x49e   :  { %7028 = vrot.lane.b32.xlu1 %v6969_v22, %s12465_s17  ;;  %11811 = vmatpush3.bf16.msra.mxu1 %v12319_v33 }
 0x49f   :  { %v6995_v56 = vpop.permute.xlu0 %6994  ;;  %11812 = vmatprep.subr.bf16.mxu1 %v12320_v45 }
 0x4a0   :  { %v6997_v26 = vpop.permute.xlu1 %6996  ;;  %v7060_v30 = vadd.f32 %v6995_v56, %v6916_v21 }
 0x4a1   :  { %7162 = vrot.lane.b32.xlu0 %v7108_v13, %s12466_s1  ;;  %v7061_v50 = vadd.f32 %v6997_v26, %v6917_v8  ;;  %v6828_v26 = vld [vmem:[#allocation2 + $0xd2] sm:$0xff]  ;;  %v6970_v13 = vld [vmem:[#allocation2 + $0xc3] sm:$0xff] }
 0x4a2   :  { %7164 = vrot.lane.b32.xlu1 %v7109_v38, %s12466_s1  ;;  %11813 = vmatpush3.bf16.msra.mxu1 %v12320_v45  ;;  %v6971_v38 = vld [vmem:[#allocation2 + $0xcb] sm:$0xff] }
 0x4a3   :  { %v6999_v34 = vpop.permute.xlu0 %6998  ;;  %11814 = vmatprep.subr.bf16.mxu1 %v12321_v58 }
 0x4a4   :  { %v7001_v61 = vpop.permute.xlu1 %7000  ;;  %v7062_v54 = vadd.f32 %v6999_v34, %v6918_v27  ;;  %v6972_v34 = vld [vmem:[#allocation2 + $0xd3] sm:$0xff] }
 0x4a5   :  { %7166 = vrot.lane.b32.xlu0 %v7110_v25, %s12466_s1  ;;  %v7063_v6 = vadd.f32 %v7001_v61, %v6919_v43  ;;  %v6973_v61 = vld [vmem:[#allocation2 + $0xdb] sm:$0xff] }
 0x4a6   :  { %7168 = vrot.lane.b32.xlu1 %v7111_v40, %s12466_s1  ;;  %11815 = vmatpush3.bf16.msra.mxu1 %v12321_v58 }
 0x4a7   :  { %v7139_v29 = vpop.permute.xlu0 %7138  ;;  %11816 = vmatprep.subr.bf16.mxu1 %v12322_v46 }
 0x4a8   :  { %v7141_v19 = vpop.permute.xlu1 %7140  ;;  %v7204_v12 = vadd.f32 %v7139_v29, %v7060_v30 }
 0x4a9   :  { %v7205_v18 = vadd.f32 %v7141_v19, %v7061_v50  ;;  %7170 = vrot.lane.b32.xlu0 %v7112_v37, %s12466_s1  ;;  %v7114_v50 = vld [vmem:[#allocation2 + $0xc4] sm:$0xff]  ;;  %v7116_v37 = vld [vmem:[#allocation2 + $0xd4] sm:$0xff] }
 0x4aa   :  { %7172 = vrot.lane.b32.xlu1 %v7113_v9, %s12466_s1  ;;  %11817 = vmatpush3.bf16.msra.mxu1 %v12322_v46  ;;  %v7117_v9 = vld [vmem:[#allocation2 + $0xdc] sm:$0xff] }
 0x4ab   :  { %v16869_v10 = vpack.c.bf16 %v7205_v18, %v7204_v12  ;;  %v7143_v57 = vpop.permute.xlu0 %7142  ;;  %11818 = vmatprep.subr.bf16.mxu1 %v12323_v31 }
 0x4ac   :  { %v7145_v2 = vpop.permute.xlu1 %7144  ;;  %v7206_v52 = vadd.f32 %v7143_v57, %v7062_v54 }
 0x4ad   :  { %v7207_v62 = vadd.f32 %v7145_v2, %v7063_v6  ;;  %v7324_v24 = vrot.slane %v16869_v10, 6  ;;  %6742 = vrot.lane.b32.xlu0 %v6682_v60, %s12462_s3 }
 0x4ae   :  { %6744 = vrot.lane.b32.xlu1 %v6683_v47, %s12462_s3  ;;  %11819 = vmatpush3.bf16.msra.mxu1 %v12323_v31 }
 0x4af   :  { %v16877_v32 = vpack.c.bf16 %v7207_v62, %v7206_v52  ;;  %v7325_v59 = vsel %vm7318_vm1, %v7322_v35, %v7324_v24  ;;  %v6715_v55 = vpop.permute.xlu0 %6714  ;;  %11820 = vmatprep.subr.bf16.mxu1 %v12324_v49  ;;  %v6687_v62 = vld [vmem:[#allocation2 + $0xe9] sm:$0xff]  ;;  %v6686_v52 = vld [vmem:[#allocation2 + $0xe1] sm:$0xff] }
 0x4b0   :  { %v6717_v17 = vpop.permute.xlu1 %6716  ;;  %11798 = vmatprep.mubr.bf16.mxu1 %v7325_v59  ;;  %v6776_v8 = vadd.f32 %v6715_v55, %v16652_v16  ;;  %v6689_v55 = vld [vmem:[#allocation2 + $0xf9] sm:$0xff] }
 0x4b1   :  { %v7326_v33 = vrot.slane %v16877_v32, 6  ;;  %6746 = vrot.lane.b32.xlu0 %v6684_v3, %s12462_s3  ;;  %v6777_v46 = vadd.f32 %v6717_v17, %v16655_v39 }
 0x4b2   :  { %6748 = vrot.lane.b32.xlu1 %v6685_v5, %s12462_s3  ;;  %11821 = vmatpush3.bf16.msra.mxu1 %v12324_v49  ;;  %v6688_v5 = vld [vmem:[#allocation2 + $0xf1] sm:$0xff] }
 0x4b3   :  { %v7327_v35 = vsel %vm7318_vm1, %v7324_v24, %v7326_v33  ;;  %v6719_v20 = vpop.permute.xlu0 %6718  ;;  %11834 = vmatprep.subr.bf16.mxu1 %v16885_v63 }
 0x4b4   :  { %v6721_v42 = vpop.permute.xlu1 %6720  ;;  %11799 = vmatmul.mubr.bf16.gmra.mrb[4].mxu1 %v7327_v35  ;;  %v6778_v19 = vadd.f32 %v6719_v20, %v16658_v48  ;;  %v6830_v20 = vld [vmem:[#allocation2 + $0xe2] sm:$0xff] }
 0x4b5   :  { %6886 = vrot.lane.b32.xlu0 %v6826_v51, %s12464_s4  ;;  %v6779_v30 = vadd.f32 %v6721_v42, %v16661_v28  ;;  %v6831_v42 = vld [vmem:[#allocation2 + $0xea] sm:$0xff] }
 0x4b6   :  { %6888 = vrot.lane.b32.xlu1 %v6827_v41, %s12464_s4 }
 0x4b7   :  { %v6859_v22 = vpop.permute.xlu0 %6858 }
 0x4b8   :  { %v6861_v45 = vpop.permute.xlu1 %6860  ;;  %v6920_v44 = vadd.f32 %v6859_v22, %v6776_v8  ;;  %v6974_v8 = vld [vmem:[#allocation2 + $0xe3] sm:$0xff] }
 0x4b9   :  { %6890 = vrot.lane.b32.xlu0 %v6828_v26, %s12464_s4  ;;  %v6921_v25 = vadd.f32 %v6861_v45, %v6777_v46  ;;  %v6975_v46 = vld [vmem:[#allocation2 + $0xeb] sm:$0xff] }
 0x4ba   :  { %6892 = vrot.lane.b32.xlu1 %v6829_v53, %s12464_s4 }
 0x4bb   :  { %v6863_v58 = vpop.permute.xlu0 %6862 }
 0x4bc   :  { %v6865_v56 = vpop.permute.xlu1 %6864  ;;  %v6922_v16 = vadd.f32 %v6863_v58, %v6778_v19  ;;  %v6832_v58 = vld [vmem:[#allocation2 + $0xf2] sm:$0xff] }
 0x4bd   :  { %7030 = vrot.lane.b32.xlu0 %v6970_v13, %s12465_s17  ;;  %v6923_v27 = vadd.f32 %v6865_v56, %v6779_v30  ;;  %v6833_v56 = vld [vmem:[#allocation2 + $0xfa] sm:$0xff]  ;;  %v7119_v19 = vld [vmem:[#allocation2 + $0xec] sm:$0xff] }
 0x4be   :  { %7032 = vrot.lane.b32.xlu1 %v6971_v38, %s12465_s17 }
 0x4bf   :  { %v7003_v11 = vpop.permute.xlu0 %7002 }
 0x4c0   :  { %v7005_v23 = vpop.permute.xlu1 %7004  ;;  %v7064_v31 = vadd.f32 %v7003_v11, %v6920_v44  ;;  %v6977_v44 = vld [vmem:[#allocation2 + $0xfb] sm:$0xff] }
 0x4c1   :  { %7034 = vrot.lane.b32.xlu0 %v6972_v34, %s12465_s17  ;;  %v7065_v29 = vadd.f32 %v7005_v23, %v6921_v25 }
 0x4c2   :  { %7036 = vrot.lane.b32.xlu1 %v6973_v61, %s12465_s17 }
 0x4c3   :  { %v7007_v40 = vpop.permute.xlu0 %7006 }
 0x4c4   :  { %v7009_v21 = vpop.permute.xlu1 %7008  ;;  %v7066_v54 = vadd.f32 %v7007_v40, %v6922_v16  ;;  %v12327_v16 = vld [vmem:[%s18047_s5 + $0x90] sm:$0xff]  }
 0x4c5   :  { %7174 = vrot.lane.b32.xlu0 %v7114_v50, %s12466_s1  ;;  %v7067_v6 = vadd.f32 %v7009_v21, %v6923_v27 }
 0x4c6   :  { %7176 = vrot.lane.b32.xlu1 %v7115_v4, %s12466_s1  ;;  %v6976_v4 = vld [vmem:[#allocation2 + $0xf3] sm:$0xff] }
 0x4c7   :  { %v7147_v39 = vpop.permute.xlu0 %7146 }
 0x4c8   :  { %v7149_v43 = vpop.permute.xlu1 %7148  ;;  %v7208_v12 = vadd.f32 %v7147_v39, %v7064_v31  ;;  %v6639_v31 = vld [vmem:[#allocation2 + $0x88] sm:$0xff] }
 0x4c9   :  { %v7209_v18 = vadd.f32 %v7149_v43, %v7065_v29  ;;  %7178 = vrot.lane.b32.xlu0 %v7116_v37, %s12466_s1  ;;  %v7118_v29 = vld [vmem:[#allocation2 + $0xe4] sm:$0xff]  ;;  %v7120_v37 = vld [vmem:[#allocation2 + $0xf4] sm:$0xff] }
 0x4ca   :  { %7180 = vrot.lane.b32.xlu1 %v7117_v9, %s12466_s1  ;;  %v6638_v43 = vld [vmem:[#allocation2 + $0x80] sm:$0xff] }
 0x4cb   :  { %v16910_v2 = vpack.c.bf16 %v7209_v18, %v7208_v12  ;;  %v7151_v48 = vpop.permute.xlu0 %7150  ;;  %v7121_v9 = vld [vmem:[#allocation2 + $0xfc] sm:$0xff] }
 0x4cc   :  { %v7153_v28 = vpop.permute.xlu1 %7152  ;;  %v7210_v49 = vadd.f32 %v7151_v48, %v7066_v54 }
 0x4cd   :  { %v7211_v57 = vadd.f32 %v7153_v28, %v7067_v6  ;;  %v7328_v47 = vrot.slane %v16910_v2, 6  ;;  %6750 = vrot.lane.b32.xlu0 %v6686_v52, %s12462_s3  ;;  %v12328_v28 = vld [vmem:[%s18047_s5 + $0x98] sm:$0xff]   ;;  %v6691_v52 = vld [vmem:[#allocation2 + $0x109] sm:$0xff] }
 0x4ce   :  { %6752 = vrot.lane.b32.xlu1 %v6687_v62, %s12462_s3 }
 0x4cf   :  { %v16915_v60 = vpack.c.bf16 %v7211_v57, %v7210_v49  ;;  %v7329_v24 = vsel %vm7318_vm1, %v7326_v33, %v7328_v47  ;;  %v6723_v17 = vpop.permute.xlu0 %6722 }
 0x4d0   :  { %v6725_v59 = vpop.permute.xlu1 %6724  ;;  %11802 = vmatprep.mubr.bf16.mxu1 %v7329_v24  ;;  %v6780_v41 = vadd.f32 %v6723_v17, %v16664_v1  ;;  %v7596_v24 = vld [vmem:[#allocation3 + $0x8] sm:$0xf0]  ;;  %v12329_v17 = vld [vmem:[%s18047_s5 + $0xa0] sm:$0xff]  }
 0x4d1   :  { %7258 = vst [vmem:[#allocation3 + $0x30] sm:$0xff] %v16915_v60  ;;  %6754 = vrot.lane.b32.xlu0 %v6688_v5, %s12462_s3  ;;  %v6781_v33 = vadd.f32 %v6725_v59, %v16667_v7 }
 0x4d2   :  { %6756 = vrot.lane.b32.xlu1 %v6689_v55, %s12462_s3 }
 0x4d3   :  { %v6867_v35 = vpop.permute.xlu0 %6866 }
 0x4d4   :  { %v6869_v3 = vpop.permute.xlu1 %6868  ;;  %v6924_v26 = vadd.f32 %v6867_v35, %v6780_v41  ;;  %v6835_v35 = vld [vmem:[#allocation2 + $0x10a] sm:$0xff] }
 0x4d5   :  { %6894 = vrot.lane.b32.xlu0 %v6830_v20, %s12464_s4  ;;  %v6925_v53 = vadd.f32 %v6869_v3, %v6781_v33  ;;  %v7628_v3 = vrot.slane %v7596_v24, 4  ;;  %v7629_v20 = vrot.slane %v16823_v36, 4  ;;  %v12330_v33 = vld [vmem:[%s18047_s5 + $0xa8] sm:$0xff]   ;;  %v7788_v24 = vld [vmem:[#allocation3 + $0x10] sm:$0xfc] }
 0x4d6   :  { %6896 = vrot.lane.b32.xlu1 %v6831_v42, %s12464_s4  ;;  %v6834_v42 = vld [vmem:[#allocation2 + $0x102] sm:$0xff] }
 0x4d7   :  { %v7011_v45 = vpop.permute.xlu0 %7010 }
 0x4d8   :  { %v7013_v51 = vpop.permute.xlu1 %7012  ;;  %v7293_v22 = vld [vmem:[#allocation3 + $0x30] sm:$0x3f]  ;;  %v7068_v23 = vadd.f32 %v7011_v45, %v6924_v26  ;;  %v7630_v45 = vsel %vm7627_vm2, %v7628_v3, %v7629_v20 }
 0x4d9   :  { %v7330_v38 = vrot.slane %v7293_v22, 6  ;;  %6898 = vrot.lane.b32.xlu0 %v6832_v58, %s12464_s4  ;;  %v7069_v13 = vadd.f32 %v7013_v51, %v6925_v53  ;;  %v6979_v22 = vld [vmem:[#allocation2 + $0x10b] sm:$0xff]  ;;  %v6978_v53 = vld [vmem:[#allocation2 + $0x103] sm:$0xff] }
 0x4da   :  { %6900 = vrot.lane.b32.xlu1 %v6833_v56, %s12464_s4  ;;  %v7123_v58 = vld [vmem:[#allocation2 + $0x10c] sm:$0xff] }
 0x4db   :  { %v7331_v11 = vsel %vm7318_vm1, %v7328_v47, %v7330_v38  ;;  %v7155_v7 = vpop.permute.xlu0 %7154  ;;  %v6690_v47 = vld [vmem:[#allocation2 + $0x101] sm:$0xff] }
 0x4dc   :  { %v7157_v61 = vpop.permute.xlu1 %7156  ;;  %11803 = vmatmul.mubr.bf16.gmra.mrb[8].mxu1 %v7331_v11  ;;  %v7212_v34 = vadd.f32 %v7155_v7, %v7068_v23  ;;  %v7122_v38 = vld [vmem:[#allocation2 + $0x104] sm:$0xff]  ;;  %v6692_v7 = vld [vmem:[#allocation2 + $0x111] sm:$0xff] }
 0x4dd   :  { %v7213_v1 = vadd.f32 %v7157_v61, %v7069_v13  ;;  %11822 = vmatprep.mubr.bf16.mxu1 %v16813_v14  ;;  %7038 = vrot.lane.b32.xlu0 %v6974_v8, %s12465_s17  ;;  %v12326_v14 = vld [vmem:[%s18047_s5 + $0x88] sm:$0xff]   ;;  %v12332_v13 = vld [vmem:[%s18047_s5 + $0xb8] sm:$0xff]  }
 0x4de   :  { %7040 = vrot.lane.b32.xlu1 %v6975_v46, %s12465_s17  ;;  %v6693_v61 = vld [vmem:[#allocation2 + $0x119] sm:$0xff] }
 0x4df   :  { %v16933_v21 = vpack.c.bf16 %v7213_v1, %v7212_v34  ;;  %v6727_v25 = vpop.permute.xlu0 %6726  ;;  %v7631_v1 = vrot.slane %v16869_v10, 4  ;;  %v12333_v34 = vld [vmem:[%s18047_s5 + $0xc0] sm:$0xff]  }
 0x4e0   :  { %v6729_v40 = vpop.permute.xlu1 %6728  ;;  %v6782_v27 = vadd.f32 %v6727_v25, %v6638_v43  ;;  %v6837_v25 = vld [vmem:[#allocation2 + $0x11a] sm:$0xff]  ;;  %v7635_v43 = vrot.slane %v16910_v2, 4 }
 0x4e1   :  { %7259 = vst [vmem:[#allocation3 + $0x38] sm:$0xff] %v16933_v21  ;;  %7042 = vrot.lane.b32.xlu0 %v6976_v4, %s12465_s17  ;;  %v6783_v39 = vadd.f32 %v6729_v40, %v6639_v31  ;;  %v7633_v40 = vrot.slane %v16877_v32, 4  ;;  %v7632_v4 = vsel %vm7627_vm2, %v7629_v20, %v7631_v1  ;;  %v6980_v31 = vld [vmem:[#allocation2 + $0x113] sm:$0xff] }
 0x4e2   :  { %7044 = vrot.lane.b32.xlu1 %v6977_v44, %s12465_s17  ;;  %v6836_v44 = vld [vmem:[#allocation2 + $0x112] sm:$0xff] }
 0x4e3   :  { %v6871_v30 = vpop.permute.xlu0 %6870 }
 0x4e4   :  { %v6873_v50 = vpop.permute.xlu1 %6872  ;;  %11823 = vmatmul.mubr.bf16.vlgmr.msra.gmra.mrb[0].mxu1 %v16818_v0  ;;  %v6926_v12 = vadd.f32 %v6871_v30, %v6782_v27 }
 0x4e5   :  { %11835 = vmatpush3.bf16.msra.mxu1 %v16885_v63  ;;  %11826 = vmatprep.mubr.bf16.mxu1 %v16823_v36  ;;  %v6927_v63 = vadd.f32 %v6873_v50, %v6783_v39  ;;  %v12331_v36 = vld [vmem:[%s18047_s5 + $0xb0] sm:$0xff]  }
 0x4e6   :  { %7184 = vrot.lane.b32.xlu1 %v7119_v19, %s12466_s1  ;;  %7182 = vrot.lane.b32.xlu0 %v7118_v29, %s12466_s1  ;;  %v7634_v19 = vsel %vm7627_vm2, %v7631_v1, %v7633_v40  ;;  %v6981_v29 = vld [vmem:[#allocation2 + $0x11b] sm:$0xff] }
 0x4e7   :  { %11836 = vmatprep.subr.bf16.mxu1 %v12326_v14  ;;  %v7015_v18 = vpop.permute.xlu0 %7014  ;;  %v12335_v39 = vld [vmem:[%s18047_s5 + $0xd0] sm:$0xff]  }
 0x4e8   :  { %v7017_v0 = vpop.permute.xlu1 %7016  ;;  %v7070_v54 = vadd.f32 %v7015_v18, %v6926_v12  ;;  %v7125_v18 = vld [vmem:[#allocation2 + $0x11c] sm:$0xff] }
 0x4e9   :  { %11837 = vmatpush3.bf16.msra.mxu1 %v12326_v14  ;;  %v7071_v6 = vadd.f32 %v7017_v0, %v6927_v63  ;;  %v12334_v14 = vld [vmem:[%s18047_s5 + $0xc8] sm:$0xff]   ;;  %v7637_v0 = vrot.slane %v16915_v60, 4  ;;  %v12336_v12 = vld [vmem:[%s18047_s5 + $0xd8] sm:$0xff]  }
 0x4ea   :  { %7188 = vrot.lane.b32.xlu1 %v7121_v9, %s12466_s1  ;;  %7186 = vrot.lane.b32.xlu0 %v7120_v37, %s12466_s1  ;;  %v7124_v63 = vld [vmem:[#allocation2 + $0x114] sm:$0xff]  ;;  %v7636_v9 = vsel %vm7627_vm2, %v7633_v40, %v7635_v43 }
 0x4eb   :  { %11838 = vmatprep.subr.bf16.mxu1 %v12327_v16  ;;  %v7159_v57 = vpop.permute.xlu0 %7158  ;;  %v6644_v40 = vld [vmem:[#allocation2 + $0xb0] sm:$0xff] }
 0x4ec   :  { %v7161_v48 = vpop.permute.xlu1 %7160  ;;  %11827 = vmatmul.mubr.bf16.gmra.mrb[4].mxu1 %v16869_v10  ;;  %v7214_v62 = vadd.f32 %v7159_v57, %v7070_v54  ;;  %v7638_v54 = vsel %vm7627_vm2, %v7635_v43, %v7637_v0  ;;  %v6640_v57 = vld [vmem:[#allocation2 + $0x90] sm:$0xff] }
 0x4ed   :  { %v7215_v49 = vadd.f32 %v7161_v48, %v7071_v6  ;;  %11839 = vmatpush3.bf16.msra.mxu1 %v12327_v16  ;;  %11830 = vmatprep.mubr.bf16.mxu1 %v16877_v32  ;;  %v6641_v48 = vld [vmem:[#allocation2 + $0x98] sm:$0xff] }
 0x4ee   :  { %6760 = vrot.lane.b32.xlu1 %v6691_v52, %s12462_s3  ;;  %6758 = vrot.lane.b32.xlu0 %v6690_v47, %s12462_s3 }
 0x4ef   :  { %v16958_v59 = vpack.c.bf16 %v7215_v49, %v7214_v62  ;;  %11840 = vmatprep.subr.bf16.mxu1 %v12328_v28  ;;  %v16965_v5 = vpop.permute.xlu0 %6730  ;;  %v12337_v49 = vld [vmem:[%s18047_s5 + $0xe0] sm:$0xff]  }
 0x4f0   :  { %v16963_v55 = vpop.permute.xlu1 %6732  ;;  %v6784_v52 = vadd.f32 %v16965_v5, %v6640_v57  ;;  %v12338_v5 = vld [vmem:[%s18047_s5 + $0xe8] sm:$0xff]  }
 0x4f1   :  { %7260 = vst [vmem:[#allocation3 + $0x40] sm:$0xff] %v16958_v59  ;;  %11841 = vmatpush3.bf16.msra.mxu1 %v12328_v28  ;;  %v7602_v28 = vld [vmem:[#allocation3 + $0x38] sm:$0xf]  ;;  %v6785_v62 = vadd.f32 %v16963_v55, %v6641_v48  ;;  %v7820_v55 = vrot.slane %v7788_v24, 2 }
 0x4f2   :  { %6904 = vrot.lane.b32.xlu1 %v6835_v35, %s12464_s4  ;;  %6902 = vrot.lane.b32.xlu0 %v6834_v42, %s12464_s4  ;;  %v7639_v47 = vrot.slane %v7602_v28, 4  ;;  %v7821_v35 = vrot.slane %v16869_v10, 2  ;;  %v6643_v42 = vld [vmem:[#allocation2 + $0xa8] sm:$0xff]  ;;  %v12342_v28 = vld [vmem:[%s18047_s5 + $0x108] sm:$0xff]  }
 0x4f3   :  { %11842 = vmatprep.subr.bf16.mxu1 %v12329_v17  ;;  %v16976_v51 = vpop.permute.xlu0 %6734 }
 0x4f4   :  { %v16974_v41 = vpop.permute.xlu1 %6736  ;;  %11831 = vmatmul.mubr.bf16.gmra.mrb[8].mxu1 %v16910_v2 }
 0x4f5   :  { %11843 = vmatpush3.bf16.msra.mxu1 %v12329_v17  ;;  %11850 = vmatprep.mubr.bf16.mxu1 %v7630_v45  ;;  %v6787_v45 = vadd.f32 %v16974_v41, %v6643_v42  ;;  %v7822_v41 = vsel %vm7819_vm3, %v7820_v55, %v7821_v35  ;;  %v12345_v55 = vld [vmem:[%s18047_s5 + $0x120] sm:$0xff]  }
 0x4f6   :  { %7048 = vrot.lane.b32.xlu1 %v6979_v22, %s12465_s17  ;;  %7046 = vrot.lane.b32.xlu0 %v6978_v53, %s12465_s17  ;;  %v6642_v22 = vld [vmem:[#allocation2 + $0xa0] sm:$0xff] }
 0x4f7   :  { %11844 = vmatprep.subr.bf16.mxu1 %v12330_v33  ;;  %v16987_v56 = vpop.permute.xlu0 %6738  ;;  %v6786_v53 = vadd.f32 %v16976_v51, %v6642_v22 }
 0x4f8   :  { %v16985_v26 = vpop.permute.xlu1 %6740  ;;  %v7794_v22 = vld [vmem:[#allocation3 + $0x40] sm:$0x3] }
 0x4f9   :  { %11845 = vmatpush3.bf16.msra.mxu1 %v12330_v33 }
 0x4fa   :  { %7192 = vrot.lane.b32.xlu1 %v7123_v58, %s12466_s1  ;;  %7190 = vrot.lane.b32.xlu0 %v7122_v38, %s12466_s1  ;;  %v7640_v38 = vsel %vm7627_vm2, %v7637_v0, %v7639_v47  ;;  %v7827_v47 = vrot.slane %v16915_v60, 2 }
 0x4fb   :  { %11846 = vmatprep.subr.bf16.mxu1 %v12331_v36  ;;  %v16996_v11 = vpop.permute.xlu0 %6874 }
 0x4fc   :  { %v16994_v23 = vpop.permute.xlu1 %6876  ;;  %v6928_v33 = vadd.f32 %v16996_v11, %v6784_v52  ;;  %v12343_v52 = vld [vmem:[%s18047_s5 + $0x110] sm:$0xff]  }
 0x4fd   :  { %11847 = vmatpush3.bf16.msra.mxu1 %v12331_v36  ;;  %v6929_v20 = vadd.f32 %v16994_v23, %v6785_v62 }
 0x4fe   :  { %6764 = vrot.lane.b32.xlu1 %v6693_v61, %s12462_s3  ;;  %6762 = vrot.lane.b32.xlu0 %v6692_v7, %s12462_s3  ;;  %v6645_v61 = vld [vmem:[#allocation2 + $0xb8] sm:$0xff] }
 0x4ff   :  { %11848 = vmatprep.subr.bf16.mxu1 %v12332_v13  ;;  %v17006_v8 = vpop.permute.xlu0 %6878  ;;  %v6789_v51 = vadd.f32 %v16985_v26, %v6645_v61 }
 0x500   :  { %v17004_v46 = vpop.permute.xlu1 %6880  ;;  %v6930_v7 = vadd.f32 %v17006_v8, %v6786_v53 }
 0x501   :  { %11849 = vmatpush3.bf16.msra.mxu1 %v12332_v13  ;;  %v6931_v13 = vadd.f32 %v17004_v46, %v6787_v45  ;;  %v12339_v46 = vld [vmem:[%s18047_s5 + $0xf0] sm:$0xff]  }
 0x502   :  { %6908 = vrot.lane.b32.xlu1 %v6837_v25, %s12464_s4  ;;  %6906 = vrot.lane.b32.xlu0 %v6836_v44, %s12464_s4  ;;  %v6788_v25 = vadd.f32 %v16987_v56, %v6644_v40  ;;  %v12340_v56 = vld [vmem:[%s18047_s5 + $0xf8] sm:$0xff]   ;;  %v6648_v40 = vld [vmem:[#allocation2 + $0xd0] sm:$0xff] }
 0x503   :  { %11862 = vmatprep.subr.bf16.mxu1 %v12333_v34  ;;  %v17017_v30 = vpop.permute.xlu0 %6882 }
 0x504   :  { %11851 = vmatmul.mubr.bf16.vlgmr.msra.gmra.mrb[0].mxu1 %v7632_v4  ;;  %v17015_v50 = vpop.permute.xlu1 %6884 }
 0x505   :  { %11854 = vmatprep.mubr.bf16.mxu1 %v7634_v19  ;;  %11863 = vmatpush3.bf16.msra.mxu1 %v12333_v34 }
 0x506   :  { %7052 = vrot.lane.b32.xlu1 %v6981_v29, %s12465_s17  ;;  %7050 = vrot.lane.b32.xlu0 %v6980_v31, %s12465_s17  ;;  %v6933_v29 = vadd.f32 %v17015_v50, %v6789_v51  ;;  %v6932_v31 = vadd.f32 %v17017_v30, %v6788_v25  ;;  %v6649_v51 = vld [vmem:[#allocation2 + $0xd8] sm:$0xff] }
 0x507   :  { %11864 = vmatprep.subr.bf16.mxu1 %v12334_v14  ;;  %v7019_v16 = vpop.permute.xlu0 %7018 }
 0x508   :  { %v7021_v27 = vpop.permute.xlu1 %7020  ;;  %v7072_v58 = vadd.f32 %v7019_v16, %v6928_v33 }
 0x509   :  { %11865 = vmatpush3.bf16.msra.mxu1 %v12334_v14  ;;  %v7073_v36 = vadd.f32 %v7021_v27, %v6929_v20 }
 0x50a   :  { %7196 = vrot.lane.b32.xlu1 %v7125_v18, %s12466_s1  ;;  %7194 = vrot.lane.b32.xlu0 %v7124_v63, %s12466_s1  ;;  %v12341_v63 = vld [vmem:[%s18047_s5 + $0x100] sm:$0xff]  }
 0x50b   :  { %11866 = vmatprep.subr.bf16.mxu1 %v12335_v39  ;;  %v7023_v6 = vpop.permute.xlu0 %7022 }
 0x50c   :  { %11855 = vmatmul.mubr.bf16.gmra.mrb[4].mxu1 %v7636_v9  ;;  %v7025_v37 = vpop.permute.xlu1 %7024  ;;  %v7074_v4 = vadd.f32 %v7023_v6, %v6930_v7  ;;  %v7823_v9 = vrot.slane %v16877_v32, 2 }
 0x50d   :  { %11858 = vmatprep.mubr.bf16.mxu1 %v7638_v54  ;;  %11867 = vmatpush3.bf16.msra.mxu1 %v12335_v39  ;;  %v7075_v44 = vadd.f32 %v7025_v37, %v6931_v13  ;;  %v7825_v54 = vrot.slane %v16910_v2, 2  ;;  %v12346_v13 = vld [vmem:[%s18047_s5 + $0x128] sm:$0xff]  }
 0x50e   :  { %11868 = vmatprep.subr.bf16.mxu1 %v12336_v12  ;;  %v7824_v48 = vsel %vm7819_vm3, %v7821_v35, %v7823_v9  ;;  %v12344_v35 = vld [vmem:[%s18047_s5 + $0x118] sm:$0xff]  }
 0x50f   :  { %v7027_v3 = vpop.permute.xlu0 %7026  ;;  %v7826_v62 = vsel %vm7819_vm3, %v7823_v9, %v7825_v54  ;;  %v7828_v42 = vsel %vm7819_vm3, %v7825_v54, %v7827_v47  ;;  %v12349_v9 = vld [vmem:[%s18047_s5 + $0x40] sm:$0xff]  }
 0x510   :  { %v7029_v17 = vpop.permute.xlu1 %7028  ;;  %v7076_v27 = vadd.f32 %v7027_v3, %v6932_v31  ;;  %v7829_v3 = vrot.slane %v16933_v21, 2 }
 0x511   :  { %11869 = vmatpush3.bf16.msra.mxu1 %v12336_v12  ;;  %v7077_v39 = vadd.f32 %v7029_v17, %v6933_v29 }
 0x512   :  { %11870 = vmatprep.subr.bf16.mxu1 %v12337_v49  ;;  %v7830_v45 = vsel %vm7819_vm3, %v7827_v47, %v7829_v3  ;;  %v12352_v47 = vld [vmem:[%s18047_s5 + $0x58] sm:$0xff]  }
 0x513   :  { %v7163_v11 = vpop.permute.xlu0 %7162 }
 0x514   :  { %11859 = vmatmul.mubr.bf16.gmra.mrb[8].mxu1 %v7640_v38  ;;  %v7165_v23 = vpop.permute.xlu1 %7164  ;;  %v7216_v34 = vadd.f32 %v7163_v11, %v7072_v58  ;;  %v6647_v58 = vld [vmem:[#allocation2 + $0xc8] sm:$0xff]  ;;  %v6646_v38 = vld [vmem:[#allocation2 + $0xc0] sm:$0xff] }
 0x515   :  { %v7217_v1 = vadd.f32 %v7165_v23, %v7073_v36  ;;  %11871 = vmatpush3.bf16.msra.mxu1 %v12337_v49  ;;  %11878 = vmatprep.mubr.bf16.mxu1 %v7822_v41 }
 0x516   :  { %11872 = vmatprep.subr.bf16.mxu1 %v12338_v5 }
 0x517   :  { %v17058_v14 = vpack.c.bf16 %v7217_v1, %v7216_v34  ;;  %v7167_v8 = vpop.permute.xlu0 %7166 }
 0x518   :  { %v7169_v19 = vpop.permute.xlu1 %7168  ;;  %v7218_v43 = vadd.f32 %v7167_v8, %v7074_v4 }
 0x519   :  { %7261 = vst [vmem:[#allocation3 + $0x48] sm:$0xff] %v17058_v14  ;;  %v7219_v26 = vadd.f32 %v7169_v19, %v7075_v44  ;;  %11873 = vmatpush3.bf16.msra.mxu1 %v12338_v5  ;;  %v7831_v5 = vrot.slane %v7794_v22, 2 }
 0x51a   :  { %11874 = vmatprep.subr.bf16.mxu1 %v12339_v46 }
 0x51b   :  { %v17066_v16 = vpack.c.bf16 %v7219_v26, %v7218_v43  ;;  %v7171_v18 = vpop.permute.xlu0 %7170  ;;  %v7832_v41 = vsel %vm7819_vm3, %v7829_v3, %v7831_v5 }
 0x51c   :  { %v7173_v0 = vpop.permute.xlu1 %7172  ;;  %v7220_v30 = vadd.f32 %v7171_v18, %v7076_v27 }
 0x51d   :  { %7262 = vst [vmem:[#allocation3 + $0x50] sm:$0xff] %v17066_v16  ;;  %v7221_v50 = vadd.f32 %v7173_v0, %v7077_v39  ;;  %11875 = vmatpush3.bf16.msra.mxu1 %v12339_v46  ;;  %v12347_v46 = vld [vmem:[%s18047_s5 + $0x130] sm:$0xff]  }
 0x51e   :  { %11876 = vmatprep.subr.bf16.mxu1 %v12340_v56 }
 0x51f   :  { %v17072_v12 = vpack.c.bf16 %v7221_v50, %v7220_v30  ;;  %v6743_v6 = vpop.permute.xlu0 %6742 }
 0x520   :  { %v6745_v37 = vpop.permute.xlu1 %6744  ;;  %v6790_v11 = vadd.f32 %v6743_v6, %v6646_v38  ;;  %v6653_v38 = vld [vmem:[#allocation2 + $0xf8] sm:$0xff] }
 0x521   :  { %7263 = vst [vmem:[#allocation3 + $0x58] sm:$0xff] %v17072_v12  ;;  %11877 = vmatpush3.bf16.msra.mxu1 %v12340_v56  ;;  %v6791_v23 = vadd.f32 %v6745_v37, %v6647_v58 }
 0x522   :  { %11890 = vmatprep.subr.bf16.mxu1 %v12341_v63 }
 0x523   :  { %v6747_v49 = vpop.permute.xlu0 %6746 }
 0x524   :  { %11879 = vmatmul.mubr.bf16.vlgmr.msra.gmra.mrb[0].mxu1 %v7824_v48  ;;  %v6749_v57 = vpop.permute.xlu1 %6748  ;;  %v6792_v44 = vadd.f32 %v6747_v49, %v6648_v40  ;;  %v12351_v49 = vld [vmem:[%s18047_s5 + $0x50] sm:$0xff]  }
 0x525   :  { %11882 = vmatprep.mubr.bf16.mxu1 %v7826_v62  ;;  %11891 = vmatpush3.bf16.msra.mxu1 %v12341_v63  ;;  %v6793_v25 = vadd.f32 %v6749_v57, %v6649_v51 }
 0x526   :  { %11892 = vmatprep.subr.bf16.mxu1 %v12342_v28 }
 0x527   :  { %v6887_v17 = vpop.permute.xlu0 %6886 }
 0x528   :  { %v6889_v24 = vpop.permute.xlu1 %6888  ;;  %v6934_v34 = vadd.f32 %v6887_v17, %v6790_v11  ;;  %v12353_v17 = vld [vmem:[%s18047_s5 + $0x60] sm:$0xff]  }
 0x529   :  { %11893 = vmatpush3.bf16.msra.mxu1 %v12342_v28  ;;  %v6935_v1 = vadd.f32 %v6889_v24, %v6791_v23  ;;  %v12350_v28 = vld [vmem:[%s18047_s5 + $0x48] sm:$0xff]   ;;  %v12355_v23 = vld [vmem:[%s18047_s5 + $0x70] sm:$0xff]  }
 0x52a   :  { %11894 = vmatprep.subr.bf16.mxu1 %v12343_v52 }
 0x52b   :  { %v6891_v33 = vpop.permute.xlu0 %6890 }
 0x52c   :  { %11883 = vmatmul.mubr.bf16.gmra.mrb[4].mxu1 %v7828_v42  ;;  %v6893_v20 = vpop.permute.xlu1 %6892  ;;  %v6936_v26 = vadd.f32 %v6891_v33, %v6792_v44  ;;  %v6650_v33 = vld [vmem:[#allocation2 + $0xe0] sm:$0xff] }
 0x52d   :  { %11886 = vmatprep.mubr.bf16.mxu1 %v7830_v45  ;;  %11895 = vmatpush3.bf16.msra.mxu1 %v12343_v52  ;;  %v6937_v31 = vadd.f32 %v6893_v20, %v6793_v25  ;;  %v6651_v20 = vld [vmem:[#allocation2 + $0xe8] sm:$0xff]  ;;  %v12356_v25 = vld [vmem:[%s18047_s5 + $0x78] sm:$0xff]  }
 0x52e   :  { %11896 = vmatprep.subr.bf16.mxu1 %v12344_v35 }
 0x52f   :  { %v7031_v36 = vpop.permute.xlu0 %7030 }
 0x530   :  { %v7033_v53 = vpop.permute.xlu1 %7032  ;;  %v7078_v19 = vadd.f32 %v7031_v36, %v6934_v34 }
 0x531   :  { %11897 = vmatpush3.bf16.msra.mxu1 %v12344_v35  ;;  %v7079_v4 = vadd.f32 %v7033_v53, %v6935_v1 }
 0x532   :  { %11898 = vmatprep.subr.bf16.mxu1 %v12345_v55 }
 0x533   :  { %v7035_v7 = vpop.permute.xlu0 %7034 }
 0x534   :  { %11887 = vmatmul.mubr.bf16.gmra.mrb[8].mxu1 %v7832_v41  ;;  %v7037_v61 = vpop.permute.xlu1 %7036  ;;  %v7080_v27 = vadd.f32 %v7035_v7, %v6936_v26 }
 0x535   :  { %11899 = vmatpush3.bf16.msra.mxu1 %v12345_v55  ;;  %11906 = vmatprep.mubr.bf16.mxu1 %v16869_v10  ;;  %v12348_v10 = vld [vmem:[%s18047_s5 + $0x138] sm:$0xff]   ;;  %v7081_v39 = vadd.f32 %v7037_v61, %v6937_v31 }
 0x536   :  { %11900 = vmatprep.subr.bf16.mxu1 %v12346_v13 }
 0x537   :  { %v7175_v29 = vpop.permute.xlu0 %7174 }
 0x538   :  { %v7177_v8 = vpop.permute.xlu1 %7176  ;;  %v7222_v56 = vadd.f32 %v7175_v29, %v7078_v19 }
 0x539   :  { %v7223_v43 = vadd.f32 %v7177_v8, %v7079_v4  ;;  %11901 = vmatpush3.bf16.msra.mxu1 %v12346_v13  ;;  %v6652_v13 = vld [vmem:[#allocation2 + $0xf0] sm:$0xff] }
 0x53a   :  { %11902 = vmatprep.subr.bf16.mxu1 %v12347_v46 }
 0x53b   :  { %v17108_v0 = vpack.c.bf16 %v7223_v43, %v7222_v56  ;;  %v7179_v50 = vpop.permute.xlu0 %7178  ;;  %v12357_v43 = vld [vmem:[%s18047_s5] sm:$0xff]  }
 0x53c   :  { %v7181_v18 = vpop.permute.xlu1 %7180  ;;  %v7224_v63 = vadd.f32 %v7179_v50, %v7080_v27  ;;  %v12358_v50 = vld [vmem:[%s18047_s5 + $0x8] sm:$0xff]  }
 0x53d   :  { %v7225_v30 = vadd.f32 %v7181_v18, %v7081_v39  ;;  %11903 = vmatpush3.bf16.msra.mxu1 %v12347_v46  ;;  %v8222_v18 = vrot.slane %v17108_v0, 6 }
 0x53e   :  { %11904 = vmatprep.subr.bf16.mxu1 %v12348_v10 }
 0x53f   :  { %v17113_v37 = vpack.c.bf16 %v7225_v30, %v7224_v63  ;;  %v6751_v54 = vpop.permute.xlu0 %6750 }
 0x540   :  { %v6753_v6 = vpop.permute.xlu1 %6752  ;;  %v6794_v22 = vadd.f32 %v6751_v54, %v6650_v33  ;;  %v6655_v54 = vld [vmem:[#allocation2 + $0x108] sm:$0xff] }
 0x541   :  { %11905 = vmatpush3.bf16.msra.mxu1 %v12348_v10  ;;  %v6795_v45 = vadd.f32 %v6753_v6, %v6651_v20  ;;  %v8220_v10 = vrot.slane %v17072_v12, 6 }
 0x542   :  { %11918 = vmatprep.subr.bf16.mxu1 %v12349_v9 }
 0x543   :  { %v6755_v57 = vpop.permute.xlu0 %6754  ;;  %v8223_v6 = vsel %vm7318_vm1, %v8220_v10, %v8222_v18 }
 0x544   :  { %11907 = vmatmul.mubr.bf16.vlgmr.msra.gmra.mrb[0].mxu1 %v16877_v32  ;;  %v6757_v48 = vpop.permute.xlu1 %6756  ;;  %v6796_v41 = vadd.f32 %v6755_v57, %v6652_v13 }
 0x545   :  { %11910 = vmatprep.mubr.bf16.mxu1 %v16910_v2  ;;  %11919 = vmatpush3.bf16.msra.mxu1 %v12349_v9  ;;  %v8192_v2 = vld [vmem:[#allocation3 + $0x48] sm:$0xc0]  ;;  %v6797_v11 = vadd.f32 %v6757_v48, %v6653_v38  ;;  %v12359_v48 = vld [vmem:[%s18047_s5 + $0x10] sm:$0xff]  }
 0x546   :  { %11920 = vmatprep.subr.bf16.mxu1 %v12350_v28  ;;  %v8217_v42 = vrot.slane %v8192_v2, 6  ;;  %v12362_v38 = vld [vmem:[%s18047_s5 + $0x28] sm:$0xff]  }
 0x547   :  { %v6895_v52 = vpop.permute.xlu0 %6894 }
 0x548   :  { %v6897_v62 = vpop.permute.xlu1 %6896  ;;  %v6938_v58 = vadd.f32 %v6895_v52, %v6794_v22 }
 0x549   :  { %11921 = vmatpush3.bf16.msra.mxu1 %v12350_v28  ;;  %v6939_v36 = vadd.f32 %v6897_v62, %v6795_v45  ;;  %v6654_v28 = vld [vmem:[#allocation2 + $0x100] sm:$0xff]  ;;  %v8224_v62 = vrot.slane %v17113_v37, 6 }
 0x54a   :  { %11922 = vmatprep.subr.bf16.mxu1 %v12351_v49 }
 0x54b   :  { %v6899_v24 = vpop.permute.xlu0 %6898 }
 0x54c   :  { %11911 = vmatmul.mubr.bf16.gmra.mrb[4].mxu1 %v16915_v60  ;;  %v6901_v32 = vpop.permute.xlu1 %6900  ;;  %v8218_v60 = vrot.slane %v17066_v16, 6  ;;  %v6940_v51 = vadd.f32 %v6899_v24, %v6796_v41  ;;  %v6657_v41 = vld [vmem:[#allocation2 + $0x118] sm:$0xff] }
 0x54d   :  { %11914 = vmatprep.mubr.bf16.mxu1 %v16933_v21  ;;  %11923 = vmatpush3.bf16.msra.mxu1 %v12351_v49  ;;  %v12354_v21 = vld [vmem:[%s18047_s5 + $0x68] sm:$0xff]   ;;  %v6941_v34 = vadd.f32 %v6901_v32, %v6797_v11 }
 0x54e   :  { %11924 = vmatprep.subr.bf16.mxu1 %v12352_v47  ;;  %v8219_v53 = vsel %vm7318_vm1, %v8217_v42, %v8218_v60  ;;  %v8221_v30 = vsel %vm7318_vm1, %v8218_v60, %v8220_v10  ;;  %v8225_v42 = vsel %vm7318_vm1, %v8222_v18, %v8224_v62  ;;  %v12366_v10 = vld [vmem:[%s18047_s5 + $0x88] sm:$0xff]   ;;  %v12369_v18 = vld [vmem:[%s18047_s5 + $0xa0] sm:$0xff]  }
 0x54f   :  { %v7039_v35 = vpop.permute.xlu0 %7038 }
 0x550   :  { %v7041_v3 = vpop.permute.xlu1 %7040  ;;  %v7082_v7 = vadd.f32 %v7039_v35, %v6938_v58 }
 0x551   :  { %11925 = vmatpush3.bf16.msra.mxu1 %v12352_v47  ;;  %v7083_v61 = vadd.f32 %v7041_v3, %v6939_v36 }
 0x552   :  { %11926 = vmatprep.subr.bf16.mxu1 %v12353_v17 }
 0x553   :  { %v7043_v5 = vpop.permute.xlu0 %7042 }
 0x554   :  { %11915 = vmatmul.mubr.bf16.gmra.mrb[8].mxu1 %v16958_v59  ;;  %v7045_v55 = vpop.permute.xlu1 %7044  ;;  %v7084_v4 = vadd.f32 %v7043_v5, %v6940_v51 }
 0x555   :  { %11927 = vmatpush3.bf16.msra.mxu1 %v12353_v17  ;;  %11934 = vmatprep.mubr.bf16.mxu1 %v8219_v53  ;;  %v7085_v44 = vadd.f32 %v7045_v55, %v6941_v34  ;;  %v12360_v17 = vld [vmem:[%s18047_s5 + $0x18] sm:$0xff]   ;;  %v12361_v55 = vld [vmem:[%s18047_s5 + $0x20] sm:$0xff]  }
 0x556   :  { %11928 = vmatprep.subr.bf16.mxu1 %v12354_v21 }
 0x558   :  { %v7185_v59 = vpop.permute.xlu1 %7184  ;;  %v7183_v1 = vpop.permute.xlu0 %7182 }
 0x559   :  { %v7227_v40 = vadd.f32 %v7185_v59, %v7083_v61  ;;  %v7226_v46 = vadd.f32 %v7183_v1, %v7082_v7  ;;  %11929 = vmatpush3.bf16.msra.mxu1 %v12354_v21  ;;  %v6656_v61 = vld [vmem:[#allocation2 + $0x110] sm:$0xff]  ;;  %v12363_v7 = vld [vmem:[%s18047_s5 + $0x30] sm:$0xff]  }
 0x55a   :  { %11930 = vmatprep.subr.bf16.mxu1 %v12355_v23 }
 0x55b   :  { %v17143_v19 = vpack.c.bf16 %v7227_v40, %v7226_v46 }
 0x55c   :  { %v7189_v8 = vpop.permute.xlu1 %7188  ;;  %v7187_v29 = vpop.permute.xlu0 %7186 }
 0x55d   :  { %v7229_v31 = vadd.f32 %v7189_v8, %v7085_v44  ;;  %v7228_v26 = vadd.f32 %v7187_v29, %v7084_v4  ;;  %11931 = vmatpush3.bf16.msra.mxu1 %v12355_v23  ;;  %v8226_v32 = vrot.slane %v17143_v19, 6 }
 0x55e   :  { %11932 = vmatprep.subr.bf16.mxu1 %v12356_v25 }
 0x55f   :  { %v17148_v56 = vpack.c.bf16 %v7229_v31, %v7228_v26  ;;  %v8227_v60 = vsel %vm7318_vm1, %v8224_v62, %v8226_v32  ;;  %v12365_v26 = vld [vmem:[%s18047_s5 + $0x80] sm:$0xff]  }
 0x560   :  { %v6761_v39 = vpop.permute.xlu1 %6760  ;;  %v6759_v27 = vpop.permute.xlu0 %6758 }
 0x561   :  { %7267 = vst [vmem:[#allocation3 + $0x78] sm:$0xff] %v17148_v56  ;;  %11933 = vmatpush3.bf16.msra.mxu1 %v12356_v25  ;;  %v6799_v57 = vadd.f32 %v6761_v39, %v6655_v54  ;;  %v6798_v49 = vadd.f32 %v6759_v27, %v6654_v28  ;;  %v12364_v25 = vld [vmem:[%s18047_s5 + $0x38] sm:$0xff]   ;;  %v12367_v39 = vld [vmem:[%s18047_s5 + $0x90] sm:$0xff]   ;;  %v12373_v54 = vld [vmem:[%s18047_s5 + $0xc0] sm:$0xff]   ;;  %v8527_v28 = vrot.slane %v17108_v0, 4 }
 0x562   :  { %11946 = vmatprep.subr.bf16.mxu1 %v12357_v43  ;;  %v12368_v27 = vld [vmem:[%s18047_s5 + $0x98] sm:$0xff]  }
 0x564   :  { %11935 = vmatmul.mubr.bf16.vlgmr.msra.gmra.mrb[12].mxu1 %v8221_v30  ;;  %v6905_v63 = vpop.permute.xlu1 %6904  ;;  %v6903_v9 = vpop.permute.xlu0 %6902  ;;  %v8525_v30 = vrot.slane %v17072_v12, 4 }
 0x565   :  { %11938 = vmatprep.mubr.bf16.mxu1 %v8223_v6  ;;  %11947 = vmatpush3.bf16.msra.mxu1 %v12357_v43  ;;  %v6943_v24 = vadd.f32 %v6905_v63, %v6799_v57  ;;  %v6942_v2 = vadd.f32 %v6903_v9, %v6798_v49  ;;  %v12370_v63 = vld [vmem:[%s18047_s5 + $0xa8] sm:$0xff]   ;;  %v12371_v6 = vld [vmem:[%s18047_s5 + $0xb0] sm:$0xff]  }
 0x566   :  { %11948 = vmatprep.subr.bf16.mxu1 %v12358_v50  ;;  %v12374_v57 = vld [vmem:[%s18047_s5 + $0xc8] sm:$0xff]   ;;  %v8528_v49 = vsel %vm7627_vm2, %v8525_v30, %v8527_v28 }
 0x568   :  { %v7049_v52 = vpop.permute.xlu1 %7048  ;;  %v7047_v47 = vpop.permute.xlu0 %7046  ;;  %v8193_v21 = vld [vmem:[#allocation3 + $0x78] sm:$0x3f] }
 0x569   :  { %11949 = vmatpush3.bf16.msra.mxu1 %v12358_v50  ;;  %v7087_v3 = vadd.f32 %v7049_v52, %v6943_v24  ;;  %v7086_v35 = vadd.f32 %v7047_v47, %v6942_v2  ;;  %v8228_v53 = vrot.slane %v8193_v21, 6  ;;  %v12375_v52 = vld [vmem:[%s18047_s5 + $0xd0] sm:$0xff]   ;;  %v8531_v47 = vrot.slane %v17143_v19, 4  ;;  %v12376_v24 = vld [vmem:[%s18047_s5 + $0xd8] sm:$0xff]   ;;  %v12378_v21 = vld [vmem:[%s18047_s5 + $0xe8] sm:$0xff]  }
 0x56a   :  { %11950 = vmatprep.subr.bf16.mxu1 %v12359_v48 }
 0x56b   :  { %v8229_v13 = vsel %vm7318_vm1, %v8226_v32, %v8228_v53  ;;  %v8533_v32 = vrot.slane %v17148_v56, 4  ;;  %v12380_v53 = vld [vmem:[%s18047_s5 + $0xf8] sm:$0xff]  }
 0x56c   :  { %11939 = vmatmul.mubr.bf16.gmra.mrb[16].mxu1 %v8225_v42  ;;  %v7193_v20 = vpop.permute.xlu1 %7192  ;;  %v7191_v33 = vpop.permute.xlu0 %7190 }
 0x56d   :  { %v7231_v45 = vadd.f32 %v7193_v20, %v7087_v3  ;;  %v7230_v22 = vadd.f32 %v7191_v33, %v7086_v35  ;;  %11942 = vmatprep.mubr.bf16.mxu1 %v8227_v60  ;;  %11951 = vmatpush3.bf16.msra.mxu1 %v12359_v48  ;;  %v8529_v48 = vrot.slane %v17113_v37, 4  ;;  %v12377_v35 = vld [vmem:[%s18047_s5 + $0xe0] sm:$0xff]   ;;  %v8684_v20 = vld [vmem:[#allocation3 + $0x58] sm:$0xfc]  ;;  %v8715_v33 = vrot.slane %v17108_v0, 2 }
 0x56e   :  { %11952 = vmatprep.subr.bf16.mxu1 %v12360_v17  ;;  %v8714_v60 = vrot.slane %v8684_v20, 2 }
 0x56f   :  { %v17171_v5 = vpack.c.bf16 %v7231_v45, %v7230_v22  ;;  %v8530_v62 = vsel %vm7627_vm2, %v8527_v28, %v8529_v48  ;;  %v8532_v2 = vsel %vm7627_vm2, %v8529_v48, %v8531_v47 }
 0x570   :  { %v6765_v36 = vpop.permute.xlu1 %6764  ;;  %v6763_v58 = vpop.permute.xlu0 %6762  ;;  %v8716_v22 = vsel %vm7819_vm3, %v8714_v60, %v8715_v33 }
 0x571   :  { %7268 = vst [vmem:[#allocation3 + $0x80] sm:$0xff] %v17171_v5  ;;  %11953 = vmatpush3.bf16.msra.mxu1 %v12360_v17  ;;  %v6801_v59 = vadd.f32 %v6765_v36, %v6657_v41  ;;  %v6800_v1 = vadd.f32 %v6763_v58, %v6656_v61  ;;  %v8534_v17 = vsel %vm7627_vm2, %v8531_v47, %v8533_v32  ;;  %v12381_v36 = vld [vmem:[%s18047_s5 + $0x100] sm:$0xff]   ;;  %v8717_v58 = vrot.slane %v17113_v37, 2  ;;  %v12383_v41 = vld [vmem:[%s18047_s5 + $0x110] sm:$0xff]  }
 0x572   :  { %11954 = vmatprep.subr.bf16.mxu1 %v12361_v55  ;;  %v8721_v61 = vrot.slane %v17148_v56, 2 }
 0x574   :  { %11943 = vmatmul.mubr.bf16.gmra.mrb[20].mxu1 %v8229_v13  ;;  %v6909_v23 = vpop.permute.xlu1 %6908  ;;  %v6907_v11 = vpop.permute.xlu0 %6906  ;;  %v12382_v13 = vld [vmem:[%s18047_s5 + $0x108] sm:$0xff]  }
 0x575   :  { %11955 = vmatpush3.bf16.msra.mxu1 %v12361_v55  ;;  %11962 = vmatprep.mubr.bf16.mxu1 %v17058_v14  ;;  %v6945_v40 = vadd.f32 %v6909_v23, %v6801_v59  ;;  %v6944_v46 = vadd.f32 %v6907_v11, %v6800_v1  ;;  %v12379_v55 = vld [vmem:[%s18047_s5 + $0xf0] sm:$0xff]   ;;  %v8718_v23 = vsel %vm7819_vm3, %v8715_v33, %v8717_v58  ;;  %v12384_v59 = vld [vmem:[%s18047_s5 + $0x118] sm:$0xff]  }
 0x576   :  { %11956 = vmatprep.subr.bf16.mxu1 %v12362_v38 }
 0x578   :  { %v7053_v34 = vpop.permute.xlu1 %7052  ;;  %v7051_v51 = vpop.permute.xlu0 %7050  ;;  %v8500_v3 = vld [vmem:[#allocation3 + $0x80] sm:$0xf] }
 0x579   :  { %11957 = vmatpush3.bf16.msra.mxu1 %v12362_v38  ;;  %v7089_v14 = vadd.f32 %v7053_v34, %v6945_v40  ;;  %v7088_v44 = vadd.f32 %v7051_v51, %v6944_v46  ;;  %v8535_v42 = vrot.slane %v8500_v3, 4  ;;  %v8719_v38 = vrot.slane %v17143_v19, 2  ;;  %v12385_v40 = vld [vmem:[%s18047_s5 + $0x120] sm:$0xff]  }
 0x57a   :  { %11958 = vmatprep.subr.bf16.mxu1 %v12363_v7 }
 0x57b   :  { %v8536_v45 = vsel %vm7627_vm2, %v8533_v32, %v8535_v42  ;;  %v8720_v11 = vsel %vm7819_vm3, %v8717_v58, %v8719_v38  ;;  %v8722_v1 = vsel %vm7819_vm3, %v8719_v38, %v8721_v61 }
 0x57c   :  { %v7197_v4 = vpop.permute.xlu1 %7196  ;;  %v7195_v8 = vpop.permute.xlu0 %7194 }
 0x57d   :  { %v7233_v29 = vadd.f32 %v7197_v4, %v7089_v14  ;;  %v7232_v31 = vadd.f32 %v7195_v8, %v7088_v44  ;;  %11959 = vmatpush3.bf16.msra.mxu1 %v12363_v7  ;;  %v8723_v7 = vrot.slane %v17171_v5, 2  ;;  %v12387_v44 = vld [vmem:[%s18047_s5 + $0x130] sm:$0xff]   ;;  %v12388_v4 = vld [vmem:[%s18047_s5 + $0x138] sm:$0xff]  }
 0x57e   :  { %11960 = vmatprep.subr.bf16.mxu1 %v12364_v25 }
 0x57f   :  { %v17188_v43 = vpack.c.bf16 %v7233_v29, %v7232_v31  ;;  %v8724_v34 = vsel %vm7819_vm3, %v8721_v61, %v8723_v7 }
 0x581   :  { %7269 = vst [vmem:[#allocation3 + $0x88] sm:$0xff] %v17188_v43  ;;  %11961 = vmatpush3.bf16.msra.mxu1 %v12364_v25  ;;  %v12386_v25 = vld [vmem:[%s18047_s5 + $0x128] sm:$0xff]  }
 0x582   :  { %11974 = vmatprep.subr.bf16.mxu1 %v12365_v26 }
 0x584   :  { %11963 = vmatmul.mubr.bf16.vlgmr.msra.gmra.mrb[12].mxu1 %v17066_v16  ;;  %v8494_v16 = vld [vmem:[#allocation3 + $0x50] sm:$0xf0] }
 0x585   :  { %11966 = vmatprep.mubr.bf16.mxu1 %v17072_v12  ;;  %11975 = vmatpush3.bf16.msra.mxu1 %v12365_v26  ;;  %v8524_v50 = vrot.slane %v8494_v16, 4  ;;  %v12372_v12 = vld [vmem:[%s18047_s5 + $0xb8] sm:$0xff]  }
 0x586   :  { %11976 = vmatprep.subr.bf16.mxu1 %v12366_v10 }
 0x587   :  { %v8526_v9 = vsel %vm7627_vm2, %v8524_v50, %v8525_v30 }
 0x588   :  { %v8690_v51 = vld [vmem:[#allocation3 + $0x88] sm:$0x3] }
 0x589   :  { %11977 = vmatpush3.bf16.msra.mxu1 %v12366_v10  ;;  %v8725_v46 = vrot.slane %v8690_v51, 2 }
 0x58a   :  { %11978 = vmatprep.subr.bf16.mxu1 %v12367_v39 }
 0x58b   :  { %v8726_v14 = vsel %vm7819_vm3, %v8723_v7, %v8725_v46 }
 0x58c   :  { %11967 = vmatmul.mubr.bf16.gmra.mrb[16].mxu1 %v17108_v0 }
 0x58d   :  { %11970 = vmatprep.mubr.bf16.mxu1 %v17113_v37  ;;  %11979 = vmatpush3.bf16.msra.mxu1 %v12367_v39 }
 0x58e   :  { %11980 = vmatprep.subr.bf16.mxu1 %v12368_v27 }
 0x591   :  { %11981 = vmatpush3.bf16.msra.mxu1 %v12368_v27 }
 0x592   :  { %11982 = vmatprep.subr.bf16.mxu1 %v12369_v18 }
 0x594   :  { %11971 = vmatmul.mubr.bf16.gmra.mrb[20].mxu1 %v17143_v19 }
 0x595   :  { %11983 = vmatpush3.bf16.msra.mxu1 %v12369_v18  ;;  %11990 = vmatprep.mubr.bf16.mxu1 %v8526_v9 }
 0x596   :  { %11984 = vmatprep.subr.bf16.mxu1 %v12370_v63 }
 0x599   :  { %11985 = vmatpush3.bf16.msra.mxu1 %v12370_v63 }
 0x59a   :  { %11986 = vmatprep.subr.bf16.mxu1 %v12371_v6 }
 0x59d   :  { %11987 = vmatpush3.bf16.msra.mxu1 %v12371_v6 }
 0x59e   :  { %11988 = vmatprep.subr.bf16.mxu1 %v12372_v12 }
 0x5a1   :  { %11989 = vmatpush3.bf16.msra.mxu1 %v12372_v12 }
 0x5a2   :  { %12002 = vmatprep.subr.bf16.mxu1 %v12373_v54 }
 0x5a4   :  { %11991 = vmatmul.mubr.bf16.vlgmr.msra.gmra.mrb[12].mxu1 %v8528_v49 }
 0x5a5   :  { %11994 = vmatprep.mubr.bf16.mxu1 %v8530_v62  ;;  %12003 = vmatpush3.bf16.msra.mxu1 %v12373_v54 }
 0x5a6   :  { %12004 = vmatprep.subr.bf16.mxu1 %v12374_v57 }
 0x5a9   :  { %12005 = vmatpush3.bf16.msra.mxu1 %v12374_v57 }
 0x5aa   :  { %12006 = vmatprep.subr.bf16.mxu1 %v12375_v52 }
 0x5ac   :  { %11995 = vmatmul.mubr.bf16.gmra.mrb[16].mxu1 %v8532_v2 }
 0x5ad   :  { %11998 = vmatprep.mubr.bf16.mxu1 %v8534_v17  ;;  %12007 = vmatpush3.bf16.msra.mxu1 %v12375_v52 }
 0x5ae   :  { %12008 = vmatprep.subr.bf16.mxu1 %v12376_v24 }
 0x5b1   :  { %12009 = vmatpush3.bf16.msra.mxu1 %v12376_v24 }
 0x5b2   :  { %12010 = vmatprep.subr.bf16.mxu1 %v12377_v35 }
 0x5b4   :  { %11999 = vmatmul.mubr.bf16.gmra.mrb[20].mxu1 %v8536_v45 }
 0x5b5   :  { %12011 = vmatpush3.bf16.msra.mxu1 %v12377_v35  ;;  %12018 = vmatprep.mubr.bf16.mxu1 %v8716_v22 }
 0x5b6   :  { %12012 = vmatprep.subr.bf16.mxu1 %v12378_v21 }
 0x5b9   :  { %12013 = vmatpush3.bf16.msra.mxu1 %v12378_v21 }
 0x5ba   :  { %12014 = vmatprep.subr.bf16.mxu1 %v12379_v55 }
 0x5bd   :  { %12015 = vmatpush3.bf16.msra.mxu1 %v12379_v55 }
 0x5be   :  { %12016 = vmatprep.subr.bf16.mxu1 %v12380_v53 }
 0x5c1   :  { %12017 = vmatpush3.bf16.msra.mxu1 %v12380_v53 }
 0x5c2   :  { %12030 = vmatprep.subr.bf16.mxu1 %v12381_v36 }
 0x5c4   :  { %12019 = vmatmul.mubr.bf16.vlgmr.msra.gmra.mrb[12].mxu1 %v8718_v23 }
 0x5c5   :  { %12022 = vmatprep.mubr.bf16.mxu1 %v8720_v11  ;;  %12031 = vmatpush3.bf16.msra.mxu1 %v12381_v36 }
 0x5c6   :  { %12032 = vmatprep.subr.bf16.mxu1 %v12382_v13 }
 0x5c9   :  { %12033 = vmatpush3.bf16.msra.mxu1 %v12382_v13 }
 0x5ca   :  { %12034 = vmatprep.subr.bf16.mxu1 %v12383_v41 }
 0x5cc   :  { %12023 = vmatmul.mubr.bf16.gmra.mrb[16].mxu1 %v8722_v1 }
 0x5cd   :  { %12026 = vmatprep.mubr.bf16.mxu1 %v8724_v34  ;;  %12035 = vmatpush3.bf16.msra.mxu1 %v12383_v41 }
 0x5ce   :  { %12036 = vmatprep.subr.bf16.mxu1 %v12384_v59 }
 0x5d1   :  { %12037 = vmatpush3.bf16.msra.mxu1 %v12384_v59 }
 0x5d2   :  { %12038 = vmatprep.subr.bf16.mxu1 %v12385_v40 }
 0x5d4   :  { %12027 = vmatmul.mubr.bf16.gmra.mrb[20].mxu1 %v8726_v14 }
 0x5d5   :  { %12039 = vmatpush3.bf16.msra.mxu1 %v12385_v40  ;;  %12046 = vmatprep.mubr.bf16.mxu1 %v17108_v0  ;;  %v19052_v0 = vld [vmem:[#allocation117_spill] sm:$0xff] }
 0x5d6   :  { %12040 = vmatprep.subr.bf16.mxu1 %v12386_v25  ;;  %v9067_v8 = vadd.s32 8, %v19052_v0  ;;  %v9068_v29 = vadd.s32 16, %v19052_v0  ;;  %v9069_v31 = vadd.s32 24, %v19052_v0  ;;  %v17323_v28 = vadd.s32 64, %v19052_v0 }
 0x5d7   :  { %v17297_v26 = vmul.u32.u64.low 2863311531, %v19052_v0  ;;  %v17298_v10 = vmul.u32.u64.high 2863311531, %v19052_v0, %v17297_v26  ;;  %v17331_v52 = vadd.s32 72, %v19052_v0  ;;  %v17334_v47 = vadd.s32 80, %v19052_v0 }
 0x5d8   :  { %v17307_v27 = vmul.u32.u64.low 2863311531, %v9068_v29  ;;  %v17308_v16 = vmul.u32.u64.high 2863311531, %v9068_v29, %v17307_v27  ;;  %v17310_v18 = vmul.u32.u64.low 2863311531, %v9069_v31  ;;  %v17311_v50 = vmul.u32.u64.high 2863311531, %v9069_v31, %v17310_v18 }
 0x5d9   :  { %12041 = vmatpush3.bf16.msra.mxu1 %v12386_v25  ;;  %v9084_v49 = vshrl.u32 %v17298_v10, 3  ;;  %v17337_v32 = vmul.u32.u64.low 2863311531, %v17323_v28  ;;  %v17338_v24 = vmul.u32.u64.high 2863311531, %v17323_v28, %v17337_v32  ;;  %v17343_v3 = vadd.s32 88, %v19052_v0  ;;  %v17426_v18 = vld [vmem:[%s18048_s6] ss:$0 sm:$0xff] }
 0x5da   :  { %12042 = vmatprep.subr.bf16.mxu1 %v12387_v44  ;;  %v9106_v2 = vshrl.u32 %v17308_v16, 3  ;;  %v9117_v17 = vshrl.u32 %v17311_v50, 3  ;;  %v17348_v60 = vmul.u32.u64.low 2863311531, %v17331_v52  ;;  %v17349_v21 = vmul.u32.u64.high 2863311531, %v17331_v52, %v17348_v60 }
 0x5db   :  { %v9085_v35 = vmul.u32 12, %v9084_v49  ;;  %v17354_v55 = vmul.u32.u64.low 2863311531, %v17334_v47  ;;  %v17355_v53 = vmul.u32.u64.high 2863311531, %v17334_v47, %v17354_v55  ;;  %v9172_v1 = vshrl.u32 %v17338_v24, 3 }
 0x5dc   :  { %v9107_v36 = vmul.u32 12, %v9106_v2  ;;  %v9118_v58 = vmul.u32 12, %v9117_v17  ;;  %v9183_v25 = vshrl.u32 %v17349_v21, 3 }
 0x5dd   :  { %12043 = vmatpush3.bf16.msra.mxu1 %v12387_v44  ;;  %v9086_v38 = vsub.s32 %v19052_v0, %v9085_v35  ;;  %v17361_v23 = vmul.u32.u64.low 2863311531, %v17343_v3  ;;  %v17362_v11 = vmul.u32.u64.high 2863311531, %v17343_v3, %v17361_v23 }
 0x5de   :  { %12044 = vmatprep.subr.bf16.mxu1 %v12388_v4  ;;  %v17365_v34 = vsub.s32 %v9068_v29, %v9107_v36  ;;  %v17367_v51 = vsub.s32 %v9069_v31, %v9118_v58 }
 0x5df   :  { %vm9210_vm4 = vcmp.ne.s32.totalorder %v9086_v38, 0  ;;  %vm9222_vm6 = vcmp.lt.s32.totalorder %v9086_v38, 0  ;;  %v9246_v29 = vadd.s32 12, %v9086_v38  ;;  %v9205_v31 = vshrl.u32 %v17362_v11, 3 }
 0x5e0   :  { %vm9212_vm8 = vcmp.ne.s32.totalorder %v17365_v34, 0  ;;  %vm9213_vm9 = vcmp.ne.s32.totalorder %v17367_v51, 0  ;;  %vm9224_vm10 = vcmp.lt.s32.totalorder %v17365_v34, 0  ;;  %vm9225_vm11 = vcmp.lt.s32.totalorder %v17367_v51, 0  ;;  %vm17388_vm12 = vmand %vm9222_vm6, %vm9210_vm4 }
 0x5e1   :  { %12045 = vmatpush3.bf16.msra.mxu1 %v12388_v4  ;;  %v9173_v4 = vmul.u32 12, %v9172_v1  ;;  %vm17414_vm2 = vmand %vm9224_vm10, %vm9212_vm8  ;;  %v9258_v16 = vsel %vm17388_vm12, %v9246_v29, %v9086_v38  ;;  %v9206_v50 = vmul.u32 12, %v9205_v31 }
 0x5e3   :  { %v17469_v35 = vsub.s32 %v17343_v3, %v9206_v50 }
 0x5e4   :  { %12047 = vmatmul.mubr.bf16.vlgmr.msra.gmra.mrb[12].mxu1 %v17113_v37  ;;  %v9070_v37 = vadd.s32 32, %v19052_v0 }
 0x5e5   :  { %12050 = vmatprep.mubr.bf16.mxu1 %v17143_v19  ;;  %v17301_v39 = vmul.u32.u64.low 2863311531, %v9067_v8  ;;  %v17302_v19 = vmul.u32.u64.high 2863311531, %v9067_v8, %v17301_v39 }
 0x5e6   :  { %v17313_v30 = vmul.u32.u64.low 2863311531, %v9070_v37  ;;  %v17314_v63 = vmul.u32.u64.high 2863311531, %v9070_v37, %v17313_v30  ;;  %v9184_v39 = vmul.u32 12, %v9183_v25 }
 0x5e7   :  { %v9095_v62 = vshrl.u32 %v17302_v19, 3 }
 0x5e8   :  { %v9128_v20 = vshrl.u32 %v17314_v63, 3 }
 0x5e9   :  { %v9096_v42 = vmul.u32 12, %v9095_v62 }
 0x5ea   :  { %v9129_v41 = vmul.u32 12, %v9128_v20 }
 0x5eb   :  { %v17358_v13 = vsub.s32 %v9067_v8, %v9096_v42  ;;  %v9194_v8 = vshrl.u32 %v17355_v53, 3 }
 0x5ec   :  { %12051 = vmatmul.mubr.bf16.gmra.mrb[16].mxu1 %v17148_v56  ;;  %v9071_v56 = vadd.s32 40, %v19052_v0  ;;  %v17370_v40 = vsub.s32 %v9070_v37, %v9129_v41  ;;  %v9248_v37 = vadd.s32 12, %v17365_v34 }
 0x5ed   :  { %12054 = vmatprep.mubr.bf16.mxu1 %v17171_v5  ;;  %v9072_v5 = vadd.s32 48, %v19052_v0  ;;  %vm9211_vm5 = vcmp.ne.s32.totalorder %v17358_v13, 0  ;;  %vm9223_vm7 = vcmp.lt.s32.totalorder %v17358_v13, 0  ;;  %v9247_v10 = vadd.s32 12, %v17358_v13 }
 0x5ee   :  { %v17316_v9 = vmul.u32.u64.low 2863311531, %v9071_v56  ;;  %v17317_v6 = vmul.u32.u64.high 2863311531, %v9071_v56, %v17316_v9  ;;  %vm9214_vm13 = vcmp.ne.s32.totalorder %v17370_v40, 0  ;;  %vm17400_vm15 = vmand %vm9223_vm7, %vm9211_vm5  ;;  %vm9226_vm3 = vcmp.lt.s32.totalorder %v17370_v40, 0 }
 0x5ef   :  { %v17319_v12 = vmul.u32.u64.low 2863311531, %v9072_v5  ;;  %v17320_v54 = vmul.u32.u64.high 2863311531, %v9072_v5, %v17319_v12  ;;  %vm17433_vm7 = vmand %vm9225_vm11, %vm9213_vm9  ;;  %v9250_v63 = vadd.s32 12, %v17370_v40  ;;  %vm17454_vm9 = vcmp.lt.s32.totalorder %v9258_v16, 8 }
 0x5f0   :  { %v9139_v33 = vshrl.u32 %v17317_v6, 3  ;;  %v17440_v12 = vsub.s32 %v17331_v52, %v9184_v39  ;;  %vm17475_vm11 = vmand %vm9226_vm3, %vm9214_vm13 }
 0x5f1   :  { %v9150_v45 = vshrl.u32 %v17320_v54, 3  ;;  %v9262_v58 = vsel %vm17475_vm11, %v9250_v63, %v17370_v40 }
 0x5f2   :  { %v9140_v61 = vmul.u32 12, %v9139_v33  ;;  %v17519_v53 = vadd.s32 12, %v17440_v12 }
 0x5f3   :  { %v9151_v7 = vmul.u32 12, %v9150_v45 }
 0x5f4   :  { %12055 = vmatmul.mubr.bf16.gmra.mrb[20].mxu1 %v17188_v43  ;;  %v9073_v43 = vadd.s32 56, %v19052_v0  ;;  %v17372_v46 = vsub.s32 %v9071_v56, %v9140_v61  ;;  %v9249_v56 = vadd.s32 12, %v17367_v51 }
 0x5f5   :  { %v17376_v14 = vsub.s32 %v9072_v5, %v9151_v7  ;;  %v17406_v5 = vsub.s32 %v17323_v28, %v9173_v4  ;;  %v9259_v28 = vsel %vm17400_vm15, %v9247_v10, %v17358_v13 }
 0x5f6   :  { %v17325_v48 = vmul.u32.u64.low 2863311531, %v9073_v43  ;;  %v17326_v57 = vmul.u32.u64.high 2863311531, %v9073_v43, %v17325_v48  ;;  %vm9215_vm14 = vcmp.ne.s32.totalorder %v17372_v46, 0  ;;  %vm9227_vm4 = vcmp.lt.s32.totalorder %v17372_v46, 0 }
 0x5f7   :  { %vm9216_vm0 = vcmp.ne.s32.totalorder %v17376_v14, 0  ;;  %vm9228_vm5 = vcmp.lt.s32.totalorder %v17376_v14, 0  ;;  %v9251_v9 = vadd.s32 12, %v17372_v46  ;;  %v9252_v54 = vadd.s32 12, %v17376_v14 }
 0x5f8   :  { %v9161_v22 = vshrl.u32 %v17326_v57, 3  ;;  %v9260_v48 = vsel %vm17414_vm2, %v9248_v37, %v17365_v34  ;;  %vm9218_vm8 = vcmp.ne.s32.totalorder %v17406_v5, 0  ;;  %vm9230_vm10 = vcmp.lt.s32.totalorder %v17406_v5, 0  ;;  %vm17501_vm2 = vmand %vm9227_vm4, %vm9215_vm14 }
 0x5f9   :  { %v17480_v20 = vadd.s32 12, %v17406_v5  ;;  %vm17482_vm12 = vcmp.lt.s32.totalorder %v9259_v28, 8  ;;  %vm17486_vm15 = vcmp.lt.s32.totalorder %v9260_v48, 8  ;;  %vm17514_vm13 = vmand %vm9228_vm5, %vm9216_vm0  ;;  %v9263_v11 = vsel %vm17501_vm2, %v9251_v9, %v17372_v46 }
 0x5fa   :  { %v9162_v59 = vmul.u32 12, %v9161_v22  ;;  %v9264_v34 = vsel %vm17514_vm13, %v9252_v54, %v17376_v14  ;;  %vm17575_vm11 = vmand %vm9230_vm10, %vm9218_vm8  ;;  %vm9233_vm2 = vcmp.lt.s32.totalorder %v17469_v35, 0  ;;  %vm19085_vm8 = vcmp.ne.s32.totalorder %v17440_v12, 0 }
 0x5fb   :  { %vm17579_vm13 = vcmp.lt.s32.totalorder %v9264_v34, 8  ;;  %v9257_v48 = vadd.s32 12, %v17469_v35 }
 0x5fc   :  { %v17378_v44 = vsub.s32 %v9073_v43, %v9162_v59  ;;  %v9195_v43 = vmul.u32 12, %v9194_v8 }
 0x5fe   :  { %vm9217_vm1 = vcmp.ne.s32.totalorder %v17378_v44, 0  ;;  %vm9229_vm6 = vcmp.lt.s32.totalorder %v17378_v44, 0  ;;  %v17450_v49 = vsub.s32 %v17334_v47, %v9195_v43  ;;  %v9253_v62 = vadd.s32 12, %v17378_v44 }
 0x5ff   :  { %v9261_v47 = vsel %vm17433_vm7, %v9249_v56, %v17367_v51  ;;  %vm9231_vm7 = vcmp.lt.s32.totalorder %v17440_v12, 0  ;;  %vm17539_vm0 = vmand %vm9229_vm6, %vm9217_vm1  ;;  %vm17554_vm1 = vcmp.lt.s32.totalorder %v9262_v58, 8  ;;  %vm17567_vm6 = vcmp.lt.s32.totalorder %v9263_v11, 8 }
 0x600   :  { %vm9220_vm3 = vcmp.ne.s32.totalorder %v17450_v49, 0  ;;  %vm17521_vm14 = vcmp.lt.s32.totalorder %v9261_v47, 8  ;;  %vm9232_vm4 = vcmp.lt.s32.totalorder %v17450_v49, 0  ;;  %v9256_v1 = vadd.s32 12, %v17450_v49  ;;  %vm17594_vm10 = vmand %vm9231_vm7, %vm19085_vm8 }
 0x601   :  { %v9265_v14 = vsel %vm17539_vm0, %v9253_v62, %v17378_v44  ;;  %vm17605_vm0 = vmand %vm9232_vm4, %vm9220_vm3  ;;  %vm19092_vm3 = vcmp.ne.s32.totalorder %v17469_v35, 0 }
 0x602   :  { %vm17609_vm5 = vcmp.lt.s32.totalorder %v9265_v14, 8  ;;  %vm17626_vm7 = vmand %vm9233_vm2, %vm19092_vm3 }
 0x617   :  { %v11908_v6 = vpop.f32.mrb[0].mxu1 }
 0x618   :  { %v8080_v57 = vpop.f32.mrb[1].mxu1  ;;  %v17459_v32 = vadd.f32 %v11908_v6, %v17426_v18 }
 0x619   :  { %v17462_v24 = vadd.f32 %v17426_v18, %v8080_v57  ;;  %v11909_v2 = vpop.f32.mrb[2].mxu1  ;;  %v9266_v57 = vsel %vm17575_vm11, %v17480_v20, %v17406_v5 }
 0x61a   :  { %v8083_v17 = vpop.f32.mrb[3].mxu1  ;;  %v17491_v3 = vadd.f32 %v11909_v2, %v17426_v18  ;;  %v9296_v13 = vsel %vm17486_vm15, %v17459_v32, 0.0  ;;  %vm17640_vm4 = vcmp.lt.s32.totalorder %v9266_v57, 8 }
 0x61b   :  { %v17494_v21 = vadd.f32 %v17426_v18, %v8083_v17  ;;  %v9294_v22 = vsel %vm17454_vm9, %v17462_v24, 0.0  ;;  %v9326_v4 = vmul.f32 %v9296_v13, %v9296_v13  ;;  %v9267_v17 = vsel %vm17594_vm10, %v17519_v53, %v17440_v12 }
 0x61c   :  { %v9324_v61 = vmul.f32 %v9294_v22, %v9294_v22  ;;  %v9297_v51 = vsel %vm17521_vm14, %v17491_v3, 0.0  ;;  %vm17653_vm11 = vcmp.lt.s32.totalorder %v9267_v17, 8 }
 0x61d   :  { %v9295_v38 = vsel %vm17482_vm12, %v17494_v21, 0.0  ;;  %v9327_v43 = vmul.f32 %v9297_v51, %v9297_v51 }
 0x61e   :  { %v9306_v41 = vadd.f32 %v9295_v38, %v9294_v22  ;;  %v9325_v7 = vmul.f32 %v9295_v38, %v9295_v38  ;;  %v9268_v22 = vsel %vm17605_vm0, %v9256_v1, %v17450_v49  ;;  %v9269_v49 = vsel %vm17626_vm7, %v9257_v48, %v17469_v35 }
 0x61f   :  { %v11912_v59 = vpop.f32.mrb[4].mxu1  ;;  %vm17657_vm2 = vcmp.lt.s32.totalorder %v9268_v22, 8  ;;  %vm17670_vm8 = vcmp.lt.s32.totalorder %v9269_v49, 8 }
 0x620   :  { %v8096_v40 = vpop.f32.mrb[5].mxu1  ;;  %v9307_v46 = vadd.f32 %v9306_v41, %v9296_v13  ;;  %v9336_v8 = vadd.f32 %v9325_v7, %v9324_v61  ;;  %v17559_v29 = vadd.f32 %v11912_v59, %v17426_v18 }
 0x621   :  { %v17562_v31 = vadd.f32 %v17426_v18, %v8096_v40  ;;  %v11913_v26 = vpop.f32.mrb[6].mxu1 }
 0x622   :  { %v8099_v37 = vpop.f32.mrb[7].mxu1  ;;  %v9308_v56 = vadd.f32 %v9307_v46, %v9297_v51  ;;  %v9337_v44 = vadd.f32 %v9336_v8, %v9326_v4  ;;  %v17584_v27 = vadd.f32 %v11913_v26, %v17426_v18  ;;  %v9300_v2 = vsel %vm17579_vm13, %v17559_v29, 0.0 }
 0x623   :  { %v17587_v16 = vadd.f32 %v17426_v18, %v8099_v37  ;;  %v9298_v30 = vsel %vm17554_vm1, %v17562_v31, 0.0  ;;  %v9330_v23 = vmul.f32 %v9300_v2, %v9300_v2 }
 0x624   :  { %v9309_v6 = vadd.f32 %v9308_v56, %v9298_v30  ;;  %v9328_v54 = vmul.f32 %v9298_v30, %v9298_v30  ;;  %v9338_v28 = vadd.f32 %v9337_v44, %v9327_v43  ;;  %v9301_v55 = vsel %vm17609_vm5, %v17584_v27, 0.0 }
 0x625   :  { %v9299_v62 = vsel %vm17567_vm6, %v17587_v16, 0.0  ;;  %v9331_v34 = vmul.f32 %v9301_v55, %v9301_v55 }
 0x626   :  { %v9310_v5 = vadd.f32 %v9309_v6, %v9299_v62  ;;  %v9329_v42 = vmul.f32 %v9299_v62, %v9299_v62  ;;  %v9339_v20 = vadd.f32 %v9338_v28, %v9328_v54 }
 0x627   :  { %v11916_v45 = vpop.f32.mrb[8].mxu1 }
 0x628   :  { %v8112_v58 = vpop.f32.mrb[9].mxu1  ;;  %v9311_v13 = vadd.f32 %v9310_v5, %v9300_v2  ;;  %v9340_v12 = vadd.f32 %v9339_v20, %v9329_v42  ;;  %v17645_v53 = vadd.f32 %v11916_v45, %v17426_v18 }
 0x629   :  { %v17648_v11 = vadd.f32 %v17426_v18, %v8112_v58  ;;  %v11917_v41 = vpop.f32.mrb[10].mxu1 }
 0x62a   :  { %v8115_v7 = vpop.f32.mrb[11].mxu1  ;;  %v9312_v1 = vadd.f32 %v9311_v13, %v9301_v55  ;;  %v9341_v51 = vadd.f32 %v9340_v12, %v9330_v23  ;;  %v17662_v40 = vadd.f32 %v11917_v41, %v17426_v18  ;;  %v9304_v39 = vsel %vm17657_vm2, %v17645_v53, 0.0 }
 0x62b   :  { %v17665_v46 = vadd.f32 %v17426_v18, %v8115_v7  ;;  %v9302_v35 = vsel %vm17640_vm4, %v17648_v11, 0.0  ;;  %v9334_v63 = vmul.f32 %v9304_v39, %v9304_v39 }
 0x62c   :  { %v9313_v8 = vadd.f32 %v9312_v1, %v9302_v35  ;;  %v9332_v26 = vmul.f32 %v9302_v35, %v9302_v35  ;;  %v9342_v14 = vadd.f32 %v9341_v51, %v9331_v34  ;;  %v9305_v50 = vsel %vm17670_vm8, %v17662_v40, 0.0 }
 0x62d   :  { %v9303_v37 = vsel %vm17653_vm11, %v17665_v46, 0.0  ;;  %v9335_v28 = vmul.f32 %v9305_v50, %v9305_v50 }
 0x62e   :  { %v9314_v56 = vadd.f32 %v9313_v8, %v9303_v37  ;;  %v9333_v43 = vmul.f32 %v9303_v37, %v9303_v37  ;;  %v9343_v44 = vadd.f32 %v9342_v14, %v9332_v26 }
 0x630   :  { %v9315_v30 = vadd.f32 %v9314_v56, %v9304_v39  ;;  %v9344_v6 = vadd.f32 %v9343_v44, %v9333_v43 }
 0x632   :  { %v17683_v54 = vadd.f32 %v9315_v30, %v9305_v50  ;;  %v9345_v48 = vadd.f32 %v9344_v6, %v9334_v63 }
 0x634   :  { %v17685_v57 = vadd.f32 %v9345_v48, %v9335_v28 }
 0x6b7   :  { %v12048_v62 = vpop.f32.mrb[12].mxu1 }
 0x6b8   :  { %v8973_v2 = vpop.f32.mrb[13].mxu1  ;;  %v17688_v47 = vadd.f32 %v12048_v62, %v17426_v18 }
 0x6b9   :  { %v17691_v17 = vadd.f32 %v17426_v18, %v8973_v2  ;;  %v12049_v5 = vpop.f32.mrb[14].mxu1 }
 0x6ba   :  { %v8976_v42 = vpop.f32.mrb[15].mxu1  ;;  %v17694_v20 = vadd.f32 %v12049_v5, %v17426_v18  ;;  %v9368_v58 = vsel %vm17486_vm15, %v17688_v47, 0.0 }
 0x6bb   :  { %v17697_v45 = vadd.f32 %v17426_v18, %v8976_v42  ;;  %v9366_v22 = vsel %vm17454_vm9, %v17691_v17, 0.0  ;;  %v9398_v52 = vmul.f32 %v9368_v58, %v9368_v58 }
 0x6bc   :  { %v9396_v23 = vmul.f32 %v9366_v22, %v9366_v22  ;;  %v9369_v49 = vsel %vm17521_vm14, %v17694_v20, 0.0 }
 0x6bd   :  { %v9367_v55 = vsel %vm17482_vm12, %v17697_v45, 0.0  ;;  %v9399_v26 = vmul.f32 %v9369_v49, %v9369_v49 }
 0x6be   :  { %v9378_v13 = vadd.f32 %v9367_v55, %v9366_v22  ;;  %v9397_v12 = vmul.f32 %v9367_v55, %v9367_v55 }
 0x6bf   :  { %v12052_v41 = vpop.f32.mrb[16].mxu1 }
 0x6c0   :  { %v8989_v7 = vpop.f32.mrb[17].mxu1  ;;  %v9379_v1 = vadd.f32 %v9378_v13, %v9368_v58  ;;  %v9408_v34 = vadd.f32 %v9397_v12, %v9396_v23  ;;  %v17712_v51 = vadd.f32 %v12052_v41, %v17426_v18  ;;  %v9317_v58 = vrot.slane %v17683_v54, 4 }
 0x6c1   :  { %v17715_v33 = vadd.f32 %v17426_v18, %v8989_v7  ;;  %v12053_v60 = vpop.f32.mrb[18].mxu1  ;;  %v9347_v7 = vrot.slane %v17685_v57, 4 }
 0x6c2   :  { %v8992_v35 = vpop.f32.mrb[19].mxu1  ;;  %v9380_v8 = vadd.f32 %v9379_v1, %v9369_v49  ;;  %v9409_v14 = vadd.f32 %v9408_v34, %v9398_v52  ;;  %v17718_v37 = vadd.f32 %v12053_v60, %v17426_v18  ;;  %v9372_v30 = vsel %vm17579_vm13, %v17712_v51, 0.0 }
 0x6c3   :  { %v17721_v36 = vadd.f32 %v17426_v18, %v8992_v35  ;;  %v9370_v39 = vsel %vm17554_vm1, %v17715_v33, 0.0  ;;  %v9402_v5 = vmul.f32 %v9372_v30, %v9372_v30 }
 0x6c4   :  { %v9381_v56 = vadd.f32 %v9380_v8, %v9370_v39  ;;  %v9400_v43 = vmul.f32 %v9370_v39, %v9370_v39  ;;  %v9410_v44 = vadd.f32 %v9409_v14, %v9399_v26  ;;  %v9373_v25 = vsel %vm17609_vm5, %v17718_v37, 0.0 }
 0x6c5   :  { %v9371_v50 = vsel %vm17567_vm6, %v17721_v36, 0.0  ;;  %v9403_v23 = vmul.f32 %v9373_v25, %v9373_v25  ;;  %v9348_v39 = vadd.f32 %v9347_v7, %v17685_v57 }
 0x6c6   :  { %v9382_v63 = vadd.f32 %v9381_v56, %v9371_v50  ;;  %v9401_v6 = vmul.f32 %v9371_v50, %v9371_v50  ;;  %v9411_v28 = vadd.f32 %v9410_v44, %v9400_v43 }
 0x6c7   :  { %v12056_v48 = vpop.f32.mrb[20].mxu1  ;;  %v9349_v59 = vrot.slane %v9348_v39, 2 }
 0x6c8   :  { %v9005_v62 = vpop.f32.mrb[21].mxu1  ;;  %v9383_v2 = vadd.f32 %v9382_v63, %v9372_v30  ;;  %v9412_v42 = vadd.f32 %v9411_v28, %v9401_v6  ;;  %v17736_v22 = vadd.f32 %v12056_v48, %v17426_v18 }
 0x6c9   :  { %v17739_v10 = vadd.f32 %v17426_v18, %v9005_v62  ;;  %v12057_v19 = vpop.f32.mrb[22].mxu1  ;;  %v9350_v62 = vadd.f32 %v9349_v59, %v9348_v39 }
 0x6ca   :  { %v9008_v55 = vpop.f32.mrb[23].mxu1  ;;  %v9384_v13 = vadd.f32 %v9383_v2, %v9373_v25  ;;  %v9413_v12 = vadd.f32 %v9412_v42, %v9402_v5  ;;  %v17743_v9 = vadd.f32 %v12057_v19, %v17426_v18  ;;  %v9376_v35 = vsel %vm17657_vm2, %v17736_v22, 0.0 }
 0x6cb   :  { %v17746_v41 = vadd.f32 %v17426_v18, %v9008_v55  ;;  %v9374_v49 = vsel %vm17640_vm4, %v17739_v10, 0.0  ;;  %v9318_v18 = vadd.f32 %v9317_v58, %v17683_v54  ;;  %v9406_v43 = vmul.f32 %v9376_v35, %v9376_v35 }
 0x6cc   :  { %v9385_v1 = vadd.f32 %v9384_v13, %v9374_v49  ;;  %v9404_v52 = vmul.f32 %v9374_v49, %v9374_v49  ;;  %v9414_v34 = vadd.f32 %v9413_v12, %v9403_v23  ;;  %v9377_v38 = vsel %vm17670_vm8, %v17743_v9, 0.0 }
 0x6cd   :  { %v9375_v60 = vsel %vm17653_vm11, %v17746_v41, 0.0  ;;  %v9319_v61 = vrot.slane %v9318_v18, 2  ;;  %v9407_v30 = vmul.f32 %v9377_v38, %v9377_v38  ;;  %v9351_v57 = vrot.slane %v9350_v62, 1 }
 0x6ce   :  { %v9386_v8 = vadd.f32 %v9385_v1, %v9375_v60  ;;  %v9405_v26 = vmul.f32 %v9375_v60, %v9375_v60  ;;  %v9415_v14 = vadd.f32 %v9414_v34, %v9404_v52 }
 0x6cf   :  { %v9320_v54 = vadd.f32 %v9319_v61, %v9318_v18  ;;  %v9352_v49 = vadd.f32 %v9351_v57, %v9350_v62 }
 0x6d0   :  { %v9387_v56 = vadd.f32 %v9386_v8, %v9376_v35  ;;  %v9416_v44 = vadd.f32 %v9415_v14, %v9405_v26  ;;  %v9434_v14 = vld [vmem:[%s18049_s7] sm:$0x1]  ;;  %s12467_s7 = smov 64  }
 0x6d1   :  { %v9321_v4 = vrot.slane %v9320_v54, 1 }
 0x6d2   :  { %v9388_v50 = vadd.f32 %v9387_v56, %v9377_v38  ;;  %v9417_v63 = vadd.f32 %v9416_v44, %v9406_v43  ;;  %v9436_v56 = vld [vmem:[%s18050_s8] sm:$0x1] }
 0x6d3   :  { %v9322_v13 = vadd.f32 %v9321_v4, %v9320_v54  ;;  %v19103_v44 = vld [vmem:[#allocation118_spill] sm:$0xff] }
 0x6d4   :  { %v9389_v6 = vrot.slane %v9388_v50, 4  ;;  %v9418_v28 = vadd.f32 %v9417_v63, %v9407_v30 }
 0x6d6   :  { %v9390_v48 = vadd.f32 %v9389_v6, %v9388_v50  ;;  %v9419_v25 = vrot.slane %v9418_v28, 4 }
 0x6d8   :  { %v9391_v2 = vrot.slane %v9390_v48, 2  ;;  %v9420_v5 = vadd.f32 %v9419_v25, %v9418_v28 }
 0x6da   :  { %v9392_v42 = vadd.f32 %v9391_v2, %v9390_v48  ;;  %v9421_v19 = vrot.slane %v9420_v5, 2 }
 0x6dc   :  { %v9393_v55 = vrot.slane %v9392_v42, 1  ;;  %v9422_v58 = vadd.f32 %v9421_v19, %v9420_v5 }
 0x6de   :  { %v9394_v23 = vadd.f32 %v9393_v55, %v9392_v42  ;;  %v9423_v12 = vrot.slane %v9422_v58, 1 }
 0x6e0   :  { %v9395_v7 = vadd.f32 %v9394_v23, %v9322_v13  ;;  %v9424_v1 = vadd.f32 %v9423_v12, %v9422_v58 }
 0x6e2   :  { %v9425_v52 = vadd.f32 %v9424_v1, %v9352_v49  ;;  %v9427_v34 = vmul.f32 0.0078125, %v9395_v7 }
 0x6e4   :  { %v9428_v60 = vmul.f32 0.0078125, %v9425_v52  ;;  %v9429_v35 = vmul.f32 %v9427_v34, %v9427_v34 }
 0x6e6   :  { %v9430_v18 = vsub.f32 %v9428_v60, %v9429_v35 }
 0x6e8   :  { %v9431_v8 = vmax.f32 %v9430_v18, 0.0 }
 0x6ea   :  { %v9432_v26 = vadd.f32 1e-05, %v9431_v8 }
 0x6ec   :  { %12391 = vrsqrt.f32 %v9432_v26 }
 0x6f6   :  { %v12392_v38 = vpop.eup %12391 }
 0x6f7   :  { %v9435_v39 = vmul.f32 %v12392_v38, %v9434_v14 }
 0x6f9   :  { %v9437_v43 = vmul.f32 %v9435_v39, %v9427_v34  ;;  %v9442_v61 = vrot.slane %v9435_v39, %v19103_v44 }
 0x6fb   :  { %v9438_v50 = vsub.f32 %v9436_v56, %v9437_v43  ;;  %v9443_v30 = vmul.f32 %v9442_v61, %v17462_v24  ;;  %v9444_v63 = vmul.f32 %v9442_v61, %v17494_v21  ;;  %v9445_v59 = vmul.f32 %v9442_v61, %v17459_v32 }
 0x6fc   :  { %v9446_v6 = vmul.f32 %v9442_v61, %v17491_v3  ;;  %v9447_v28 = vmul.f32 %v9442_v61, %v17562_v31  ;;  %v9448_v54 = vmul.f32 %v9442_v61, %v17587_v16  ;;  %v9449_v48 = vmul.f32 %v9442_v61, %v17559_v29 }
 0x6fd   :  { %v9450_v25 = vmul.f32 %v9442_v61, %v17584_v27  ;;  %v9451_v62 = vmul.f32 %v9442_v61, %v17648_v11  ;;  %v9452_v2 = vmul.f32 %v9442_v61, %v17665_v46  ;;  %v9453_v24 = vmul.f32 %v9442_v61, %v17645_v53 }
 0x6fe   :  { %v9454_v21 = vmul.f32 %v9442_v61, %v17662_v40  ;;  %v9459_v32 = vrot.slane %v9438_v50, %v19103_v44  ;;  %v9509_v3 = vmul.f32 %v9442_v61, %v17691_v17  ;;  %v9510_v31 = vmul.f32 %v9442_v61, %v17697_v45 }
 0x6ff   :  { %v9511_v16 = vmul.f32 %v9442_v61, %v17688_v47  ;;  %v9512_v29 = vmul.f32 %v9442_v61, %v17694_v20  ;;  %v9513_v27 = vmul.f32 %v9442_v61, %v17715_v33  ;;  %v9514_v11 = vmul.f32 %v9442_v61, %v17721_v36 }
 0x700   :  { %v17789_v5 = vadd.f32 %v9459_v32, %v9443_v30  ;;  %v9462_v46 = vadd.f32 %v9459_v32, %v9444_v63  ;;  %v9463_v53 = vadd.f32 %v9459_v32, %v9445_v59  ;;  %v17791_v4 = vadd.f32 %v9459_v32, %v9446_v6 }
 0x701   :  { %v9465_v40 = vadd.f32 %v9459_v32, %v9447_v28  ;;  %v9466_v42 = vadd.f32 %v9459_v32, %v9448_v54  ;;  %v17793_v19 = vadd.f32 %v9459_v32, %v9449_v48  ;;  %v9468_v17 = vadd.f32 %v9459_v32, %v9450_v25 }
 0x702   :  { %v9469_v45 = vadd.f32 %v9459_v32, %v9451_v62  ;;  %v17795_v57 = vadd.f32 %v9459_v32, %v9452_v2  ;;  %v9471_v47 = vadd.f32 %v9459_v32, %v9453_v24  ;;  %v9472_v20 = vadd.f32 %v9459_v32, %v9454_v21 }
 0x703   :  { %v9473_v33 = vmax.f32 %v17789_v5, 0.0  ;;  %v9474_v55 = vmax.f32 %v9462_v46, 0.0  ;;  %v9475_v36 = vmax.f32 %v9463_v53, 0.0  ;;  %v9476_v58 = vmax.f32 %v17791_v4, 0.0 }
 0x704   :  { %v9477_v13 = vmax.f32 %v9465_v40, 0.0  ;;  %v9478_v23 = vmax.f32 %v9466_v42, 0.0  ;;  %v9479_v12 = vmax.f32 %v17793_v19, 0.0  ;;  %v9480_v49 = vmax.f32 %v9468_v17, 0.0 }
 0x705   :  { %v9481_v7 = vmax.f32 %v9469_v45, 0.0  ;;  %v9482_v1 = vmax.f32 %v17795_v57, 0.0  ;;  %v9483_v52 = vmax.f32 %v9471_v47, 0.0  ;;  %v9484_v34 = vmax.f32 %v9472_v20, 0.0  ;;  %9485 = vst [vmem:[#allocation4] sm:$0xff] %v9473_v33  ;;  %9486 = vst [vmem:[#allocation4 + $0x8] sm:$0xff] %v9474_v55 }
 0x706   :  { %9487 = vst [vmem:[#allocation4 + $0x10] sm:$0xff] %v9475_v36  ;;  %9488 = vst [vmem:[#allocation4 + $0x18] sm:$0xff] %v9476_v58  ;;  %v9515_v60 = vmul.f32 %v9442_v61, %v17712_v51  ;;  %v9516_v35 = vmul.f32 %v9442_v61, %v17718_v37  ;;  %v9517_v18 = vmul.f32 %v9442_v61, %v17739_v10 }
 0x707   :  { %9489 = vst [vmem:[#allocation4 + $0x20] sm:$0xff] %v9477_v13  ;;  %9490 = vst [vmem:[#allocation4 + $0x28] sm:$0xff] %v9478_v23  ;;  %v9518_v8 = vmul.f32 %v9442_v61, %v17746_v41  ;;  %v9519_v26 = vmul.f32 %v9442_v61, %v17736_v22  ;;  %v9520_v14 = vmul.f32 %v9442_v61, %v17743_v9 }
 0x708   :  { %9491 = vst [vmem:[#allocation4 + $0x30] sm:$0xff] %v9479_v12  ;;  %9492 = vst [vmem:[#allocation4 + $0x38] sm:$0xff] %v9480_v49  ;;  %v17815_v38 = vadd.f32 %v9509_v3, %v9459_v32  ;;  %v9522_v39 = vadd.f32 %v9510_v31, %v9459_v32  ;;  %v9523_v51 = vadd.f32 %v9511_v16, %v9459_v32 }
 0x709   :  { %9493 = vst [vmem:[#allocation4 + $0x40] sm:$0xff] %v9481_v7  ;;  %9494 = vst [vmem:[#allocation4 + $0x48] sm:$0xff] %v9482_v1  ;;  %v17817_v56 = vadd.f32 %v9512_v29, %v9459_v32  ;;  %v9525_v37 = vadd.f32 %v9513_v27, %v9459_v32  ;;  %v9526_v10 = vadd.f32 %v9514_v11, %v9459_v32 }
 0x70a   :  { %9495 = vst [vmem:[#allocation4 + $0x50] sm:$0xff] %v9483_v52  ;;  %9496 = vst [vmem:[#allocation4 + $0x58] sm:$0xff] %v9484_v34  ;;  %v17819_v43 = vadd.f32 %v9515_v60, %v9459_v32  ;;  %v9528_v41 = vadd.f32 %v9516_v35, %v9459_v32  ;;  %v9529_v50 = vadd.f32 %v9517_v18, %v9459_v32  ;;  %v9533_v22 = vmax.f32 %v17815_v38, 0.0 }
 0x70b   :  { %v17821_v30 = vadd.f32 %v9518_v8, %v9459_v32  ;;  %v9531_v63 = vadd.f32 %v9519_v26, %v9459_v32  ;;  %v9532_v59 = vadd.f32 %v9520_v14, %v9459_v32  ;;  %v9534_v6 = vmax.f32 %v9522_v39, 0.0 }
 0x70c   :  { %v9535_v9 = vmax.f32 %v9523_v51, 0.0  ;;  %v9536_v61 = vmax.f32 %v17817_v56, 0.0  ;;  %v9537_v28 = vmax.f32 %v9525_v37, 0.0  ;;  %v9538_v54 = vmax.f32 %v9526_v10, 0.0  ;;  %9545 = vst [vmem:[#allocation4 + $0x60] sm:$0xff] %v9533_v22  ;;  %v9569_v21 = vld [vmem:[#allocation4 + $0x1] sm:$0xff] }
 0x70d   :  { %v9539_v48 = vmax.f32 %v17819_v43, 0.0  ;;  %v9540_v25 = vmax.f32 %v9528_v41, 0.0  ;;  %v9541_v62 = vmax.f32 %v9529_v50, 0.0  ;;  %v9542_v2 = vmax.f32 %v17821_v30, 0.0  ;;  %9546 = vst [vmem:[#allocation4 + $0x68] sm:$0xff] %v9534_v6  ;;  %v9561_v24 = vld [vmem:[#allocation4 + $0xc] sm:$0xff] }
 0x70e   :  { %v9543_v3 = vmax.f32 %v9531_v63, 0.0  ;;  %v9544_v32 = vmax.f32 %v9532_v59, 0.0  ;;  %9547 = vst [vmem:[#allocation4 + $0x70] sm:$0xff] %v9535_v9  ;;  %9548 = vst [vmem:[#allocation4 + $0x78] sm:$0xff] %v9536_v61  ;;  %v9562_v31 = vld [vmem:[#allocation4 + $0x24] sm:$0xff]  ;;  %v9570_v16 = vld [vmem:[#allocation4 + $0x19] sm:$0xff]  ;;  %v9565_v27 = vmax.f32 %v9473_v33, %v9561_v24 }
 0x70f   :  { %9549 = vst [vmem:[#allocation4 + $0x80] sm:$0xff] %v9537_v28  ;;  %9550 = vst [vmem:[#allocation4 + $0x88] sm:$0xff] %v9538_v54  ;;  %v9574_v29 = vld [vmem:[#allocation4 + $0x25] sm:$0xff]  ;;  %v9566_v11 = vmax.f32 %v9476_v58, %v9562_v31  ;;  %v9573_v53 = vld [vmem:[#allocation4 + $0xd] sm:$0xff] }
 0x710   :  { %9551 = vst [vmem:[#allocation4 + $0x90] sm:$0xff] %v9539_v48  ;;  %9552 = vst [vmem:[#allocation4 + $0x98] sm:$0xff] %v9540_v25  ;;  %v9578_v46 = vmax.f32 %v9570_v16, %v9574_v29  ;;  %v9577_v17 = vmax.f32 %v9569_v21, %v9573_v53  ;;  %v9563_v47 = vld [vmem:[#allocation4 + $0x3c] sm:$0xff]  ;;  %v9571_v5 = vld [vmem:[#allocation4 + $0x31] sm:$0xff] }
 0x711   :  { %9553 = vst [vmem:[#allocation4 + $0xa0] sm:$0xff] %v9541_v62  ;;  %9554 = vst [vmem:[#allocation4 + $0xa8] sm:$0xff] %v9542_v2  ;;  %v9564_v40 = vld [vmem:[#allocation4 + $0x54] sm:$0xff]  ;;  %v9572_v42 = vld [vmem:[#allocation4 + $0x49] sm:$0xff]  ;;  %v9567_v4 = vmax.f32 %v9479_v12, %v9563_v47 }
 0x712   :  { %9555 = vst [vmem:[#allocation4 + $0xb0] sm:$0xff] %v9543_v3  ;;  %9556 = vst [vmem:[#allocation4 + $0xb8] sm:$0xff] %v9544_v32  ;;  %v9576_v45 = vld [vmem:[#allocation4 + $0x55] sm:$0xff]  ;;  %v9582_v20 = vmax.f32 %v9566_v11, %v9578_v46  ;;  %v9568_v33 = vmax.f32 %v9482_v1, %v9564_v40  ;;  %v9575_v36 = vld [vmem:[#allocation4 + $0x3d] sm:$0xff]  ;;  %v9581_v13 = vmax.f32 %v9565_v27, %v9577_v17 }
 0x713   :  { %v9580_v55 = vmax.f32 %v9572_v42, %v9576_v45  ;;  %v9579_v58 = vmax.f32 %v9571_v5, %v9575_v36 }
 0x714   :  { %9587 = vrot.lane.b32.xlu1 %v9582_v20, %s12467_s7  ;;  %9585 = vrot.lane.b32.xlu0 %v9581_v13, %s12467_s7  ;;  %v9669_v23 = vld [vmem:[#allocation4 + $0x61] sm:$0xff] }
 0x715   :  { %v9584_v49 = vmax.f32 %v9568_v33, %v9580_v55  ;;  %v9583_v60 = vmax.f32 %v9567_v4, %v9579_v58  ;;  %v9661_v35 = vld [vmem:[#allocation4 + $0x6c] sm:$0xff] }
 0x716   :  { %v9662_v7 = vld [vmem:[#allocation4 + $0x84] sm:$0xff]  ;;  %v9670_v52 = vld [vmem:[#allocation4 + $0x79] sm:$0xff]  ;;  %v9673_v18 = vld [vmem:[#allocation4 + $0x6d] sm:$0xff]  ;;  %v9665_v19 = vmax.f32 %v9533_v22, %v9661_v35 }
 0x717   :  { %v9674_v34 = vld [vmem:[#allocation4 + $0x85] sm:$0xff]  ;;  %v9666_v57 = vmax.f32 %v9536_v61, %v9662_v7  ;;  %v9677_v12 = vmax.f32 %v9669_v23, %v9673_v18  ;;  %v9671_v39 = vld [vmem:[#allocation4 + $0x91] sm:$0xff] }
 0x718   :  { %v9678_v1 = vmax.f32 %v9670_v52, %v9674_v34  ;;  %v9663_v8 = vld [vmem:[#allocation4 + $0x9c] sm:$0xff]  ;;  %9591 = vrot.lane.b32.xlu1 %v9584_v49, %s12467_s7  ;;  %9589 = vrot.lane.b32.xlu0 %v9583_v60, %s12467_s7 }
 0x719   :  { %v9664_v26 = vld [vmem:[#allocation4 + $0xb4] sm:$0xff]  ;;  %v9672_v14 = vld [vmem:[#allocation4 + $0xa9] sm:$0xff]  ;;  %v9675_v51 = vld [vmem:[#allocation4 + $0x9d] sm:$0xff]  ;;  %v9681_v41 = vmax.f32 %v9665_v19, %v9677_v12  ;;  %v9667_v50 = vmax.f32 %v9539_v48, %v9663_v8 }
 0x71a   :  { %v9676_v38 = vld [vmem:[#allocation4 + $0xb5] sm:$0xff]  ;;  %v9682_v56 = vmax.f32 %v9666_v57, %v9678_v1  ;;  %v9668_v37 = vmax.f32 %v9542_v2, %v9664_v26  ;;  %v9679_v30 = vmax.f32 %v9671_v39, %v9675_v51 }
 0x71b   :  { %v9680_v10 = vmax.f32 %v9672_v14, %v9676_v38 }
 0x71c   :  { %9687 = vrot.lane.b32.xlu1 %v9682_v56, %s12467_s7  ;;  %9685 = vrot.lane.b32.xlu0 %v9681_v41, %s12467_s7  ;;  %v9683_v59 = vmax.f32 %v9667_v50, %v9679_v30 }
 0x71d   :  { %v9684_v63 = vmax.f32 %v9668_v37, %v9680_v10 }
 0x720   :  { %9691 = vrot.lane.b32.xlu1 %v9684_v63, %s12467_s7  ;;  %9689 = vrot.lane.b32.xlu0 %v9683_v59, %s12467_s7 }
 0x786   :  { %v9588_v22 = vpop.permute.xlu1 %9587  ;;  %v9586_v9 = vpop.permute.xlu0 %9585 }
 0x787   :  { %v9610_v6 = vrot.slane %v9588_v22, 2  ;;  %v9594_v61 = vrot.slane %v9586_v9, 2 }
 0x789   :  { %v9612_v28 = vadd.f32 %v9610_v6, %v9582_v20  ;;  %v9596_v54 = vadd.f32 %v9594_v61, %v9581_v13 }
 0x78a   :  { %v9592_v25 = vpop.permute.xlu1 %9591  ;;  %v9590_v62 = vpop.permute.xlu0 %9589 }
 0x78b   :  { %9613 = vst [vmem:[#allocation5 + $0x4] sm:$0x1] %v9612_v28  ;;  %v9615_v43 = vcombine.high %v9612_v28, %v9612_v28  ;;  %v9642_v48 = vrot.slane %v9592_v25, 2  ;;  %9597 = vst [vmem:[#allocation5] sm:$0x1] %v9596_v54  ;;  %v9599_v2 = vcombine.high %v9596_v54, %v9596_v54  ;;  %v9626_v24 = vrot.slane %v9590_v62, 2 }
 0x78d   :  { %11313 = vst.sshfl [vmem:[#allocation5 + $0x6] sm:$0x1 pattern:$0x76325410] %v9615_v43  ;;  %v9644_v21 = vadd.f32 %v9642_v48, %v9584_v49  ;;  %v9628_v3 = vadd.f32 %v9626_v24, %v9583_v60 }
 0x78e   :  { %11312 = vst.sshfl [vmem:[#allocation5 + $0x2] sm:$0x1 pattern:$0x76325410] %v9599_v2  ;;  %v9688_v32 = vpop.permute.xlu1 %9687  ;;  %v9686_v29 = vpop.permute.xlu0 %9685 }
 0x78f   :  { %9645 = vst [vmem:[#allocation5 + $0xc] sm:$0x1] %v9644_v21  ;;  %v9647_v31 = vcombine.high %v9644_v21, %v9644_v21  ;;  %v9710_v16 = vrot.slane %v9688_v32, 2  ;;  %9629 = vst [vmem:[#allocation5 + $0x8] sm:$0x1] %v9628_v3  ;;  %v9631_v27 = vcombine.high %v9628_v3, %v9628_v3  ;;  %v9694_v11 = vrot.slane %v9686_v29, 2 }
 0x791   :  { %11315 = vst.sshfl [vmem:[#allocation5 + $0xe] sm:$0x1 pattern:$0x76325410] %v9647_v31  ;;  %v9712_v46 = vadd.f32 %v9710_v16, %v9682_v56  ;;  %v9696_v53 = vadd.f32 %v9694_v11, %v9681_v41 }
 0x792   :  { %11314 = vst.sshfl [vmem:[#allocation5 + $0xa] sm:$0x1 pattern:$0x76325410] %v9631_v27  ;;  %v9692_v40 = vpop.permute.xlu1 %9691  ;;  %v9690_v45 = vpop.permute.xlu0 %9689 }
 0x793   :  { %9713 = vst [vmem:[#allocation5 + $0x5] sm:$0x1] %v9712_v46  ;;  %v9715_v42 = vcombine.high %v9712_v46, %v9712_v46  ;;  %v9742_v17 = vrot.slane %v9692_v40, 2  ;;  %9697 = vst [vmem:[#allocation5 + $0x1] sm:$0x1] %v9696_v53  ;;  %v9699_v47 = vcombine.high %v9696_v53, %v9696_v53  ;;  %v9726_v5 = vrot.slane %v9690_v45, 2 }
 0x795   :  { %11317 = vst.sshfl [vmem:[#allocation5 + $0x7] sm:$0x1 pattern:$0x76325410] %v9715_v42  ;;  %v9744_v20 = vadd.f32 %v9742_v17, %v9684_v63  ;;  %v9728_v33 = vadd.f32 %v9726_v5, %v9683_v59 }
 0x796   :  { %11316 = vst.sshfl [vmem:[#allocation5 + $0x3] sm:$0x1 pattern:$0x76325410] %v9699_v47 }
 0x797   :  { %9745 = vst [vmem:[#allocation5 + $0xd] sm:$0x1] %v9744_v20  ;;  %v9747_v55 = vcombine.high %v9744_v20, %v9744_v20  ;;  %9729 = vst [vmem:[#allocation5 + $0x9] sm:$0x1] %v9728_v33  ;;  %v9731_v36 = vcombine.high %v9728_v33, %v9728_v33 }
 0x799   :  { %11319 = vst.sshfl [vmem:[#allocation5 + $0xf] sm:$0x1 pattern:$0x76325410] %v9747_v55 }
 0x79a   :  { %11318 = vst.sshfl [vmem:[#allocation5 + $0xb] sm:$0x1 pattern:$0x76325410] %v9731_v36 }
 0x79b   :  { %12458 = dma.done.wait [#allocation7], 32768 }
 0x79c   :  { %12459 = vsyncadd [#allocation7], 4294934528  ;;  %v9816_v13 = vld [vmem:[#allocation6 + $0x8] sm:$0xff]  ;;  %v9818_v4 = vld [vmem:[#allocation6 + $0x18] sm:$0xff]  ;;  %v12468_v19 = vmov 1983009808  }
 0x79d   :  { %v9815_v58 = vld [vmem:[#allocation6] sm:$0xff]  ;;  %10093 = vmatprep.subr.bf16.mxu0 %v9816_v13  ;;  %10257 = vmatprep.subr.bf16.mxu1 %v9818_v4  ;;  %v9817_v23 = vld [vmem:[#allocation6 + $0x10] sm:$0xff]  ;;  %v9820_v49 = vld [vmem:[#allocation6 + $0x28] sm:$0xff]  ;;  %v9767_v12 = vunpack.c.l.s4 %v12468_v19  ;;  %vm12469_vm9 = vmmov 0   ;;  %s12470_s27 = smov [#allocation8]  }
 0x79e   :  { %v9822_v7 = vld [vmem:[#allocation6 + $0x38] sm:$0xff]  ;;  %10094 = vmatpush1.bf16.msra.mxu0 %v9815_v58  ;;  %10258 = vmatpush1.bf16.msra.mxu1 %v9817_v23  ;;  %v9819_v52 = vld [vmem:[#allocation6 + $0x20] sm:$0xff]  ;;  %v9821_v34 = vld [vmem:[#allocation6 + $0x30] sm:$0xff]  ;;  %s10891_s0 = sshll.u32 %s12470_s27, 4  ;;  %s10892_s0 = int_to_ptr.vmem [resolvable:$true] %s10891_s0 }
 0x79f   :  { %10095 = vmatprep.subr.bf16.mxu0 %v9820_v49  ;;  %10259 = vmatprep.subr.bf16.mxu1 %v9822_v7  ;;  %v9824_v60 = vld [vmem:[#allocation6 + $0x48] sm:$0xff]  ;;  %v9826_v57 = vld [vmem:[#allocation6 + $0x58] sm:$0xff]  ;;  %v9823_v1 = vld [vmem:[#allocation6 + $0x40] sm:$0xff]  ;;  %v9768_v51 = vunpack.c.0.s8 %v9767_v12  ;;  %p12441_p1 = scmp.lt.s32.totalorder %s10892_s0, %s10892_s0 }
 0x7a0   :  { %v9825_v35 = vld [vmem:[#allocation6 + $0x50] sm:$0xff]  ;;  %v9828_v18 = vld [vmem:[#allocation6 + $0x68] sm:$0xff]  ;;  %v9830_v8 = vld [vmem:[#allocation6 + $0x78] sm:$0xff] }
 0x7a1   :  { %v9827_v26 = vld [vmem:[#allocation6 + $0x60] sm:$0xff]  ;;  %v9829_v14 = vld [vmem:[#allocation6 + $0x70] sm:$0xff]  ;;  %v9832_v38 = vld [vmem:[#allocation6 + $0x88] sm:$0xff]  ;;  %v17848_v50 = vsub.s32 %v9768_v51, %v19052_v0 }
 0x7a2   :  { %10096 = vmatpush1.bf16.msra.mxu0 %v9819_v52  ;;  %10260 = vmatpush1.bf16.msra.mxu1 %v9821_v34  ;;  %v9834_v39 = vld [vmem:[#allocation6 + $0x98] sm:$0xff]  ;;  %v9831_v56 = vld [vmem:[#allocation6 + $0x80] sm:$0xff]  ;;  %v9833_v37 = vld [vmem:[#allocation6 + $0x90] sm:$0xff] }
 0x7a3   :  { %10097 = vmatprep.subr.bf16.mxu0 %v9824_v60  ;;  %10261 = vmatprep.subr.bf16.mxu1 %v9826_v57  ;;  %v9836_v10 = vld [vmem:[#allocation6 + $0xa8] sm:$0xff]  ;;  %v9838_v41 = vld [vmem:[#allocation6 + $0xb8] sm:$0xff]  ;;  %v9835_v30 = vld [vmem:[#allocation6 + $0xa0] sm:$0xff] }
 0x7a4   :  { %v9837_v63 = vld [vmem:[#allocation6 + $0xb0] sm:$0xff]  ;;  %v9840_v59 = vld [vmem:[#allocation6 + $0xc8] sm:$0xff]  ;;  %v9842_v22 = vld [vmem:[#allocation6 + $0xd8] sm:$0xff] }
 0x7a5   :  { %v17850_v6 = vld [vmem:[#allocation5] sm:$0xff]  ;;  %v9839_v61 = vld [vmem:[#allocation6 + $0xc0] sm:$0xff]  ;;  %v9844_v54 = vld [vmem:[#allocation6 + $0xe8] sm:$0xff] }
 0x7a6   :  { %10098 = vmatpush1.bf16.msra.mxu0 %v9823_v1  ;;  %10262 = vmatpush1.bf16.msra.mxu1 %v9825_v35  ;;  %v17854_v9 = vrot.slane %v17850_v6, %v17848_v50  ;;  %v9841_v28 = vld [vmem:[#allocation6 + $0xd0] sm:$0xff]  ;;  %v9846_v25 = vld [vmem:[#allocation6 + $0xf8] sm:$0xff]  ;;  %v9843_v62 = vld [vmem:[#allocation6 + $0xe0] sm:$0xff]  ;;  %v9765_v7 = vcombine.high %v17850_v6, %v17850_v6 }
 0x7a7   :  { %10099 = vmatprep.subr.bf16.mxu0 %v9828_v18  ;;  %10263 = vmatprep.subr.bf16.mxu1 %v9830_v8  ;;  %v9845_v2 = vld [vmem:[#allocation6 + $0xf0] sm:$0xff]  ;;  %v9848_v24 = vld [vmem:[#allocation6 + $0x108] sm:$0xff]  ;;  %v9850_v21 = vld [vmem:[#allocation6 + $0x118] sm:$0xff] }
 0x7a8   :  { %v9780_v43 = vcombine.high %v17854_v9, %v17854_v9  ;;  %v9847_v3 = vld [vmem:[#allocation6 + $0x100] sm:$0xff]  ;;  %v9849_v32 = vld [vmem:[#allocation6 + $0x110] sm:$0xff]  ;;  %v9852_v31 = vld [vmem:[#allocation6 + $0x128] sm:$0xff]  ;;  %v17861_v1 = vrot.slane %v9765_v7, %v17848_v50 }
 0x7a9   :  { %v9854_v16 = vld [vmem:[#allocation6 + $0x138] sm:$0xff]  ;;  %v9851_v29 = vld [vmem:[#allocation6 + $0x120] sm:$0xff]  ;;  %v9853_v27 = vld [vmem:[#allocation6 + $0x130] sm:$0xff] }
 0x7aa   :  { %10100 = vmatpush1.bf16.msra.mxu0 %v9827_v26  ;;  %10264 = vmatpush1.bf16.msra.mxu1 %v9829_v14  ;;  %v9808_v48 = vpack.c.bf16 %v9780_v43, %v9780_v43  ;;  %v9856_v11 = vld [vmem:[#allocation6 + $0x148] sm:$0xff]  ;;  %v9858_v46 = vld [vmem:[#allocation6 + $0x158] sm:$0xff]  ;;  %v9855_v53 = vld [vmem:[#allocation6 + $0x140] sm:$0xff]  ;;  %v9781_v12 = vcombine.high %v17861_v1, %v17861_v1  ;;  %v9807_v26 = vpack.c.bf16 %v17854_v9, %v17854_v9 }
 0x7ab   :  { %10101 = vmatprep.subr.bf16.mxu0 %v9832_v38  ;;  %10265 = vmatprep.subr.bf16.mxu1 %v9834_v39  ;;  %v9857_v40 = vld [vmem:[#allocation6 + $0x150] sm:$0xff]  ;;  %v9860_v42 = vld [vmem:[#allocation6 + $0x168] sm:$0xff]  ;;  %v9862_v17 = vld [vmem:[#allocation6 + $0x178] sm:$0xff] }
 0x7ac   :  { %10125 = vmatprep.mubr.bf16.mxu0 %v9808_v48  ;;  %10289 = vmatprep.mubr.bf16.mxu1 %v9808_v48  ;;  %v9859_v45 = vld [vmem:[#allocation6 + $0x160] sm:$0xff]  ;;  %v9861_v47 = vld [vmem:[#allocation6 + $0x170] sm:$0xff]  ;;  %v9864_v5 = vld [vmem:[#allocation6 + $0x188] sm:$0xff] }
 0x7ad   :  { %v9866_v20 = vld [vmem:[#allocation6 + $0x198] sm:$0xff]  ;;  %v9863_v33 = vld [vmem:[#allocation6 + $0x180] sm:$0xff]  ;;  %v9865_v55 = vld [vmem:[#allocation6 + $0x190] sm:$0xff] }
 0x7ae   :  { %10102 = vmatpush1.bf16.msra.mxu0 %v9831_v56  ;;  %10266 = vmatpush1.bf16.msra.mxu1 %v9833_v37  ;;  %v9868_v36 = vld [vmem:[#allocation6 + $0x1a8] sm:$0xff]  ;;  %v9870_v13 = vld [vmem:[#allocation6 + $0x1b8] sm:$0xff]  ;;  %v9867_v4 = vld [vmem:[#allocation6 + $0x1a0] sm:$0xff]  ;;  %v9810_v56 = vpack.c.bf16 %v9781_v12, %v9781_v12 }
 0x7af   :  { %10103 = vmatprep.subr.bf16.mxu0 %v9836_v10  ;;  %10267 = vmatprep.subr.bf16.mxu1 %v9838_v41  ;;  %v9869_v58 = vld [vmem:[#allocation6 + $0x1b0] sm:$0xff]  ;;  %v9872_v23 = vld [vmem:[#allocation6 + $0x1c8] sm:$0xff]  ;;  %v9874_v49 = vld [vmem:[#allocation6 + $0x1d8] sm:$0xff] }
 0x7b0   :  { %v9871_v52 = vld [vmem:[#allocation6 + $0x1c0] sm:$0xff]  ;;  %v9873_v34 = vld [vmem:[#allocation6 + $0x1d0] sm:$0xff]  ;;  %v9876_v60 = vld [vmem:[#allocation6 + $0x1e8] sm:$0xff] }
 0x7b1   :  { %v9878_v57 = vld [vmem:[#allocation6 + $0x1f8] sm:$0xff]  ;;  %v9875_v35 = vld [vmem:[#allocation6 + $0x1e0] sm:$0xff]  ;;  %v9877_v18 = vld [vmem:[#allocation6 + $0x1f0] sm:$0xff] }
 0x7b2   :  { %10104 = vmatpush1.bf16.msra.mxu0 %v9835_v30  ;;  %10268 = vmatpush1.bf16.msra.mxu1 %v9837_v63  ;;  %v9880_v8 = vld [vmem:[#allocation6 + $0x208] sm:$0xff]  ;;  %v9882_v19 = vld [vmem:[#allocation6 + $0x218] sm:$0xff]  ;;  %v9879_v14 = vld [vmem:[#allocation6 + $0x200] sm:$0xff] }
 0x7b3   :  { %10105 = vmatprep.subr.bf16.mxu0 %v9840_v59  ;;  %10269 = vmatprep.subr.bf16.mxu1 %v9842_v22  ;;  %v9881_v38 = vld [vmem:[#allocation6 + $0x210] sm:$0xff]  ;;  %v9884_v39 = vld [vmem:[#allocation6 + $0x228] sm:$0xff]  ;;  %v9886_v51 = vld [vmem:[#allocation6 + $0x238] sm:$0xff] }
 0x7b4   :  { %v9883_v37 = vld [vmem:[#allocation6 + $0x220] sm:$0xff]  ;;  %v9885_v10 = vld [vmem:[#allocation6 + $0x230] sm:$0xff]  ;;  %v9888_v41 = vld [vmem:[#allocation6 + $0x248] sm:$0xff] }
 0x7b5   :  { %v9890_v30 = vld [vmem:[#allocation6 + $0x258] sm:$0xff]  ;;  %v9887_v63 = vld [vmem:[#allocation6 + $0x240] sm:$0xff]  ;;  %v9889_v59 = vld [vmem:[#allocation6 + $0x250] sm:$0xff] }
 0x7b6   :  { %10106 = vmatpush1.bf16.msra.mxu0 %v9839_v61  ;;  %10270 = vmatpush1.bf16.msra.mxu1 %v9841_v28  ;;  %v9892_v22 = vld [vmem:[#allocation6 + $0x268] sm:$0xff]  ;;  %v9894_v6 = vld [vmem:[#allocation6 + $0x278] sm:$0xff]  ;;  %v9891_v9 = vld [vmem:[#allocation6 + $0x260] sm:$0xff] }
 0x7b7   :  { %10107 = vmatprep.subr.bf16.mxu0 %v9844_v54  ;;  %10271 = vmatprep.subr.bf16.mxu1 %v9846_v25  ;;  %v9893_v61 = vld [vmem:[#allocation6 + $0x270] sm:$0xff]  ;;  %v9896_v28 = vld [vmem:[#allocation6 + $0x288] sm:$0xff]  ;;  %v9898_v54 = vld [vmem:[#allocation6 + $0x298] sm:$0xff] }
 0x7b8   :  { %v9895_v25 = vld [vmem:[#allocation6 + $0x280] sm:$0xff]  ;;  %v9897_v43 = vld [vmem:[#allocation6 + $0x290] sm:$0xff]  ;;  %v9900_v48 = vld [vmem:[#allocation6 + $0x2a8] sm:$0xff] }
 0x7b9   :  { %v9930_v7 = vld [vmem:[#allocation6 + $0x398] sm:$0xff] }
 0x7ba   :  { %10108 = vmatpush1.bf16.msra.mxu0 %v9843_v62  ;;  %10272 = vmatpush1.bf16.msra.mxu1 %v9845_v2  ;;  %v9902_v62 = vld [vmem:[#allocation6 + $0x2b8] sm:$0xff]  ;;  %v9899_v2 = vld [vmem:[#allocation6 + $0x2a0] sm:$0xff] }
 0x7bb   :  { %10109 = vmatprep.subr.bf16.mxu0 %v9848_v24  ;;  %10273 = vmatprep.subr.bf16.mxu1 %v9850_v21  ;;  %v9901_v24 = vld [vmem:[#allocation6 + $0x2b0] sm:$0xff]  ;;  %v9904_v21 = vld [vmem:[#allocation6 + $0x2c8] sm:$0xff]  ;;  %v17867_v12 = vld [vmem:[#allocation5 + $0x8] sm:$0xff] }
 0x7be   :  { %10110 = vmatpush1.bf16.msra.mxu0 %v9847_v3  ;;  %10274 = vmatpush1.bf16.msra.mxu1 %v9849_v32  ;;  %v9906_v3 = vld [vmem:[#allocation6 + $0x2d8] sm:$0xff]  ;;  %v9903_v32 = vld [vmem:[#allocation6 + $0x2c0] sm:$0xff] }
 0x7bf   :  { %10111 = vmatprep.subr.bf16.mxu0 %v9852_v31  ;;  %10275 = vmatprep.subr.bf16.mxu1 %v9854_v16  ;;  %v9905_v31 = vld [vmem:[#allocation6 + $0x2d0] sm:$0xff]  ;;  %v9908_v16 = vld [vmem:[#allocation6 + $0x2e8] sm:$0xff] }
 0x7c2   :  { %10112 = vmatpush1.bf16.msra.mxu0 %v9851_v29  ;;  %10276 = vmatpush1.bf16.msra.mxu1 %v9853_v27  ;;  %v9910_v29 = vld [vmem:[#allocation6 + $0x2f8] sm:$0xff]  ;;  %v9907_v27 = vld [vmem:[#allocation6 + $0x2e0] sm:$0xff] }
 0x7c3   :  { %10113 = vmatprep.subr.bf16.mxu0 %v9856_v11  ;;  %10277 = vmatprep.subr.bf16.mxu1 %v9858_v46  ;;  %v9909_v11 = vld [vmem:[#allocation6 + $0x2f0] sm:$0xff]  ;;  %v9912_v46 = vld [vmem:[#allocation6 + $0x308] sm:$0xff] }
 0x7c6   :  { %10114 = vmatpush1.bf16.msra.mxu0 %v9855_v53  ;;  %10278 = vmatpush1.bf16.msra.mxu1 %v9857_v40  ;;  %v9914_v53 = vld [vmem:[#allocation6 + $0x318] sm:$0xff]  ;;  %v9911_v40 = vld [vmem:[#allocation6 + $0x300] sm:$0xff] }
 0x7c7   :  { %10115 = vmatprep.subr.bf16.mxu0 %v9860_v42  ;;  %10279 = vmatprep.subr.bf16.mxu1 %v9862_v17  ;;  %v9913_v42 = vld [vmem:[#allocation6 + $0x310] sm:$0xff]  ;;  %v9916_v17 = vld [vmem:[#allocation6 + $0x328] sm:$0xff] }
 0x7ca   :  { %10116 = vmatpush1.bf16.msra.mxu0 %v9859_v45  ;;  %10280 = vmatpush1.bf16.msra.mxu1 %v9861_v47  ;;  %v9918_v45 = vld [vmem:[#allocation6 + $0x338] sm:$0xff]  ;;  %v9915_v47 = vld [vmem:[#allocation6 + $0x320] sm:$0xff] }
 0x7cb   :  { %10117 = vmatprep.subr.bf16.mxu0 %v9864_v5  ;;  %10281 = vmatprep.subr.bf16.mxu1 %v9866_v20  ;;  %v9917_v5 = vld [vmem:[#allocation6 + $0x330] sm:$0xff]  ;;  %v9920_v20 = vld [vmem:[#allocation6 + $0x348] sm:$0xff] }
 0x7ce   :  { %10118 = vmatpush1.bf16.msra.mxu0 %v9863_v33  ;;  %10282 = vmatpush1.bf16.msra.mxu1 %v9865_v55  ;;  %v9922_v33 = vld [vmem:[#allocation6 + $0x358] sm:$0xff]  ;;  %v9919_v55 = vld [vmem:[#allocation6 + $0x340] sm:$0xff] }
 0x7cf   :  { %10119 = vmatprep.subr.bf16.mxu0 %v9868_v36  ;;  %10283 = vmatprep.subr.bf16.mxu1 %v9870_v13  ;;  %v9921_v36 = vld [vmem:[#allocation6 + $0x350] sm:$0xff]  ;;  %v9924_v13 = vld [vmem:[#allocation6 + $0x368] sm:$0xff] }
 0x7d2   :  { %10120 = vmatpush1.bf16.msra.mxu0 %v9867_v4  ;;  %10284 = vmatpush1.bf16.msra.mxu1 %v9869_v58  ;;  %v9926_v4 = vld [vmem:[#allocation6 + $0x378] sm:$0xff]  ;;  %v9923_v58 = vld [vmem:[#allocation6 + $0x360] sm:$0xff] }
 0x7d3   :  { %10121 = vmatprep.subr.bf16.mxu0 %v9872_v23  ;;  %10285 = vmatprep.subr.bf16.mxu1 %v9874_v49  ;;  %v9925_v23 = vld [vmem:[#allocation6 + $0x370] sm:$0xff]  ;;  %v9928_v49 = vld [vmem:[#allocation6 + $0x388] sm:$0xff] }
 0x7d6   :  { %10122 = vmatpush1.bf16.msra.mxu0 %v9871_v52  ;;  %10286 = vmatpush1.bf16.msra.mxu1 %v9873_v34  ;;  %v9927_v52 = vld [vmem:[#allocation6 + $0x380] sm:$0xff]  ;;  %v9929_v34 = vld [vmem:[#allocation6 + $0x390] sm:$0xff] }
 0x7d7   :  { %10123 = vmatprep.subr.bf16.mxu0 %v9876_v60  ;;  %10287 = vmatprep.subr.bf16.mxu1 %v9878_v57  ;;  %v9932_v60 = vld [vmem:[#allocation6 + $0x3a8] sm:$0xff]  ;;  %v9934_v57 = vld [vmem:[#allocation6 + $0x3b8] sm:$0xff] }
 0x7da   :  { %10124 = vmatpush1.bf16.msra.mxu0 %v9875_v35  ;;  %10288 = vmatpush1.bf16.msra.mxu1 %v9877_v18  ;;  %v9931_v35 = vld [vmem:[#allocation6 + $0x3a0] sm:$0xff]  ;;  %v9933_v18 = vld [vmem:[#allocation6 + $0x3b0] sm:$0xff] }
 0x7db   :  { %10134 = vmatprep.subr.bf16.mxu0 %v9880_v8  ;;  %10298 = vmatprep.subr.bf16.mxu1 %v9882_v19  ;;  %v9936_v8 = vld [vmem:[#allocation6 + $0x3c8] sm:$0xff]  ;;  %v9938_v19 = vld [vmem:[#allocation6 + $0x3d8] sm:$0xff] }
 0x7dd   :  { %10126 = vmatmul.mubr.bf16.vlgmr.msra.gmra.mrb[144].mxu0 %v9807_v26  ;;  %10290 = vmatmul.mubr.bf16.vlgmr.msra.gmra.mrb[24].mxu1 %v9807_v26  ;;  %v9935_v26 = vld [vmem:[#allocation6 + $0x3c0] sm:$0xff] }
 0x7de   :  { %10135 = vmatpush1.bf16.msra.mxu0 %v9879_v14  ;;  %10299 = vmatpush1.bf16.msra.mxu1 %v9881_v38  ;;  %v9937_v14 = vld [vmem:[#allocation6 + $0x3d0] sm:$0xff]  ;;  %v9940_v38 = vld [vmem:[#allocation6 + $0x3e8] sm:$0xff] }
 0x7df   :  { %10136 = vmatprep.subr.bf16.mxu0 %v9884_v39  ;;  %10300 = vmatprep.subr.bf16.mxu1 %v9886_v51  ;;  %v9942_v39 = vld [vmem:[#allocation6 + $0x3f8] sm:$0xff]  ;;  %v17871_v51 = vrot.slane %v17867_v12, %v17848_v50 }
 0x7e0   :  { %10166 = vmatprep.mubr.bf16.mxu0 %v9810_v56  ;;  %10330 = vmatprep.mubr.bf16.mxu1 %v9810_v56  ;;  %v9939_v56 = vld [vmem:[#allocation6 + $0x3e0] sm:$0xff] }
 0x7e2   :  { %10137 = vmatpush1.bf16.msra.mxu0 %v9883_v37  ;;  %10301 = vmatpush1.bf16.msra.mxu1 %v9885_v10  ;;  %v9941_v37 = vld [vmem:[#allocation6 + $0x3f0] sm:$0xff]  ;;  %v9944_v10 = vld [vmem:[#allocation6 + $0x408] sm:$0xff] }
 0x7e3   :  { %10138 = vmatprep.subr.bf16.mxu0 %v9888_v41  ;;  %10302 = vmatprep.subr.bf16.mxu1 %v9890_v30  ;;  %v9946_v41 = vld [vmem:[#allocation6 + $0x418] sm:$0xff]  ;;  %v9797_v30 = vcombine.high %v17871_v51, %v17871_v51 }
 0x7e6   :  { %10139 = vmatpush1.bf16.msra.mxu0 %v9887_v63  ;;  %10303 = vmatpush1.bf16.msra.mxu1 %v9889_v59  ;;  %v9809_v63 = vpack.c.bf16 %v17861_v1, %v17861_v1  ;;  %v9943_v59 = vld [vmem:[#allocation6 + $0x400] sm:$0xff] }
 0x7e7   :  { %10140 = vmatprep.subr.bf16.mxu0 %v9892_v22  ;;  %10304 = vmatprep.subr.bf16.mxu1 %v9894_v6  ;;  %v9945_v22 = vld [vmem:[#allocation6 + $0x410] sm:$0xff]  ;;  %v9948_v6 = vld [vmem:[#allocation6 + $0x428] sm:$0xff]  ;;  %v9951_v1 = vld [vmem:[#allocation6 + $0x440] sm:$0xff] }
 0x7ea   :  { %10141 = vmatpush1.bf16.msra.mxu0 %v9891_v9  ;;  %10305 = vmatpush1.bf16.msra.mxu1 %v9893_v61  ;;  %v9950_v9 = vld [vmem:[#allocation6 + $0x438] sm:$0xff]  ;;  %v9812_v61 = vpack.c.bf16 %v9797_v30, %v9797_v30 }
 0x7eb   :  { %10142 = vmatprep.subr.bf16.mxu0 %v9896_v28  ;;  %10306 = vmatprep.subr.bf16.mxu1 %v9898_v54  ;;  %v9947_v28 = vld [vmem:[#allocation6 + $0x420] sm:$0xff]  ;;  %v9949_v54 = vld [vmem:[#allocation6 + $0x430] sm:$0xff]  ;;  %v10002_v30 = vld [vmem:[#allocation6 + $0x5d8] sm:$0xff] }
 0x7ee   :  { %10143 = vmatpush1.bf16.msra.mxu0 %v9895_v25  ;;  %10307 = vmatpush1.bf16.msra.mxu1 %v9897_v43  ;;  %v9952_v25 = vld [vmem:[#allocation6 + $0x448] sm:$0xff]  ;;  %v9954_v43 = vld [vmem:[#allocation6 + $0x458] sm:$0xff] }
 0x7ef   :  { %10144 = vmatprep.subr.bf16.mxu0 %v9900_v48  ;;  %10308 = vmatprep.subr.bf16.mxu1 %v9902_v62  ;;  %v9953_v48 = vld [vmem:[#allocation6 + $0x450] sm:$0xff]  ;;  %v9956_v62 = vld [vmem:[#allocation6 + $0x468] sm:$0xff] }
 0x7f2   :  { %10145 = vmatpush1.bf16.msra.mxu0 %v9899_v2  ;;  %10309 = vmatpush1.bf16.msra.mxu1 %v9901_v24  ;;  %v9958_v2 = vld [vmem:[#allocation6 + $0x478] sm:$0xff]  ;;  %v9955_v24 = vld [vmem:[#allocation6 + $0x460] sm:$0xff] }
 0x7f3   :  { %10146 = vmatprep.subr.bf16.mxu0 %v9904_v21  ;;  %10310 = vmatprep.subr.bf16.mxu1 %v9906_v3  ;;  %v9957_v21 = vld [vmem:[#allocation6 + $0x470] sm:$0xff]  ;;  %v9960_v3 = vld [vmem:[#allocation6 + $0x488] sm:$0xff] }
 0x7f6   :  { %10147 = vmatpush1.bf16.msra.mxu0 %v9903_v32  ;;  %10311 = vmatpush1.bf16.msra.mxu1 %v9905_v31  ;;  %v9962_v32 = vld [vmem:[#allocation6 + $0x498] sm:$0xff]  ;;  %v9959_v31 = vld [vmem:[#allocation6 + $0x480] sm:$0xff] }
 0x7f7   :  { %10148 = vmatprep.subr.bf16.mxu0 %v9908_v16  ;;  %10312 = vmatprep.subr.bf16.mxu1 %v9910_v29  ;;  %v9961_v16 = vld [vmem:[#allocation6 + $0x490] sm:$0xff]  ;;  %v9964_v29 = vld [vmem:[#allocation6 + $0x4a8] sm:$0xff] }
 0x7fa   :  { %10149 = vmatpush1.bf16.msra.mxu0 %v9907_v27  ;;  %10313 = vmatpush1.bf16.msra.mxu1 %v9909_v11  ;;  %v9966_v27 = vld [vmem:[#allocation6 + $0x4b8] sm:$0xff]  ;;  %v9963_v11 = vld [vmem:[#allocation6 + $0x4a0] sm:$0xff] }
 0x7fb   :  { %10150 = vmatprep.subr.bf16.mxu0 %v9912_v46  ;;  %10314 = vmatprep.subr.bf16.mxu1 %v9914_v53  ;;  %v9965_v46 = vld [vmem:[#allocation6 + $0x4b0] sm:$0xff]  ;;  %v9968_v53 = vld [vmem:[#allocation6 + $0x4c8] sm:$0xff] }
 0x7fe   :  { %10151 = vmatpush1.bf16.msra.mxu0 %v9911_v40  ;;  %10315 = vmatpush1.bf16.msra.mxu1 %v9913_v42  ;;  %v9970_v40 = vld [vmem:[#allocation6 + $0x4d8] sm:$0xff]  ;;  %v9967_v42 = vld [vmem:[#allocation6 + $0x4c0] sm:$0xff] }
 0x7ff   :  { %10152 = vmatprep.subr.bf16.mxu0 %v9916_v17  ;;  %10316 = vmatprep.subr.bf16.mxu1 %v9918_v45  ;;  %v9969_v17 = vld [vmem:[#allocation6 + $0x4d0] sm:$0xff]  ;;  %v9972_v45 = vld [vmem:[#allocation6 + $0x4e8] sm:$0xff] }
 0x802   :  { %10153 = vmatpush1.bf16.msra.mxu0 %v9915_v47  ;;  %10317 = vmatpush1.bf16.msra.mxu1 %v9917_v5  ;;  %v9974_v47 = vld [vmem:[#allocation6 + $0x4f8] sm:$0xff]  ;;  %v9971_v5 = vld [vmem:[#allocation6 + $0x4e0] sm:$0xff] }
 0x803   :  { %10154 = vmatprep.subr.bf16.mxu0 %v9920_v20  ;;  %10318 = vmatprep.subr.bf16.mxu1 %v9922_v33  ;;  %v9973_v20 = vld [vmem:[#allocation6 + $0x4f0] sm:$0xff]  ;;  %v9976_v33 = vld [vmem:[#allocation6 + $0x508] sm:$0xff] }
 0x806   :  { %10155 = vmatpush1.bf16.msra.mxu0 %v9919_v55  ;;  %10319 = vmatpush1.bf16.msra.mxu1 %v9921_v36  ;;  %v9978_v55 = vld [vmem:[#allocation6 + $0x518] sm:$0xff]  ;;  %v9975_v36 = vld [vmem:[#allocation6 + $0x500] sm:$0xff] }
 0x807   :  { %10156 = vmatprep.subr.bf16.mxu0 %v9924_v13  ;;  %10320 = vmatprep.subr.bf16.mxu1 %v9926_v4  ;;  %v9977_v13 = vld [vmem:[#allocation6 + $0x510] sm:$0xff]  ;;  %v9980_v4 = vld [vmem:[#allocation6 + $0x528] sm:$0xff] }
 0x80a   :  { %10157 = vmatpush1.bf16.msra.mxu0 %v9923_v58  ;;  %10321 = vmatpush1.bf16.msra.mxu1 %v9925_v23  ;;  %v9982_v58 = vld [vmem:[#allocation6 + $0x538] sm:$0xff]  ;;  %v9979_v23 = vld [vmem:[#allocation6 + $0x520] sm:$0xff] }
 0x80b   :  { %10158 = vmatprep.subr.bf16.mxu0 %v9928_v49  ;;  %10322 = vmatprep.subr.bf16.mxu1 %v9930_v7  ;;  %v9981_v49 = vld [vmem:[#allocation6 + $0x530] sm:$0xff]  ;;  %v9984_v7 = vld [vmem:[#allocation6 + $0x548] sm:$0xff] }
 0x80e   :  { %10159 = vmatpush1.bf16.msra.mxu0 %v9927_v52  ;;  %10323 = vmatpush1.bf16.msra.mxu1 %v9929_v34  ;;  %v9986_v52 = vld [vmem:[#allocation6 + $0x558] sm:$0xff]  ;;  %v9983_v34 = vld [vmem:[#allocation6 + $0x540] sm:$0xff] }
 0x80f   :  { %10160 = vmatprep.subr.bf16.mxu0 %v9932_v60  ;;  %10324 = vmatprep.subr.bf16.mxu1 %v9934_v57  ;;  %v9985_v60 = vld [vmem:[#allocation6 + $0x550] sm:$0xff]  ;;  %v9988_v57 = vld [vmem:[#allocation6 + $0x568] sm:$0xff] }
 0x812   :  { %10161 = vmatpush1.bf16.msra.mxu0 %v9931_v35  ;;  %10325 = vmatpush1.bf16.msra.mxu1 %v9933_v18  ;;  %v9990_v35 = vld [vmem:[#allocation6 + $0x578] sm:$0xff]  ;;  %v9987_v18 = vld [vmem:[#allocation6 + $0x560] sm:$0xff] }
 0x813   :  { %10162 = vmatprep.subr.bf16.mxu0 %v9936_v8  ;;  %10326 = vmatprep.subr.bf16.mxu1 %v9938_v19  ;;  %v9989_v8 = vld [vmem:[#allocation6 + $0x570] sm:$0xff]  ;;  %v9992_v19 = vld [vmem:[#allocation6 + $0x588] sm:$0xff] }
 0x816   :  { %10163 = vmatpush1.bf16.msra.mxu0 %v9935_v26  ;;  %10327 = vmatpush1.bf16.msra.mxu1 %v9937_v14  ;;  %v9994_v26 = vld [vmem:[#allocation6 + $0x598] sm:$0xff]  ;;  %v9991_v14 = vld [vmem:[#allocation6 + $0x580] sm:$0xff] }
 0x817   :  { %10164 = vmatprep.subr.bf16.mxu0 %v9940_v38  ;;  %10328 = vmatprep.subr.bf16.mxu1 %v9942_v39  ;;  %v9993_v38 = vld [vmem:[#allocation6 + $0x590] sm:$0xff]  ;;  %v9996_v39 = vld [vmem:[#allocation6 + $0x5a8] sm:$0xff] }
 0x81a   :  { %10165 = vmatpush1.bf16.msra.mxu0 %v9939_v56  ;;  %10329 = vmatpush1.bf16.msra.mxu1 %v9941_v37  ;;  %v9998_v56 = vld [vmem:[#allocation6 + $0x5b8] sm:$0xff]  ;;  %v9995_v37 = vld [vmem:[#allocation6 + $0x5a0] sm:$0xff] }
 0x81b   :  { %10175 = vmatprep.subr.bf16.mxu0 %v9944_v10  ;;  %10339 = vmatprep.subr.bf16.mxu1 %v9946_v41  ;;  %v9997_v10 = vld [vmem:[#allocation6 + $0x5b0] sm:$0xff]  ;;  %v10000_v41 = vld [vmem:[#allocation6 + $0x5c8] sm:$0xff] }
 0x81d   :  { %10167 = vmatmul.mubr.bf16.vlgmr.msra.gmra.mrb[144].mxu0 %v9809_v63  ;;  %10331 = vmatmul.mubr.bf16.vlgmr.msra.gmra.mrb[24].mxu1 %v9809_v63  ;;  %v9782_v63 = vcombine.high %v17867_v12, %v17867_v12 }
 0x81e   :  { %10176 = vmatpush1.bf16.msra.mxu0 %v9943_v59  ;;  %10340 = vmatpush1.bf16.msra.mxu1 %v9945_v22  ;;  %v9999_v59 = vld [vmem:[#allocation6 + $0x5c0] sm:$0xff]  ;;  %v10001_v22 = vld [vmem:[#allocation6 + $0x5d0] sm:$0xff] }
 0x81f   :  { %10177 = vmatprep.subr.bf16.mxu0 %v9948_v6  ;;  %10341 = vmatprep.subr.bf16.mxu1 %v9950_v9  ;;  %v10004_v6 = vld [vmem:[#allocation6 + $0x5e8] sm:$0xff]  ;;  %v10006_v9 = vld [vmem:[#allocation6 + $0x5f8] sm:$0xff] }
 0x820   :  { %10207 = vmatprep.mubr.bf16.mxu0 %v9812_v61  ;;  %10371 = vmatprep.mubr.bf16.mxu1 %v9812_v61  ;;  %v17880_v61 = vrot.slane %v9782_v63, %v17848_v50  ;;  %v10007_v50 = vld [vmem:[#allocation6 + $0x600] sm:$0xff] }
 0x821   :  { %v10055_v63 = vld [vmem:[#allocation6 + $0x780] sm:$0xff] }
 0x822   :  { %10178 = vmatpush1.bf16.msra.mxu0 %v9947_v28  ;;  %10342 = vmatpush1.bf16.msra.mxu1 %v9949_v54  ;;  %v10003_v28 = vld [vmem:[#allocation6 + $0x5e0] sm:$0xff]  ;;  %v10005_v54 = vld [vmem:[#allocation6 + $0x5f0] sm:$0xff]  ;;  %v9798_v12 = vcombine.high %v17880_v61, %v17880_v61 }
 0x823   :  { %10179 = vmatprep.subr.bf16.mxu0 %v9952_v25  ;;  %10343 = vmatprep.subr.bf16.mxu1 %v9954_v43  ;;  %v10008_v25 = vld [vmem:[#allocation6 + $0x608] sm:$0xff]  ;;  %v10010_v43 = vld [vmem:[#allocation6 + $0x618] sm:$0xff] }
 0x826   :  { %10180 = vmatpush1.bf16.msra.mxu0 %v9951_v1  ;;  %10344 = vmatpush1.bf16.msra.mxu1 %v9953_v48  ;;  %v9811_v1 = vpack.c.bf16 %v17871_v51, %v17871_v51  ;;  %v10009_v48 = vld [vmem:[#allocation6 + $0x610] sm:$0xff]  ;;  %v10015_v51 = vld [vmem:[#allocation6 + $0x640] sm:$0xff] }
 0x827   :  { %10181 = vmatprep.subr.bf16.mxu0 %v9956_v62  ;;  %10345 = vmatprep.subr.bf16.mxu1 %v9958_v2  ;;  %v10012_v62 = vld [vmem:[#allocation6 + $0x628] sm:$0xff]  ;;  %v10014_v2 = vld [vmem:[#allocation6 + $0x638] sm:$0xff] }
 0x82a   :  { %10182 = vmatpush1.bf16.msra.mxu0 %v9955_v24  ;;  %10346 = vmatpush1.bf16.msra.mxu1 %v9957_v21  ;;  %v9814_v24 = vpack.c.bf16 %v9798_v12, %v9798_v12  ;;  %v10011_v21 = vld [vmem:[#allocation6 + $0x620] sm:$0xff]  ;;  %v10065_v12 = vld [vmem:[#allocation6 + $0x7d0] sm:$0xff] }
 0x82b   :  { %10183 = vmatprep.subr.bf16.mxu0 %v9960_v3  ;;  %10347 = vmatprep.subr.bf16.mxu1 %v9962_v32  ;;  %v10013_v3 = vld [vmem:[#allocation6 + $0x630] sm:$0xff]  ;;  %v10016_v32 = vld [vmem:[#allocation6 + $0x648] sm:$0xff] }
 0x82e   :  { %10184 = vmatpush1.bf16.msra.mxu0 %v9959_v31  ;;  %10348 = vmatpush1.bf16.msra.mxu1 %v9961_v16  ;;  %v10018_v31 = vld [vmem:[#allocation6 + $0x658] sm:$0xff]  ;;  %v10017_v16 = vld [vmem:[#allocation6 + $0x650] sm:$0xff] }
 0x82f   :  { %10185 = vmatprep.subr.bf16.mxu0 %v9964_v29  ;;  %10349 = vmatprep.subr.bf16.mxu1 %v9966_v27  ;;  %v10020_v29 = vld [vmem:[#allocation6 + $0x668] sm:$0xff]  ;;  %v10022_v27 = vld [vmem:[#allocation6 + $0x678] sm:$0xff] }
 0x832   :  { %10186 = vmatpush1.bf16.msra.mxu0 %v9963_v11  ;;  %10350 = vmatpush1.bf16.msra.mxu1 %v9965_v46  ;;  %v10019_v11 = vld [vmem:[#allocation6 + $0x660] sm:$0xff]  ;;  %v10021_v46 = vld [vmem:[#allocation6 + $0x670] sm:$0xff] }
 0x833   :  { %10187 = vmatprep.subr.bf16.mxu0 %v9968_v53  ;;  %10351 = vmatprep.subr.bf16.mxu1 %v9970_v40  ;;  %v10024_v53 = vld [vmem:[#allocation6 + $0x688] sm:$0xff]  ;;  %v10026_v40 = vld [vmem:[#allocation6 + $0x698] sm:$0xff] }
 0x836   :  { %10188 = vmatpush1.bf16.msra.mxu0 %v9967_v42  ;;  %10352 = vmatpush1.bf16.msra.mxu1 %v9969_v17  ;;  %v10023_v42 = vld [vmem:[#allocation6 + $0x680] sm:$0xff]  ;;  %v10025_v17 = vld [vmem:[#allocation6 + $0x690] sm:$0xff] }
 0x837   :  { %10189 = vmatprep.subr.bf16.mxu0 %v9972_v45  ;;  %10353 = vmatprep.subr.bf16.mxu1 %v9974_v47  ;;  %v10028_v45 = vld [vmem:[#allocation6 + $0x6a8] sm:$0xff]  ;;  %v10030_v47 = vld [vmem:[#allocation6 + $0x6b8] sm:$0xff] }
 0x83a   :  { %10190 = vmatpush1.bf16.msra.mxu0 %v9971_v5  ;;  %10354 = vmatpush1.bf16.msra.mxu1 %v9973_v20  ;;  %v10027_v5 = vld [vmem:[#allocation6 + $0x6a0] sm:$0xff]  ;;  %v10029_v20 = vld [vmem:[#allocation6 + $0x6b0] sm:$0xff] }
 0x83b   :  { %10191 = vmatprep.subr.bf16.mxu0 %v9976_v33  ;;  %10355 = vmatprep.subr.bf16.mxu1 %v9978_v55  ;;  %v10032_v33 = vld [vmem:[#allocation6 + $0x6c8] sm:$0xff]  ;;  %v10034_v55 = vld [vmem:[#allocation6 + $0x6d8] sm:$0xff] }
 0x83e   :  { %10192 = vmatpush1.bf16.msra.mxu0 %v9975_v36  ;;  %10356 = vmatpush1.bf16.msra.mxu1 %v9977_v13  ;;  %v10031_v36 = vld [vmem:[#allocation6 + $0x6c0] sm:$0xff]  ;;  %v10033_v13 = vld [vmem:[#allocation6 + $0x6d0] sm:$0xff] }
 0x83f   :  { %10193 = vmatprep.subr.bf16.mxu0 %v9980_v4  ;;  %10357 = vmatprep.subr.bf16.mxu1 %v9982_v58  ;;  %v10036_v4 = vld [vmem:[#allocation6 + $0x6e8] sm:$0xff]  ;;  %v10038_v58 = vld [vmem:[#allocation6 + $0x6f8] sm:$0xff] }
 0x842   :  { %10194 = vmatpush1.bf16.msra.mxu0 %v9979_v23  ;;  %10358 = vmatpush1.bf16.msra.mxu1 %v9981_v49  ;;  %v10035_v23 = vld [vmem:[#allocation6 + $0x6e0] sm:$0xff]  ;;  %v10037_v49 = vld [vmem:[#allocation6 + $0x6f0] sm:$0xff] }
 0x843   :  { %10195 = vmatprep.subr.bf16.mxu0 %v9984_v7  ;;  %10359 = vmatprep.subr.bf16.mxu1 %v9986_v52  ;;  %v10040_v7 = vld [vmem:[#allocation6 + $0x708] sm:$0xff]  ;;  %v10042_v52 = vld [vmem:[#allocation6 + $0x718] sm:$0xff] }
 0x846   :  { %10196 = vmatpush1.bf16.msra.mxu0 %v9983_v34  ;;  %10360 = vmatpush1.bf16.msra.mxu1 %v9985_v60  ;;  %v10039_v34 = vld [vmem:[#allocation6 + $0x700] sm:$0xff]  ;;  %v10041_v60 = vld [vmem:[#allocation6 + $0x710] sm:$0xff] }
 0x847   :  { %10197 = vmatprep.subr.bf16.mxu0 %v9988_v57  ;;  %10361 = vmatprep.subr.bf16.mxu1 %v9990_v35  ;;  %v10044_v57 = vld [vmem:[#allocation6 + $0x728] sm:$0xff]  ;;  %v10046_v35 = vld [vmem:[#allocation6 + $0x738] sm:$0xff] }
 0x84a   :  { %10198 = vmatpush1.bf16.msra.mxu0 %v9987_v18  ;;  %10362 = vmatpush1.bf16.msra.mxu1 %v9989_v8  ;;  %v10043_v18 = vld [vmem:[#allocation6 + $0x720] sm:$0xff]  ;;  %v10045_v8 = vld [vmem:[#allocation6 + $0x730] sm:$0xff] }
 0x84b   :  { %10199 = vmatprep.subr.bf16.mxu0 %v9992_v19  ;;  %10363 = vmatprep.subr.bf16.mxu1 %v9994_v26  ;;  %v10048_v19 = vld [vmem:[#allocation6 + $0x748] sm:$0xff]  ;;  %v10050_v26 = vld [vmem:[#allocation6 + $0x758] sm:$0xff] }
 0x84e   :  { %10200 = vmatpush1.bf16.msra.mxu0 %v9991_v14  ;;  %10364 = vmatpush1.bf16.msra.mxu1 %v9993_v38  ;;  %v10047_v14 = vld [vmem:[#allocation6 + $0x740] sm:$0xff]  ;;  %v10049_v38 = vld [vmem:[#allocation6 + $0x750] sm:$0xff] }
 0x84f   :  { %10201 = vmatprep.subr.bf16.mxu0 %v9996_v39  ;;  %10365 = vmatprep.subr.bf16.mxu1 %v9998_v56  ;;  %v10052_v39 = vld [vmem:[#allocation6 + $0x768] sm:$0xff]  ;;  %v10054_v56 = vld [vmem:[#allocation6 + $0x778] sm:$0xff] }
 0x852   :  { %10202 = vmatpush1.bf16.msra.mxu0 %v9995_v37  ;;  %10366 = vmatpush1.bf16.msra.mxu1 %v9997_v10  ;;  %v10051_v37 = vld [vmem:[#allocation6 + $0x760] sm:$0xff]  ;;  %v10053_v10 = vld [vmem:[#allocation6 + $0x770] sm:$0xff] }
 0x853   :  { %10203 = vmatprep.subr.bf16.mxu0 %v10000_v41  ;;  %10367 = vmatprep.subr.bf16.mxu1 %v10002_v30  ;;  %v10056_v41 = vld [vmem:[#allocation6 + $0x788] sm:$0xff]  ;;  %v10058_v30 = vld [vmem:[#allocation6 + $0x798] sm:$0xff] }
 0x856   :  { %10204 = vmatpush1.bf16.msra.mxu0 %v9999_v59  ;;  %10368 = vmatpush1.bf16.msra.mxu1 %v10001_v22  ;;  %v10057_v59 = vld [vmem:[#allocation6 + $0x790] sm:$0xff]  ;;  %v10060_v22 = vld [vmem:[#allocation6 + $0x7a8] sm:$0xff] }
 0x857   :  { %10205 = vmatprep.subr.bf16.mxu0 %v10004_v6  ;;  %10369 = vmatprep.subr.bf16.mxu1 %v10006_v9  ;;  %v10062_v6 = vld [vmem:[#allocation6 + $0x7b8] sm:$0xff]  ;;  %v10059_v9 = vld [vmem:[#allocation6 + $0x7a0] sm:$0xff] }
 0x85a   :  { %10206 = vmatpush1.bf16.msra.mxu0 %v10003_v28  ;;  %10370 = vmatpush1.bf16.msra.mxu1 %v10005_v54  ;;  %v10061_v28 = vld [vmem:[#allocation6 + $0x7b0] sm:$0xff]  ;;  %v10064_v54 = vld [vmem:[#allocation6 + $0x7c8] sm:$0xff] }
 0x85b   :  { %10216 = vmatprep.subr.bf16.mxu0 %v10008_v25  ;;  %10380 = vmatprep.subr.bf16.mxu1 %v10010_v43  ;;  %v10066_v25 = vld [vmem:[#allocation6 + $0x7d8] sm:$0xff]  ;;  %v10063_v43 = vld [vmem:[#allocation6 + $0x7c0] sm:$0xff] }
 0x85d   :  { %10208 = vmatmul.mubr.bf16.vlgmr.msra.gmra.mrb[144].mxu0 %v9811_v1  ;;  %10372 = vmatmul.mubr.bf16.vlgmr.msra.gmra.mrb[24].mxu1 %v9811_v1  ;;  %v10068_v1 = vld [vmem:[#allocation6 + $0x7e8] sm:$0xff] }
 0x85e   :  { %10217 = vmatpush1.bf16.msra.mxu0 %v10007_v50  ;;  %10381 = vmatpush1.bf16.msra.mxu1 %v10009_v48  ;;  %v10070_v50 = vld [vmem:[#allocation6 + $0x7f8] sm:$0xff]  ;;  %v10067_v48 = vld [vmem:[#allocation6 + $0x7e0] sm:$0xff] }
 0x85f   :  { %10218 = vmatprep.subr.bf16.mxu0 %v10012_v62  ;;  %10382 = vmatprep.subr.bf16.mxu1 %v10014_v2  ;;  %v10069_v62 = vld [vmem:[#allocation6 + $0x7f0] sm:$0xff] }
 0x860   :  { %10248 = vmatprep.mubr.bf16.mxu0 %v9814_v24  ;;  %10412 = vmatprep.mubr.bf16.mxu1 %v9814_v24  ;;  %v12396_v2 = vld [vmem:[%s18053_s11 + $0x40] sm:$0xff]   ;;  %v9813_v24 = vpack.c.bf16 %v17880_v61, %v17880_v61  ;;  %v12400_v61 = vld [vmem:[%s18053_s11 + $0x50] sm:$0xff]  }
 0x862   :  { %10219 = vmatpush1.bf16.msra.mxu0 %v10011_v21  ;;  %10383 = vmatpush1.bf16.msra.mxu1 %v10013_v3  ;;  %v12397_v21 = vld [vmem:[%s18053_s11] sm:$0xff]   ;;  %v12398_v3 = vld [vmem:[%s18053_s11 + $0x48] sm:$0xff]  }
 0x863   :  { %10220 = vmatprep.subr.bf16.mxu0 %v10016_v32  ;;  %10384 = vmatprep.subr.bf16.mxu1 %v10018_v31  ;;  %v12399_v32 = vld [vmem:[%s18053_s11 + $0x8] sm:$0xff]   ;;  %v12401_v31 = vld [vmem:[%s18053_s11 + $0x10] sm:$0xff]  }
 0x866   :  { %10221 = vmatpush1.bf16.msra.mxu0 %v10015_v51  ;;  %10385 = vmatpush1.bf16.msra.mxu1 %v10017_v16  ;;  %v12402_v51 = vld [vmem:[%s18053_s11 + $0x58] sm:$0xff]  }
 0x867   :  { %10222 = vmatprep.subr.bf16.mxu0 %v10020_v29  ;;  %10386 = vmatprep.subr.bf16.mxu1 %v10022_v27  ;;  %v12403_v16 = vld [vmem:[%s18053_s11 + $0x18] sm:$0xff]   ;;  %v12404_v29 = vld [vmem:[%s18053_s11 + $0x60] sm:$0xff]  }
 0x868   :  { %v12405_v27 = vld [vmem:[%s18053_s11 + $0x20] sm:$0xff]  }
 0x86a   :  { %10223 = vmatpush1.bf16.msra.mxu0 %v10019_v11  ;;  %10387 = vmatpush1.bf16.msra.mxu1 %v10021_v46  ;;  %v12406_v11 = vld [vmem:[%s18053_s11 + $0x68] sm:$0xff]  }
 0x86b   :  { %10224 = vmatprep.subr.bf16.mxu0 %v10024_v53  ;;  %10388 = vmatprep.subr.bf16.mxu1 %v10026_v40  ;;  %v12407_v46 = vld [vmem:[%s18053_s11 + $0x28] sm:$0xff]   ;;  %v12408_v53 = vld [vmem:[%s18053_s11 + $0x70] sm:$0xff]  }
 0x86c   :  { %v12409_v40 = vld [vmem:[%s18053_s11 + $0x30] sm:$0xff]  }
 0x86e   :  { %10225 = vmatpush1.bf16.msra.mxu0 %v10023_v42  ;;  %10389 = vmatpush1.bf16.msra.mxu1 %v10025_v17  ;;  %v12410_v42 = vld [vmem:[%s18053_s11 + $0x78] sm:$0xff]  }
 0x86f   :  { %10226 = vmatprep.subr.bf16.mxu0 %v10028_v45  ;;  %10390 = vmatprep.subr.bf16.mxu1 %v10030_v47  ;;  %v12411_v17 = vld [vmem:[%s18053_s11 + $0x38] sm:$0xff]   ;;  %v12412_v45 = vld [vmem:[%s18053_s11 + $0xc0] sm:$0xff]  }
 0x870   :  { %v10071_v47 = vld [vmem:[%s18052_s10] sm:$0xf] }
 0x872   :  { %10227 = vmatpush1.bf16.msra.mxu0 %v10027_v5  ;;  %10391 = vmatpush1.bf16.msra.mxu1 %v10029_v20  ;;  %v10079_v5 = vsub.s32 1, %v19052_v0  ;;  %v10087_v20 = vsub.s32 3, %v19052_v0 }
 0x873   :  { %10228 = vmatprep.subr.bf16.mxu0 %v10032_v33  ;;  %10392 = vmatprep.subr.bf16.mxu1 %v10034_v55  ;;  %v10076_v33 = vrot.slane %v10071_v47, %v19103_v44  ;;  %v12413_v44 = vld [vmem:[%s18053_s11 + $0x80] sm:$0xff]  }
 0x874   :  { %v10080_v55 = vrot.slane %v10071_v47, %v10079_v5 }
 0x876   :  { %10229 = vmatpush1.bf16.msra.mxu0 %v10031_v36  ;;  %10393 = vmatpush1.bf16.msra.mxu1 %v10033_v13  ;;  %v10088_v36 = vrot.slane %v10071_v47, %v10087_v20 }
 0x877   :  { %10230 = vmatprep.subr.bf16.mxu0 %v10036_v4  ;;  %10394 = vmatprep.subr.bf16.mxu1 %v10038_v58 }
 0x87a   :  { %10231 = vmatpush1.bf16.msra.mxu0 %v10035_v23  ;;  %10395 = vmatpush1.bf16.msra.mxu1 %v10037_v49 }
 0x87b   :  { %10232 = vmatprep.subr.bf16.mxu0 %v10040_v7  ;;  %10396 = vmatprep.subr.bf16.mxu1 %v10042_v52 }
 0x87e   :  { %10233 = vmatpush1.bf16.msra.mxu0 %v10039_v34  ;;  %10397 = vmatpush1.bf16.msra.mxu1 %v10041_v60 }
 0x87f   :  { %10234 = vmatprep.subr.bf16.mxu0 %v10044_v57  ;;  %10398 = vmatprep.subr.bf16.mxu1 %v10046_v35 }
 0x882   :  { %10235 = vmatpush1.bf16.msra.mxu0 %v10043_v18  ;;  %10399 = vmatpush1.bf16.msra.mxu1 %v10045_v8 }
 0x883   :  { %10236 = vmatprep.subr.bf16.mxu0 %v10048_v19  ;;  %10400 = vmatprep.subr.bf16.mxu1 %v10050_v26 }
 0x886   :  { %10237 = vmatpush1.bf16.msra.mxu0 %v10047_v14  ;;  %10401 = vmatpush1.bf16.msra.mxu1 %v10049_v38  ;;  %v12414_v38 = vld [vmem:[%s18053_s11 + $0xc8] sm:$0xff]  }
 0x887   :  { %10238 = vmatprep.subr.bf16.mxu0 %v10052_v39  ;;  %10402 = vmatprep.subr.bf16.mxu1 %v10054_v56  ;;  %v12415_v56 = vld [vmem:[%s18053_s11 + $0x88] sm:$0xff]  }
 0x88a   :  { %10239 = vmatpush1.bf16.msra.mxu0 %v10051_v37  ;;  %10403 = vmatpush1.bf16.msra.mxu1 %v10053_v10  ;;  %v12416_v37 = vld [vmem:[%s18053_s11 + $0xd0] sm:$0xff]  }
 0x88b   :  { %10240 = vmatprep.subr.bf16.mxu0 %v10056_v41  ;;  %10404 = vmatprep.subr.bf16.mxu1 %v10058_v30  ;;  %v12417_v10 = vld [vmem:[%s18053_s11 + $0x90] sm:$0xff]   ;;  %v12418_v41 = vld [vmem:[%s18053_s11 + $0xd8] sm:$0xff]  }
 0x88c   :  { %v12419_v30 = vld [vmem:[%s18053_s11 + $0x98] sm:$0xff]  }
 0x88e   :  { %10241 = vmatpush1.bf16.msra.mxu0 %v10055_v63  ;;  %10405 = vmatpush1.bf16.msra.mxu1 %v10057_v59  ;;  %v12420_v63 = vld [vmem:[%s18053_s11 + $0xe0] sm:$0xff]  }
 0x88f   :  { %10242 = vmatprep.subr.bf16.mxu0 %v10060_v22  ;;  %10406 = vmatprep.subr.bf16.mxu1 %v10062_v6  ;;  %v12421_v59 = vld [vmem:[%s18053_s11 + $0xa0] sm:$0xff]   ;;  %v10083_v22 = vsub.s32 2, %v19052_v0  ;;  %v12422_v6 = vld [vmem:[%s18053_s11 + $0xe8] sm:$0xff]   ;;  %v12425_v0 = vld [vmem:[%s18053_s11 + $0xb0] sm:$0xff]  }
 0x892   :  { %10243 = vmatpush1.bf16.msra.mxu0 %v10059_v9  ;;  %10407 = vmatpush1.bf16.msra.mxu1 %v10061_v28  ;;  %v12423_v9 = vld [vmem:[%s18053_s11 + $0xa8] sm:$0xff]   ;;  %v10084_v28 = vrot.slane %v10071_v47, %v10083_v22 }
 0x893   :  { %10244 = vmatprep.subr.bf16.mxu0 %v10064_v54  ;;  %10408 = vmatprep.subr.bf16.mxu1 %v10066_v25  ;;  %v12424_v54 = vld [vmem:[%s18053_s11 + $0xf0] sm:$0xff]  }
 0x896   :  { %10245 = vmatpush1.bf16.msra.mxu0 %v10063_v43  ;;  %10409 = vmatpush1.bf16.msra.mxu1 %v10065_v12  ;;  %v12426_v43 = vld [vmem:[%s18053_s11 + $0xf8] sm:$0xff]  }
 0x897   :  { %10246 = vmatprep.subr.bf16.mxu0 %v10068_v1  ;;  %10410 = vmatprep.subr.bf16.mxu1 %v10070_v50  ;;  %v12427_v12 = vld [vmem:[%s18053_s11 + $0xb8] sm:$0xff]  }
 0x89a   :  { %10247 = vmatpush1.bf16.msra.mxu0 %v10067_v48  ;;  %10411 = vmatpush1.bf16.msra.mxu1 %v10069_v62  ;;  %v12428_v48 = vld [vmem:[%s18055_s13] sm:$0xff]   ;;  %v12429_v62 = vld [vmem:[%s18055_s13 + $0x8] sm:$0xff]  }
 0x89b   :  { %11577 = vmatprep.subr.bf16.mxu0 %v12396_v2  ;;  %v12430_v2 = vld [vmem:[%s18055_s13 + $0x10] sm:$0xff]  }
 0x89d   :  { %10249 = vmatmul.mubr.bf16.vlgmr.msra.gmra.mrb[144].mxu0 %v9813_v24  ;;  %10413 = vmatmul.mubr.bf16.vlgmr.msra.gmra.mrb[24].mxu1 %v9813_v24  ;;  %v12431_v24 = vld [vmem:[%s18055_s13 + $0x18] sm:$0xff]  }
 0x89e   :  { %11578 = vmatpush3.bf16.msra.mxu0 %v12397_v21  ;;  %v12432_v21 = vld [vmem:[%s18055_s13 + $0x20] sm:$0xff]  }
 0x89f   :  { %11579 = vmatprep.subr.bf16.mxu0 %v12398_v3  ;;  %v12433_v3 = vld [vmem:[%s18055_s13 + $0x28] sm:$0xff]  }
 0x8a2   :  { %11580 = vmatpush3.bf16.msra.mxu0 %v12399_v32  ;;  %v12434_v32 = vld [vmem:[%s18055_s13 + $0x30] sm:$0xff]  }
 0x8a3   :  { %11581 = vmatprep.subr.bf16.mxu0 %v12400_v61  ;;  %v12435_v61 = vld [vmem:[%s18055_s13 + $0x38] sm:$0xff]  }
 0x8a6   :  { %11582 = vmatpush3.bf16.msra.mxu0 %v12401_v31 }
 0x8a7   :  { %11583 = vmatprep.subr.bf16.mxu0 %v12402_v51 }
 0x8aa   :  { %11584 = vmatpush3.bf16.msra.mxu0 %v12403_v16 }
 0x8ab   :  { %11585 = vmatprep.subr.bf16.mxu0 %v12404_v29 }
 0x8ae   :  { %11586 = vmatpush3.bf16.msra.mxu0 %v12405_v27 }
 0x8af   :  { %11587 = vmatprep.subr.bf16.mxu0 %v12406_v11  ;;  %v11320_v11 = vld [vmem:[%s18054_s12] ss:$0 sm:$0xff]  ;;  %s12436_s12 = scalar_lea.vmem %s10892_s0, 32 }
 0x8b0   :  { %p12437_p0 = scmp.ne.s32.totalorder %s10892_s0, %s12436_s12  ;;  %p12442_p2 = scmp.lt.s32.totalorder %s12436_s12, %s12436_s12 }
 0x8b2   :  { %11588 = vmatpush3.bf16.msra.mxu0 %v12407_v46  ;;  %p12443_p3 = por %p12442_p2, %p12441_p1 }
 0x8b3   :  { %11589 = vmatprep.subr.bf16.mxu0 %v12408_v53 }
 0x8b4   :  { %p12444_p4 = pnand %p12443_p3, %p12437_p0 }
 0x8b6   :  { %11590 = vmatpush3.bf16.msra.mxu0 %v12409_v40 }
 0x8b7   :  { %11591 = vmatprep.subr.bf16.mxu0 %v12410_v42 }
 0x8ba   :  { %11592 = vmatpush3.bf16.msra.mxu0 %v12411_v17 }
 0x8bb   :  { %11599 = vmatprep.subr.bf16.mxu0 %v12412_v45 }
 0x970   :  { %v10250_v13 = vpop.f32.mrb[144].mxu0  ;;  %v10414_v4 = vpop.f32.mrb[24].mxu1 }
 0x971   :  { %v12078_v58 = vadd.f32 %v10250_v13, %v10076_v33  ;;  %v10252_v23 = vpop.f32.mrb[145].mxu0  ;;  %v10416_v49 = vpop.f32.mrb[25].mxu1  ;;  %v12080_v25 = vadd.f32 %v10414_v4, %v10084_v28 }
 0x972   :  { %v12079_v7 = vadd.f32 %v10252_v23, %v10080_v55  ;;  %v12081_v52 = vadd.f32 %v10416_v49, %v10088_v36  ;;  %v10254_v34 = vpop.f32.mrb[146].mxu0  ;;  %v10418_v60 = vpop.f32.mrb[26].mxu1 }
 0x973   :  { %v10421_v57 = vmax.f32 %v12078_v58, 0.0  ;;  %v10255_v35 = vpop.f32.mrb[147].mxu0  ;;  %v10419_v18 = vpop.f32.mrb[27].mxu1  ;;  %v10423_v1 = vmax.f32 %v12080_v25, 0.0 }
 0x974   :  { %v10422_v8 = vmax.f32 %v12079_v7, 0.0  ;;  %v10424_v19 = vmax.f32 %v12081_v52, 0.0 }
 0x975   :  { %v10425_v14 = vpack.c.bf16 %v10421_v57, %v10421_v57  ;;  %v10427_v50 = vpack.c.bf16 %v10423_v1, %v10423_v1 }
 0x976   :  { %v10426_v26 = vpack.c.bf16 %v10422_v8, %v10422_v8  ;;  %v10428_v39 = vpack.c.bf16 %v10424_v19, %v10424_v19 }
 0x978   :  { %10724 = vmatprep.mubr.bf16.mxu0 %v10426_v26 }
 0x979   :  { %10725 = vmatmul.mubr.bf16.vlgmr.msra.gmra.mrb[148].mxu0 %v10425_v14 }
 0x97a   :  { %11600 = vmatpush3.bf16.msra.mxu0 %v12413_v44  ;;  %10764 = vmatprep.mubr.bf16.mxu0 %v10428_v39 }
 0x97b   :  { %11601 = vmatprep.subr.bf16.mxu0 %v12414_v38 }
 0x97e   :  { %11602 = vmatpush3.bf16.msra.mxu0 %v12415_v56 }
 0x97f   :  { %11603 = vmatprep.subr.bf16.mxu0 %v12416_v37 }
 0x982   :  { %11604 = vmatpush3.bf16.msra.mxu0 %v12417_v10 }
 0x983   :  { %11605 = vmatprep.subr.bf16.mxu0 %v12418_v41 }
 0x986   :  { %11606 = vmatpush3.bf16.msra.mxu0 %v12419_v30 }
 0x987   :  { %11607 = vmatprep.subr.bf16.mxu0 %v12420_v63 }
 0x98a   :  { %11608 = vmatpush3.bf16.msra.mxu0 %v12421_v59 }
 0x98b   :  { %11609 = vmatprep.subr.bf16.mxu0 %v12422_v6 }
 0x98e   :  { %11610 = vmatpush3.bf16.msra.mxu0 %v12423_v9 }
 0x98f   :  { %11611 = vmatprep.subr.bf16.mxu0 %v12424_v54 }
 0x992   :  { %11612 = vmatpush3.bf16.msra.mxu0 %v12425_v0 }
 0x993   :  { %11613 = vmatprep.subr.bf16.mxu0 %v12426_v43 }
 0x996   :  { %11614 = vmatpush3.bf16.msra.mxu0 %v12427_v12 }
 0x997   :  { %12058 = vmatprep.subr.bf16.mxu0 %v12463_v15 }
 0x999   :  { %10765 = vmatmul.mubr.bf16.vlgmr.msra.gmra.mrb[152].mxu0 %v10427_v50 }
 0x99a   :  { %12059 = vmatpush3.bf16.msra.mxu0 %v12428_v48  ;;  %12074 = vmatprep.mubr.msk.bf16.mxu0 %vm12469_vm9, %v12463_v15 }
 0x99b   :  { %12060 = vmatprep.subr.bf16.mxu0 %v12463_v15 }
 0x99e   :  { %12061 = vmatpush3.bf16.msra.mxu0 %v12429_v62 }
 0x99f   :  { %12062 = vmatprep.subr.bf16.mxu0 %v12463_v15 }
 0x9a2   :  { %12063 = vmatpush3.bf16.msra.mxu0 %v12430_v2 }
 0x9a3   :  { %12064 = vmatprep.subr.bf16.mxu0 %v12463_v15 }
 0x9a6   :  { %12065 = vmatpush3.bf16.msra.mxu0 %v12431_v24 }
 0x9a7   :  { %12066 = vmatprep.subr.bf16.mxu0 %v12463_v15 }
 0x9aa   :  { %12067 = vmatpush3.bf16.msra.mxu0 %v12432_v21 }
 0x9ab   :  { %12068 = vmatprep.subr.bf16.mxu0 %v12463_v15 }
 0x9ae   :  { %12069 = vmatpush3.bf16.msra.mxu0 %v12433_v3 }
 0x9af   :  { %12070 = vmatprep.subr.bf16.mxu0 %v12463_v15 }
 0x9b2   :  { %12071 = vmatpush3.bf16.msra.mxu0 %v12434_v32 }
 0x9b3   :  { %12072 = vmatprep.subr.bf16.mxu0 %v12463_v15  ;;  %v11353_v15 = vld [vmem:[%s18056_s14] ss:$0 sm:$0xff] }
 0x9b6   :  { %12073 = vmatpush3.bf16.msra.mxu0 %v12435_v61 }
 0xa4c   :  { %v11593_v31 = vpop.f32.mrb[148].mxu0 }
 0xa4d   :  { %v11594_v51 = vpop.f32.mrb[149].mxu0 }
 0xa4e   :  { %v11595_v16 = vadd.f32 %v11594_v51, %v11593_v31  ;;  %v11596_v29 = vpop.f32.mrb[150].mxu0 }
 0xa4f   :  { %v11597_v27 = vpop.f32.mrb[151].mxu0 }
 0xa50   :  { %v10727_v40 = vadd.f32 %v11595_v16, %v11320_v11 }
 0xa6c   :  { %v11615_v46 = vpop.f32.mrb[152].mxu0 }
 0xa6d   :  { %v11616_v53 = vpop.f32.mrb[153].mxu0 }
 0xa6e   :  { %v11617_v42 = vadd.f32 %v11616_v53, %v11615_v46  ;;  %v11618_v17 = vpop.f32.mrb[154].mxu0 }
 0xa6f   :  { %v11619_v45 = vpop.f32.mrb[155].mxu0 }
 0xa70   :  { %v10767_v47 = vadd.f32 %v11617_v42, %v10727_v40 }
 0xa72   :  { %v10772_v5 = vpack.c.bf16 %v10767_v47, %v10767_v47 }
 0xa74   :  { %12075 = vmatmul.mubr.bf16.vlgmr.msra.gmra.mrb[156].mxu0 %v10772_v5 }
 0xb47   :  { %v10878_v20 = vpop.f32.mrb[156].mxu0 }
 0xb48   :  { %v10879_v33 = vadd.f32 %v11353_v15, %v10878_v20  ;;  %v12076_v55 = vpop.f32.mrb[157].mxu0 }
 0xb49   :  { %v10881_v36 = vpop.f32.mrb[158].mxu0 }
 0xb4a   :  { %10884 = vst [vmem:[#allocation8] sm:$0x3] %v10879_v33  ;;  %v12077_v13 = vpop.f32.mrb[159].mxu0 }
 0xb4b   :  { %12447 = shalt.err (!%p12444_p4)
}
 0xb4c   :  { %s12448_s14 = scalar_lea.hbm %s18057_s15, 32 }
 0xb4d   :  { %p12449_p5 = scmp.ne.s32.totalorder %s18057_s15, %s12448_s14  ;;  %p12452_p6 = scmp.lt.u32.totalorder %s12448_s14, %s18057_s15 }
 0xb4f   :  { %p12454_p7 = pnand %p12452_p6, %p12449_p5 }
 0xb51   :  { %12457 = shalt.err (!%p12454_p7)
}
 0xb52   :  { %10894 = dma.vmem_to_hbm [thread:$0]  %s10892_s0, 32, %s18057_s15, [#allocation9]  }
 0xb53   :  { %12460 = dma.done.wait [#allocation9], 32  }
 0xb54   :  { %12461 = vsyncadd [#allocation9], 4294967264 }
 0xb55   :  { %10898 = vsyncpa [#allocation9], 1 }
 0xb56   :  { %10899 = vsyncmov [#allocation7] }
 0xb59   :  { %s10900_s18 = vpop.sfrf %10899 }
 0xb5a   :  { %p11362_p8 = scmp.ne.s32.totalorder %s10900_s18, 0 }
 0xb5c   :  { %10904 = shalt.err (%p11362_p8)  }

</bundles_post_ra>
